<compile_context>
chip_gen: v5e
topology: v5e:2x2
jax: 0.10.0
libtpu: 0.0.40
codegen_flags: <defaults>
</compile_context>

<pallas_src>
import numpy as np
import jax
import jax.numpy as jnp
from jax.experimental import pallas as pl

# ----------------------------- model config ----------------------------------
N_TOKENS = 31            # n_tokens
D_EMB    = 32            # d_embedding
D_MODEL  = 64            # d_model
D_H      = D_MODEL // 2  # slim=True
N_LAYER  = 2             # n_layer
KERNEL   = 5             # kernel_size
R        = 4             # r -> dilation schedule
FREQ     = 256           # TimestepEmbedder frequency_embedding_size (default)
LN_EPS   = 1e-5

LOG2      = int(np.log2(R)) + 1
DILATIONS = [2 ** (n % LOG2) for n in range(N_LAYER)]

VEC_PAD   = max(128, 2 * D_MODEL)             # lane width of packed bias/gain bundles
V_EMB_PAD = ((N_TOKENS + 7) // 8) * 8         # padded vocab for the one-hot embedding
V_OUT_PAD = ((N_TOKENS + 127) // 128) * 128   # lane-dense padded logits width


# ----------------------------- shared math ------------------------------------
def _ln(v, g, b):
    mu = jnp.mean(v, axis=-1, keepdims=True)
    var = jnp.mean(jnp.square(v - mu), axis=-1, keepdims=True)
    return (v - mu) * jax.lax.rsqrt(var + LN_EPS) * g + b


def _erf_poly(v):
    # float32-accurate erf (Abramowitz & Stegun 7.1.26, max err ~1.5e-7);
    # used in-kernel so we do not rely on a lax.erf Mosaic lowering.
    a1, a2, a3, a4, a5 = 0.254829592, -0.284496736, 1.421413741, -1.453152027, 1.061405429
    p = 0.3275911
    s = jnp.where(v >= 0.0, 1.0, -1.0)
    z = jnp.abs(v)
    t = 1.0 / (1.0 + p * z)
    poly = ((((a5 * t + a4) * t + a3) * t + a2) * t + a1) * t
    return s * (1.0 - poly * jnp.exp(-z * z))


def _gelu_exact(v):
    # nn.GELU() default = exact (erf) gelu
    return 0.5 * v * (1.0 + _erf_poly(v * np.float32(1.0 / np.sqrt(2.0))))


def _freq_features(tvals):
    half = FREQ // 2
    freqs = jnp.exp(-jnp.log(10000.0) * jnp.arange(half, dtype=jnp.float32) / half)
    args = tvals.astype(jnp.float32).reshape(-1)[:, None] * freqs[None, :]
    return jnp.concatenate([jnp.cos(args), jnp.sin(args)], axis=-1)   # (M, FREQ)


# ----------------------------- fused kernel ------------------------------------
def make_fused_kernel(N, L, n_layer, dilations):
    NL = N * L
    K = KERNEL

    def kernel(*refs):
        (femb_t_ref, femb_s_ref, tok_ref, mask_ref, lpos_ref,
         te_w1_ref, te_w2_ref, si_w1_ref, si_w2_ref, sb_w1_ref, sb_w2_ref, tb_ref,
         emb_w_ref, tm_w_ref, gv_ref, dec_w_ref) = refs[:16]
        layer_refs = refs[16:-1]
        o_ref = refs[-1]

        f32 = jnp.float32
        D = emb_w_ref.shape[1]
        E = te_w2_ref.shape[0]

        def mlp(f, w1, b1, w2, b2):
            # TimestepEmbedder MLP; the outer F.silu applied at every call site
            # (time_encoding / s_embed_input / s_embed_block) is folded in.
            h = jnp.dot(f, w1, preferred_element_type=f32) + b1
            h = jax.nn.silu(h)
            h = jnp.dot(h, w2, preferred_element_type=f32) + b2
            return jax.nn.silu(h)

        # tb rows: [te_b1, te_b2, si_b1, si_b2, sb_b1, sb_b2] (zero padded to VEC_PAD lanes)
        c_t  = mlp(femb_t_ref[...], te_w1_ref[...], tb_ref[0:1, :E], te_w2_ref[...], tb_ref[1:2, :E])
        s_in = mlp(femb_s_ref[...], si_w1_ref[...], tb_ref[2:3, :D], si_w2_ref[...], tb_ref[3:4, :D])
        s_bk = mlp(femb_s_ref[...], sb_w1_ref[...], tb_ref[4:5, :E], sb_w2_ref[...], tb_ref[5:6, :E])

        # token embedding as a one-hot matmul (vocab padded to a sublane multiple)
        tok = tok_ref[...]                                             # (NL, 1) i32
        Vp = emb_w_ref.shape[0]
        iota_v = jax.lax.broadcasted_iota(jnp.int32, (NL, Vp), 1)
        onehot = (iota_v == tok).astype(f32)                           # (NL, Vp)
        x = jnp.dot(onehot, emb_w_ref[...], preferred_element_type=f32)
        # gv rows: [tm_b, ln_f_g, ln_f_b, dec_b]
        x = x + jnp.dot(c_t, tm_w_ref[...], preferred_element_type=f32) + gv_ref[0:1, :D]
        x = x + s_in                                                   # (NL, D)

        c = c_t + s_bk                                                 # (NL, E)
        m = mask_ref[...]                                              # (NL, 1) f32
        lpos = lpos_ref[...]                                           # (NL, 1) i32, position inside its sequence

        for li in range(n_layer):
            pff1_w_ref, conv_w_ref, pff2_w_ref, cmod_w_ref, lv = layer_refs[5 * li: 5 * li + 5]
            d = dilations[li]
            Dh = pff1_w_ref.shape[1]
            # lv rows: 0 ln1_g 1 ln1_b 2 pff1_b 3 ln2_g 4 ln2_b 5 conv_b
            #          6 ln3_g 7 ln3_b 8 pff2_b 9 ln4_g 10 ln4_b 11 cmod_b

            # sequence1: LN -> GELU -> PFF(D->Dh) -> LN -> GELU
            h = _gelu_exact(_ln(x, lv[0:1, :D], lv[1:2, :D]))
            h = jnp.dot(h, pff1_w_ref[...], preferred_element_type=f32) + lv[2:3, :Dh]
            h = _gelu_exact(_ln(h, lv[3:4, :Dh], lv[4:5, :Dh]))

            # MaskedConv1d: mask the input, then 'same'-padded dilated conv expressed
            # as ONE stacked matmul over the K dilation-shifted views.
            h = h * m
            zpad = jnp.zeros((2 * d, Dh), f32)                         # hoisted; reused by all taps
            cols = []
            for k in range(K):
                s = (k - (K - 1) // 2) * d                             # tap offset along length
                if s == 0:
                    hs = h
                elif s > 0:
                    hs = jnp.concatenate([h[s:, :], zpad[:s, :]], axis=0)
                else:
                    hs = jnp.concatenate([zpad[:-s, :], h[:NL + s, :]], axis=0)
                # taps that would cross a sequence (batch) boundary read zeros
                valid = jnp.logical_and(lpos + s >= 0, lpos + s < L)
                cols.append(jnp.where(valid, hs, 0.0))
            hstack = jnp.concatenate(cols, axis=1)                     # (NL, K*Dh)
            h = jnp.dot(hstack, conv_w_ref[...], preferred_element_type=f32) + lv[5:6, :Dh]

            # sequence2: LN -> GELU -> PFF(Dh->D) -> LN -> GELU
            h = _gelu_exact(_ln(h, lv[6:7, :Dh], lv[7:8, :Dh]))
            h = jnp.dot(h, pff2_w_ref[...], preferred_element_type=f32) + lv[8:9, :D]
            h = _gelu_exact(_ln(h, lv[9:10, :D], lv[10:11, :D]))

            x = x + h                                                  # residual

            # c_mod_layer + modulate_fused:  x * (1 + scale) + shift
            cmod = jnp.dot(c, cmod_w_ref[...], preferred_element_type=f32) + lv[11:12, :2 * D]
            x = x * (1.0 + cmod[:, D:2 * D]) + cmod[:, :D]
            # TODO(synk): F.dropout(p=0.1) in the PyTorch forward (training-mode,
            # stochastic) is omitted -- identity / inference behavior.

        # last_norm + decoder -> lane-dense padded logits
        h = _ln(x, gv_ref[1:2, :D], gv_ref[2:3, :D])
        o_ref[...] = (jnp.dot(h, dec_w_ref[...], preferred_element_type=f32)
                      + gv_ref[3:4, :o_ref.shape[1]])

    return kernel


# ----------------------------- packing + wrapper --------------------------------
def _pack_rows(vs, width=VEC_PAD):
    rows = []
    for v in vs:
        v2 = v.reshape(1, -1).astype(jnp.float32)
        rows.append(jnp.pad(v2, ((0, 0), (0, width - v2.shape[1]))))
    return jnp.concatenate(rows, axis=0)


def bytenet_lm_time_forward(params, tokens, t, input_mask, S):
    """x:(N,L) int32, t:(N,), input_mask:(N,L), S:(N,L) -> (N, L, n_tokens) logits."""
    N, L = tokens.shape
    NL = N * L

    # ---- tiny glue (sinusoidal features, flattening, weight packing) ----
    femb_t = _freq_features(jnp.repeat(t, L))          # (NL, FREQ): t broadcast per position
    femb_S = _freq_features(S.reshape(-1))             # (NL, FREQ)
    tok = tokens.reshape(NL, 1).astype(jnp.int32)
    mask = input_mask.reshape(NL, 1).astype(jnp.float32)
    lpos = jnp.tile(jnp.arange(L, dtype=jnp.int32), N).reshape(NL, 1)

    te, si, sb = params["time_enc"], params["s_embed_input"], params["s_embed_block"]
    tbias = _pack_rows([te["b1"], te["b2"], si["b1"], si["b2"], sb["b1"], sb["b2"]])
    gvec = _pack_rows([params["tm_b"], params["ln_f_g"], params["ln_f_b"], params["dec_b"]])
    emb_w = jnp.pad(params["emb_w"], ((0, V_EMB_PAD - N_TOKENS), (0, 0)))
    dec_w = jnp.pad(params["dec_w"], ((0, 0), (0, V_OUT_PAD - N_TOKENS)))

    args = [femb_t, femb_S, tok, mask, lpos,
            te["w1"], te["w2"], si["w1"], si["w2"], sb["w1"], sb["w2"], tbias,
            emb_w, params["tm_w"], gvec, dec_w]
    for lp_ in params["layers"]:
        lvec = _pack_rows([lp_["ln1_g"], lp_["ln1_b"], lp_["pff1_b"], lp_["ln2_g"],
                           lp_["ln2_b"], lp_["conv_b"], lp_["ln3_g"], lp_["ln3_b"],
                           lp_["pff2_b"], lp_["ln4_g"], lp_["ln4_b"], lp_["cmod_b"]])
        kk, dh_in, dh_out = lp_["conv_w"].shape
        conv_flat = lp_["conv_w"].reshape(kk * dh_in, dh_out)
        args += [lp_["pff1_w"], conv_flat, lp_["pff2_w"], lp_["cmod_w"], lvec]

    logits_pad = pl.pallas_call(
        make_fused_kernel(N, L, len(params["layers"]), DILATIONS),
        out_shape=jax.ShapeDtypeStruct((NL, V_OUT_PAD), jnp.float32),
    )(*args)
    return logits_pad.reshape(N, L, V_OUT_PAD)[..., :N_TOKENS]


# ------------------------------ parameters --------------------------------------
def init_params(key):
    ks = iter(jax.random.split(key, 256))

    def nrm(shape, scale=0.05):
        return (scale * jax.random.normal(next(ks), shape)).astype(jnp.float32)

    def temb_params(hidden):
        return {"w1": nrm((FREQ, hidden)), "b1": nrm((1, hidden), 0.02),
                "w2": nrm((hidden, hidden)), "b2": nrm((1, hidden), 0.02)}

    def ln_params(dim):
        # randomized (instead of ones/zeros) so the packing/unpacking of every
        # LayerNorm is actually exercised by the reference check
        return (jnp.ones((1, dim), jnp.float32) + nrm((1, dim), 0.05), nrm((1, dim), 0.02))

    p = {
        "time_enc": temb_params(D_EMB),
        "s_embed_input": temb_params(D_MODEL),
        "s_embed_block": temb_params(D_EMB),
        "emb_w": nrm((N_TOKENS, D_MODEL)),
        "tm_w": nrm((D_EMB, D_MODEL)),
        "tm_b": nrm((1, D_MODEL), 0.02),
        "dec_w": nrm((D_MODEL, N_TOKENS)),
        "dec_b": nrm((1, N_TOKENS), 0.02),
        "layers": [],
    }
    p["ln_f_g"], p["ln_f_b"] = ln_params(D_MODEL)
    for _ in range(N_LAYER):
        ln1_g, ln1_b = ln_params(D_MODEL)
        ln2_g, ln2_b = ln_params(D_H)
        ln3_g, ln3_b = ln_params(D_H)
        ln4_g, ln4_b = ln_params(D_MODEL)
        p["layers"].append({
            "ln1_g": ln1_g, "ln1_b": ln1_b,
            "pff1_w": nrm((D_MODEL, D_H)), "pff1_b": nrm((1, D_H), 0.02),
            "ln2_g": ln2_g, "ln2_b": ln2_b,
            "conv_w": nrm((KERNEL, D_H, D_H)),     # conv_w[k] = (C_in, C_out)
            "conv_b": nrm((1, D_H), 0.02),
            "ln3_g": ln3_g, "ln3_b": ln3_b,
            "pff2_w": nrm((D_H, D_MODEL)), "pff2_b": nrm((1, D_MODEL), 0.02),
            "ln4_g": ln4_g, "ln4_b": ln4_b,
            # NOTE: the PyTorch module zero-initialises c_mod_layers; small non-zero
            # values are used here so the modulate_fused path is actually tested.
            "cmod_w": nrm((D_EMB, 2 * D_MODEL), 0.05),
            "cmod_b": nrm((1, 2 * D_MODEL), 0.02),
        })
    return p


# --------------------------- pure-JAX reference ----------------------------------
def ref_forward(params, tokens, t, input_mask, S):
    N, L = tokens.shape

    def temb(tv, p):
        f = _freq_features(tv)
        h = jax.nn.silu(f @ p["w1"] + p["b1"])
        return jax.nn.silu(h @ p["w2"] + p["b2"])

    gelu = lambda v: jax.nn.gelu(v, approximate=False)
    c_t = temb(t, params["time_enc"])                                   # (N, E)
    x = params["emb_w"][tokens]                                         # (N, L, D)
    x = x + (c_t @ params["tm_w"] + params["tm_b"])[:, None, :]
    S_flat = S.reshape(-1)
    x = x + temb(S_flat, params["s_embed_input"]).reshape(N, L, D_MODEL)
    c = c_t[:, None, :] + temb(S_flat, params["s_embed_block"]).reshape(N, L, D_EMB)
    m = input_mask.astype(jnp.float32)[..., None]

    for li, lp_ in enumerate(params["layers"]):
        d = DILATIONS[li]
        h = gelu(_ln(x, lp_["ln1_g"], lp_["ln1_b"]))
        h = h @ lp_["pff1_w"] + lp_["pff1_b"]
        h = gelu(_ln(h, lp_["ln2_g"], lp_["ln2_b"]))
        h = h * m
        hp = jnp.pad(h, ((0, 0), (2 * d, 2 * d), (0, 0)))
        acc = jnp.zeros((N, L, D_H), jnp.float32)
        for k in range(KERNEL):
            acc = acc + hp[:, k * d:k * d + L, :] @ lp_["conv_w"][k]
        h = acc + lp_["conv_b"]
        h = gelu(_ln(h, lp_["ln3_g"], lp_["ln3_b"]))
        h = h @ lp_["pff2_w"] + lp_["pff2_b"]
        h = gelu(_ln(h, lp_["ln4_g"], lp_["ln4_b"]))
        x = x + h
        cmod = c @ lp_["cmod_w"] + lp_["cmod_b"]
        x = x * (1.0 + cmod[..., D_MODEL:]) + cmod[..., :D_MODEL]

    h = _ln(x, params["ln_f_g"], params["ln_f_b"])
    return h @ params["dec_w"] + params["dec_b"]


# ------------------------------------ main ---------------------------------------
if __name__ == "__main__":
    key = jax.random.PRNGKey(0)
    pkey, kx, kt, ks, km = jax.random.split(key, 5)
    params = init_params(pkey)

    N, L = 2, 16
    tokens = jax.random.randint(kx, (N, L), 0, N_TOKENS, dtype=jnp.int32)   # x: (N, L)
    t = jax.random.uniform(kt, (N,), dtype=jnp.float32)                     # t: (N,)
    S = jax.random.randint(ks, (N, L), 1, 100, dtype=jnp.int32)             # S: (N, L)
    input_mask = (jax.random.uniform(km, (N, L)) > 0.1).astype(jnp.float32) # (N, L)

    fwd = jax.jit(bytenet_lm_time_forward)
    out = jax.block_until_ready(fwd(params, tokens, t, input_mask, S))
    assert out.shape == (N, L, N_TOKENS)

    # Pure-JAX reference at the same (MXU-native, bf16-operand / f32-accumulate)
    # default matmul precision; tolerance sized for that, plus a tight mean check
    # so structural errors cannot hide under the per-element slack.
    ref = np.asarray(ref_forward(params, tokens, t, input_mask, S))
    outn = np.asarray(out)
    np.testing.assert_allclose(outn, ref, rtol=3e-2, atol=3e-2)
    assert float(np.mean(np.abs(outn - ref))) < 1e-2

    print("KERNEL_OK")
</pallas_src>

<mosaic_0001>
module attributes {stable_mosaic.version = 11 : i64} {
  func.func @kernel(%arg0: memref<32x256xf32, #tpu.memory_space<vmem>>, %arg1: memref<32x256xf32, #tpu.memory_space<vmem>>, %arg2: memref<32x1xi32, #tpu.memory_space<vmem>>, %arg3: memref<32x1xf32, #tpu.memory_space<vmem>>, %arg4: memref<32x1xi32, #tpu.memory_space<vmem>>, %arg5: memref<256x32xf32, #tpu.memory_space<vmem>>, %arg6: memref<32x32xf32, #tpu.memory_space<vmem>>, %arg7: memref<256x64xf32, #tpu.memory_space<vmem>>, %arg8: memref<64x64xf32, #tpu.memory_space<vmem>>, %arg9: memref<256x32xf32, #tpu.memory_space<vmem>>, %arg10: memref<32x32xf32, #tpu.memory_space<vmem>>, %arg11: memref<6x128xf32, #tpu.memory_space<vmem>>, %arg12: memref<32x64xf32, #tpu.memory_space<vmem>>, %arg13: memref<32x64xf32, #tpu.memory_space<vmem>>, %arg14: memref<4x128xf32, #tpu.memory_space<vmem>>, %arg15: memref<64x128xf32, #tpu.memory_space<vmem>>, %arg16: memref<64x32xf32, #tpu.memory_space<vmem>>, %arg17: memref<160x32xf32, #tpu.memory_space<vmem>>, %arg18: memref<32x64xf32, #tpu.memory_space<vmem>>, %arg19: memref<32x128xf32, #tpu.memory_space<vmem>>, %arg20: memref<12x128xf32, #tpu.memory_space<vmem>>, %arg21: memref<64x32xf32, #tpu.memory_space<vmem>>, %arg22: memref<160x32xf32, #tpu.memory_space<vmem>>, %arg23: memref<32x64xf32, #tpu.memory_space<vmem>>, %arg24: memref<32x128xf32, #tpu.memory_space<vmem>>, %arg25: memref<12x128xf32, #tpu.memory_space<vmem>>, %arg26: memref<32x128xf32, #tpu.memory_space<vmem>>) attributes {dimension_semantics = [], scalar_prefetch = 0 : i64, scratch_operands = 0 : i64, tpu.core_type = #tpu.core_type<tc>} {
    %c0 = arith.constant 0 : index
    %c0_0 = arith.constant 0 : index
    %0 = vector.load %arg0[%c0, %c0_0] : memref<32x256xf32, #tpu.memory_space<vmem>>, vector<32x256xf32>
    %c0_1 = arith.constant 0 : index
    %c0_2 = arith.constant 0 : index
    %1 = vector.load %arg5[%c0_1, %c0_2] : memref<256x32xf32, #tpu.memory_space<vmem>>, vector<256x32xf32>
    %c0_3 = arith.constant 0 : index
    %c0_4 = arith.constant 0 : index
    %2 = vector.load %arg11[%c0_3, %c0_4] : memref<6x128xf32, #tpu.memory_space<vmem>>, vector<1x32xf32>
    %c0_5 = arith.constant 0 : index
    %c0_6 = arith.constant 0 : index
    %3 = vector.load %arg6[%c0_5, %c0_6] : memref<32x32xf32, #tpu.memory_space<vmem>>, vector<32x32xf32>
    %c1 = arith.constant 1 : index
    %c0_7 = arith.constant 0 : index
    %4 = vector.load %arg11[%c1, %c0_7] : memref<6x128xf32, #tpu.memory_space<vmem>>, vector<1x32xf32>
    %cst = arith.constant dense<0.000000e+00> : vector<32x32xf32>
    %5 = tpu.matmul %0, %1, %cst {dimension_numbers = #tpu.dot_dimension_numbers<[1], [0], [0], [1], [0, 0, 1, 1], [], []>} : vector<32x256xf32>, vector<256x32xf32>, vector<32x32xf32> -> vector<32x32xf32>
    %6 = vector.broadcast %2 : vector<1x32xf32> to vector<32x32xf32>
    %7 = arith.addf %5, %6 : vector<32x32xf32>
    %8 = arith.negf %7 : vector<32x32xf32>
    %9 = math.exp %8 : vector<32x32xf32>
    %cst_8 = arith.constant 1.000000e+00 : f32
    %10 = vector.broadcast %cst_8 : f32 to vector<32x32xf32>
    %11 = arith.addf %10, %9 : vector<32x32xf32>
    %12 = arith.divf %10, %11 : vector<32x32xf32>
    %13 = arith.mulf %7, %12 : vector<32x32xf32>
    %cst_9 = arith.constant dense<0.000000e+00> : vector<32x32xf32>
    %14 = tpu.matmul %13, %3, %cst_9 {dimension_numbers = #tpu.dot_dimension_numbers<[1], [0], [0], [1], [0, 0, 1, 1], [], []>} : vector<32x32xf32>, vector<32x32xf32>, vector<32x32xf32> -> vector<32x32xf32>
    %15 = vector.broadcast %4 : vector<1x32xf32> to vector<32x32xf32>
    %16 = arith.addf %14, %15 : vector<32x32xf32>
    %17 = arith.negf %16 : vector<32x32xf32>
    %18 = math.exp %17 : vector<32x32xf32>
    %cst_10 = arith.constant 1.000000e+00 : f32
    %19 = vector.broadcast %cst_10 : f32 to vector<32x32xf32>
    %20 = arith.addf %19, %18 : vector<32x32xf32>
    %21 = arith.divf %19, %20 : vector<32x32xf32>
    %22 = arith.mulf %16, %21 : vector<32x32xf32>
    %c0_11 = arith.constant 0 : index
    %c0_12 = arith.constant 0 : index
    %23 = vector.load %arg1[%c0_11, %c0_12] : memref<32x256xf32, #tpu.memory_space<vmem>>, vector<32x256xf32>
    %c0_13 = arith.constant 0 : index
    %c0_14 = arith.constant 0 : index
    %24 = vector.load %arg7[%c0_13, %c0_14] : memref<256x64xf32, #tpu.memory_space<vmem>>, vector<256x64xf32>
    %c2 = arith.constant 2 : index
    %c0_15 = arith.constant 0 : index
    %25 = vector.load %arg11[%c2, %c0_15] : memref<6x128xf32, #tpu.memory_space<vmem>>, vector<1x64xf32>
    %c0_16 = arith.constant 0 : index
    %c0_17 = arith.constant 0 : index
    %26 = vector.load %arg8[%c0_16, %c0_17] : memref<64x64xf32, #tpu.memory_space<vmem>>, vector<64x64xf32>
    %c3 = arith.constant 3 : index
    %c0_18 = arith.constant 0 : index
    %27 = vector.load %arg11[%c3, %c0_18] : memref<6x128xf32, #tpu.memory_space<vmem>>, vector<1x64xf32>
    %cst_19 = arith.constant dense<0.000000e+00> : vector<32x64xf32>
    %28 = tpu.matmul %23, %24, %cst_19 {dimension_numbers = #tpu.dot_dimension_numbers<[1], [0], [0], [1], [0, 0, 1, 1], [], []>} : vector<32x256xf32>, vector<256x64xf32>, vector<32x64xf32> -> vector<32x64xf32>
    %29 = vector.broadcast %25 : vector<1x64xf32> to vector<32x64xf32>
    %30 = arith.addf %28, %29 : vector<32x64xf32>
    %31 = arith.negf %30 : vector<32x64xf32>
    %32 = math.exp %31 : vector<32x64xf32>
    %cst_20 = arith.constant 1.000000e+00 : f32
    %33 = vector.broadcast %cst_20 : f32 to vector<32x64xf32>
    %34 = arith.addf %33, %32 : vector<32x64xf32>
    %35 = arith.divf %33, %34 : vector<32x64xf32>
    %36 = arith.mulf %30, %35 : vector<32x64xf32>
    %cst_21 = arith.constant dense<0.000000e+00> : vector<32x64xf32>
    %37 = tpu.matmul %36, %26, %cst_21 {dimension_numbers = #tpu.dot_dimension_numbers<[1], [0], [0], [1], [0, 0, 1, 1], [], []>} : vector<32x64xf32>, vector<64x64xf32>, vector<32x64xf32> -> vector<32x64xf32>
    %38 = vector.broadcast %27 : vector<1x64xf32> to vector<32x64xf32>
    %39 = arith.addf %37, %38 : vector<32x64xf32>
    %40 = arith.negf %39 : vector<32x64xf32>
    %41 = math.exp %40 : vector<32x64xf32>
    %cst_22 = arith.constant 1.000000e+00 : f32
    %42 = vector.broadcast %cst_22 : f32 to vector<32x64xf32>
    %43 = arith.addf %42, %41 : vector<32x64xf32>
    %44 = arith.divf %42, %43 : vector<32x64xf32>
    %45 = arith.mulf %39, %44 : vector<32x64xf32>
    %c0_23 = arith.constant 0 : index
    %c0_24 = arith.constant 0 : index
    %46 = vector.load %arg1[%c0_23, %c0_24] : memref<32x256xf32, #tpu.memory_space<vmem>>, vector<32x256xf32>
    %c0_25 = arith.constant 0 : index
    %c0_26 = arith.constant 0 : index
    %47 = vector.load %arg9[%c0_25, %c0_26] : memref<256x32xf32, #tpu.memory_space<vmem>>, vector<256x32xf32>
    %c4 = arith.constant 4 : index
    %c0_27 = arith.constant 0 : index
    %48 = vector.load %arg11[%c4, %c0_27] : memref<6x128xf32, #tpu.memory_space<vmem>>, vector<1x32xf32>
    %c0_28 = arith.constant 0 : index
    %c0_29 = arith.constant 0 : index
    %49 = vector.load %arg10[%c0_28, %c0_29] : memref<32x32xf32, #tpu.memory_space<vmem>>, vector<32x32xf32>
    %c5 = arith.constant 5 : index
    %c0_30 = arith.constant 0 : index
    %50 = vector.load %arg11[%c5, %c0_30] : memref<6x128xf32, #tpu.memory_space<vmem>>, vector<1x32xf32>
    %cst_31 = arith.constant dense<0.000000e+00> : vector<32x32xf32>
    %51 = tpu.matmul %46, %47, %cst_31 {dimension_numbers = #tpu.dot_dimension_numbers<[1], [0], [0], [1], [0, 0, 1, 1], [], []>} : vector<32x256xf32>, vector<256x32xf32>, vector<32x32xf32> -> vector<32x32xf32>
    %52 = vector.broadcast %48 : vector<1x32xf32> to vector<32x32xf32>
    %53 = arith.addf %51, %52 : vector<32x32xf32>
    %54 = arith.negf %53 : vector<32x32xf32>
    %55 = math.exp %54 : vector<32x32xf32>
    %cst_32 = arith.constant 1.000000e+00 : f32
    %56 = vector.broadcast %cst_32 : f32 to vector<32x32xf32>
    %57 = arith.addf %56, %55 : vector<32x32xf32>
    %58 = arith.divf %56, %57 : vector<32x32xf32>
    %59 = arith.mulf %53, %58 : vector<32x32xf32>
    %cst_33 = arith.constant dense<0.000000e+00> : vector<32x32xf32>
    %60 = tpu.matmul %59, %49, %cst_33 {dimension_numbers = #tpu.dot_dimension_numbers<[1], [0], [0], [1], [0, 0, 1, 1], [], []>} : vector<32x32xf32>, vector<32x32xf32>, vector<32x32xf32> -> vector<32x32xf32>
    %61 = vector.broadcast %50 : vector<1x32xf32> to vector<32x32xf32>
    %62 = arith.addf %60, %61 : vector<32x32xf32>
    %63 = arith.negf %62 : vector<32x32xf32>
    %64 = math.exp %63 : vector<32x32xf32>
    %cst_34 = arith.constant 1.000000e+00 : f32
    %65 = vector.broadcast %cst_34 : f32 to vector<32x32xf32>
    %66 = arith.addf %65, %64 : vector<32x32xf32>
    %67 = arith.divf %65, %66 : vector<32x32xf32>
    %68 = arith.mulf %62, %67 : vector<32x32xf32>
    %c0_35 = arith.constant 0 : index
    %c0_36 = arith.constant 0 : index
    %69 = vector.load %arg2[%c0_35, %c0_36] : memref<32x1xi32, #tpu.memory_space<vmem>>, vector<32x1xi32>
    %70 = tpu.iota {dimensions = array<i32: 1>} : vector<32x32xi32>
    %71 = vector.broadcast %69 : vector<32x1xi32> to vector<32x32xi32>
    %72 = arith.cmpi eq, %70, %71 : vector<32x32xi32>
    %73 = arith.extui %72 : vector<32x32xi1> to vector<32x32xi32>
    %74 = arith.sitofp %73 : vector<32x32xi32> to vector<32x32xf32>
    %c0_37 = arith.constant 0 : index
    %c0_38 = arith.constant 0 : index
    %75 = vector.load %arg12[%c0_37, %c0_38] : memref<32x64xf32, #tpu.memory_space<vmem>>, vector<32x64xf32>
    %cst_39 = arith.constant dense<0.000000e+00> : vector<32x64xf32>
    %76 = tpu.matmul %74, %75, %cst_39 {dimension_numbers = #tpu.dot_dimension_numbers<[1], [0], [0], [1], [0, 0, 1, 1], [], []>} : vector<32x32xf32>, vector<32x64xf32>, vector<32x64xf32> -> vector<32x64xf32>
    %c0_40 = arith.constant 0 : index
    %c0_41 = arith.constant 0 : index
    %77 = vector.load %arg13[%c0_40, %c0_41] : memref<32x64xf32, #tpu.memory_space<vmem>>, vector<32x64xf32>
    %cst_42 = arith.constant dense<0.000000e+00> : vector<32x64xf32>
    %78 = tpu.matmul %22, %77, %cst_42 {dimension_numbers = #tpu.dot_dimension_numbers<[1], [0], [0], [1], [0, 0, 1, 1], [], []>} : vector<32x32xf32>, vector<32x64xf32>, vector<32x64xf32> -> vector<32x64xf32>
    %79 = arith.addf %76, %78 : vector<32x64xf32>
    %c0_43 = arith.constant 0 : index
    %c0_44 = arith.constant 0 : index
    %80 = vector.load %arg14[%c0_43, %c0_44] : memref<4x128xf32, #tpu.memory_space<vmem>>, vector<1x64xf32>
    %81 = vector.broadcast %80 : vector<1x64xf32> to vector<32x64xf32>
    %82 = arith.addf %79, %81 : vector<32x64xf32>
    %83 = arith.addf %82, %45 : vector<32x64xf32>
    %84 = arith.addf %22, %68 : vector<32x32xf32>
    %c0_45 = arith.constant 0 : index
    %c0_46 = arith.constant 0 : index
    %85 = vector.load %arg3[%c0_45, %c0_46] : memref<32x1xf32, #tpu.memory_space<vmem>>, vector<32x1xf32>
    %c0_47 = arith.constant 0 : index
    %c0_48 = arith.constant 0 : index
    %86 = vector.load %arg4[%c0_47, %c0_48] : memref<32x1xi32, #tpu.memory_space<vmem>>, vector<32x1xi32>
    %c0_49 = arith.constant 0 : index
    %c0_50 = arith.constant 0 : index
    %87 = vector.load %arg20[%c0_49, %c0_50] : memref<12x128xf32, #tpu.memory_space<vmem>>, vector<1x64xf32>
    %c1_51 = arith.constant 1 : index
    %c0_52 = arith.constant 0 : index
    %88 = vector.load %arg20[%c1_51, %c0_52] : memref<12x128xf32, #tpu.memory_space<vmem>>, vector<1x64xf32>
    %cst_53 = arith.constant dense<0.000000e+00> : vector<32xf32>
    %89 = vector.multi_reduction <add>, %83, %cst_53 [1] : vector<32x64xf32> to vector<32xf32>
    %90 = vector.shape_cast %89 : vector<32xf32> to vector<32x1xf32>
    %cst_54 = arith.constant 6.400000e+01 : f32
    %91 = vector.broadcast %cst_54 : f32 to vector<32x1xf32>
    %92 = arith.divf %90, %91 : vector<32x1xf32>
    %93 = vector.broadcast %92 : vector<32x1xf32> to vector<32x64xf32>
    %94 = arith.subf %83, %93 : vector<32x64xf32>
    %95 = arith.mulf %94, %94 : vector<32x64xf32>
    %cst_55 = arith.constant dense<0.000000e+00> : vector<32xf32>
    %96 = vector.multi_reduction <add>, %95, %cst_55 [1] : vector<32x64xf32> to vector<32xf32>
    %97 = vector.shape_cast %96 : vector<32xf32> to vector<32x1xf32>
    %cst_56 = arith.constant 6.400000e+01 : f32
    %98 = vector.broadcast %cst_56 : f32 to vector<32x1xf32>
    %99 = arith.divf %97, %98 : vector<32x1xf32>
    %100 = vector.broadcast %92 : vector<32x1xf32> to vector<32x64xf32>
    %101 = arith.subf %83, %100 : vector<32x64xf32>
    %cst_57 = arith.constant 9.99999974E-6 : f32
    %102 = vector.broadcast %cst_57 : f32 to vector<32x1xf32>
    %103 = arith.addf %99, %102 : vector<32x1xf32>
    %104 = math.rsqrt %103 : vector<32x1xf32>
    %105 = vector.broadcast %104 : vector<32x1xf32> to vector<32x64xf32>
    %106 = arith.mulf %101, %105 : vector<32x64xf32>
    %107 = vector.broadcast %87 : vector<1x64xf32> to vector<32x64xf32>
    %108 = arith.mulf %106, %107 : vector<32x64xf32>
    %109 = vector.broadcast %88 : vector<1x64xf32> to vector<32x64xf32>
    %110 = arith.addf %108, %109 : vector<32x64xf32>
    %cst_58 = arith.constant 5.000000e-01 : f32
    %111 = vector.broadcast %cst_58 : f32 to vector<32x64xf32>
    %112 = arith.mulf %111, %110 : vector<32x64xf32>
    %cst_59 = arith.constant 0.707106769 : f32
    %113 = vector.broadcast %cst_59 : f32 to vector<32x64xf32>
    %114 = arith.mulf %110, %113 : vector<32x64xf32>
    %cst_60 = arith.constant 0.000000e+00 : f32
    %115 = vector.broadcast %cst_60 : f32 to vector<32x64xf32>
    %116 = arith.cmpf oge, %114, %115 : vector<32x64xf32>
    %cst_61 = arith.constant 1.000000e+00 : f32
    %cst_62 = arith.constant -1.000000e+00 : f32
    %117 = vector.broadcast %cst_61 : f32 to vector<32x64xf32>
    %118 = vector.broadcast %cst_62 : f32 to vector<32x64xf32>
    %119 = arith.select %116, %117, %118 : vector<32x64xi1>, vector<32x64xf32>
    %120 = math.absf %114 : vector<32x64xf32>
    %cst_63 = arith.constant 0.327591091 : f32
    %121 = vector.broadcast %cst_63 : f32 to vector<32x64xf32>
    %122 = arith.mulf %121, %120 : vector<32x64xf32>
    %cst_64 = arith.constant 1.000000e+00 : f32
    %123 = vector.broadcast %cst_64 : f32 to vector<32x64xf32>
    %124 = arith.addf %123, %122 : vector<32x64xf32>
    %cst_65 = arith.constant 1.000000e+00 : f32
    %125 = vector.broadcast %cst_65 : f32 to vector<32x64xf32>
    %126 = arith.divf %125, %124 : vector<32x64xf32>
    %cst_66 = arith.constant 1.06140542 : f32
    %127 = vector.broadcast %cst_66 : f32 to vector<32x64xf32>
    %128 = arith.mulf %127, %126 : vector<32x64xf32>
    %cst_67 = arith.constant -1.45315206 : f32
    %129 = vector.broadcast %cst_67 : f32 to vector<32x64xf32>
    %130 = arith.addf %128, %129 : vector<32x64xf32>
    %131 = arith.mulf %130, %126 : vector<32x64xf32>
    %cst_68 = arith.constant 1.42141378 : f32
    %132 = vector.broadcast %cst_68 : f32 to vector<32x64xf32>
    %133 = arith.addf %131, %132 : vector<32x64xf32>
    %134 = arith.mulf %133, %126 : vector<32x64xf32>
    %cst_69 = arith.constant -0.284496725 : f32
    %135 = vector.broadcast %cst_69 : f32 to vector<32x64xf32>
    %136 = arith.addf %134, %135 : vector<32x64xf32>
    %137 = arith.mulf %136, %126 : vector<32x64xf32>
    %cst_70 = arith.constant 0.254829586 : f32
    %138 = vector.broadcast %cst_70 : f32 to vector<32x64xf32>
    %139 = arith.addf %137, %138 : vector<32x64xf32>
    %140 = arith.mulf %139, %126 : vector<32x64xf32>
    %cst_71 = arith.constant 0.000000e+00 : f32
    %141 = vector.broadcast %cst_71 : f32 to vector<32x64xf32>
    %142 = arith.subf %141, %120 : vector<32x64xf32>
    %143 = arith.mulf %142, %120 : vector<32x64xf32>
    %144 = math.exp %143 : vector<32x64xf32>
    %145 = arith.mulf %140, %144 : vector<32x64xf32>
    %cst_72 = arith.constant 1.000000e+00 : f32
    %146 = vector.broadcast %cst_72 : f32 to vector<32x64xf32>
    %147 = arith.subf %146, %145 : vector<32x64xf32>
    %148 = arith.mulf %119, %147 : vector<32x64xf32>
    %cst_73 = arith.constant 1.000000e+00 : f32
    %149 = vector.broadcast %cst_73 : f32 to vector<32x64xf32>
    %150 = arith.addf %149, %148 : vector<32x64xf32>
    %151 = arith.mulf %112, %150 : vector<32x64xf32>
    %c0_74 = arith.constant 0 : index
    %c0_75 = arith.constant 0 : index
    %152 = vector.load %arg16[%c0_74, %c0_75] : memref<64x32xf32, #tpu.memory_space<vmem>>, vector<64x32xf32>
    %cst_76 = arith.constant dense<0.000000e+00> : vector<32x32xf32>
    %153 = tpu.matmul %151, %152, %cst_76 {dimension_numbers = #tpu.dot_dimension_numbers<[1], [0], [0], [1], [0, 0, 1, 1], [], []>} : vector<32x64xf32>, vector<64x32xf32>, vector<32x32xf32> -> vector<32x32xf32>
    %c2_77 = arith.constant 2 : index
    %c0_78 = arith.constant 0 : index
    %154 = vector.load %arg20[%c2_77, %c0_78] : memref<12x128xf32, #tpu.memory_space<vmem>>, vector<1x32xf32>
    %155 = vector.broadcast %154 : vector<1x32xf32> to vector<32x32xf32>
    %156 = arith.addf %153, %155 : vector<32x32xf32>
    %c3_79 = arith.constant 3 : index
    %c0_80 = arith.constant 0 : index
    %157 = vector.load %arg20[%c3_79, %c0_80] : memref<12x128xf32, #tpu.memory_space<vmem>>, vector<1x32xf32>
    %c4_81 = arith.constant 4 : index
    %c0_82 = arith.constant 0 : index
    %158 = vector.load %arg20[%c4_81, %c0_82] : memref<12x128xf32, #tpu.memory_space<vmem>>, vector<1x32xf32>
    %cst_83 = arith.constant dense<0.000000e+00> : vector<32xf32>
    %159 = vector.multi_reduction <add>, %156, %cst_83 [1] : vector<32x32xf32> to vector<32xf32>
    %160 = vector.shape_cast %159 : vector<32xf32> to vector<32x1xf32>
    %cst_84 = arith.constant 3.200000e+01 : f32
    %161 = vector.broadcast %cst_84 : f32 to vector<32x1xf32>
    %162 = arith.divf %160, %161 : vector<32x1xf32>
    %163 = vector.broadcast %162 : vector<32x1xf32> to vector<32x32xf32>
    %164 = arith.subf %156, %163 : vector<32x32xf32>
    %165 = arith.mulf %164, %164 : vector<32x32xf32>
    %cst_85 = arith.constant dense<0.000000e+00> : vector<32xf32>
    %166 = vector.multi_reduction <add>, %165, %cst_85 [1] : vector<32x32xf32> to vector<32xf32>
    %167 = vector.shape_cast %166 : vector<32xf32> to vector<32x1xf32>
    %cst_86 = arith.constant 3.200000e+01 : f32
    %168 = vector.broadcast %cst_86 : f32 to vector<32x1xf32>
    %169 = arith.divf %167, %168 : vector<32x1xf32>
    %170 = vector.broadcast %162 : vector<32x1xf32> to vector<32x32xf32>
    %171 = arith.subf %156, %170 : vector<32x32xf32>
    %cst_87 = arith.constant 9.99999974E-6 : f32
    %172 = vector.broadcast %cst_87 : f32 to vector<32x1xf32>
    %173 = arith.addf %169, %172 : vector<32x1xf32>
    %174 = math.rsqrt %173 : vector<32x1xf32>
    %175 = vector.broadcast %174 : vector<32x1xf32> to vector<32x32xf32>
    %176 = arith.mulf %171, %175 : vector<32x32xf32>
    %177 = vector.broadcast %157 : vector<1x32xf32> to vector<32x32xf32>
    %178 = arith.mulf %176, %177 : vector<32x32xf32>
    %179 = vector.broadcast %158 : vector<1x32xf32> to vector<32x32xf32>
    %180 = arith.addf %178, %179 : vector<32x32xf32>
    %cst_88 = arith.constant 5.000000e-01 : f32
    %181 = vector.broadcast %cst_88 : f32 to vector<32x32xf32>
    %182 = arith.mulf %181, %180 : vector<32x32xf32>
    %cst_89 = arith.constant 0.707106769 : f32
    %183 = vector.broadcast %cst_89 : f32 to vector<32x32xf32>
    %184 = arith.mulf %180, %183 : vector<32x32xf32>
    %cst_90 = arith.constant 0.000000e+00 : f32
    %185 = vector.broadcast %cst_90 : f32 to vector<32x32xf32>
    %186 = arith.cmpf oge, %184, %185 : vector<32x32xf32>
    %cst_91 = arith.constant 1.000000e+00 : f32
    %cst_92 = arith.constant -1.000000e+00 : f32
    %187 = vector.broadcast %cst_91 : f32 to vector<32x32xf32>
    %188 = vector.broadcast %cst_92 : f32 to vector<32x32xf32>
    %189 = arith.select %186, %187, %188 : vector<32x32xi1>, vector<32x32xf32>
    %190 = math.absf %184 : vector<32x32xf32>
    %cst_93 = arith.constant 0.327591091 : f32
    %191 = vector.broadcast %cst_93 : f32 to vector<32x32xf32>
    %192 = arith.mulf %191, %190 : vector<32x32xf32>
    %cst_94 = arith.constant 1.000000e+00 : f32
    %193 = vector.broadcast %cst_94 : f32 to vector<32x32xf32>
    %194 = arith.addf %193, %192 : vector<32x32xf32>
    %cst_95 = arith.constant 1.000000e+00 : f32
    %195 = vector.broadcast %cst_95 : f32 to vector<32x32xf32>
    %196 = arith.divf %195, %194 : vector<32x32xf32>
    %cst_96 = arith.constant 1.06140542 : f32
    %197 = vector.broadcast %cst_96 : f32 to vector<32x32xf32>
    %198 = arith.mulf %197, %196 : vector<32x32xf32>
    %cst_97 = arith.constant -1.45315206 : f32
    %199 = vector.broadcast %cst_97 : f32 to vector<32x32xf32>
    %200 = arith.addf %198, %199 : vector<32x32xf32>
    %201 = arith.mulf %200, %196 : vector<32x32xf32>
    %cst_98 = arith.constant 1.42141378 : f32
    %202 = vector.broadcast %cst_98 : f32 to vector<32x32xf32>
    %203 = arith.addf %201, %202 : vector<32x32xf32>
    %204 = arith.mulf %203, %196 : vector<32x32xf32>
    %cst_99 = arith.constant -0.284496725 : f32
    %205 = vector.broadcast %cst_99 : f32 to vector<32x32xf32>
    %206 = arith.addf %204, %205 : vector<32x32xf32>
    %207 = arith.mulf %206, %196 : vector<32x32xf32>
    %cst_100 = arith.constant 0.254829586 : f32
    %208 = vector.broadcast %cst_100 : f32 to vector<32x32xf32>
    %209 = arith.addf %207, %208 : vector<32x32xf32>
    %210 = arith.mulf %209, %196 : vector<32x32xf32>
    %cst_101 = arith.constant 0.000000e+00 : f32
    %211 = vector.broadcast %cst_101 : f32 to vector<32x32xf32>
    %212 = arith.subf %211, %190 : vector<32x32xf32>
    %213 = arith.mulf %212, %190 : vector<32x32xf32>
    %214 = math.exp %213 : vector<32x32xf32>
    %215 = arith.mulf %210, %214 : vector<32x32xf32>
    %cst_102 = arith.constant 1.000000e+00 : f32
    %216 = vector.broadcast %cst_102 : f32 to vector<32x32xf32>
    %217 = arith.subf %216, %215 : vector<32x32xf32>
    %218 = arith.mulf %189, %217 : vector<32x32xf32>
    %cst_103 = arith.constant 1.000000e+00 : f32
    %219 = vector.broadcast %cst_103 : f32 to vector<32x32xf32>
    %220 = arith.addf %219, %218 : vector<32x32xf32>
    %221 = arith.mulf %182, %220 : vector<32x32xf32>
    %222 = vector.broadcast %85 : vector<32x1xf32> to vector<32x32xf32>
    %223 = arith.mulf %221, %222 : vector<32x32xf32>
    %cst_104 = arith.constant 0.000000e+00 : f32
    %224 = vector.broadcast %cst_104 : f32 to vector<2x32xf32>
    %225 = vector.extract_strided_slice %223 {offsets = [0, 0], sizes = [30, 32], strides = [1, 1]} : vector<32x32xf32> to vector<30x32xf32>
    %226 = tpu.concatenate %224, %225 in 0 : vector<2x32xf32>, vector<30x32xf32> -> vector<32x32xf32>
    %c-2_i32 = arith.constant -2 : i32
    %227 = vector.broadcast %c-2_i32 : i32 to vector<32x1xi32>
    %228 = arith.addi %86, %227 : vector<32x1xi32>
    %c0_i32 = arith.constant 0 : i32
    %229 = vector.broadcast %c0_i32 : i32 to vector<32x1xi32>
    %230 = arith.cmpi sge, %228, %229 : vector<32x1xi32>
    %c-2_i32_105 = arith.constant -2 : i32
    %231 = vector.broadcast %c-2_i32_105 : i32 to vector<32x1xi32>
    %232 = arith.addi %86, %231 : vector<32x1xi32>
    %c16_i32 = arith.constant 16 : i32
    %233 = vector.broadcast %c16_i32 : i32 to vector<32x1xi32>
    %234 = arith.cmpi slt, %232, %233 : vector<32x1xi32>
    %235 = arith.andi %230, %234 : vector<32x1xi1>
    %cst_106 = arith.constant 0.000000e+00 : f32
    %236 = vector.shape_cast %235 : vector<32x1xi1> to vector<32x1xi1>
    %237 = vector.broadcast %236 : vector<32x1xi1> to vector<32x32xi1>
    %238 = vector.broadcast %cst_106 : f32 to vector<32x32xf32>
    %239 = arith.select %237, %226, %238 : vector<32x32xi1>, vector<32x32xf32>
    %240 = vector.extract_strided_slice %224 {offsets = [0, 0], sizes = [1, 32], strides = [1, 1]} : vector<2x32xf32> to vector<1x32xf32>
    %241 = vector.extract_strided_slice %223 {offsets = [0, 0], sizes = [31, 32], strides = [1, 1]} : vector<32x32xf32> to vector<31x32xf32>
    %242 = tpu.concatenate %240, %241 in 0 : vector<1x32xf32>, vector<31x32xf32> -> vector<32x32xf32>
    %c-1_i32 = arith.constant -1 : i32
    %243 = vector.broadcast %c-1_i32 : i32 to vector<32x1xi32>
    %244 = arith.addi %86, %243 : vector<32x1xi32>
    %c0_i32_107 = arith.constant 0 : i32
    %245 = vector.broadcast %c0_i32_107 : i32 to vector<32x1xi32>
    %246 = arith.cmpi sge, %244, %245 : vector<32x1xi32>
    %c-1_i32_108 = arith.constant -1 : i32
    %247 = vector.broadcast %c-1_i32_108 : i32 to vector<32x1xi32>
    %248 = arith.addi %86, %247 : vector<32x1xi32>
    %c16_i32_109 = arith.constant 16 : i32
    %249 = vector.broadcast %c16_i32_109 : i32 to vector<32x1xi32>
    %250 = arith.cmpi slt, %248, %249 : vector<32x1xi32>
    %251 = arith.andi %246, %250 : vector<32x1xi1>
    %cst_110 = arith.constant 0.000000e+00 : f32
    %252 = vector.shape_cast %251 : vector<32x1xi1> to vector<32x1xi1>
    %253 = vector.broadcast %252 : vector<32x1xi1> to vector<32x32xi1>
    %254 = vector.broadcast %cst_110 : f32 to vector<32x32xf32>
    %255 = arith.select %253, %242, %254 : vector<32x32xi1>, vector<32x32xf32>
    %c0_i32_111 = arith.constant 0 : i32
    %256 = vector.broadcast %c0_i32_111 : i32 to vector<32x1xi32>
    %257 = arith.addi %86, %256 : vector<32x1xi32>
    %c0_i32_112 = arith.constant 0 : i32
    %258 = vector.broadcast %c0_i32_112 : i32 to vector<32x1xi32>
    %259 = arith.cmpi sge, %257, %258 : vector<32x1xi32>
    %c0_i32_113 = arith.constant 0 : i32
    %260 = vector.broadcast %c0_i32_113 : i32 to vector<32x1xi32>
    %261 = arith.addi %86, %260 : vector<32x1xi32>
    %c16_i32_114 = arith.constant 16 : i32
    %262 = vector.broadcast %c16_i32_114 : i32 to vector<32x1xi32>
    %263 = arith.cmpi slt, %261, %262 : vector<32x1xi32>
    %264 = arith.andi %259, %263 : vector<32x1xi1>
    %cst_115 = arith.constant 0.000000e+00 : f32
    %265 = vector.shape_cast %264 : vector<32x1xi1> to vector<32x1xi1>
    %266 = vector.broadcast %265 : vector<32x1xi1> to vector<32x32xi1>
    %267 = vector.broadcast %cst_115 : f32 to vector<32x32xf32>
    %268 = arith.select %266, %223, %267 : vector<32x32xi1>, vector<32x32xf32>
    %269 = vector.extract_strided_slice %223 {offsets = [1, 0], sizes = [31, 32], strides = [1, 1]} : vector<32x32xf32> to vector<31x32xf32>
    %270 = vector.extract_strided_slice %224 {offsets = [0, 0], sizes = [1, 32], strides = [1, 1]} : vector<2x32xf32> to vector<1x32xf32>
    %271 = tpu.concatenate %269, %270 in 0 : vector<31x32xf32>, vector<1x32xf32> -> vector<32x32xf32>
    %c1_i32 = arith.constant 1 : i32
    %272 = vector.broadcast %c1_i32 : i32 to vector<32x1xi32>
    %273 = arith.addi %86, %272 : vector<32x1xi32>
    %c0_i32_116 = arith.constant 0 : i32
    %274 = vector.broadcast %c0_i32_116 : i32 to vector<32x1xi32>
    %275 = arith.cmpi sge, %273, %274 : vector<32x1xi32>
    %c1_i32_117 = arith.constant 1 : i32
    %276 = vector.broadcast %c1_i32_117 : i32 to vector<32x1xi32>
    %277 = arith.addi %86, %276 : vector<32x1xi32>
    %c16_i32_118 = arith.constant 16 : i32
    %278 = vector.broadcast %c16_i32_118 : i32 to vector<32x1xi32>
    %279 = arith.cmpi slt, %277, %278 : vector<32x1xi32>
    %280 = arith.andi %275, %279 : vector<32x1xi1>
    %cst_119 = arith.constant 0.000000e+00 : f32
    %281 = vector.shape_cast %280 : vector<32x1xi1> to vector<32x1xi1>
    %282 = vector.broadcast %281 : vector<32x1xi1> to vector<32x32xi1>
    %283 = vector.broadcast %cst_119 : f32 to vector<32x32xf32>
    %284 = arith.select %282, %271, %283 : vector<32x32xi1>, vector<32x32xf32>
    %285 = vector.extract_strided_slice %223 {offsets = [2, 0], sizes = [30, 32], strides = [1, 1]} : vector<32x32xf32> to vector<30x32xf32>
    %286 = tpu.concatenate %285, %224 in 0 : vector<30x32xf32>, vector<2x32xf32> -> vector<32x32xf32>
    %c2_i32 = arith.constant 2 : i32
    %287 = vector.broadcast %c2_i32 : i32 to vector<32x1xi32>
    %288 = arith.addi %86, %287 : vector<32x1xi32>
    %c0_i32_120 = arith.constant 0 : i32
    %289 = vector.broadcast %c0_i32_120 : i32 to vector<32x1xi32>
    %290 = arith.cmpi sge, %288, %289 : vector<32x1xi32>
    %c2_i32_121 = arith.constant 2 : i32
    %291 = vector.broadcast %c2_i32_121 : i32 to vector<32x1xi32>
    %292 = arith.addi %86, %291 : vector<32x1xi32>
    %c16_i32_122 = arith.constant 16 : i32
    %293 = vector.broadcast %c16_i32_122 : i32 to vector<32x1xi32>
    %294 = arith.cmpi slt, %292, %293 : vector<32x1xi32>
    %295 = arith.andi %290, %294 : vector<32x1xi1>
    %cst_123 = arith.constant 0.000000e+00 : f32
    %296 = vector.shape_cast %295 : vector<32x1xi1> to vector<32x1xi1>
    %297 = vector.broadcast %296 : vector<32x1xi1> to vector<32x32xi1>
    %298 = vector.broadcast %cst_123 : f32 to vector<32x32xf32>
    %299 = arith.select %297, %286, %298 : vector<32x32xi1>, vector<32x32xf32>
    %300 = tpu.concatenate %239, %255, %268, %284, %299 in 1 : vector<32x32xf32>, vector<32x32xf32>, vector<32x32xf32>, vector<32x32xf32>, vector<32x32xf32> -> vector<32x160xf32>
    %c0_124 = arith.constant 0 : index
    %c0_125 = arith.constant 0 : index
    %301 = vector.load %arg17[%c0_124, %c0_125] : memref<160x32xf32, #tpu.memory_space<vmem>>, vector<160x32xf32>
    %cst_126 = arith.constant dense<0.000000e+00> : vector<32x32xf32>
    %302 = tpu.matmul %300, %301, %cst_126 {dimension_numbers = #tpu.dot_dimension_numbers<[1], [0], [0], [1], [0, 0, 1, 1], [], []>} : vector<32x160xf32>, vector<160x32xf32>, vector<32x32xf32> -> vector<32x32xf32>
    %c5_127 = arith.constant 5 : index
    %c0_128 = arith.constant 0 : index
    %303 = vector.load %arg20[%c5_127, %c0_128] : memref<12x128xf32, #tpu.memory_space<vmem>>, vector<1x32xf32>
    %304 = vector.broadcast %303 : vector<1x32xf32> to vector<32x32xf32>
    %305 = arith.addf %302, %304 : vector<32x32xf32>
    %c6 = arith.constant 6 : index
    %c0_129 = arith.constant 0 : index
    %306 = vector.load %arg20[%c6, %c0_129] : memref<12x128xf32, #tpu.memory_space<vmem>>, vector<1x32xf32>
    %c7 = arith.constant 7 : index
    %c0_130 = arith.constant 0 : index
    %307 = vector.load %arg20[%c7, %c0_130] : memref<12x128xf32, #tpu.memory_space<vmem>>, vector<1x32xf32>
    %cst_131 = arith.constant dense<0.000000e+00> : vector<32xf32>
    %308 = vector.multi_reduction <add>, %305, %cst_131 [1] : vector<32x32xf32> to vector<32xf32>
    %309 = vector.shape_cast %308 : vector<32xf32> to vector<32x1xf32>
    %cst_132 = arith.constant 3.200000e+01 : f32
    %310 = vector.broadcast %cst_132 : f32 to vector<32x1xf32>
    %311 = arith.divf %309, %310 : vector<32x1xf32>
    %312 = vector.broadcast %311 : vector<32x1xf32> to vector<32x32xf32>
    %313 = arith.subf %305, %312 : vector<32x32xf32>
    %314 = arith.mulf %313, %313 : vector<32x32xf32>
    %cst_133 = arith.constant dense<0.000000e+00> : vector<32xf32>
    %315 = vector.multi_reduction <add>, %314, %cst_133 [1] : vector<32x32xf32> to vector<32xf32>
    %316 = vector.shape_cast %315 : vector<32xf32> to vector<32x1xf32>
    %cst_134 = arith.constant 3.200000e+01 : f32
    %317 = vector.broadcast %cst_134 : f32 to vector<32x1xf32>
    %318 = arith.divf %316, %317 : vector<32x1xf32>
    %319 = vector.broadcast %311 : vector<32x1xf32> to vector<32x32xf32>
    %320 = arith.subf %305, %319 : vector<32x32xf32>
    %cst_135 = arith.constant 9.99999974E-6 : f32
    %321 = vector.broadcast %cst_135 : f32 to vector<32x1xf32>
    %322 = arith.addf %318, %321 : vector<32x1xf32>
    %323 = math.rsqrt %322 : vector<32x1xf32>
    %324 = vector.broadcast %323 : vector<32x1xf32> to vector<32x32xf32>
    %325 = arith.mulf %320, %324 : vector<32x32xf32>
    %326 = vector.broadcast %306 : vector<1x32xf32> to vector<32x32xf32>
    %327 = arith.mulf %325, %326 : vector<32x32xf32>
    %328 = vector.broadcast %307 : vector<1x32xf32> to vector<32x32xf32>
    %329 = arith.addf %327, %328 : vector<32x32xf32>
    %cst_136 = arith.constant 5.000000e-01 : f32
    %330 = vector.broadcast %cst_136 : f32 to vector<32x32xf32>
    %331 = arith.mulf %330, %329 : vector<32x32xf32>
    %cst_137 = arith.constant 0.707106769 : f32
    %332 = vector.broadcast %cst_137 : f32 to vector<32x32xf32>
    %333 = arith.mulf %329, %332 : vector<32x32xf32>
    %cst_138 = arith.constant 0.000000e+00 : f32
    %334 = vector.broadcast %cst_138 : f32 to vector<32x32xf32>
    %335 = arith.cmpf oge, %333, %334 : vector<32x32xf32>
    %cst_139 = arith.constant 1.000000e+00 : f32
    %cst_140 = arith.constant -1.000000e+00 : f32
    %336 = vector.broadcast %cst_139 : f32 to vector<32x32xf32>
    %337 = vector.broadcast %cst_140 : f32 to vector<32x32xf32>
    %338 = arith.select %335, %336, %337 : vector<32x32xi1>, vector<32x32xf32>
    %339 = math.absf %333 : vector<32x32xf32>
    %cst_141 = arith.constant 0.327591091 : f32
    %340 = vector.broadcast %cst_141 : f32 to vector<32x32xf32>
    %341 = arith.mulf %340, %339 : vector<32x32xf32>
    %cst_142 = arith.constant 1.000000e+00 : f32
    %342 = vector.broadcast %cst_142 : f32 to vector<32x32xf32>
    %343 = arith.addf %342, %341 : vector<32x32xf32>
    %cst_143 = arith.constant 1.000000e+00 : f32
    %344 = vector.broadcast %cst_143 : f32 to vector<32x32xf32>
    %345 = arith.divf %344, %343 : vector<32x32xf32>
    %cst_144 = arith.constant 1.06140542 : f32
    %346 = vector.broadcast %cst_144 : f32 to vector<32x32xf32>
    %347 = arith.mulf %346, %345 : vector<32x32xf32>
    %cst_145 = arith.constant -1.45315206 : f32
    %348 = vector.broadcast %cst_145 : f32 to vector<32x32xf32>
    %349 = arith.addf %347, %348 : vector<32x32xf32>
    %350 = arith.mulf %349, %345 : vector<32x32xf32>
    %cst_146 = arith.constant 1.42141378 : f32
    %351 = vector.broadcast %cst_146 : f32 to vector<32x32xf32>
    %352 = arith.addf %350, %351 : vector<32x32xf32>
    %353 = arith.mulf %352, %345 : vector<32x32xf32>
    %cst_147 = arith.constant -0.284496725 : f32
    %354 = vector.broadcast %cst_147 : f32 to vector<32x32xf32>
    %355 = arith.addf %353, %354 : vector<32x32xf32>
    %356 = arith.mulf %355, %345 : vector<32x32xf32>
    %cst_148 = arith.constant 0.254829586 : f32
    %357 = vector.broadcast %cst_148 : f32 to vector<32x32xf32>
    %358 = arith.addf %356, %357 : vector<32x32xf32>
    %359 = arith.mulf %358, %345 : vector<32x32xf32>
    %cst_149 = arith.constant 0.000000e+00 : f32
    %360 = vector.broadcast %cst_149 : f32 to vector<32x32xf32>
    %361 = arith.subf %360, %339 : vector<32x32xf32>
    %362 = arith.mulf %361, %339 : vector<32x32xf32>
    %363 = math.exp %362 : vector<32x32xf32>
    %364 = arith.mulf %359, %363 : vector<32x32xf32>
    %cst_150 = arith.constant 1.000000e+00 : f32
    %365 = vector.broadcast %cst_150 : f32 to vector<32x32xf32>
    %366 = arith.subf %365, %364 : vector<32x32xf32>
    %367 = arith.mulf %338, %366 : vector<32x32xf32>
    %cst_151 = arith.constant 1.000000e+00 : f32
    %368 = vector.broadcast %cst_151 : f32 to vector<32x32xf32>
    %369 = arith.addf %368, %367 : vector<32x32xf32>
    %370 = arith.mulf %331, %369 : vector<32x32xf32>
    %c0_152 = arith.constant 0 : index
    %c0_153 = arith.constant 0 : index
    %371 = vector.load %arg18[%c0_152, %c0_153] : memref<32x64xf32, #tpu.memory_space<vmem>>, vector<32x64xf32>
    %cst_154 = arith.constant dense<0.000000e+00> : vector<32x64xf32>
    %372 = tpu.matmul %370, %371, %cst_154 {dimension_numbers = #tpu.dot_dimension_numbers<[1], [0], [0], [1], [0, 0, 1, 1], [], []>} : vector<32x32xf32>, vector<32x64xf32>, vector<32x64xf32> -> vector<32x64xf32>
    %c8 = arith.constant 8 : index
    %c0_155 = arith.constant 0 : index
    %373 = vector.load %arg20[%c8, %c0_155] : memref<12x128xf32, #tpu.memory_space<vmem>>, vector<1x64xf32>
    %374 = vector.broadcast %373 : vector<1x64xf32> to vector<32x64xf32>
    %375 = arith.addf %372, %374 : vector<32x64xf32>
    %c9 = arith.constant 9 : index
    %c0_156 = arith.constant 0 : index
    %376 = vector.load %arg20[%c9, %c0_156] : memref<12x128xf32, #tpu.memory_space<vmem>>, vector<1x64xf32>
    %c10 = arith.constant 10 : index
    %c0_157 = arith.constant 0 : index
    %377 = vector.load %arg20[%c10, %c0_157] : memref<12x128xf32, #tpu.memory_space<vmem>>, vector<1x64xf32>
    %cst_158 = arith.constant dense<0.000000e+00> : vector<32xf32>
    %378 = vector.multi_reduction <add>, %375, %cst_158 [1] : vector<32x64xf32> to vector<32xf32>
    %379 = vector.shape_cast %378 : vector<32xf32> to vector<32x1xf32>
    %cst_159 = arith.constant 6.400000e+01 : f32
    %380 = vector.broadcast %cst_159 : f32 to vector<32x1xf32>
    %381 = arith.divf %379, %380 : vector<32x1xf32>
    %382 = vector.broadcast %381 : vector<32x1xf32> to vector<32x64xf32>
    %383 = arith.subf %375, %382 : vector<32x64xf32>
    %384 = arith.mulf %383, %383 : vector<32x64xf32>
    %cst_160 = arith.constant dense<0.000000e+00> : vector<32xf32>
    %385 = vector.multi_reduction <add>, %384, %cst_160 [1] : vector<32x64xf32> to vector<32xf32>
    %386 = vector.shape_cast %385 : vector<32xf32> to vector<32x1xf32>
    %cst_161 = arith.constant 6.400000e+01 : f32
    %387 = vector.broadcast %cst_161 : f32 to vector<32x1xf32>
    %388 = arith.divf %386, %387 : vector<32x1xf32>
    %389 = vector.broadcast %381 : vector<32x1xf32> to vector<32x64xf32>
    %390 = arith.subf %375, %389 : vector<32x64xf32>
    %cst_162 = arith.constant 9.99999974E-6 : f32
    %391 = vector.broadcast %cst_162 : f32 to vector<32x1xf32>
    %392 = arith.addf %388, %391 : vector<32x1xf32>
    %393 = math.rsqrt %392 : vector<32x1xf32>
    %394 = vector.broadcast %393 : vector<32x1xf32> to vector<32x64xf32>
    %395 = arith.mulf %390, %394 : vector<32x64xf32>
    %396 = vector.broadcast %376 : vector<1x64xf32> to vector<32x64xf32>
    %397 = arith.mulf %395, %396 : vector<32x64xf32>
    %398 = vector.broadcast %377 : vector<1x64xf32> to vector<32x64xf32>
    %399 = arith.addf %397, %398 : vector<32x64xf32>
    %cst_163 = arith.constant 5.000000e-01 : f32
    %400 = vector.broadcast %cst_163 : f32 to vector<32x64xf32>
    %401 = arith.mulf %400, %399 : vector<32x64xf32>
    %cst_164 = arith.constant 0.707106769 : f32
    %402 = vector.broadcast %cst_164 : f32 to vector<32x64xf32>
    %403 = arith.mulf %399, %402 : vector<32x64xf32>
    %cst_165 = arith.constant 0.000000e+00 : f32
    %404 = vector.broadcast %cst_165 : f32 to vector<32x64xf32>
    %405 = arith.cmpf oge, %403, %404 : vector<32x64xf32>
    %cst_166 = arith.constant 1.000000e+00 : f32
    %cst_167 = arith.constant -1.000000e+00 : f32
    %406 = vector.broadcast %cst_166 : f32 to vector<32x64xf32>
    %407 = vector.broadcast %cst_167 : f32 to vector<32x64xf32>
    %408 = arith.select %405, %406, %407 : vector<32x64xi1>, vector<32x64xf32>
    %409 = math.absf %403 : vector<32x64xf32>
    %cst_168 = arith.constant 0.327591091 : f32
    %410 = vector.broadcast %cst_168 : f32 to vector<32x64xf32>
    %411 = arith.mulf %410, %409 : vector<32x64xf32>
    %cst_169 = arith.constant 1.000000e+00 : f32
    %412 = vector.broadcast %cst_169 : f32 to vector<32x64xf32>
    %413 = arith.addf %412, %411 : vector<32x64xf32>
    %cst_170 = arith.constant 1.000000e+00 : f32
    %414 = vector.broadcast %cst_170 : f32 to vector<32x64xf32>
    %415 = arith.divf %414, %413 : vector<32x64xf32>
    %cst_171 = arith.constant 1.06140542 : f32
    %416 = vector.broadcast %cst_171 : f32 to vector<32x64xf32>
    %417 = arith.mulf %416, %415 : vector<32x64xf32>
    %cst_172 = arith.constant -1.45315206 : f32
    %418 = vector.broadcast %cst_172 : f32 to vector<32x64xf32>
    %419 = arith.addf %417, %418 : vector<32x64xf32>
    %420 = arith.mulf %419, %415 : vector<32x64xf32>
    %cst_173 = arith.constant 1.42141378 : f32
    %421 = vector.broadcast %cst_173 : f32 to vector<32x64xf32>
    %422 = arith.addf %420, %421 : vector<32x64xf32>
    %423 = arith.mulf %422, %415 : vector<32x64xf32>
    %cst_174 = arith.constant -0.284496725 : f32
    %424 = vector.broadcast %cst_174 : f32 to vector<32x64xf32>
    %425 = arith.addf %423, %424 : vector<32x64xf32>
    %426 = arith.mulf %425, %415 : vector<32x64xf32>
    %cst_175 = arith.constant 0.254829586 : f32
    %427 = vector.broadcast %cst_175 : f32 to vector<32x64xf32>
    %428 = arith.addf %426, %427 : vector<32x64xf32>
    %429 = arith.mulf %428, %415 : vector<32x64xf32>
    %cst_176 = arith.constant 0.000000e+00 : f32
    %430 = vector.broadcast %cst_176 : f32 to vector<32x64xf32>
    %431 = arith.subf %430, %409 : vector<32x64xf32>
    %432 = arith.mulf %431, %409 : vector<32x64xf32>
    %433 = math.exp %432 : vector<32x64xf32>
    %434 = arith.mulf %429, %433 : vector<32x64xf32>
    %cst_177 = arith.constant 1.000000e+00 : f32
    %435 = vector.broadcast %cst_177 : f32 to vector<32x64xf32>
    %436 = arith.subf %435, %434 : vector<32x64xf32>
    %437 = arith.mulf %408, %436 : vector<32x64xf32>
    %cst_178 = arith.constant 1.000000e+00 : f32
    %438 = vector.broadcast %cst_178 : f32 to vector<32x64xf32>
    %439 = arith.addf %438, %437 : vector<32x64xf32>
    %440 = arith.mulf %401, %439 : vector<32x64xf32>
    %441 = arith.addf %83, %440 : vector<32x64xf32>
    %c0_179 = arith.constant 0 : index
    %c0_180 = arith.constant 0 : index
    %442 = vector.load %arg19[%c0_179, %c0_180] : memref<32x128xf32, #tpu.memory_space<vmem>>, vector<32x128xf32>
    %cst_181 = arith.constant dense<0.000000e+00> : vector<32x128xf32>
    %443 = tpu.matmul %84, %442, %cst_181 {dimension_numbers = #tpu.dot_dimension_numbers<[1], [0], [0], [1], [0, 0, 1, 1], [], []>} : vector<32x32xf32>, vector<32x128xf32>, vector<32x128xf32> -> vector<32x128xf32>
    %c11 = arith.constant 11 : index
    %c0_182 = arith.constant 0 : index
    %444 = vector.load %arg20[%c11, %c0_182] : memref<12x128xf32, #tpu.memory_space<vmem>>, vector<1x128xf32>
    %445 = vector.broadcast %444 : vector<1x128xf32> to vector<32x128xf32>
    %446 = arith.addf %443, %445 : vector<32x128xf32>
    %447 = vector.extract_strided_slice %446 {offsets = [0, 64], sizes = [32, 64], strides = [1, 1]} : vector<32x128xf32> to vector<32x64xf32>
    %cst_183 = arith.constant 1.000000e+00 : f32
    %448 = vector.broadcast %cst_183 : f32 to vector<32x64xf32>
    %449 = arith.addf %448, %447 : vector<32x64xf32>
    %450 = arith.mulf %441, %449 : vector<32x64xf32>
    %451 = vector.extract_strided_slice %446 {offsets = [0, 0], sizes = [32, 64], strides = [1, 1]} : vector<32x128xf32> to vector<32x64xf32>
    %452 = arith.addf %450, %451 : vector<32x64xf32>
    %c0_184 = arith.constant 0 : index
    %c0_185 = arith.constant 0 : index
    %453 = vector.load %arg25[%c0_184, %c0_185] : memref<12x128xf32, #tpu.memory_space<vmem>>, vector<1x64xf32>
    %c1_186 = arith.constant 1 : index
    %c0_187 = arith.constant 0 : index
    %454 = vector.load %arg25[%c1_186, %c0_187] : memref<12x128xf32, #tpu.memory_space<vmem>>, vector<1x64xf32>
    %cst_188 = arith.constant dense<0.000000e+00> : vector<32xf32>
    %455 = vector.multi_reduction <add>, %452, %cst_188 [1] : vector<32x64xf32> to vector<32xf32>
    %456 = vector.shape_cast %455 : vector<32xf32> to vector<32x1xf32>
    %cst_189 = arith.constant 6.400000e+01 : f32
    %457 = vector.broadcast %cst_189 : f32 to vector<32x1xf32>
    %458 = arith.divf %456, %457 : vector<32x1xf32>
    %459 = vector.broadcast %458 : vector<32x1xf32> to vector<32x64xf32>
    %460 = arith.subf %452, %459 : vector<32x64xf32>
    %461 = arith.mulf %460, %460 : vector<32x64xf32>
    %cst_190 = arith.constant dense<0.000000e+00> : vector<32xf32>
    %462 = vector.multi_reduction <add>, %461, %cst_190 [1] : vector<32x64xf32> to vector<32xf32>
    %463 = vector.shape_cast %462 : vector<32xf32> to vector<32x1xf32>
    %cst_191 = arith.constant 6.400000e+01 : f32
    %464 = vector.broadcast %cst_191 : f32 to vector<32x1xf32>
    %465 = arith.divf %463, %464 : vector<32x1xf32>
    %466 = vector.broadcast %458 : vector<32x1xf32> to vector<32x64xf32>
    %467 = arith.subf %452, %466 : vector<32x64xf32>
    %cst_192 = arith.constant 9.99999974E-6 : f32
    %468 = vector.broadcast %cst_192 : f32 to vector<32x1xf32>
    %469 = arith.addf %465, %468 : vector<32x1xf32>
    %470 = math.rsqrt %469 : vector<32x1xf32>
    %471 = vector.broadcast %470 : vector<32x1xf32> to vector<32x64xf32>
    %472 = arith.mulf %467, %471 : vector<32x64xf32>
    %473 = vector.broadcast %453 : vector<1x64xf32> to vector<32x64xf32>
    %474 = arith.mulf %472, %473 : vector<32x64xf32>
    %475 = vector.broadcast %454 : vector<1x64xf32> to vector<32x64xf32>
    %476 = arith.addf %474, %475 : vector<32x64xf32>
    %cst_193 = arith.constant 5.000000e-01 : f32
    %477 = vector.broadcast %cst_193 : f32 to vector<32x64xf32>
    %478 = arith.mulf %477, %476 : vector<32x64xf32>
    %cst_194 = arith.constant 0.707106769 : f32
    %479 = vector.broadcast %cst_194 : f32 to vector<32x64xf32>
    %480 = arith.mulf %476, %479 : vector<32x64xf32>
    %cst_195 = arith.constant 0.000000e+00 : f32
    %481 = vector.broadcast %cst_195 : f32 to vector<32x64xf32>
    %482 = arith.cmpf oge, %480, %481 : vector<32x64xf32>
    %cst_196 = arith.constant 1.000000e+00 : f32
    %cst_197 = arith.constant -1.000000e+00 : f32
    %483 = vector.broadcast %cst_196 : f32 to vector<32x64xf32>
    %484 = vector.broadcast %cst_197 : f32 to vector<32x64xf32>
    %485 = arith.select %482, %483, %484 : vector<32x64xi1>, vector<32x64xf32>
    %486 = math.absf %480 : vector<32x64xf32>
    %cst_198 = arith.constant 0.327591091 : f32
    %487 = vector.broadcast %cst_198 : f32 to vector<32x64xf32>
    %488 = arith.mulf %487, %486 : vector<32x64xf32>
    %cst_199 = arith.constant 1.000000e+00 : f32
    %489 = vector.broadcast %cst_199 : f32 to vector<32x64xf32>
    %490 = arith.addf %489, %488 : vector<32x64xf32>
    %cst_200 = arith.constant 1.000000e+00 : f32
    %491 = vector.broadcast %cst_200 : f32 to vector<32x64xf32>
    %492 = arith.divf %491, %490 : vector<32x64xf32>
    %cst_201 = arith.constant 1.06140542 : f32
    %493 = vector.broadcast %cst_201 : f32 to vector<32x64xf32>
    %494 = arith.mulf %493, %492 : vector<32x64xf32>
    %cst_202 = arith.constant -1.45315206 : f32
    %495 = vector.broadcast %cst_202 : f32 to vector<32x64xf32>
    %496 = arith.addf %494, %495 : vector<32x64xf32>
    %497 = arith.mulf %496, %492 : vector<32x64xf32>
    %cst_203 = arith.constant 1.42141378 : f32
    %498 = vector.broadcast %cst_203 : f32 to vector<32x64xf32>
    %499 = arith.addf %497, %498 : vector<32x64xf32>
    %500 = arith.mulf %499, %492 : vector<32x64xf32>
    %cst_204 = arith.constant -0.284496725 : f32
    %501 = vector.broadcast %cst_204 : f32 to vector<32x64xf32>
    %502 = arith.addf %500, %501 : vector<32x64xf32>
    %503 = arith.mulf %502, %492 : vector<32x64xf32>
    %cst_205 = arith.constant 0.254829586 : f32
    %504 = vector.broadcast %cst_205 : f32 to vector<32x64xf32>
    %505 = arith.addf %503, %504 : vector<32x64xf32>
    %506 = arith.mulf %505, %492 : vector<32x64xf32>
    %cst_206 = arith.constant 0.000000e+00 : f32
    %507 = vector.broadcast %cst_206 : f32 to vector<32x64xf32>
    %508 = arith.subf %507, %486 : vector<32x64xf32>
    %509 = arith.mulf %508, %486 : vector<32x64xf32>
    %510 = math.exp %509 : vector<32x64xf32>
    %511 = arith.mulf %506, %510 : vector<32x64xf32>
    %cst_207 = arith.constant 1.000000e+00 : f32
    %512 = vector.broadcast %cst_207 : f32 to vector<32x64xf32>
    %513 = arith.subf %512, %511 : vector<32x64xf32>
    %514 = arith.mulf %485, %513 : vector<32x64xf32>
    %cst_208 = arith.constant 1.000000e+00 : f32
    %515 = vector.broadcast %cst_208 : f32 to vector<32x64xf32>
    %516 = arith.addf %515, %514 : vector<32x64xf32>
    %517 = arith.mulf %478, %516 : vector<32x64xf32>
    %c0_209 = arith.constant 0 : index
    %c0_210 = arith.constant 0 : index
    %518 = vector.load %arg21[%c0_209, %c0_210] : memref<64x32xf32, #tpu.memory_space<vmem>>, vector<64x32xf32>
    %cst_211 = arith.constant dense<0.000000e+00> : vector<32x32xf32>
    %519 = tpu.matmul %517, %518, %cst_211 {dimension_numbers = #tpu.dot_dimension_numbers<[1], [0], [0], [1], [0, 0, 1, 1], [], []>} : vector<32x64xf32>, vector<64x32xf32>, vector<32x32xf32> -> vector<32x32xf32>
    %c2_212 = arith.constant 2 : index
    %c0_213 = arith.constant 0 : index
    %520 = vector.load %arg25[%c2_212, %c0_213] : memref<12x128xf32, #tpu.memory_space<vmem>>, vector<1x32xf32>
    %521 = vector.broadcast %520 : vector<1x32xf32> to vector<32x32xf32>
    %522 = arith.addf %519, %521 : vector<32x32xf32>
    %c3_214 = arith.constant 3 : index
    %c0_215 = arith.constant 0 : index
    %523 = vector.load %arg25[%c3_214, %c0_215] : memref<12x128xf32, #tpu.memory_space<vmem>>, vector<1x32xf32>
    %c4_216 = arith.constant 4 : index
    %c0_217 = arith.constant 0 : index
    %524 = vector.load %arg25[%c4_216, %c0_217] : memref<12x128xf32, #tpu.memory_space<vmem>>, vector<1x32xf32>
    %cst_218 = arith.constant dense<0.000000e+00> : vector<32xf32>
    %525 = vector.multi_reduction <add>, %522, %cst_218 [1] : vector<32x32xf32> to vector<32xf32>
    %526 = vector.shape_cast %525 : vector<32xf32> to vector<32x1xf32>
    %cst_219 = arith.constant 3.200000e+01 : f32
    %527 = vector.broadcast %cst_219 : f32 to vector<32x1xf32>
    %528 = arith.divf %526, %527 : vector<32x1xf32>
    %529 = vector.broadcast %528 : vector<32x1xf32> to vector<32x32xf32>
    %530 = arith.subf %522, %529 : vector<32x32xf32>
    %531 = arith.mulf %530, %530 : vector<32x32xf32>
    %cst_220 = arith.constant dense<0.000000e+00> : vector<32xf32>
    %532 = vector.multi_reduction <add>, %531, %cst_220 [1] : vector<32x32xf32> to vector<32xf32>
    %533 = vector.shape_cast %532 : vector<32xf32> to vector<32x1xf32>
    %cst_221 = arith.constant 3.200000e+01 : f32
    %534 = vector.broadcast %cst_221 : f32 to vector<32x1xf32>
    %535 = arith.divf %533, %534 : vector<32x1xf32>
    %536 = vector.broadcast %528 : vector<32x1xf32> to vector<32x32xf32>
    %537 = arith.subf %522, %536 : vector<32x32xf32>
    %cst_222 = arith.constant 9.99999974E-6 : f32
    %538 = vector.broadcast %cst_222 : f32 to vector<32x1xf32>
    %539 = arith.addf %535, %538 : vector<32x1xf32>
    %540 = math.rsqrt %539 : vector<32x1xf32>
    %541 = vector.broadcast %540 : vector<32x1xf32> to vector<32x32xf32>
    %542 = arith.mulf %537, %541 : vector<32x32xf32>
    %543 = vector.broadcast %523 : vector<1x32xf32> to vector<32x32xf32>
    %544 = arith.mulf %542, %543 : vector<32x32xf32>
    %545 = vector.broadcast %524 : vector<1x32xf32> to vector<32x32xf32>
    %546 = arith.addf %544, %545 : vector<32x32xf32>
    %cst_223 = arith.constant 5.000000e-01 : f32
    %547 = vector.broadcast %cst_223 : f32 to vector<32x32xf32>
    %548 = arith.mulf %547, %546 : vector<32x32xf32>
    %cst_224 = arith.constant 0.707106769 : f32
    %549 = vector.broadcast %cst_224 : f32 to vector<32x32xf32>
    %550 = arith.mulf %546, %549 : vector<32x32xf32>
    %cst_225 = arith.constant 0.000000e+00 : f32
    %551 = vector.broadcast %cst_225 : f32 to vector<32x32xf32>
    %552 = arith.cmpf oge, %550, %551 : vector<32x32xf32>
    %cst_226 = arith.constant 1.000000e+00 : f32
    %cst_227 = arith.constant -1.000000e+00 : f32
    %553 = vector.broadcast %cst_226 : f32 to vector<32x32xf32>
    %554 = vector.broadcast %cst_227 : f32 to vector<32x32xf32>
    %555 = arith.select %552, %553, %554 : vector<32x32xi1>, vector<32x32xf32>
    %556 = math.absf %550 : vector<32x32xf32>
    %cst_228 = arith.constant 0.327591091 : f32
    %557 = vector.broadcast %cst_228 : f32 to vector<32x32xf32>
    %558 = arith.mulf %557, %556 : vector<32x32xf32>
    %cst_229 = arith.constant 1.000000e+00 : f32
    %559 = vector.broadcast %cst_229 : f32 to vector<32x32xf32>
    %560 = arith.addf %559, %558 : vector<32x32xf32>
    %cst_230 = arith.constant 1.000000e+00 : f32
    %561 = vector.broadcast %cst_230 : f32 to vector<32x32xf32>
    %562 = arith.divf %561, %560 : vector<32x32xf32>
    %cst_231 = arith.constant 1.06140542 : f32
    %563 = vector.broadcast %cst_231 : f32 to vector<32x32xf32>
    %564 = arith.mulf %563, %562 : vector<32x32xf32>
    %cst_232 = arith.constant -1.45315206 : f32
    %565 = vector.broadcast %cst_232 : f32 to vector<32x32xf32>
    %566 = arith.addf %564, %565 : vector<32x32xf32>
    %567 = arith.mulf %566, %562 : vector<32x32xf32>
    %cst_233 = arith.constant 1.42141378 : f32
    %568 = vector.broadcast %cst_233 : f32 to vector<32x32xf32>
    %569 = arith.addf %567, %568 : vector<32x32xf32>
    %570 = arith.mulf %569, %562 : vector<32x32xf32>
    %cst_234 = arith.constant -0.284496725 : f32
    %571 = vector.broadcast %cst_234 : f32 to vector<32x32xf32>
    %572 = arith.addf %570, %571 : vector<32x32xf32>
    %573 = arith.mulf %572, %562 : vector<32x32xf32>
    %cst_235 = arith.constant 0.254829586 : f32
    %574 = vector.broadcast %cst_235 : f32 to vector<32x32xf32>
    %575 = arith.addf %573, %574 : vector<32x32xf32>
    %576 = arith.mulf %575, %562 : vector<32x32xf32>
    %cst_236 = arith.constant 0.000000e+00 : f32
    %577 = vector.broadcast %cst_236 : f32 to vector<32x32xf32>
    %578 = arith.subf %577, %556 : vector<32x32xf32>
    %579 = arith.mulf %578, %556 : vector<32x32xf32>
    %580 = math.exp %579 : vector<32x32xf32>
    %581 = arith.mulf %576, %580 : vector<32x32xf32>
    %cst_237 = arith.constant 1.000000e+00 : f32
    %582 = vector.broadcast %cst_237 : f32 to vector<32x32xf32>
    %583 = arith.subf %582, %581 : vector<32x32xf32>
    %584 = arith.mulf %555, %583 : vector<32x32xf32>
    %cst_238 = arith.constant 1.000000e+00 : f32
    %585 = vector.broadcast %cst_238 : f32 to vector<32x32xf32>
    %586 = arith.addf %585, %584 : vector<32x32xf32>
    %587 = arith.mulf %548, %586 : vector<32x32xf32>
    %588 = vector.broadcast %85 : vector<32x1xf32> to vector<32x32xf32>
    %589 = arith.mulf %587, %588 : vector<32x32xf32>
    %cst_239 = arith.constant 0.000000e+00 : f32
    %590 = vector.broadcast %cst_239 : f32 to vector<4x32xf32>
    %591 = vector.extract_strided_slice %589 {offsets = [0, 0], sizes = [28, 32], strides = [1, 1]} : vector<32x32xf32> to vector<28x32xf32>
    %592 = tpu.concatenate %590, %591 in 0 : vector<4x32xf32>, vector<28x32xf32> -> vector<32x32xf32>
    %c-4_i32 = arith.constant -4 : i32
    %593 = vector.broadcast %c-4_i32 : i32 to vector<32x1xi32>
    %594 = arith.addi %86, %593 : vector<32x1xi32>
    %c0_i32_240 = arith.constant 0 : i32
    %595 = vector.broadcast %c0_i32_240 : i32 to vector<32x1xi32>
    %596 = arith.cmpi sge, %594, %595 : vector<32x1xi32>
    %c-4_i32_241 = arith.constant -4 : i32
    %597 = vector.broadcast %c-4_i32_241 : i32 to vector<32x1xi32>
    %598 = arith.addi %86, %597 : vector<32x1xi32>
    %c16_i32_242 = arith.constant 16 : i32
    %599 = vector.broadcast %c16_i32_242 : i32 to vector<32x1xi32>
    %600 = arith.cmpi slt, %598, %599 : vector<32x1xi32>
    %601 = arith.andi %596, %600 : vector<32x1xi1>
    %cst_243 = arith.constant 0.000000e+00 : f32
    %602 = vector.shape_cast %601 : vector<32x1xi1> to vector<32x1xi1>
    %603 = vector.broadcast %602 : vector<32x1xi1> to vector<32x32xi1>
    %604 = vector.broadcast %cst_243 : f32 to vector<32x32xf32>
    %605 = arith.select %603, %592, %604 : vector<32x32xi1>, vector<32x32xf32>
    %606 = vector.extract_strided_slice %590 {offsets = [0, 0], sizes = [2, 32], strides = [1, 1]} : vector<4x32xf32> to vector<2x32xf32>
    %607 = vector.extract_strided_slice %589 {offsets = [0, 0], sizes = [30, 32], strides = [1, 1]} : vector<32x32xf32> to vector<30x32xf32>
    %608 = tpu.concatenate %606, %607 in 0 : vector<2x32xf32>, vector<30x32xf32> -> vector<32x32xf32>
    %c-2_i32_244 = arith.constant -2 : i32
    %609 = vector.broadcast %c-2_i32_244 : i32 to vector<32x1xi32>
    %610 = arith.addi %86, %609 : vector<32x1xi32>
    %c0_i32_245 = arith.constant 0 : i32
    %611 = vector.broadcast %c0_i32_245 : i32 to vector<32x1xi32>
    %612 = arith.cmpi sge, %610, %611 : vector<32x1xi32>
    %c-2_i32_246 = arith.constant -2 : i32
    %613 = vector.broadcast %c-2_i32_246 : i32 to vector<32x1xi32>
    %614 = arith.addi %86, %613 : vector<32x1xi32>
    %c16_i32_247 = arith.constant 16 : i32
    %615 = vector.broadcast %c16_i32_247 : i32 to vector<32x1xi32>
    %616 = arith.cmpi slt, %614, %615 : vector<32x1xi32>
    %617 = arith.andi %612, %616 : vector<32x1xi1>
    %cst_248 = arith.constant 0.000000e+00 : f32
    %618 = vector.shape_cast %617 : vector<32x1xi1> to vector<32x1xi1>
    %619 = vector.broadcast %618 : vector<32x1xi1> to vector<32x32xi1>
    %620 = vector.broadcast %cst_248 : f32 to vector<32x32xf32>
    %621 = arith.select %619, %608, %620 : vector<32x32xi1>, vector<32x32xf32>
    %c0_i32_249 = arith.constant 0 : i32
    %622 = vector.broadcast %c0_i32_249 : i32 to vector<32x1xi32>
    %623 = arith.addi %86, %622 : vector<32x1xi32>
    %c0_i32_250 = arith.constant 0 : i32
    %624 = vector.broadcast %c0_i32_250 : i32 to vector<32x1xi32>
    %625 = arith.cmpi sge, %623, %624 : vector<32x1xi32>
    %c0_i32_251 = arith.constant 0 : i32
    %626 = vector.broadcast %c0_i32_251 : i32 to vector<32x1xi32>
    %627 = arith.addi %86, %626 : vector<32x1xi32>
    %c16_i32_252 = arith.constant 16 : i32
    %628 = vector.broadcast %c16_i32_252 : i32 to vector<32x1xi32>
    %629 = arith.cmpi slt, %627, %628 : vector<32x1xi32>
    %630 = arith.andi %625, %629 : vector<32x1xi1>
    %cst_253 = arith.constant 0.000000e+00 : f32
    %631 = vector.shape_cast %630 : vector<32x1xi1> to vector<32x1xi1>
    %632 = vector.broadcast %631 : vector<32x1xi1> to vector<32x32xi1>
    %633 = vector.broadcast %cst_253 : f32 to vector<32x32xf32>
    %634 = arith.select %632, %589, %633 : vector<32x32xi1>, vector<32x32xf32>
    %635 = vector.extract_strided_slice %589 {offsets = [2, 0], sizes = [30, 32], strides = [1, 1]} : vector<32x32xf32> to vector<30x32xf32>
    %636 = vector.extract_strided_slice %590 {offsets = [0, 0], sizes = [2, 32], strides = [1, 1]} : vector<4x32xf32> to vector<2x32xf32>
    %637 = tpu.concatenate %635, %636 in 0 : vector<30x32xf32>, vector<2x32xf32> -> vector<32x32xf32>
    %c2_i32_254 = arith.constant 2 : i32
    %638 = vector.broadcast %c2_i32_254 : i32 to vector<32x1xi32>
    %639 = arith.addi %86, %638 : vector<32x1xi32>
    %c0_i32_255 = arith.constant 0 : i32
    %640 = vector.broadcast %c0_i32_255 : i32 to vector<32x1xi32>
    %641 = arith.cmpi sge, %639, %640 : vector<32x1xi32>
    %c2_i32_256 = arith.constant 2 : i32
    %642 = vector.broadcast %c2_i32_256 : i32 to vector<32x1xi32>
    %643 = arith.addi %86, %642 : vector<32x1xi32>
    %c16_i32_257 = arith.constant 16 : i32
    %644 = vector.broadcast %c16_i32_257 : i32 to vector<32x1xi32>
    %645 = arith.cmpi slt, %643, %644 : vector<32x1xi32>
    %646 = arith.andi %641, %645 : vector<32x1xi1>
    %cst_258 = arith.constant 0.000000e+00 : f32
    %647 = vector.shape_cast %646 : vector<32x1xi1> to vector<32x1xi1>
    %648 = vector.broadcast %647 : vector<32x1xi1> to vector<32x32xi1>
    %649 = vector.broadcast %cst_258 : f32 to vector<32x32xf32>
    %650 = arith.select %648, %637, %649 : vector<32x32xi1>, vector<32x32xf32>
    %651 = vector.extract_strided_slice %589 {offsets = [4, 0], sizes = [28, 32], strides = [1, 1]} : vector<32x32xf32> to vector<28x32xf32>
    %652 = tpu.concatenate %651, %590 in 0 : vector<28x32xf32>, vector<4x32xf32> -> vector<32x32xf32>
    %c4_i32 = arith.constant 4 : i32
    %653 = vector.broadcast %c4_i32 : i32 to vector<32x1xi32>
    %654 = arith.addi %86, %653 : vector<32x1xi32>
    %c0_i32_259 = arith.constant 0 : i32
    %655 = vector.broadcast %c0_i32_259 : i32 to vector<32x1xi32>
    %656 = arith.cmpi sge, %654, %655 : vector<32x1xi32>
    %c4_i32_260 = arith.constant 4 : i32
    %657 = vector.broadcast %c4_i32_260 : i32 to vector<32x1xi32>
    %658 = arith.addi %86, %657 : vector<32x1xi32>
    %c16_i32_261 = arith.constant 16 : i32
    %659 = vector.broadcast %c16_i32_261 : i32 to vector<32x1xi32>
    %660 = arith.cmpi slt, %658, %659 : vector<32x1xi32>
    %661 = arith.andi %656, %660 : vector<32x1xi1>
    %cst_262 = arith.constant 0.000000e+00 : f32
    %662 = vector.shape_cast %661 : vector<32x1xi1> to vector<32x1xi1>
    %663 = vector.broadcast %662 : vector<32x1xi1> to vector<32x32xi1>
    %664 = vector.broadcast %cst_262 : f32 to vector<32x32xf32>
    %665 = arith.select %663, %652, %664 : vector<32x32xi1>, vector<32x32xf32>
    %666 = tpu.concatenate %605, %621, %634, %650, %665 in 1 : vector<32x32xf32>, vector<32x32xf32>, vector<32x32xf32>, vector<32x32xf32>, vector<32x32xf32> -> vector<32x160xf32>
    %c0_263 = arith.constant 0 : index
    %c0_264 = arith.constant 0 : index
    %667 = vector.load %arg22[%c0_263, %c0_264] : memref<160x32xf32, #tpu.memory_space<vmem>>, vector<160x32xf32>
    %cst_265 = arith.constant dense<0.000000e+00> : vector<32x32xf32>
    %668 = tpu.matmul %666, %667, %cst_265 {dimension_numbers = #tpu.dot_dimension_numbers<[1], [0], [0], [1], [0, 0, 1, 1], [], []>} : vector<32x160xf32>, vector<160x32xf32>, vector<32x32xf32> -> vector<32x32xf32>
    %c5_266 = arith.constant 5 : index
    %c0_267 = arith.constant 0 : index
    %669 = vector.load %arg25[%c5_266, %c0_267] : memref<12x128xf32, #tpu.memory_space<vmem>>, vector<1x32xf32>
    %670 = vector.broadcast %669 : vector<1x32xf32> to vector<32x32xf32>
    %671 = arith.addf %668, %670 : vector<32x32xf32>
    %c6_268 = arith.constant 6 : index
    %c0_269 = arith.constant 0 : index
    %672 = vector.load %arg25[%c6_268, %c0_269] : memref<12x128xf32, #tpu.memory_space<vmem>>, vector<1x32xf32>
    %c7_270 = arith.constant 7 : index
    %c0_271 = arith.constant 0 : index
    %673 = vector.load %arg25[%c7_270, %c0_271] : memref<12x128xf32, #tpu.memory_space<vmem>>, vector<1x32xf32>
    %cst_272 = arith.constant dense<0.000000e+00> : vector<32xf32>
    %674 = vector.multi_reduction <add>, %671, %cst_272 [1] : vector<32x32xf32> to vector<32xf32>
    %675 = vector.shape_cast %674 : vector<32xf32> to vector<32x1xf32>
    %cst_273 = arith.constant 3.200000e+01 : f32
    %676 = vector.broadcast %cst_273 : f32 to vector<32x1xf32>
    %677 = arith.divf %675, %676 : vector<32x1xf32>
    %678 = vector.broadcast %677 : vector<32x1xf32> to vector<32x32xf32>
    %679 = arith.subf %671, %678 : vector<32x32xf32>
    %680 = arith.mulf %679, %679 : vector<32x32xf32>
    %cst_274 = arith.constant dense<0.000000e+00> : vector<32xf32>
    %681 = vector.multi_reduction <add>, %680, %cst_274 [1] : vector<32x32xf32> to vector<32xf32>
    %682 = vector.shape_cast %681 : vector<32xf32> to vector<32x1xf32>
    %cst_275 = arith.constant 3.200000e+01 : f32
    %683 = vector.broadcast %cst_275 : f32 to vector<32x1xf32>
    %684 = arith.divf %682, %683 : vector<32x1xf32>
    %685 = vector.broadcast %677 : vector<32x1xf32> to vector<32x32xf32>
    %686 = arith.subf %671, %685 : vector<32x32xf32>
    %cst_276 = arith.constant 9.99999974E-6 : f32
    %687 = vector.broadcast %cst_276 : f32 to vector<32x1xf32>
    %688 = arith.addf %684, %687 : vector<32x1xf32>
    %689 = math.rsqrt %688 : vector<32x1xf32>
    %690 = vector.broadcast %689 : vector<32x1xf32> to vector<32x32xf32>
    %691 = arith.mulf %686, %690 : vector<32x32xf32>
    %692 = vector.broadcast %672 : vector<1x32xf32> to vector<32x32xf32>
    %693 = arith.mulf %691, %692 : vector<32x32xf32>
    %694 = vector.broadcast %673 : vector<1x32xf32> to vector<32x32xf32>
    %695 = arith.addf %693, %694 : vector<32x32xf32>
    %cst_277 = arith.constant 5.000000e-01 : f32
    %696 = vector.broadcast %cst_277 : f32 to vector<32x32xf32>
    %697 = arith.mulf %696, %695 : vector<32x32xf32>
    %cst_278 = arith.constant 0.707106769 : f32
    %698 = vector.broadcast %cst_278 : f32 to vector<32x32xf32>
    %699 = arith.mulf %695, %698 : vector<32x32xf32>
    %cst_279 = arith.constant 0.000000e+00 : f32
    %700 = vector.broadcast %cst_279 : f32 to vector<32x32xf32>
    %701 = arith.cmpf oge, %699, %700 : vector<32x32xf32>
    %cst_280 = arith.constant 1.000000e+00 : f32
    %cst_281 = arith.constant -1.000000e+00 : f32
    %702 = vector.broadcast %cst_280 : f32 to vector<32x32xf32>
    %703 = vector.broadcast %cst_281 : f32 to vector<32x32xf32>
    %704 = arith.select %701, %702, %703 : vector<32x32xi1>, vector<32x32xf32>
    %705 = math.absf %699 : vector<32x32xf32>
    %cst_282 = arith.constant 0.327591091 : f32
    %706 = vector.broadcast %cst_282 : f32 to vector<32x32xf32>
    %707 = arith.mulf %706, %705 : vector<32x32xf32>
    %cst_283 = arith.constant 1.000000e+00 : f32
    %708 = vector.broadcast %cst_283 : f32 to vector<32x32xf32>
    %709 = arith.addf %708, %707 : vector<32x32xf32>
    %cst_284 = arith.constant 1.000000e+00 : f32
    %710 = vector.broadcast %cst_284 : f32 to vector<32x32xf32>
    %711 = arith.divf %710, %709 : vector<32x32xf32>
    %cst_285 = arith.constant 1.06140542 : f32
    %712 = vector.broadcast %cst_285 : f32 to vector<32x32xf32>
    %713 = arith.mulf %712, %711 : vector<32x32xf32>
    %cst_286 = arith.constant -1.45315206 : f32
    %714 = vector.broadcast %cst_286 : f32 to vector<32x32xf32>
    %715 = arith.addf %713, %714 : vector<32x32xf32>
    %716 = arith.mulf %715, %711 : vector<32x32xf32>
    %cst_287 = arith.constant 1.42141378 : f32
    %717 = vector.broadcast %cst_287 : f32 to vector<32x32xf32>
    %718 = arith.addf %716, %717 : vector<32x32xf32>
    %719 = arith.mulf %718, %711 : vector<32x32xf32>
    %cst_288 = arith.constant -0.284496725 : f32
    %720 = vector.broadcast %cst_288 : f32 to vector<32x32xf32>
    %721 = arith.addf %719, %720 : vector<32x32xf32>
    %722 = arith.mulf %721, %711 : vector<32x32xf32>
    %cst_289 = arith.constant 0.254829586 : f32
    %723 = vector.broadcast %cst_289 : f32 to vector<32x32xf32>
    %724 = arith.addf %722, %723 : vector<32x32xf32>
    %725 = arith.mulf %724, %711 : vector<32x32xf32>
    %cst_290 = arith.constant 0.000000e+00 : f32
    %726 = vector.broadcast %cst_290 : f32 to vector<32x32xf32>
    %727 = arith.subf %726, %705 : vector<32x32xf32>
    %728 = arith.mulf %727, %705 : vector<32x32xf32>
    %729 = math.exp %728 : vector<32x32xf32>
    %730 = arith.mulf %725, %729 : vector<32x32xf32>
    %cst_291 = arith.constant 1.000000e+00 : f32
    %731 = vector.broadcast %cst_291 : f32 to vector<32x32xf32>
    %732 = arith.subf %731, %730 : vector<32x32xf32>
    %733 = arith.mulf %704, %732 : vector<32x32xf32>
    %cst_292 = arith.constant 1.000000e+00 : f32
    %734 = vector.broadcast %cst_292 : f32 to vector<32x32xf32>
    %735 = arith.addf %734, %733 : vector<32x32xf32>
    %736 = arith.mulf %697, %735 : vector<32x32xf32>
    %c0_293 = arith.constant 0 : index
    %c0_294 = arith.constant 0 : index
    %737 = vector.load %arg23[%c0_293, %c0_294] : memref<32x64xf32, #tpu.memory_space<vmem>>, vector<32x64xf32>
    %cst_295 = arith.constant dense<0.000000e+00> : vector<32x64xf32>
    %738 = tpu.matmul %736, %737, %cst_295 {dimension_numbers = #tpu.dot_dimension_numbers<[1], [0], [0], [1], [0, 0, 1, 1], [], []>} : vector<32x32xf32>, vector<32x64xf32>, vector<32x64xf32> -> vector<32x64xf32>
    %c8_296 = arith.constant 8 : index
    %c0_297 = arith.constant 0 : index
    %739 = vector.load %arg25[%c8_296, %c0_297] : memref<12x128xf32, #tpu.memory_space<vmem>>, vector<1x64xf32>
    %740 = vector.broadcast %739 : vector<1x64xf32> to vector<32x64xf32>
    %741 = arith.addf %738, %740 : vector<32x64xf32>
    %c9_298 = arith.constant 9 : index
    %c0_299 = arith.constant 0 : index
    %742 = vector.load %arg25[%c9_298, %c0_299] : memref<12x128xf32, #tpu.memory_space<vmem>>, vector<1x64xf32>
    %c10_300 = arith.constant 10 : index
    %c0_301 = arith.constant 0 : index
    %743 = vector.load %arg25[%c10_300, %c0_301] : memref<12x128xf32, #tpu.memory_space<vmem>>, vector<1x64xf32>
    %cst_302 = arith.constant dense<0.000000e+00> : vector<32xf32>
    %744 = vector.multi_reduction <add>, %741, %cst_302 [1] : vector<32x64xf32> to vector<32xf32>
    %745 = vector.shape_cast %744 : vector<32xf32> to vector<32x1xf32>
    %cst_303 = arith.constant 6.400000e+01 : f32
    %746 = vector.broadcast %cst_303 : f32 to vector<32x1xf32>
    %747 = arith.divf %745, %746 : vector<32x1xf32>
    %748 = vector.broadcast %747 : vector<32x1xf32> to vector<32x64xf32>
    %749 = arith.subf %741, %748 : vector<32x64xf32>
    %750 = arith.mulf %749, %749 : vector<32x64xf32>
    %cst_304 = arith.constant dense<0.000000e+00> : vector<32xf32>
    %751 = vector.multi_reduction <add>, %750, %cst_304 [1] : vector<32x64xf32> to vector<32xf32>
    %752 = vector.shape_cast %751 : vector<32xf32> to vector<32x1xf32>
    %cst_305 = arith.constant 6.400000e+01 : f32
    %753 = vector.broadcast %cst_305 : f32 to vector<32x1xf32>
    %754 = arith.divf %752, %753 : vector<32x1xf32>
    %755 = vector.broadcast %747 : vector<32x1xf32> to vector<32x64xf32>
    %756 = arith.subf %741, %755 : vector<32x64xf32>
    %cst_306 = arith.constant 9.99999974E-6 : f32
    %757 = vector.broadcast %cst_306 : f32 to vector<32x1xf32>
    %758 = arith.addf %754, %757 : vector<32x1xf32>
    %759 = math.rsqrt %758 : vector<32x1xf32>
    %760 = vector.broadcast %759 : vector<32x1xf32> to vector<32x64xf32>
    %761 = arith.mulf %756, %760 : vector<32x64xf32>
    %762 = vector.broadcast %742 : vector<1x64xf32> to vector<32x64xf32>
    %763 = arith.mulf %761, %762 : vector<32x64xf32>
    %764 = vector.broadcast %743 : vector<1x64xf32> to vector<32x64xf32>
    %765 = arith.addf %763, %764 : vector<32x64xf32>
    %cst_307 = arith.constant 5.000000e-01 : f32
    %766 = vector.broadcast %cst_307 : f32 to vector<32x64xf32>
    %767 = arith.mulf %766, %765 : vector<32x64xf32>
    %cst_308 = arith.constant 0.707106769 : f32
    %768 = vector.broadcast %cst_308 : f32 to vector<32x64xf32>
    %769 = arith.mulf %765, %768 : vector<32x64xf32>
    %cst_309 = arith.constant 0.000000e+00 : f32
    %770 = vector.broadcast %cst_309 : f32 to vector<32x64xf32>
    %771 = arith.cmpf oge, %769, %770 : vector<32x64xf32>
    %cst_310 = arith.constant 1.000000e+00 : f32
    %cst_311 = arith.constant -1.000000e+00 : f32
    %772 = vector.broadcast %cst_310 : f32 to vector<32x64xf32>
    %773 = vector.broadcast %cst_311 : f32 to vector<32x64xf32>
    %774 = arith.select %771, %772, %773 : vector<32x64xi1>, vector<32x64xf32>
    %775 = math.absf %769 : vector<32x64xf32>
    %cst_312 = arith.constant 0.327591091 : f32
    %776 = vector.broadcast %cst_312 : f32 to vector<32x64xf32>
    %777 = arith.mulf %776, %775 : vector<32x64xf32>
    %cst_313 = arith.constant 1.000000e+00 : f32
    %778 = vector.broadcast %cst_313 : f32 to vector<32x64xf32>
    %779 = arith.addf %778, %777 : vector<32x64xf32>
    %cst_314 = arith.constant 1.000000e+00 : f32
    %780 = vector.broadcast %cst_314 : f32 to vector<32x64xf32>
    %781 = arith.divf %780, %779 : vector<32x64xf32>
    %cst_315 = arith.constant 1.06140542 : f32
    %782 = vector.broadcast %cst_315 : f32 to vector<32x64xf32>
    %783 = arith.mulf %782, %781 : vector<32x64xf32>
    %cst_316 = arith.constant -1.45315206 : f32
    %784 = vector.broadcast %cst_316 : f32 to vector<32x64xf32>
    %785 = arith.addf %783, %784 : vector<32x64xf32>
    %786 = arith.mulf %785, %781 : vector<32x64xf32>
    %cst_317 = arith.constant 1.42141378 : f32
    %787 = vector.broadcast %cst_317 : f32 to vector<32x64xf32>
    %788 = arith.addf %786, %787 : vector<32x64xf32>
    %789 = arith.mulf %788, %781 : vector<32x64xf32>
    %cst_318 = arith.constant -0.284496725 : f32
    %790 = vector.broadcast %cst_318 : f32 to vector<32x64xf32>
    %791 = arith.addf %789, %790 : vector<32x64xf32>
    %792 = arith.mulf %791, %781 : vector<32x64xf32>
    %cst_319 = arith.constant 0.254829586 : f32
    %793 = vector.broadcast %cst_319 : f32 to vector<32x64xf32>
    %794 = arith.addf %792, %793 : vector<32x64xf32>
    %795 = arith.mulf %794, %781 : vector<32x64xf32>
    %cst_320 = arith.constant 0.000000e+00 : f32
    %796 = vector.broadcast %cst_320 : f32 to vector<32x64xf32>
    %797 = arith.subf %796, %775 : vector<32x64xf32>
    %798 = arith.mulf %797, %775 : vector<32x64xf32>
    %799 = math.exp %798 : vector<32x64xf32>
    %800 = arith.mulf %795, %799 : vector<32x64xf32>
    %cst_321 = arith.constant 1.000000e+00 : f32
    %801 = vector.broadcast %cst_321 : f32 to vector<32x64xf32>
    %802 = arith.subf %801, %800 : vector<32x64xf32>
    %803 = arith.mulf %774, %802 : vector<32x64xf32>
    %cst_322 = arith.constant 1.000000e+00 : f32
    %804 = vector.broadcast %cst_322 : f32 to vector<32x64xf32>
    %805 = arith.addf %804, %803 : vector<32x64xf32>
    %806 = arith.mulf %767, %805 : vector<32x64xf32>
    %807 = arith.addf %452, %806 : vector<32x64xf32>
    %c0_323 = arith.constant 0 : index
    %c0_324 = arith.constant 0 : index
    %808 = vector.load %arg24[%c0_323, %c0_324] : memref<32x128xf32, #tpu.memory_space<vmem>>, vector<32x128xf32>
    %cst_325 = arith.constant dense<0.000000e+00> : vector<32x128xf32>
    %809 = tpu.matmul %84, %808, %cst_325 {dimension_numbers = #tpu.dot_dimension_numbers<[1], [0], [0], [1], [0, 0, 1, 1], [], []>} : vector<32x32xf32>, vector<32x128xf32>, vector<32x128xf32> -> vector<32x128xf32>
    %c11_326 = arith.constant 11 : index
    %c0_327 = arith.constant 0 : index
    %810 = vector.load %arg25[%c11_326, %c0_327] : memref<12x128xf32, #tpu.memory_space<vmem>>, vector<1x128xf32>
    %811 = vector.broadcast %810 : vector<1x128xf32> to vector<32x128xf32>
    %812 = arith.addf %809, %811 : vector<32x128xf32>
    %813 = vector.extract_strided_slice %812 {offsets = [0, 64], sizes = [32, 64], strides = [1, 1]} : vector<32x128xf32> to vector<32x64xf32>
    %cst_328 = arith.constant 1.000000e+00 : f32
    %814 = vector.broadcast %cst_328 : f32 to vector<32x64xf32>
    %815 = arith.addf %814, %813 : vector<32x64xf32>
    %816 = arith.mulf %807, %815 : vector<32x64xf32>
    %817 = vector.extract_strided_slice %812 {offsets = [0, 0], sizes = [32, 64], strides = [1, 1]} : vector<32x128xf32> to vector<32x64xf32>
    %818 = arith.addf %816, %817 : vector<32x64xf32>
    %c1_329 = arith.constant 1 : index
    %c0_330 = arith.constant 0 : index
    %819 = vector.load %arg14[%c1_329, %c0_330] : memref<4x128xf32, #tpu.memory_space<vmem>>, vector<1x64xf32>
    %c2_331 = arith.constant 2 : index
    %c0_332 = arith.constant 0 : index
    %820 = vector.load %arg14[%c2_331, %c0_332] : memref<4x128xf32, #tpu.memory_space<vmem>>, vector<1x64xf32>
    %cst_333 = arith.constant dense<0.000000e+00> : vector<32xf32>
    %821 = vector.multi_reduction <add>, %818, %cst_333 [1] : vector<32x64xf32> to vector<32xf32>
    %822 = vector.shape_cast %821 : vector<32xf32> to vector<32x1xf32>
    %cst_334 = arith.constant 6.400000e+01 : f32
    %823 = vector.broadcast %cst_334 : f32 to vector<32x1xf32>
    %824 = arith.divf %822, %823 : vector<32x1xf32>
    %825 = vector.broadcast %824 : vector<32x1xf32> to vector<32x64xf32>
    %826 = arith.subf %818, %825 : vector<32x64xf32>
    %827 = arith.mulf %826, %826 : vector<32x64xf32>
    %cst_335 = arith.constant dense<0.000000e+00> : vector<32xf32>
    %828 = vector.multi_reduction <add>, %827, %cst_335 [1] : vector<32x64xf32> to vector<32xf32>
    %829 = vector.shape_cast %828 : vector<32xf32> to vector<32x1xf32>
    %cst_336 = arith.constant 6.400000e+01 : f32
    %830 = vector.broadcast %cst_336 : f32 to vector<32x1xf32>
    %831 = arith.divf %829, %830 : vector<32x1xf32>
    %832 = vector.broadcast %824 : vector<32x1xf32> to vector<32x64xf32>
    %833 = arith.subf %818, %832 : vector<32x64xf32>
    %cst_337 = arith.constant 9.99999974E-6 : f32
    %834 = vector.broadcast %cst_337 : f32 to vector<32x1xf32>
    %835 = arith.addf %831, %834 : vector<32x1xf32>
    %836 = math.rsqrt %835 : vector<32x1xf32>
    %837 = vector.broadcast %836 : vector<32x1xf32> to vector<32x64xf32>
    %838 = arith.mulf %833, %837 : vector<32x64xf32>
    %839 = vector.broadcast %819 : vector<1x64xf32> to vector<32x64xf32>
    %840 = arith.mulf %838, %839 : vector<32x64xf32>
    %841 = vector.broadcast %820 : vector<1x64xf32> to vector<32x64xf32>
    %842 = arith.addf %840, %841 : vector<32x64xf32>
    %c0_338 = arith.constant 0 : index
    %c0_339 = arith.constant 0 : index
    %843 = vector.load %arg15[%c0_338, %c0_339] : memref<64x128xf32, #tpu.memory_space<vmem>>, vector<64x128xf32>
    %cst_340 = arith.constant dense<0.000000e+00> : vector<32x128xf32>
    %844 = tpu.matmul %842, %843, %cst_340 {dimension_numbers = #tpu.dot_dimension_numbers<[1], [0], [0], [1], [0, 0, 1, 1], [], []>} : vector<32x64xf32>, vector<64x128xf32>, vector<32x128xf32> -> vector<32x128xf32>
    %c3_341 = arith.constant 3 : index
    %c0_342 = arith.constant 0 : index
    %845 = vector.load %arg14[%c3_341, %c0_342] : memref<4x128xf32, #tpu.memory_space<vmem>>, vector<1x128xf32>
    %846 = vector.broadcast %845 : vector<1x128xf32> to vector<32x128xf32>
    %847 = arith.addf %844, %846 : vector<32x128xf32>
    %c0_343 = arith.constant 0 : index
    %c0_344 = arith.constant 0 : index
    %848 = vector.load %arg26[%c0_343, %c0_344] : memref<32x128xf32, #tpu.memory_space<vmem>>, vector<32x128xf32>
    tpu.vector_store %arg26[%c0_343, %c0_344], %847 {strides = array<i32>} : memref<32x128xf32, #tpu.memory_space<vmem>>, vector<32x128xf32>,
    return
  }
}

</mosaic_0001>

<bundles_post_ra>
// kernel: mul.18
= control target key start
LH: loop header
LB: loop body
LE: loop exit
PB: predicated region body
PF: predicated region fallthrough
CT: control target
= control target key end

     0   :  { %vm7_vm0 = vcmask 130048   ;;  %vm13_vm1 = vcmask 261248   ;;  %s39_s0 = inlined_call_operand.vmem [shape: f32[2,16], index: 0, kind: input, shape index: {}]   ;;  %s40_s1 = inlined_call_operand.vmem [shape: f32[32], index: 1, kind: output, shape index: {}]  }
   0x1   :  { %v4_v0 = vld [vmem:[%s39_s0] sm:$0x3]  ;;  %s22_s0 = smov 16  }
   0x2   :  { %5 = vst [vmem:[#allocation1] sm:$0x3] %v4_v0 }
   0x9   :  { %v10_v1 = vld [vmem:[#allocation1 + $0x1] sm:$0x1]   ;;  %v6_v2 = vld [vmem:[#allocation1] sm:$0x1]  }
   0xa   :  { %11 = vrot.lane.b32.xlu0 %v10_v1, %s22_s0  ;;  %8 = vst.msk [vmem:[#allocation0] sm:$0x1] %vm7_vm0, %v6_v2  }
  0x7c   :  { %v12_v3 = vpop.permute.xlu0 %11  }
  0x7d   :  { %14 = vst.msk [vmem:[#allocation0] sm:$0x1] %vm13_vm1, %v12_v3  }
  0x84   :  { %v17_v4 = vld [vmem:[#allocation0] sm:$0x1] }
  0x85   :  { %20 = vst [vmem:[%s40_s1] sm:$0x1] %v17_v4 }

// kernel: tile.0
= control target key start
LH: loop header
LB: loop body
LE: loop exit
PB: predicated region body
PF: predicated region fallthrough
CT: control target
= control target key end

     0   :  { %s130_s8 = smov 127   ;;  %s131_s9 = smov 123   ;;  %vm7_vm0 = vcmask 7168   ;;  %s221_s0 = inlined_call_operand.vmem [shape: s32[2,16], index: 0, kind: input, shape index: {}]   ;;  %s222_s1 = inlined_call_operand.vmem [shape: s32[32,1], index: 1, kind: output, shape index: {}]  }
   0x1   :  { %v4_v0 = vld [vmem:[%s221_s0] sm:$0x3]  ;;  %s129_s0 = smov 125   ;;  %s132_s10 = smov 124  }
   0x2   :  { %5 = vst [vmem:[#allocation0] sm:$0x3] %v4_v0  ;;  %s133_s11 = smov 126   ;;  %s134_s12 = smov 122  }
   0x3   :  { %s135_s13 = smov 120   ;;  %s136_s14 = smov 121  }
   0x4   :  { %s137_s15 = smov 119   ;;  %s138_s16 = smov 117  }
   0x5   :  { %s139_s17 = smov 118   ;;  %s140_s18 = smov 116  }
   0x6   :  { %s141_s19 = smov 114   ;;  %s142_s20 = smov 115  }
   0x7   :  { %s143_s21 = smov 113  }
   0x9   :  { %v21_v1 = vld [vmem:[#allocation0] sm:$0x3]  }
   0xa   :  { %v9_v2 = vld [vmem:[#allocation0] sm:$0x3]   ;;  %22 = vrot.lane.b32.xlu1 %v21_v1, %s129_s0 }
   0xb   :  { %10 = vrot.lane.b32.xlu0 %v9_v2, %s130_s8  ;;  %v33_v3 = vld [vmem:[#allocation0] sm:$0x3]  }
   0xc   :  { %34 = vrot.lane.b32.xlu2 %v33_v3, %s131_s9  ;;  %v27_v4 = vld [vmem:[#allocation0] sm:$0x3]  }
   0xd   :  { %v15_v5 = vld [vmem:[#allocation0] sm:$0x3]  }
   0xe   :  { %v39_v6 = vld [vmem:[#allocation0] sm:$0x3]  }
   0xf   :  { %v51_v7 = vld [vmem:[#allocation0] sm:$0x3]  }
  0x10   :  { %v45_v8 = vld [vmem:[#allocation0] sm:$0x3]  }
  0x11   :  { %v57_v9 = vld [vmem:[#allocation0] sm:$0x3]  }
  0x12   :  { %28 = vrot.lane.b32.xlu1 %v27_v4, %s132_s10  ;;  %v69_v10 = vld [vmem:[#allocation0] sm:$0x3]  }
  0x13   :  { %16 = vrot.lane.b32.xlu0 %v15_v5, %s133_s11  ;;  %v63_v11 = vld [vmem:[#allocation0] sm:$0x3]  }
  0x14   :  { %40 = vrot.lane.b32.xlu2 %v39_v6, %s134_s12  ;;  %v75_v12 = vld [vmem:[#allocation0] sm:$0x3]  }
  0x15   :  { %v87_v13 = vld [vmem:[#allocation0] sm:$0x3]  }
  0x16   :  { %v81_v14 = vld [vmem:[#allocation0] sm:$0x3]  }
  0x17   :  { %v93_v15 = vld [vmem:[#allocation0] sm:$0x3]  }
  0x18   :  { %v6_v21 = vld [vmem:[#allocation0] sm:$0x3]  }
  0x19   :  { %8 = vst.msk [vmem:[%s222_s1] ss:$16 sm:$0x3] %vm7_vm0, %v6_v21  }
  0x1a   :  { %52 = vrot.lane.b32.xlu1 %v51_v7, %s135_s13 }
  0x1b   :  { %46 = vrot.lane.b32.xlu0 %v45_v8, %s136_s14 }
  0x1c   :  { %58 = vrot.lane.b32.xlu2 %v57_v9, %s137_s15 }
  0x22   :  { %70 = vrot.lane.b32.xlu1 %v69_v10, %s138_s16 }
  0x23   :  { %64 = vrot.lane.b32.xlu0 %v63_v11, %s139_s17 }
  0x24   :  { %76 = vrot.lane.b32.xlu2 %v75_v12, %s140_s18 }
  0x2a   :  { %88 = vrot.lane.b32.xlu1 %v87_v13, %s141_s19 }
  0x2b   :  { %82 = vrot.lane.b32.xlu0 %v81_v14, %s142_s20 }
  0x2c   :  { %94 = vrot.lane.b32.xlu2 %v93_v15, %s143_s21 }
  0x66   :  { %v35_v16 = vpop.permute.xlu2 %34  }
  0x67   :  { %103 = vst.msk [vmem:[%s222_s1 + $0x5] ss:$16 sm:$0x3] %vm7_vm0, %v35_v16  }
  0x6e   :  { %v41_v17 = vpop.permute.xlu2 %40  }
  0x6f   :  { %104 = vst.msk [vmem:[%s222_s1 + $0x6] ss:$16 sm:$0x3] %vm7_vm0, %v41_v17  }
  0x76   :  { %v59_v18 = vpop.permute.xlu2 %58  }
  0x77   :  { %107 = vst.msk [vmem:[%s222_s1 + $0x9] ss:$16 sm:$0x3] %vm7_vm0, %v59_v18  }
  0x7c   :  { %v23_v19 = vpop.permute.xlu1 %22  }
  0x7d   :  { %v11_v20 = vpop.permute.xlu0 %10   ;;  %101 = vst.msk [vmem:[%s222_s1 + $0x3] ss:$16 sm:$0x3] %vm7_vm0, %v23_v19  }
  0x7e   :  { %99 = vst.msk [vmem:[%s222_s1 + $0x1] ss:$16 sm:$0x3] %vm7_vm0, %v11_v20   ;;  %v77_v22 = vpop.permute.xlu2 %76  }
  0x7f   :  { %110 = vst.msk [vmem:[%s222_s1 + $0xc] ss:$16 sm:$0x3] %vm7_vm0, %v77_v22  }
  0x84   :  { %v29_v23 = vpop.permute.xlu1 %28  }
  0x85   :  { %v17_v24 = vpop.permute.xlu0 %16   ;;  %102 = vst.msk [vmem:[%s222_s1 + $0x4] ss:$16 sm:$0x3] %vm7_vm0, %v29_v23  }
  0x86   :  { %100 = vst.msk [vmem:[%s222_s1 + $0x2] ss:$16 sm:$0x3] %vm7_vm0, %v17_v24   ;;  %v95_v25 = vpop.permute.xlu2 %94  }
  0x87   :  { %113 = vst.msk [vmem:[%s222_s1 + $0xf] ss:$16 sm:$0x3] %vm7_vm0, %v95_v25  }
  0x8c   :  { %v53_v26 = vpop.permute.xlu1 %52  }
  0x8d   :  { %v47_v27 = vpop.permute.xlu0 %46   ;;  %106 = vst.msk [vmem:[%s222_s1 + $0x8] ss:$16 sm:$0x3] %vm7_vm0, %v53_v26  }
  0x8e   :  { %105 = vst.msk [vmem:[%s222_s1 + $0x7] ss:$16 sm:$0x3] %vm7_vm0, %v47_v27  }
  0x94   :  { %v71_v28 = vpop.permute.xlu1 %70  }
  0x95   :  { %v65_v29 = vpop.permute.xlu0 %64   ;;  %109 = vst.msk [vmem:[%s222_s1 + $0xb] ss:$16 sm:$0x3] %vm7_vm0, %v71_v28  }
  0x96   :  { %108 = vst.msk [vmem:[%s222_s1 + $0xa] ss:$16 sm:$0x3] %vm7_vm0, %v65_v29  }
  0x9c   :  { %v89_v30 = vpop.permute.xlu1 %88  }
  0x9d   :  { %v83_v31 = vpop.permute.xlu0 %82   ;;  %112 = vst.msk [vmem:[%s222_s1 + $0xe] ss:$16 sm:$0x3] %vm7_vm0, %v89_v30  }
  0x9e   :  { %111 = vst.msk [vmem:[%s222_s1 + $0xd] ss:$16 sm:$0x3] %vm7_vm0, %v83_v31  }

// kernel: bytenet_lm_time_forward.1
= control target key start
LH: loop header
LB: loop body
LE: loop exit
PB: predicated region body
PF: predicated region fallthrough
CT: control target
= control target key end

     0   :  { %s7579_s0 = inlined_call_operand.vmem [shape: f32[32,256], index: 0, kind: input, shape index: {}]   ;;  %s7580_s1 = inlined_call_operand.vmem [shape: f32[32,256], index: 1, kind: input, shape index: {}]   ;;  %s7581_s2 = inlined_call_operand.vmem [shape: s32[32,1], index: 2, kind: input, shape index: {}]   ;;  %s7582_s3 = inlined_call_operand.vmem [shape: f32[32,1], index: 3, kind: input, shape index: {}]   ;;  %s7583_s4 = inlined_call_operand.vmem [shape: s32[32,1], index: 4, kind: input, shape index: {}]   ;;  %s7584_s5 = inlined_call_operand.vmem [shape: f32[256,32], index: 5, kind: input, shape index: {}]   ;;  %s7585_s6 = inlined_call_operand.vmem [shape: f32[32,32], index: 6, kind: input, shape index: {}]   ;;  %s7586_s7 = inlined_call_operand.vmem [shape: f32[256,64], index: 7, kind: input, shape index: {}]   ;;  %s7587_s8 = inlined_call_operand.vmem [shape: f32[64,64], index: 8, kind: input, shape index: {}]   ;;  %s7588_s9 = inlined_call_operand.vmem [shape: f32[256,32], index: 9, kind: input, shape index: {}]   ;;  %s7589_s10 = inlined_call_operand.vmem [shape: f32[32,32], index: 10, kind: input, shape index: {}]   ;;  %s7590_s11 = inlined_call_operand.vmem [shape: f32[6,128], index: 11, kind: input, shape index: {}]   ;;  %s7591_s12 = inlined_call_operand.vmem [shape: f32[32,64], index: 12, kind: input, shape index: {}]   ;;  %s7592_s13 = inlined_call_operand.vmem [shape: f32[32,64], index: 13, kind: input, shape index: {}]   ;;  %s7593_s14 = inlined_call_operand.vmem [shape: f32[4,128], index: 14, kind: input, shape index: {}]   ;;  %s7594_s15 = inlined_call_operand.vmem [shape: f32[64,128], index: 15, kind: input, shape index: {}]   ;;  %s7595_s16 = inlined_call_operand.vmem [shape: f32[64,32], index: 16, kind: input, shape index: {}]   ;;  %s7596_s17 = inlined_call_operand.vmem [shape: f32[160,32], index: 17, kind: input, shape index: {}]   ;;  %s7597_s18 = inlined_call_operand.vmem [shape: f32[32,64], index: 18, kind: input, shape index: {}]   ;;  %s7598_s19 = inlined_call_operand.vmem [shape: f32[32,128], index: 19, kind: input, shape index: {}]   ;;  %s7599_s20 = inlined_call_operand.vmem [shape: f32[12,128], index: 20, kind: input, shape index: {}]   ;;  %s7600_s21 = inlined_call_operand.vmem [shape: f32[64,32], index: 21, kind: input, shape index: {}]   ;;  %s7601_s22 = inlined_call_operand.vmem [shape: f32[160,32], index: 22, kind: input, shape index: {}]   ;;  %s7602_s23 = inlined_call_operand.vmem [shape: f32[32,64], index: 23, kind: input, shape index: {}]   ;;  %s7603_s24 = inlined_call_operand.vmem [shape: f32[32,128], index: 24, kind: input, shape index: {}]   ;;  %s7604_s25 = inlined_call_operand.vmem [shape: f32[12,128], index: 25, kind: input, shape index: {}]   ;;  %s7605_s26 = inlined_call_operand.hbm [shape: f32[32,128], index: 26, kind: output, shape index: {}]  }
   0x1   :  { %7631 = sst [smem:[#allocation7_spill]] %s7579_s0 }
   0x2   :  { %7632 = sst [smem:[#allocation8_spill]] %s7580_s1 }
   0x3   :  { %7633 = sst [smem:[#allocation9_spill]] %s7581_s2 }
   0x4   :  { %7634 = sst [smem:[#allocation10_spill]] %s7582_s3 }
   0x5   :  { %7635 = sst [smem:[#allocation11_spill]] %s7583_s4 }
   0x6   :  { %7636 = sst [smem:[#allocation12_spill]] %s7584_s5 }
   0x7   :  { %7637 = sst [smem:[#allocation13_spill]] %s7585_s6 }
   0x8   :  { %7638 = sst [smem:[#allocation14_spill]] %s7586_s7 }
   0x9   :  { %7639 = sst [smem:[#allocation15_spill]] %s7587_s8 }
   0xa   :  { %7640 = sst [smem:[#allocation16_spill]] %s7588_s9 }
   0xb   :  { %7641 = sst [smem:[#allocation17_spill]] %s7589_s10 }
   0xc   :  { %s7642_s7 = sld [smem:[#allocation12_spill]] }
   0xd   :  { %s7643_s6 = sld [smem:[#allocation14_spill]] }
   0xe   :  { %s7644_s2 = sld [smem:[#allocation7_spill]] }
   0xf   :  { %s7645_s8 = sld [smem:[#allocation16_spill]] }
  0x10   :  { %s7646_s1 = sld [smem:[#allocation8_spill]] }
  0x12   :  { %v107_v0 = vld [vmem:[%s7642_s7 + $0x78] sm:$0xff]  ;;  %v106_v1 = vld [vmem:[%s7642_s7 + $0x70] sm:$0xff]  ;;  %v105_v4 = vld [vmem:[%s7642_s7 + $0x68] sm:$0xff] }
  0x13   :  { %v123_v2 = vld [vmem:[%s7642_s7 + $0xf8] sm:$0xff]  ;;  %131 = vmatpush.msra.mxu0 %v107_v0  ;;  %v122_v3 = vld [vmem:[%s7642_s7 + $0xf0] sm:$0xff]  ;;  %v121_v5 = vld [vmem:[%s7642_s7 + $0xe8] sm:$0xff] }
  0x14   :  { %160 = vmatpush.msra.mxu1 %v123_v2  ;;  %v104_v6 = vld [vmem:[%s7642_s7 + $0x60] sm:$0xff]  ;;  %v103_v8 = vld [vmem:[%s7642_s7 + $0x58] sm:$0xff]  ;;  %v102_v10 = vld [vmem:[%s7642_s7 + $0x50] sm:$0xff] }
  0x15   :  { %132 = vmatpush.msra.mxu0 %v106_v1  ;;  %v120_v7 = vld [vmem:[%s7642_s7 + $0xe0] sm:$0xff]  ;;  %v119_v9 = vld [vmem:[%s7642_s7 + $0xd8] sm:$0xff]  ;;  %v118_v11 = vld [vmem:[%s7642_s7 + $0xd0] sm:$0xff] }
  0x16   :  { %161 = vmatpush.msra.mxu1 %v122_v3  ;;  %v415_v12 = vld [vmem:[%s7643_s6 + $0x78] sm:$0xff]  ;;  %v101_v13 = vld [vmem:[%s7642_s7 + $0x48] sm:$0xff]  ;;  %v414_v15 = vld [vmem:[%s7643_s6 + $0x70] sm:$0xff] }
  0x17   :  { %133 = vmatpush.msra.mxu0 %v105_v4  ;;  %v117_v14 = vld [vmem:[%s7642_s7 + $0xc8] sm:$0xff]  ;;  %443 = vmatpush.msra.mxu3 %v415_v12  ;;  %v100_v17 = vld [vmem:[%s7642_s7 + $0x40] sm:$0xff]  ;;  %v99_v20 = vld [vmem:[%s7642_s7 + $0x38] sm:$0xff] }
  0x18   :  { %162 = vmatpush.msra.mxu1 %v121_v5  ;;  %v413_v16 = vld [vmem:[%s7643_s6 + $0x68] sm:$0xff]  ;;  %v116_v18 = vld [vmem:[%s7642_s7 + $0xc0] sm:$0xff]  ;;  %v115_v21 = vld [vmem:[%s7642_s7 + $0xb8] sm:$0xff] }
  0x19   :  { %134 = vmatpush.msra.mxu0 %v104_v6  ;;  %444 = vmatpush.msra.mxu3 %v414_v15  ;;  %v412_v19 = vld [vmem:[%s7643_s6 + $0x60] sm:$0xff]  ;;  %v411_v22 = vld [vmem:[%s7643_s6 + $0x58] sm:$0xff]  ;;  %v98_v23 = vld [vmem:[%s7642_s7 + $0x30] sm:$0xff] }
  0x1a   :  { %163 = vmatpush.msra.mxu1 %v120_v7  ;;  %v97_v24 = vld [vmem:[%s7642_s7 + $0x28] sm:$0xff]  ;;  %v114_v25 = vld [vmem:[%s7642_s7 + $0xb0] sm:$0xff]  ;;  %v96_v29 = vld [vmem:[%s7642_s7 + $0x20] sm:$0xff] }
  0x1b   :  { %135 = vmatpush.msra.mxu0 %v103_v8  ;;  %445 = vmatpush.msra.mxu3 %v413_v16  ;;  %v113_v26 = vld [vmem:[%s7642_s7 + $0xa8] sm:$0xff]  ;;  %v410_v27 = vld [vmem:[%s7643_s6 + $0x50] sm:$0xff]  ;;  %v112_v30 = vld [vmem:[%s7642_s7 + $0xa0] sm:$0xff] }
  0x1c   :  { %164 = vmatpush.msra.mxu1 %v119_v9  ;;  %v409_v28 = vld [vmem:[%s7643_s6 + $0x48] sm:$0xff]  ;;  %v408_v31 = vld [vmem:[%s7643_s6 + $0x40] sm:$0xff]  ;;  %v95_v32 = vld [vmem:[%s7642_s7 + $0x18] sm:$0xff] }
  0x1d   :  { %136 = vmatpush.msra.mxu0 %v102_v10  ;;  %446 = vmatpush.msra.mxu3 %v412_v19  ;;  %v111_v33 = vld [vmem:[%s7642_s7 + $0x98] sm:$0xff]  ;;  %v94_v35 = vld [vmem:[%s7642_s7 + $0x10] sm:$0xff]  ;;  %v93_v38 = vld [vmem:[%s7642_s7 + $0x8] sm:$0xff] }
  0x1e   :  { %165 = vmatpush.msra.mxu1 %v118_v11  ;;  %v407_v34 = vld [vmem:[%s7643_s6 + $0x38] sm:$0xff]  ;;  %v110_v36 = vld [vmem:[%s7642_s7 + $0x90] sm:$0xff]  ;;  %v109_v39 = vld [vmem:[%s7642_s7 + $0x88] sm:$0xff] }
  0x1f   :  { %137 = vmatpush.msra.mxu0 %v101_v13  ;;  %447 = vmatpush.msra.mxu3 %v411_v22  ;;  %v406_v37 = vld [vmem:[%s7643_s6 + $0x30] sm:$0xff]  ;;  %v405_v40 = vld [vmem:[%s7643_s6 + $0x28] sm:$0xff]  ;;  %v92_v41 = vld [vmem:[%s7642_s7] sm:$0xff] }
  0x20   :  { %166 = vmatpush.msra.mxu1 %v117_v14  ;;  %v108_v42 = vld [vmem:[%s7642_s7 + $0x80] sm:$0xff]  ;;  %v85_v44 = vld [vmem:[%s7644_s2 + $0x8] sm:$0xff]  ;;  %v719_v46 = vld [vmem:[%s7645_s8 + $0x78] sm:$0xff] }
  0x21   :  { %138 = vmatpush.msra.mxu0 %v100_v17  ;;  %448 = vmatpush.msra.mxu3 %v410_v27  ;;  %v84_v43 = vld [vmem:[%s7644_s2] sm:$0xff]  ;;  %v403_v47 = vld [vmem:[%s7643_s6 + $0x18] sm:$0xff]  ;;  %v718_v48 = vld [vmem:[%s7645_s8 + $0x70] sm:$0xff] }
  0x22   :  { %167 = vmatpush.msra.mxu1 %v116_v18  ;;  %v404_v45 = vld [vmem:[%s7643_s6 + $0x20] sm:$0xff]  ;;  %v402_v49 = vld [vmem:[%s7643_s6 + $0x10] sm:$0xff]  ;;  %v717_v50 = vld [vmem:[%s7645_s8 + $0x68] sm:$0xff] }
  0x23   :  { %139 = vmatpush.msra.mxu0 %v99_v20  ;;  %449 = vmatpush.msra.mxu3 %v409_v28  ;;  %v86_v51 = vld [vmem:[%s7644_s2 + $0x10] sm:$0xff]  ;;  %v87_v52 = vld [vmem:[%s7644_s2 + $0x18] sm:$0xff]  ;;  %v401_v53 = vld [vmem:[%s7643_s6 + $0x8] sm:$0xff] }
  0x24   :  { %168 = vmatpush.msra.mxu1 %v115_v21  ;;  %v716_v54 = vld [vmem:[%s7645_s8 + $0x60] sm:$0xff]  ;;  %v715_v57 = vld [vmem:[%s7645_s8 + $0x58] sm:$0xff]  ;;  %v714_v59 = vld [vmem:[%s7645_s8 + $0x50] sm:$0xff] }
  0x25   :  { %140 = vmatpush.msra.mxu0 %v98_v23  ;;  %450 = vmatpush.msra.mxu3 %v408_v31  ;;  %v400_v55 = vld [vmem:[%s7643_s6] sm:$0xff]  ;;  %v735_v58 = vld [vmem:[%s7645_s8 + $0xf8] sm:$0xff] }
  0x26   :  { %169 = vmatpush.msra.mxu1 %v114_v25  ;;  %v5297_v56 = vld [vmem:[%s7646_s1] sm:$0xff] }
  0x27   :  { %141 = vmatpush.msra.mxu0 %v97_v24  ;;  %451 = vmatpush.msra.mxu3 %v407_v34 }
  0x28   :  { %170 = vmatpush.msra.mxu1 %v113_v26 }
  0x29   :  { %142 = vmatpush.msra.mxu0 %v96_v29  ;;  %452 = vmatpush.msra.mxu3 %v406_v37 }
  0x2a   :  { %171 = vmatpush.msra.mxu1 %v112_v30 }
  0x2b   :  { %143 = vmatpush.msra.mxu0 %v95_v32  ;;  %453 = vmatpush.msra.mxu3 %v405_v40 }
  0x2c   :  { %172 = vmatpush.msra.mxu1 %v111_v33 }
  0x2d   :  { %144 = vmatpush.msra.mxu0 %v94_v35  ;;  %454 = vmatpush.msra.mxu3 %v404_v45 }
  0x2e   :  { %173 = vmatpush.msra.mxu1 %v110_v36 }
  0x2f   :  { %145 = vmatpush.msra.mxu0 %v93_v38  ;;  %455 = vmatpush.msra.mxu3 %v403_v47 }
  0x30   :  { %174 = vmatpush.msra.mxu1 %v109_v39 }
  0x31   :  { %146 = vmatpush.msra.mxu0 %v92_v41  ;;  %456 = vmatpush.msra.mxu3 %v402_v49 }
  0x32   :  { %175 = vmatpush.msra.mxu1 %v108_v42  ;;  %147 = vmatmul.f32.vlgmr.msra.gmra.mxu0 %v84_v43 }
  0x33   :  { %176 = vmatmul.f32.vlgmr.msra.gmra.mxu1 %v85_v44  ;;  %457 = vmatpush.msra.mxu3 %v401_v53 }
  0x34   :  { %743 = vmatpush.msrb.mxu1 %v719_v46 }
  0x35   :  { %458 = vmatpush.msra.mxu3 %v400_v55 }
  0x36   :  { %744 = vmatpush.msrb.mxu1 %v718_v48 }
  0x38   :  { %745 = vmatpush.msrb.mxu1 %v717_v50 }
  0x3a   :  { %746 = vmatpush.msrb.mxu1 %v716_v54  ;;  %150 = vmatmul.f32.gmra.mxu0 %v86_v51 }
  0x3b   :  { %179 = vmatmul.f32.gmra.mxu1 %v87_v52 }
  0x3c   :  { %747 = vmatpush.msrb.mxu1 %v715_v57 }
  0x3d   :  { %31 = vsyncpa [#allocation3], 0  ;;  %459 = vmatmul.f32.vlgmr.msra.gmra.mxu3 %v5297_v56  ;;  %v734_v60 = vld [vmem:[%s7645_s8 + $0xf0] sm:$0xff]  ;;  %v713_v61 = vld [vmem:[%s7645_s8 + $0x48] sm:$0xff]  ;;  %s7647_s10 = sld [smem:[#allocation13_spill]]  ;;  %vm270_vm4 = vcmask 261120  }
  0x3e   :  { %772 = vmatpush.msrb.mxu3 %v735_v58  ;;  %748 = vmatpush.msrb.mxu1 %v714_v59  ;;  %v733_v62 = vld [vmem:[%s7645_s8 + $0xe8] sm:$0xff]  ;;  %v712_v63 = vld [vmem:[%s7645_s8 + $0x40] sm:$0xff]  ;;  %v711_v3 = vld [vmem:[%s7645_s8 + $0x38] sm:$0xff]  ;;  %s7648_s3 = sld [smem:[#allocation17_spill]]  ;;  %s4986_s0 = smov 32  }
  0x3f   :  { %v88_v0 = vld [vmem:[%s7644_s2 + $0x20] sm:$0xff]  ;;  %v89_v1 = vld [vmem:[%s7644_s2 + $0x28] sm:$0xff]  ;;  %v394_v4 = vld [vmem:[%s7646_s1 + $0x10] sm:$0xff]  ;;  %s7649_s9 = sld [smem:[#allocation9_spill]]  ;;  %s4988_s30 = smov [#allocation2]  }
  0x40   :  { %773 = vmatpush.msrb.mxu3 %v734_v60  ;;  %749 = vmatpush.msrb.mxu1 %v713_v61  ;;  %v732_v2 = vld [vmem:[%s7645_s8 + $0xe0] sm:$0xff]  ;;  %v731_v5 = vld [vmem:[%s7645_s8 + $0xd8] sm:$0xff]  ;;  %v710_v6 = vld [vmem:[%s7645_s8 + $0x30] sm:$0xff] }
  0x41   :  { %v730_v7 = vld [vmem:[%s7645_s8 + $0xd0] sm:$0xff]  ;;  %v709_v8 = vld [vmem:[%s7645_s8 + $0x28] sm:$0xff]  ;;  %v708_v10 = vld [vmem:[%s7645_s8 + $0x20] sm:$0xff] }
  0x42   :  { %774 = vmatpush.msrb.mxu3 %v733_v62  ;;  %750 = vmatpush.msrb.mxu1 %v712_v63  ;;  %v729_v9 = vld [vmem:[%s7645_s8 + $0xc8] sm:$0xff]  ;;  %v90_v11 = vld [vmem:[%s7644_s2 + $0x30] sm:$0xff]  ;;  %v91_v12 = vld [vmem:[%s7644_s2 + $0x38] sm:$0xff] }
  0x43   :  { %153 = vmatmul.f32.gmra.mxu0 %v88_v0  ;;  %182 = vmatmul.f32.gmra.mxu1 %v89_v1  ;;  %v728_v13 = vld [vmem:[%s7645_s8 + $0xc0] sm:$0xff]  ;;  %v707_v14 = vld [vmem:[%s7645_s8 + $0x18] sm:$0xff]  ;;  %v706_v17 = vld [vmem:[%s7645_s8 + $0x10] sm:$0xff] }
  0x44   :  { %775 = vmatpush.msrb.mxu3 %v732_v2  ;;  %751 = vmatpush.msrb.mxu1 %v711_v3  ;;  %v396_v15 = vld [vmem:[%s7646_s1 + $0x20] sm:$0xff]  ;;  %v727_v16 = vld [vmem:[%s7645_s8 + $0xb8] sm:$0xff]  ;;  %v726_v18 = vld [vmem:[%s7645_s8 + $0xb0] sm:$0xff] }
  0x45   :  { %462 = vmatmul.f32.gmra.mxu3 %v394_v4  ;;  %v705_v19 = vld [vmem:[%s7645_s8 + $0x8] sm:$0xff]  ;;  %v704_v21 = vld [vmem:[%s7645_s8] sm:$0xff]  ;;  %v398_v23 = vld [vmem:[%s7646_s1 + $0x30] sm:$0xff] }
  0x46   :  { %776 = vmatpush.msrb.mxu3 %v731_v5  ;;  %752 = vmatpush.msrb.mxu1 %v710_v6  ;;  %v725_v20 = vld [vmem:[%s7645_s8 + $0xa8] sm:$0xff]  ;;  %v724_v22 = vld [vmem:[%s7645_s8 + $0xa0] sm:$0xff]  ;;  %v723_v24 = vld [vmem:[%s7645_s8 + $0x98] sm:$0xff] }
  0x47   :  { %v722_v25 = vld [vmem:[%s7645_s8 + $0x90] sm:$0xff]  ;;  %v721_v26 = vld [vmem:[%s7645_s8 + $0x88] sm:$0xff]  ;;  %v720_v27 = vld [vmem:[%s7645_s8 + $0x80] sm:$0xff]  ;;  %s4985_s8 = smov 64  }
  0x48   :  { %777 = vmatpush.msrb.mxu3 %v730_v7  ;;  %753 = vmatpush.msrb.mxu1 %v709_v8  ;;  %v5409_v28 = vld [vmem:[%s7646_s1 + $0x8] sm:$0xff]  ;;  %v5415_v29 = vld [vmem:[%s7646_s1 + $0x18] sm:$0xff]  ;;  %v4616_v33 = vld [vmem:[%s7590_s11] ss:$0 sm:$0xff] }
  0x49   :  { %v5421_v30 = vld [vmem:[%s7646_s1 + $0x28] sm:$0xff]  ;;  %v5427_v31 = vld [vmem:[%s7646_s1 + $0x38] sm:$0xff]  ;;  %v127_v34 = vld [vmem:[%s7647_s10 + $0x10] sm:$0xff] }
  0x4a   :  { %778 = vmatpush.msrb.mxu3 %v729_v9  ;;  %754 = vmatpush.msrb.mxu1 %v708_v10  ;;  %v128_v32 = vld [vmem:[%s7647_s10 + $0x18] sm:$0xff]  ;;  %v126_v37 = vld [vmem:[%s7647_s10 + $0x8] sm:$0xff]  ;;  %v125_v39 = vld [vmem:[%s7647_s10] sm:$0xff]  ;;  %s7650_s10 = sld [smem:[#allocation15_spill]] }
  0x4b   :  { %156 = vmatmul.f32.gmra.mxu0 %v90_v11  ;;  %185 = vmatmul.f32.gmra.mxu1 %v91_v12  ;;  %v431_v41 = vld [vmem:[%s7643_s6 + $0xf8] sm:$0xff]  ;;  %v430_v43 = vld [vmem:[%s7643_s6 + $0xf0] sm:$0xff]  ;;  %v429_v46 = vld [vmem:[%s7643_s6 + $0xe8] sm:$0xff] }
  0x4c   :  { %779 = vmatpush.msrb.mxu3 %v728_v13  ;;  %755 = vmatpush.msrb.mxu1 %v707_v14  ;;  %v428_v48 = vld [vmem:[%s7643_s6 + $0xe0] sm:$0xff]  ;;  %v427_v50 = vld [vmem:[%s7643_s6 + $0xd8] sm:$0xff]  ;;  %v426_v54 = vld [vmem:[%s7643_s6 + $0xd0] sm:$0xff] }
  0x4d   :  { %465 = vmatmul.f32.gmra.mxu3 %v396_v15  ;;  %295 = vmatpush.msra.mxu2 %v128_v32  ;;  %v425_v57 = vld [vmem:[%s7643_s6 + $0xc8] sm:$0xff]  ;;  %v424_v60 = vld [vmem:[%s7643_s6 + $0xc0] sm:$0xff]  ;;  %v423_v62 = vld [vmem:[%s7643_s6 + $0xb8] sm:$0xff] }
  0x4e   :  { %780 = vmatpush.msrb.mxu3 %v727_v16  ;;  %756 = vmatpush.msrb.mxu1 %v706_v17  ;;  %v422_v3 = vld [vmem:[%s7643_s6 + $0xb0] sm:$0xff]  ;;  %v421_v7 = vld [vmem:[%s7643_s6 + $0xa8] sm:$0xff]  ;;  %v420_v11 = vld [vmem:[%s7643_s6 + $0xa0] sm:$0xff] }
  0x4f   :  { %296 = vmatpush.msra.mxu2 %v127_v34  ;;  %v419_v16 = vld [vmem:[%s7643_s6 + $0x98] sm:$0xff]  ;;  %v418_v17 = vld [vmem:[%s7643_s6 + $0x90] sm:$0xff] }
  0x50   :  { %781 = vmatpush.msrb.mxu3 %v726_v18  ;;  %757 = vmatpush.msrb.mxu1 %v705_v19 }
  0x51   :  { %297 = vmatpush.msra.mxu2 %v126_v37 }
  0x52   :  { %782 = vmatpush.msrb.mxu3 %v725_v20  ;;  %758 = vmatpush.msrb.mxu1 %v704_v21 }
  0x53   :  { %759 = vmatmul.f32.vlgmr.msrb.gmra.mxu1 %v5297_v56  ;;  %298 = vmatpush.msra.mxu2 %v125_v39 }
  0x54   :  { %783 = vmatpush.msrb.mxu3 %v724_v22 }
  0x55   :  { %468 = vmatmul.f32.gmra.mxu3 %v398_v23  ;;  %472 = vmatpush.msrb.mxu2 %v431_v41 }
  0x56   :  { %784 = vmatpush.msrb.mxu3 %v723_v24  ;;  %v417_v24 = vld [vmem:[%s7643_s6 + $0x88] sm:$0xff] }
  0x57   :  { %473 = vmatpush.msrb.mxu2 %v430_v43 }
  0x58   :  { %785 = vmatpush.msrb.mxu3 %v722_v25 }
  0x59   :  { %474 = vmatpush.msrb.mxu2 %v429_v46 }
  0x5a   :  { %786 = vmatpush.msrb.mxu3 %v721_v26 }
  0x5b   :  { %762 = vmatmul.f32.gmra.mxu1 %v394_v4  ;;  %475 = vmatpush.msrb.mxu2 %v428_v48 }
  0x5c   :  { %787 = vmatpush.msrb.mxu3 %v720_v27 }
  0x5d   :  { %788 = vmatmul.f32.vlgmr.msrb.gmra.mxu3 %v5409_v28  ;;  %476 = vmatpush.msrb.mxu2 %v427_v50 }
  0x5f   :  { %477 = vmatpush.msrb.mxu2 %v426_v54 }
  0x61   :  { %478 = vmatpush.msrb.mxu2 %v425_v57 }
  0x63   :  { %765 = vmatmul.f32.gmra.mxu1 %v396_v15  ;;  %479 = vmatpush.msrb.mxu2 %v424_v60 }
  0x65   :  { %791 = vmatmul.f32.gmra.mxu3 %v5415_v29  ;;  %480 = vmatpush.msrb.mxu2 %v423_v62 }
  0x67   :  { %481 = vmatpush.msrb.mxu2 %v422_v3 }
  0x69   :  { %482 = vmatpush.msrb.mxu2 %v421_v7 }
  0x6b   :  { %768 = vmatmul.f32.gmra.mxu1 %v398_v23  ;;  %483 = vmatpush.msrb.mxu2 %v420_v11 }
  0x6d   :  { %794 = vmatmul.f32.gmra.mxu3 %v5421_v30  ;;  %484 = vmatpush.msrb.mxu2 %v419_v16 }
  0x6f   :  { %485 = vmatpush.msrb.mxu2 %v418_v17 }
  0x71   :  { %486 = vmatpush.msrb.mxu2 %v417_v24  ;;  %v738_v24 = vld [vmem:[%s7648_s3 + $0x8] sm:$0xff] }
  0x75   :  { %797 = vmatmul.f32.gmra.mxu3 %v5427_v31 }
  0xaf   :  { %v148_v35 = vpop.f32.mrf.mxu0 }
  0xb0   :  { %v177_v36 = vpop.f32.mrf.mxu1  ;;  %v149_v38 = vadd.f32 %v4616_v33, %v148_v35  ;;  %v416_v35 = vld [vmem:[%s7643_s6 + $0x80] sm:$0xff]  ;;  %s4460_s6 = sshll.u32 %s4988_s30, 4  ;;  %s4461_s6 = int_to_ptr.vmem [resolvable:$true] %s4460_s6 }
  0xb1   :  { %487 = vmatpush.msrb.mxu2 %v416_v35 }
  0xb2   :  { %v5445_v40 = vadd.f32 %v177_v36, %v149_v38 }
  0xb4   :  { %v4474_v42 = vmul.f32 -1.442695, %v5445_v40 }
  0xb6   :  { %4650 = vpow2.f32 %v4474_v42 }
  0xb7   :  { %v151_v44 = vpop.f32.mrf.mxu0 }
  0xb8   :  { %v180_v45 = vpop.f32.mrf.mxu1  ;;  %v152_v47 = vadd.f32 %v4616_v33, %v151_v44 }
  0xba   :  { %v5460_v49 = vadd.f32 %v180_v45, %v152_v47 }
  0xbc   :  { %v4651_v51 = vpop.eup %4650  ;;  %v4475_v52 = vmul.f32 -1.442695, %v5460_v49 }
  0xbd   :  { %v201_v53 = vadd.f32 1.0, %v4651_v51 }
  0xbe   :  { %4652 = vpow2.f32 %v4475_v52 }
  0xbf   :  { %4654 = vrcp.f32 %v201_v53  ;;  %v216_v12 = vand.u32 2147483648, %v201_v53  ;;  %v214_v14 = vand.u32 2147483647, %v201_v53  ;;  %vm210_vm1 = vweird.f32 %v201_v53 }
  0xc0   :  { %v154_v55 = vpop.f32.mrf.mxu0  ;;  %v183_v56 = vpop.f32.mrf.mxu1 }
  0xc1   :  { %v155_v58 = vadd.f32 %v4616_v33, %v154_v55  ;;  %v5472_v59 = vpop.f32.mrf.mxu3  ;;  %v217_v22 = vor.u32 1.1754944e-38, %v216_v12  ;;  %vm215_vm3 = vcmp.eq.f32.partialorder %v214_v14, 8.507059e+37 }
  0xc3   :  { %v5477_v61 = vadd.f32 %v183_v56, %v155_v58 }
  0xc4   :  { %v4653_v63 = vpop.eup %4652 }
  0xc5   :  { %v4476_v0 = vmul.f32 -1.442695, %v5477_v61  ;;  %v4655_v1 = vpop.eup %4654  ;;  %v202_v2 = vadd.f32 1.0, %v4653_v63 }
  0xc6   :  { %v206_v4 = vmul.f32 %v4655_v1, %v201_v53  ;;  %vm211_vm0 = vweird.f32 %v4655_v1  ;;  %v5519_v53 = vld [vmem:[%s7590_s11 + $0x4] ss:$0 sm:$0xff] }
  0xc7   :  { %4656 = vpow2.f32 %v4476_v0  ;;  %vm212_vm2 = vmor %vm210_vm1, %vm211_vm0  ;;  %v231_v36 = vand.u32 2147483648, %v202_v2  ;;  %v229_v38 = vand.u32 2147483647, %v202_v2  ;;  %vm225_vm6 = vweird.f32 %v202_v2 }
  0xc8   :  { %4658 = vrcp.f32 %v202_v2  ;;  %v157_v5 = vpop.f32.mrf.mxu0  ;;  %v186_v6 = vpop.f32.mrf.mxu1  ;;  %v207_v8 = vsub.f32 1.0, %v206_v4 }
  0xc9   :  { %v158_v9 = vadd.f32 %v4616_v33, %v157_v5  ;;  %v5489_v10 = vpop.f32.mrf.mxu3  ;;  %v232_v43 = vor.u32 1.1754944e-38, %v231_v36  ;;  %vm230_vm8 = vcmp.eq.f32.partialorder %v229_v38, 8.507059e+37 }
  0xca   :  { %v208_v13 = vmul.f32 %v4655_v1, %v207_v8 }
  0xcb   :  { %v5494_v15 = vadd.f32 %v186_v6, %v158_v9 }
  0xcc   :  { %v209_v19 = vadd.f32 %v4655_v1, %v208_v13 }
  0xcd   :  { %v4657_v18 = vpop.eup %4656  ;;  %v4477_v20 = vmul.f32 -1.442695, %v5494_v15 }
  0xce   :  { %v4659_v21 = vpop.eup %4658  ;;  %v203_v23 = vadd.f32 1.0, %v4657_v18  ;;  %v213_v25 = vsel %vm212_vm2, %v4655_v1, %v209_v19 }
  0xcf   :  { %v221_v26 = vmul.f32 %v4659_v21, %v202_v2  ;;  %4660 = vpow2.f32 %v4477_v20  ;;  %v218_v27 = vsel %vm215_vm3, %v217_v22, %v213_v25  ;;  %vm226_vm5 = vweird.f32 %v4659_v21 }
  0xd0   :  { %4662 = vrcp.f32 %v203_v23  ;;  %v265_v32 = vmul.f32 %v218_v27, %v5445_v40  ;;  %v760_v42 = vpop.f32.mrf.mxu1  ;;  %vm227_vm7 = vmor %vm225_vm6, %vm226_vm5  ;;  %v246_v52 = vand.u32 2147483648, %v203_v23  ;;  %v244_v55 = vand.u32 2147483647, %v203_v23  ;;  %v737_v27 = vld [vmem:[%s7648_s3] sm:$0xff] }
  0xd1   :  { %v222_v33 = vsub.f32 1.0, %v221_v26  ;;  %v5507_v34 = vpop.f32.mrf.mxu3  ;;  %vm240_vm10 = vweird.f32 %v203_v23 }
  0xd2   :  { %4478 = vmatmul.msk.f32.vlgmr.msra.gmra.mxu2 %vm270_vm4, %v265_v32  ;;  %v247_v58 = vor.u32 1.1754944e-38, %v246_v52  ;;  %vm245_vm12 = vcmp.eq.f32.partialorder %v244_v55, 8.507059e+37 }
  0xd3   :  { %v223_v37 = vmul.f32 %v4659_v21, %v222_v33 }
  0xd5   :  { %v4661_v39 = vpop.eup %4660  ;;  %v224_v41 = vadd.f32 %v4659_v21, %v223_v37 }
  0xd6   :  { %v4663_v40 = vpop.eup %4662  ;;  %v204_v44 = vadd.f32 1.0, %v4661_v39 }
  0xd7   :  { %v228_v45 = vsel %vm227_vm7, %v4659_v21, %v224_v41  ;;  %v236_v46 = vmul.f32 %v4663_v40, %v203_v23  ;;  %vm241_vm9 = vweird.f32 %v4663_v40  ;;  %v740_v21 = vld [vmem:[%s7648_s3 + $0x18] sm:$0xff] }
  0xd8   :  { %v233_v47 = vsel %vm230_vm8, %v232_v43, %v228_v45  ;;  %4664 = vrcp.f32 %v204_v44  ;;  %vm242_vm11 = vmor %vm240_vm10, %vm241_vm9  ;;  %v763_v63 = vpop.f32.mrf.mxu1  ;;  %v261_v4 = vand.u32 2147483648, %v204_v44  ;;  %v259_v7 = vand.u32 2147483647, %v204_v44  ;;  %906 = vmatpush.msra.mxu2 %v740_v21 }
  0xd9   :  { %v266_v48 = vmul.f32 %v233_v47, %v5460_v49  ;;  %v237_v50 = vsub.f32 1.0, %v236_v46  ;;  %v5514_v51 = vpop.f32.mrf.mxu3  ;;  %v761_v49 = vadd.f32 %v5519_v53, %v760_v42  ;;  %vm255_vm14 = vweird.f32 %v204_v44 }
  0xda   :  { %v262_v11 = vor.u32 1.1754944e-38, %v261_v4  ;;  %v764_v12 = vadd.f32 %v5519_v53, %v763_v63  ;;  %vm260_vm0 = vcmp.eq.f32.partialorder %v259_v7, 8.507059e+37 }
  0xdb   :  { %v238_v54 = vmul.f32 %v4663_v40, %v237_v50  ;;  %4479 = vmatmul.msk.f32.gmra.mxu2 %vm270_vm4, %v266_v48  ;;  %v1004_v50 = vld [vmem:[%s7649_s9 + $0x8] sm:$0xff] }
  0xdd   :  { %v239_v56 = vadd.f32 %v4663_v40, %v238_v54 }
  0xde   :  { %v4665_v57 = vpop.eup %4664 }
  0xdf   :  { %v243_v60 = vsel %vm242_vm11, %v4663_v40, %v239_v56  ;;  %v251_v62 = vmul.f32 %v4665_v57, %v204_v44  ;;  %vm256_vm13 = vweird.f32 %v4665_v57  ;;  %v7625_v44 = vmov 0  }
  0xe0   :  { %v248_v0 = vsel %vm245_vm12, %v247_v58, %v243_v60  ;;  %vm257_vm15 = vmor %vm255_vm14, %vm256_vm13  ;;  %v766_v17 = vpop.f32.mrf.mxu1  ;;  %4573 = vset.pattern.permute.xlu0 %v7625_v44  ;;  %4574 = vset.pattern.permute.xlu1 %v7625_v44 }
  0xe1   :  { %v267_v1 = vmul.f32 %v248_v0, %v5477_v61  ;;  %v252_v2 = vsub.f32 1.0, %v251_v62  ;;  %v789_v3 = vpop.f32.mrf.mxu3  ;;  %v767_v23 = vadd.f32 %v5519_v53, %v766_v17  ;;  %4575 = vset.pattern.permute.xlu2 %v7625_v44 }
  0xe2   :  { %v5524_v5 = vadd.f32 %v789_v3, %v761_v49 }
  0xe3   :  { %v253_v6 = vmul.f32 %v4665_v57, %v252_v2  ;;  %4480 = vmatmul.msk.f32.gmra.mxu2 %vm270_vm4, %v267_v1 }
  0xe4   :  { %v4498_v8 = vmul.f32 -1.442695, %v5524_v5 }
  0xe5   :  { %v254_v9 = vadd.f32 %v4665_v57, %v253_v6 }
  0xe6   :  { %4666 = vpow2.f32 %v4498_v8 }
  0xe7   :  { %v258_v61 = vsel %vm257_vm15, %v4665_v57, %v254_v9 }
  0xe8   :  { %v263_v13 = vsel %vm260_vm0, %v262_v11, %v258_v61  ;;  %v769_v32 = vpop.f32.mrf.mxu1 }
  0xe9   :  { %v268_v14 = vmul.f32 %v263_v13, %v5494_v15  ;;  %v792_v16 = vpop.f32.mrf.mxu3  ;;  %v739_v15 = vld [vmem:[%s7648_s3 + $0x10] sm:$0xff]  ;;  %v770_v38 = vadd.f32 %v5519_v53, %v769_v32 }
  0xea   :  { %v5530_v18 = vadd.f32 %v792_v16, %v764_v12  ;;  %907 = vmatpush.msra.mxu2 %v739_v15 }
  0xeb   :  { %4481 = vmatmul.msk.f32.gmra.mxu2 %vm270_vm4, %v268_v14 }
  0xec   :  { %v4667_v19 = vpop.eup %4666  ;;  %v4499_v20 = vmul.f32 -1.442695, %v5530_v18  ;;  %908 = vmatpush.msra.mxu2 %v738_v24 }
  0xed   :  { %v813_v22 = vadd.f32 1.0, %v4667_v19 }
  0xee   :  { %4668 = vpow2.f32 %v4499_v20  ;;  %909 = vmatpush.msra.mxu2 %v737_v27 }
  0xef   :  { %4670 = vrcp.f32 %v813_v22  ;;  %vm822_vm1 = vweird.f32 %v813_v22  ;;  %v828_v53 = vand.u32 2147483648, %v813_v22  ;;  %v826_v55 = vand.u32 2147483647, %v813_v22 }
  0xf1   :  { %v795_v25 = vpop.f32.mrf.mxu3  ;;  %v829_v49 = vor.u32 1.1754944e-38, %v828_v53  ;;  %vm827_vm5 = vcmp.eq.f32.partialorder %v826_v55, 8.507059e+37  ;;  %v1036_v53 = vld [vmem:[%s7591_s12 + $0x18] sm:$0xff] }
  0xf2   :  { %v5544_v26 = vadd.f32 %v795_v25, %v767_v23 }
  0xf3   :  { %488 = vmatmul.f32.vlgmr.msrb.gmra.mxu2 %v5409_v28  ;;  %v1003_v28 = vld [vmem:[%s7649_s9] sm:$0xff] }
  0xf4   :  { %v4669_v33 = vpop.eup %4668  ;;  %v4500_v35 = vmul.f32 -1.442695, %v5544_v26  ;;  %1010 = vperm.xlu0 %4573, %v1003_v28  }
  0xf5   :  { %v814_v36 = vadd.f32 1.0, %v4669_v33  ;;  %v4671_v37 = vpop.eup %4670 }
  0xf6   :  { %4672 = vpow2.f32 %v4500_v35  ;;  %v818_v39 = vmul.f32 %v4671_v37, %v813_v22  ;;  %vm823_vm2 = vweird.f32 %v4671_v37 }
  0xf7   :  { %4674 = vrcp.f32 %v814_v36  ;;  %vm824_vm3 = vmor %vm822_vm1, %vm823_vm2  ;;  %vm837_vm6 = vweird.f32 %v814_v36  ;;  %v843_v1 = vand.u32 2147483648, %v814_v36  ;;  %v841_v3 = vand.u32 2147483647, %v814_v36 }
  0xf8   :  { %v819_v45 = vsub.f32 1.0, %v818_v39  ;;  %v5595_v39 = vld [vmem:[%s7590_s11 + $0x1] ss:$0 sm:$0xff] }
  0xf9   :  { %v798_v41 = vpop.f32.mrf.mxu3  ;;  %v844_v8 = vor.u32 1.1754944e-38, %v843_v1  ;;  %vm842_vm9 = vcmp.eq.f32.partialorder %v841_v3, 8.507059e+37 }
  0xfa   :  { %v5552_v42 = vadd.f32 %v798_v41, %v770_v38  ;;  %v1038_v38 = vld [vmem:[%s7592_s13 + $0x8] sm:$0xff] }
  0xfb   :  { %491 = vmatmul.f32.gmra.mxu2 %v5415_v29  ;;  %v820_v29 = vmul.f32 %v4671_v37, %v819_v45  ;;  %v439_v45 = vld [vmem:[%s7650_s10 + $0x30] sm:$0xff] }
  0xfc   :  { %v4673_v40 = vpop.eup %4672  ;;  %v4501_v43 = vmul.f32 -1.442695, %v5552_v42  ;;  %1013 = vperm.xlu0 %4573, %v1004_v50  }
  0xfd   :  { %v815_v46 = vadd.f32 1.0, %v4673_v40  ;;  %v4675_v47 = vpop.eup %4674  ;;  %v821_v54 = vadd.f32 %v4671_v37, %v820_v29  ;;  %v440_v40 = vld [vmem:[%s7650_s10 + $0x38] sm:$0xff]  ;;  %v437_v29 = vld [vmem:[%s7650_s10 + $0x20] sm:$0xff] }
  0xfe   :  { %4676 = vpow2.f32 %v4501_v43  ;;  %v833_v48 = vmul.f32 %v4675_v47, %v814_v36  ;;  %vm838_vm7 = vweird.f32 %v4675_v47  ;;  %603 = vmatpush.msrb.mxu0 %v440_v40 }
  0xff   :  { %4678 = vrcp.f32 %v815_v46  ;;  %v825_v60 = vsel %vm824_vm3, %v4671_v37, %v821_v54  ;;  %vm839_vm8 = vmor %vm837_vm6, %vm838_vm7  ;;  %vm852_vm10 = vweird.f32 %v815_v46  ;;  %v858_v13 = vand.u32 2147483648, %v815_v46  ;;  %v1040_v37 = vld [vmem:[%s7592_s13 + $0x18] sm:$0xff] }
 0x100   :  { %v834_v56 = vsub.f32 1.0, %v833_v48  ;;  %v830_v0 = vsel %vm827_vm5, %v829_v49, %v825_v60  ;;  %v856_v16 = vand.u32 2147483647, %v815_v46  ;;  %4558 = vmatpush.msra.mxu1 %v1040_v37  ;;  %604 = vmatpush.msrb.mxu0 %v439_v45  ;;  %v5619_v48 = vld [vmem:[%s7590_s11 + $0x2] ss:$0 sm:$0xff]  ;;  %v434_v60 = vld [vmem:[%s7650_s10 + $0x8] sm:$0xff] }
 0x101   :  { %v877_v7 = vmul.f32 %v830_v0, %v5524_v5  ;;  %v859_v19 = vor.u32 1.1754944e-38, %v858_v13  ;;  %v461_v49 = vadd.f32 %v5619_v48, %v5472_v59  ;;  %v1033_v59 = vld [vmem:[%s7591_s12] sm:$0xff] }
 0x102   :  { %v835_v62 = vmul.f32 %v4675_v47, %v834_v56  ;;  %vm857_vm13 = vcmp.eq.f32.partialorder %v856_v16, 8.507059e+37 }
 0x103   :  { %494 = vmatmul.f32.gmra.mxu2 %v5421_v30  ;;  %v1005_v30 = vld [vmem:[%s7649_s9 + $0x10] sm:$0xff] }
 0x104   :  { %v4677_v52 = vpop.eup %4676  ;;  %1016 = vperm.xlu1 %4574, %v1005_v30   ;;  %v836_v2 = vadd.f32 %v4675_v47, %v835_v62  ;;  %v1034_v62 = vld [vmem:[%s7591_s12 + $0x8] sm:$0xff]  ;;  %v433_v30 = vld [vmem:[%s7650_s10] sm:$0xff] }
 0x105   :  { %v816_v57 = vadd.f32 1.0, %v4677_v52  ;;  %v4679_v58 = vpop.eup %4678  ;;  %v436_v52 = vld [vmem:[%s7650_s10 + $0x18] sm:$0xff] }
 0x106   :  { %v848_v63 = vmul.f32 %v4679_v58, %v815_v46  ;;  %v840_v9 = vsel %vm839_vm8, %v4675_v47, %v836_v2  ;;  %vm853_vm11 = vweird.f32 %v4679_v58  ;;  %v438_v46 = vld [vmem:[%s7650_s10 + $0x28] sm:$0xff] }
 0x107   :  { %4680 = vrcp.f32 %v816_v57  ;;  %v845_v61 = vsel %vm842_vm9, %v844_v8, %v840_v9  ;;  %vm854_vm12 = vmor %vm852_vm10, %vm853_vm11  ;;  %vm867_vm14 = vweird.f32 %v816_v57  ;;  %v873_v23 = vand.u32 2147483648, %v816_v57  ;;  %605 = vmatpush.msrb.mxu0 %v438_v46 }
 0x108   :  { %v849_v4 = vsub.f32 1.0, %v848_v63  ;;  %v878_v5 = vmul.f32 %v845_v61, %v5530_v18  ;;  %v871_v24 = vand.u32 2147483647, %v816_v57 }
 0x109   :  { %v874_v27 = vor.u32 1.1754944e-38, %v873_v23  ;;  %606 = vmatpush.msrb.mxu0 %v437_v29 }
 0x10a   :  { %v850_v11 = vmul.f32 %v4679_v58, %v849_v4  ;;  %vm872_vm1 = vcmp.eq.f32.partialorder %v871_v24, 8.507059e+37 }
 0x10b   :  { %497 = vmatmul.f32.gmra.mxu2 %v5427_v31  ;;  %v1006_v31 = vld [vmem:[%s7649_s9 + $0x18] sm:$0xff]  ;;  %607 = vmatpush.msrb.mxu0 %v436_v52  ;;  %s7654_s9 = sld [smem:[#allocation10_spill]] }
 0x10c   :  { %1019 = vperm.xlu1 %4574, %v1006_v31   ;;  %v851_v14 = vadd.f32 %v4679_v58, %v850_v11 }
 0x10d   :  { %v4681_v6 = vpop.eup %4680 }
 0x10e   :  { %v863_v12 = vmul.f32 %v4681_v6, %v816_v57  ;;  %v855_v20 = vsel %vm854_vm12, %v4679_v58, %v851_v14  ;;  %vm868_vm15 = vweird.f32 %v4681_v6  ;;  %v435_v57 = vld [vmem:[%s7650_s10 + $0x10] sm:$0xff]  ;;  %s7653_s10 = sld [smem:[#allocation11_spill]] }
 0x10f   :  { %v860_v22 = vsel %vm857_vm13, %v859_v19, %v855_v20  ;;  %vm869_vm0 = vmor %vm867_vm14, %vm868_vm15  ;;  %v1035_v58 = vld [vmem:[%s7591_s12 + $0x10] sm:$0xff]  ;;  %608 = vmatpush.msrb.mxu0 %v435_v57 }
 0x110   :  { %v864_v17 = vsub.f32 1.0, %v863_v12  ;;  %v879_v25 = vmul.f32 %v860_v22, %v5544_v26  ;;  %v1039_v26 = vld [vmem:[%s7592_s13 + $0x10] sm:$0xff] }
 0x111   :  { %4559 = vmatpush.msra.mxu1 %v1039_v26  ;;  %609 = vmatpush.msrb.mxu0 %v434_v60 }
 0x112   :  { %v865_v21 = vmul.f32 %v4681_v6, %v864_v17 }
 0x113   :  { %4502 = vmatmul.msk.f32.vlgmr.msra.gmra.mxu2 %vm270_vm4, %v877_v7  ;;  %4560 = vmatpush.msra.mxu1 %v1038_v38 }
 0x114   :  { %v866_v15 = vadd.f32 %v4681_v6, %v865_v21  ;;  %610 = vmatpush.msrb.mxu0 %v433_v30 }
 0x116   :  { %v870_v32 = vsel %vm869_vm0, %v4681_v6, %v866_v15  ;;  %1065 = vmatpush.msra.mxu0 %v1040_v37  ;;  %v464_v6 = vadd.f32 %v5619_v48, %v5489_v10  ;;  %vm582_vm0 = vcmask 523264  }
 0x117   :  { %v875_v18 = vsel %vm872_vm1, %v874_v27, %v870_v32 }
 0x118   :  { %v880_v33 = vmul.f32 %v875_v18, %v5552_v42  ;;  %v1037_v42 = vld [vmem:[%s7592_s13] sm:$0xff]  ;;  %1066 = vmatpush.msra.mxu0 %v1039_v26 }
 0x119   :  { %4561 = vmatpush.msra.mxu1 %v1037_v42 }
 0x11a   :  { %1067 = vmatpush.msra.mxu0 %v1038_v38 }
 0x11b   :  { %4503 = vmatmul.msk.f32.gmra.mxu2 %vm270_vm4, %v878_v5  ;;  %1106 = vmatpush.msrb.mxu1 %v1036_v53  ;;  %v467_v5 = vadd.f32 %v5619_v48, %v5507_v34 }
 0x11c   :  { %1068 = vmatpush.msra.mxu0 %v1037_v42 }
 0x11d   :  { %1107 = vmatpush.msrb.mxu1 %v1035_v58 }
 0x11f   :  { %1108 = vmatpush.msrb.mxu1 %v1034_v62 }
 0x121   :  { %1109 = vmatpush.msrb.mxu1 %v1033_v59 }
 0x123   :  { %4504 = vmatmul.msk.f32.gmra.mxu2 %vm270_vm4, %v879_v25 }
 0x12b   :  { %4505 = vmatmul.msk.f32.gmra.mxu2 %vm270_vm4, %v880_v33 }
 0x155   :  { %v300_v35 = vpop.f32.mrf.mxu2 }
 0x156   :  { %v5657_v9 = vadd.f32 %v5595_v39, %v300_v35 }
 0x158   :  { %v4482_v19 = vmul.f32 -1.442695, %v5657_v9 }
 0x15e   :  { %v5581_v36 = vpop.f32.mrf.mxu2 }
 0x15f   :  { %v5674_v35 = vadd.f32 %v5595_v39, %v5581_v36 }
 0x166   :  { %v306_v41 = vpop.f32.mrf.mxu2  ;;  %v1011_v29 = vpop.permute.xlu0 %1010 }
 0x167   :  { %v5601_v28 = vadd.f32 %v5595_v39, %v306_v41  ;;  %v1007_v41 = vlaneseq }
 0x169   :  { %v4484_v43 = vmul.f32 -1.442695, %v5601_v28 }
 0x16b   :  { %4682 = vpow2.f32 %v4484_v43 }
 0x16e   :  { %v309_v47 = vpop.f32.mrf.mxu2 }
 0x16f   :  { %v5622_v50 = vadd.f32 %v5595_v39, %v309_v47  ;;  %v4483_v39 = vmul.f32 -1.442695, %v5674_v35 }
 0x171   :  { %v4683_v54 = vpop.eup %4682  ;;  %v4485_v55 = vmul.f32 -1.442695, %v5622_v50 }
 0x172   :  { %v326_v56 = vadd.f32 1.0, %v4683_v54 }
 0x173   :  { %4684 = vpow2.f32 %v4485_v55 }
 0x174   :  { %4686 = vrcp.f32 %v326_v56  ;;  %v369_v11 = vand.u32 2147483648, %v326_v56  ;;  %v367_v61 = vand.u32 2147483647, %v326_v56  ;;  %vm363_vm3 = vweird.f32 %v326_v56 }
 0x176   :  { %v489_v63 = vpop.f32.mrf.mxu2  ;;  %v370_v20 = vor.u32 1.1754944e-38, %v369_v11  ;;  %vm368_vm6 = vcmp.eq.f32.partialorder %v367_v61, 8.507059e+37 }
 0x177   :  { %v5651_v0 = vadd.f32 %v489_v63, %v461_v49 }
 0x179   :  { %v4685_v1 = vpop.eup %4684  ;;  %v4486_v2 = vmul.f32 -1.442695, %v5651_v0 }
 0x17a   :  { %v4687_v3 = vpop.eup %4686  ;;  %v327_v4 = vadd.f32 1.0, %v4685_v1 }
 0x17b   :  { %v359_v7 = vmul.f32 %v4687_v3, %v326_v56  ;;  %4688 = vpow2.f32 %v4486_v2  ;;  %vm364_vm2 = vweird.f32 %v4687_v3 }
 0x17c   :  { %4690 = vrcp.f32 %v327_v4  ;;  %vm365_vm5 = vmor %vm363_vm3, %vm364_vm2  ;;  %v384_v27 = vand.u32 2147483648, %v327_v4  ;;  %v382_v34 = vand.u32 2147483647, %v327_v4  ;;  %vm378_vm8 = vweird.f32 %v327_v4 }
 0x17d   :  { %v360_v8 = vsub.f32 1.0, %v359_v7 }
 0x17e   :  { %v492_v12 = vpop.f32.mrf.mxu2  ;;  %v385_v40 = vor.u32 1.1754944e-38, %v384_v27  ;;  %vm383_vm10 = vcmp.eq.f32.partialorder %v382_v34, 8.507059e+37 }
 0x17f   :  { %v361_v31 = vmul.f32 %v4687_v3, %v360_v8  ;;  %v5659_v13 = vadd.f32 %v492_v12, %v464_v6  ;;  %v1014_v12 = vpop.permute.xlu0 %1013 }
 0x181   :  { %v4689_v14 = vpop.eup %4688  ;;  %v362_v16 = vadd.f32 %v4687_v3, %v361_v31  ;;  %v4487_v10 = vmul.f32 -1.442695, %v5659_v13 }
 0x182   :  { %v4691_v17 = vpop.eup %4690  ;;  %v513_v21 = vadd.f32 1.0, %v4689_v14 }
 0x183   :  { %v366_v22 = vsel %vm365_vm5, %v4687_v3, %v362_v16  ;;  %v374_v23 = vmul.f32 %v4691_v17, %v327_v4  ;;  %4692 = vpow2.f32 %v4487_v10  ;;  %vm379_vm7 = vweird.f32 %v4691_v17 }
 0x184   :  { %v371_v15 = vsel %vm368_vm6, %v370_v20, %v366_v22  ;;  %4694 = vrcp.f32 %v513_v21  ;;  %vm380_vm9 = vmor %vm378_vm8, %vm379_vm7  ;;  %v526_v56 = vand.u32 2147483647, %v513_v21  ;;  %vm522_vm12 = vweird.f32 %v513_v21 }
 0x185   :  { %v5666_v24 = vmul.f32 %v371_v15, %v5601_v28  ;;  %v375_v25 = vsub.f32 1.0, %v374_v23  ;;  %4696 = vpow2.f32 %v4482_v19  ;;  %v470_v28 = vadd.f32 %v5619_v48, %v5514_v51  ;;  %v1017_v15 = vpop.permute.xlu1 %1016 }
 0x186   :  { %v495_v32 = vpop.f32.mrf.mxu2  ;;  %v5686_v51 = vand.u32 127, %v1007_v41  ;;  %v528_v48 = vand.u32 2147483648, %v513_v21  ;;  %vm527_vm15 = vcmp.eq.f32.partialorder %v526_v56, 8.507059e+37  ;;  %v4981_v3 = vmov 0.0  }
 0x187   :  { %v376_v18 = vmul.f32 %v4691_v17, %v375_v25  ;;  %v5668_v33 = vadd.f32 %v495_v32, %v467_v5  ;;  %4516 = vmatmul.msk.f32.vlgmr.msra.gmra.mxu1 %vm270_vm4, %v5666_v24 }
 0x188   :  { %vm1021_vm13 = vcmp.eq.s32.totalorder %v5686_v51, %v1011_v29  ;;  %v529_v63 = vor.u32 1.1754944e-38, %v528_v48  ;;  %vm1022_vm3 = vcmp.eq.s32.totalorder %v5686_v51, %v1014_v12 }
 0x189   :  { %v4693_v37 = vpop.eup %4692  ;;  %v377_v26 = vadd.f32 %v4691_v17, %v376_v18  ;;  %v4488_v38 = vmul.f32 -1.442695, %v5668_v33  ;;  %v4510_v4 = vsel %vm1021_vm13, 1.0, %v4981_v3  ;;  %v4511_v23 = vsel %vm1022_vm3, 1.0, %v4981_v3 }
 0x18a   :  { %v4695_v42 = vpop.eup %4694  ;;  %v5679_v43 = vadd.f32 1.0, %v4693_v37 }
 0x18b   :  { %v381_v45 = vsel %vm380_vm9, %v4691_v17, %v377_v26  ;;  %v518_v46 = vmul.f32 %v4695_v42, %v513_v21  ;;  %4698 = vpow2.f32 %v4488_v38  ;;  %v4697_v36 = vpop.eup %4696  ;;  %vm523_vm11 = vweird.f32 %v4695_v42 }
 0x18c   :  { %v386_v47 = vsel %vm383_vm10, %v385_v40, %v381_v45  ;;  %4700 = vrcp.f32 %v5679_v43  ;;  %v5692_v58 = vadd.f32 1.0, %v4697_v36  ;;  %vm524_vm14 = vmor %vm522_vm12, %vm523_vm11  ;;  %v543_v11 = vand.u32 2147483648, %v5679_v43 }
 0x18d   :  { %v5684_v52 = vmul.f32 %v386_v47, %v5622_v50  ;;  %v519_v53 = vsub.f32 1.0, %v518_v46  ;;  %4702 = vpow2.f32 %v4483_v39  ;;  %v541_v61 = vand.u32 2147483647, %v5679_v43  ;;  %v1020_v29 = vpop.permute.xlu1 %1019 }
 0x18e   :  { %v498_v54 = vpop.f32.mrf.mxu2  ;;  %vm537_vm2 = vweird.f32 %v5679_v43  ;;  %v544_v17 = vor.u32 1.1754944e-38, %v543_v11  ;;  %vm1023_vm9 = vcmp.eq.s32.totalorder %v5686_v51, %v1017_v15  ;;  %vm333_vm3 = vweird.f32 %v5692_v58 }
 0x18f   :  { %v520_v55 = vmul.f32 %v4695_v42, %v519_v53  ;;  %v5688_v57 = vadd.f32 %v498_v54, %v470_v28  ;;  %4517 = vmatmul.msk.f32.gmra.mxu1 %vm270_vm4, %v5684_v52  ;;  %vm542_vm6 = vcmp.eq.f32.partialorder %v541_v61, 8.507059e+37  ;;  %v4512_v45 = vsel %vm1023_vm9, 1.0, %v4981_v3 }
 0x191   :  { %v4699_v49 = vpop.eup %4698  ;;  %v521_v60 = vadd.f32 %v4695_v42, %v520_v55  ;;  %v4489_v50 = vmul.f32 -1.442695, %v5688_v57 }
 0x192   :  { %v4701_v62 = vpop.eup %4700  ;;  %v515_v30 = vadd.f32 1.0, %v4699_v49 }
 0x193   :  { %v525_v59 = vsel %vm524_vm14, %v4695_v42, %v521_v60  ;;  %v533_v1 = vmul.f32 %v4701_v62, %v5679_v43  ;;  %4704 = vpow2.f32 %v4489_v50  ;;  %v4703_v8 = vpop.eup %4702  ;;  %vm538_vm1 = vweird.f32 %v4701_v62 }
 0x194   :  { %v530_v2 = vsel %vm527_vm15, %v529_v63, %v525_v59  ;;  %4706 = vrcp.f32 %v515_v30  ;;  %v5706_v10 = vadd.f32 1.0, %v4703_v8  ;;  %vm539_vm5 = vmor %vm537_vm2, %vm538_vm1  ;;  %v558_v18 = vand.u32 2147483648, %v515_v30 }
 0x195   :  { %4708 = vrcp.f32 %v5692_v58  ;;  %v577_v6 = vmul.f32 %v530_v2, %v5651_v0  ;;  %v534_v7 = vsub.f32 1.0, %v533_v1  ;;  %v556_v37 = vand.u32 2147483647, %v515_v30 }
 0x196   :  { %vm552_vm8 = vweird.f32 %v515_v30  ;;  %v559_v41 = vor.u32 1.1754944e-38, %v558_v18  ;;  %vm1024_vm14 = vcmp.eq.s32.totalorder %v5686_v51, %v1020_v29  ;;  %v339_v50 = vand.u32 2147483648, %v5692_v58 }
 0x197   :  { %v535_v31 = vmul.f32 %v4701_v62, %v534_v7  ;;  %4490 = vmatmul.msk.f32.vlgmr.msrb.gmra.mxu0 %vm582_vm0, %v577_v6  ;;  %4518 = vmatmul.msk.f32.vlgmr.msrb.gmra.mxu1 %vm270_vm4, %v4510_v4  ;;  %vm557_vm11 = vcmp.eq.f32.partialorder %v556_v37, 8.507059e+37  ;;  %v4513_v63 = vsel %vm1024_vm14, 1.0, %v4981_v3  ;;  %v354_v3 = vand.u32 2147483648, %v5706_v10 }
 0x198   :  { %v340_v2 = vor.u32 1.1754944e-38, %v339_v50 }
 0x199   :  { %v4705_v14 = vpop.eup %4704  ;;  %v536_v16 = vadd.f32 %v4701_v62, %v535_v31  ;;  %v355_v8 = vor.u32 1.1754944e-38, %v354_v3 }
 0x19a   :  { %v4707_v0 = vpop.eup %4706  ;;  %v516_v5 = vadd.f32 1.0, %v4705_v14 }
 0x19b   :  { %v5708_v19 = vpop.eup %4708  ;;  %v540_v20 = vsel %vm539_vm5, %v4701_v62, %v536_v16  ;;  %v548_v21 = vmul.f32 %v4707_v0, %v515_v30  ;;  %vm553_vm7 = vweird.f32 %v4707_v0  ;;  %v337_v30 = vand.u32 2147483647, %v5692_v58 }
 0x19c   :  { %v545_v22 = vsel %vm542_vm6, %v544_v17, %v540_v20  ;;  %4710 = vrcp.f32 %v516_v5  ;;  %v329_v32 = vmul.f32 %v5708_v19, %v5692_v58  ;;  %vm554_vm10 = vmor %vm552_vm8, %vm553_vm7  ;;  %v573_v47 = vand.u32 2147483648, %v516_v5 }
 0x19d   :  { %v578_v25 = vmul.f32 %v545_v22, %v5659_v13  ;;  %v549_v27 = vsub.f32 1.0, %v548_v21  ;;  %4712 = vrcp.f32 %v5706_v10  ;;  %v571_v54 = vand.u32 2147483647, %v516_v5 }
 0x19e   :  { %v330_v13 = vsub.f32 1.0, %v329_v32  ;;  %vm567_vm13 = vweird.f32 %v516_v5  ;;  %vm334_vm15 = vweird.f32 %v5708_v19  ;;  %vm338_vm6 = vcmp.eq.f32.partialorder %v337_v30, 8.507059e+37 }
 0x19f   :  { %v550_v34 = vmul.f32 %v4707_v0, %v549_v27  ;;  %4491 = vmatmul.msk.f32.gmra.mxu0 %vm582_vm0, %v578_v25  ;;  %4519 = vmatmul.msk.f32.gmra.mxu1 %vm270_vm4, %v4511_v23  ;;  %vm572_vm2 = vcmp.eq.f32.partialorder %v571_v54, 8.507059e+37  ;;  %vm335_vm5 = vmor %vm333_vm3, %vm334_vm15  ;;  %vm348_vm8 = vweird.f32 %v5706_v10  ;;  %v5767_v54 = vld [vmem:[%s7593_s14] ss:$0 sm:$0xff] }
 0x1a0   :  { %v331_v39 = vmul.f32 %v5708_v19, %v330_v13 }
 0x1a1   :  { %v551_v26 = vadd.f32 %v4707_v0, %v550_v34 }
 0x1a2   :  { %v4711_v38 = vpop.eup %4710  ;;  %v332_v56 = vadd.f32 %v5708_v19, %v331_v39 }
 0x1a3   :  { %v555_v42 = vsel %vm554_vm10, %v4707_v0, %v551_v26  ;;  %v563_v28 = vmul.f32 %v4711_v38, %v516_v5  ;;  %v4713_v40 = vpop.eup %4712  ;;  %vm568_vm12 = vweird.f32 %v4711_v38 }
 0x1a4   :  { %v560_v43 = vsel %vm557_vm11, %v559_v41, %v555_v42  ;;  %v344_v53 = vmul.f32 %v4713_v40, %v5706_v10  ;;  %vm569_vm1 = vmor %vm567_vm13, %vm568_vm12  ;;  %v336_v59 = vsel %vm335_vm5, %v5708_v19, %v332_v56  ;;  %vm349_vm7 = vweird.f32 %v4713_v40 }
 0x1a5   :  { %v579_v46 = vmul.f32 %v560_v43, %v5668_v33  ;;  %v564_v36 = vsub.f32 1.0, %v563_v28  ;;  %v574_v33 = vor.u32 1.1754944e-38, %v573_v47  ;;  %v341_v4 = vsel %vm338_vm6, %v340_v2, %v336_v59  ;;  %vm350_vm9 = vmor %vm348_vm8, %vm349_vm7 }
 0x1a6   :  { %v345_v49 = vsub.f32 1.0, %v344_v53  ;;  %v5737_v7 = vmul.f32 %v341_v4, %v5657_v9  ;;  %v4621_v9 = vld [vmem:[%s7590_s11 + $0x3] ss:$0 sm:$0xff] }
 0x1a7   :  { %v565_v48 = vmul.f32 %v4711_v38, %v564_v36  ;;  %4492 = vmatmul.msk.f32.gmra.mxu0 %vm582_vm0, %v579_v46  ;;  %4520 = vmatmul.msk.f32.gmra.mxu1 %vm270_vm4, %v4512_v45 }
 0x1a8   :  { %v346_v1 = vmul.f32 %v4713_v40, %v345_v49 }
 0x1a9   :  { %v566_v55 = vadd.f32 %v4711_v38, %v565_v48 }
 0x1aa   :  { %v347_v6 = vadd.f32 %v4713_v40, %v346_v1 }
 0x1ab   :  { %v570_v60 = vsel %vm569_vm1, %v4711_v38, %v566_v55 }
 0x1ac   :  { %v575_v62 = vsel %vm572_vm2, %v574_v33, %v570_v60  ;;  %v351_v58 = vsel %vm350_vm9, %v4713_v40, %v347_v6 }
 0x1ad   :  { %v580_v51 = vmul.f32 %v575_v62, %v5688_v57  ;;  %v352_v57 = vand.u32 2147483647, %v5706_v10 }
 0x1af   :  { %4493 = vmatmul.msk.f32.gmra.mxu0 %vm582_vm0, %v580_v51  ;;  %4521 = vmatmul.msk.f32.gmra.mxu1 %vm270_vm4, %v4513_v63  ;;  %vm353_vm10 = vcmp.eq.f32.partialorder %v352_v57, 8.507059e+37 }
 0x1b0   :  { %v356_v11 = vsel %vm353_vm10, %v355_v8, %v351_v58 }
 0x1b1   :  { %v5744_v12 = vmul.f32 %v356_v11, %v5674_v35 }
 0x1b7   :  { %4514 = vmatmul.msk.f32.vlgmr.msra.gmra.mxu0 %vm270_vm4, %v5737_v7 }
 0x1bf   :  { %4515 = vmatmul.msk.f32.gmra.mxu0 %vm270_vm4, %v5744_v12 }
 0x204   :  { %v5751_v31 = vpop.f32.mrf.mxu1 }
 0x20c   :  { %v5753_v0 = vpop.f32.mrf.mxu1 }
 0x214   :  { %v612_v61 = vpop.f32.mrf.mxu0  ;;  %v1111_v22 = vpop.f32.mrf.mxu1 }
 0x215   :  { %v613_v14 = vadd.f32 %v4621_v9, %v612_v61 }
 0x217   :  { %v4494_v16 = vmul.f32 -1.442695, %v613_v14 }
 0x219   :  { %4714 = vpow2.f32 %v4494_v16 }
 0x21c   :  { %v615_v10 = vpop.f32.mrf.mxu0  ;;  %v1114_v43 = vpop.f32.mrf.mxu1 }
 0x21d   :  { %v5755_v17 = vadd.f32 %v4621_v9, %v615_v10 }
 0x21f   :  { %v4715_v35 = vpop.eup %4714  ;;  %v4495_v5 = vmul.f32 -1.442695, %v5755_v17 }
 0x220   :  { %v636_v19 = vadd.f32 1.0, %v4715_v35 }
 0x221   :  { %4716 = vpow2.f32 %v4495_v5 }
 0x222   :  { %4718 = vrcp.f32 %v636_v19  ;;  %v651_v38 = vand.u32 2147483648, %v636_v19  ;;  %vm645_vm12 = vweird.f32 %v636_v19  ;;  %v649_v42 = vand.u32 2147483647, %v636_v19 }
 0x224   :  { %v618_v20 = vpop.f32.mrf.mxu0  ;;  %v652_v39 = vor.u32 1.1754944e-38, %v651_v38  ;;  %vm650_vm14 = vcmp.eq.f32.partialorder %v649_v42, 8.507059e+37  ;;  %v1117_v4 = vpop.f32.mrf.mxu1 }
 0x225   :  { %v5758_v21 = vadd.f32 %v4621_v9, %v618_v20 }
 0x227   :  { %v4717_v23 = vpop.eup %4716  ;;  %v4496_v15 = vmul.f32 -1.442695, %v5758_v21 }
 0x228   :  { %v4719_v25 = vpop.eup %4718  ;;  %v637_v27 = vadd.f32 1.0, %v4717_v23 }
 0x229   :  { %v641_v32 = vmul.f32 %v4719_v25, %v636_v19  ;;  %4720 = vpow2.f32 %v4496_v15  ;;  %vm646_vm11 = vweird.f32 %v4719_v25 }
 0x22a   :  { %4722 = vrcp.f32 %v637_v27  ;;  %vm647_vm13 = vmor %vm645_vm12, %vm646_vm11  ;;  %vm660_vm1 = vweird.f32 %v637_v27  ;;  %v666_v33 = vand.u32 2147483648, %v637_v27  ;;  %v664_v50 = vand.u32 2147483647, %v637_v27 }
 0x22b   :  { %v642_v18 = vsub.f32 1.0, %v641_v32 }
 0x22c   :  { %v621_v34 = vpop.f32.mrf.mxu0  ;;  %v667_v2 = vor.u32 1.1754944e-38, %v666_v33  ;;  %vm665_vm3 = vcmp.eq.f32.partialorder %v664_v50, 8.507059e+37 }
 0x22d   :  { %v643_v37 = vmul.f32 %v4719_v25, %v642_v18  ;;  %v5761_v26 = vadd.f32 %v4621_v9, %v621_v34  ;;  %v1120_v18 = vpop.f32.mrf.mxu1 }
 0x22f   :  { %v4721_v13 = vpop.eup %4720  ;;  %v644_v41 = vadd.f32 %v4719_v25, %v643_v37  ;;  %v4497_v28 = vmul.f32 -1.442695, %v5761_v26 }
 0x230   :  { %v4723_v40 = vpop.eup %4722  ;;  %v638_v45 = vadd.f32 1.0, %v4721_v13 }
 0x231   :  { %v648_v46 = vsel %vm647_vm13, %v4719_v25, %v644_v41  ;;  %v656_v36 = vmul.f32 %v4723_v40, %v637_v27  ;;  %4724 = vpow2.f32 %v4497_v28  ;;  %vm661_vm15 = vweird.f32 %v4723_v40 }
 0x232   :  { %4726 = vrcp.f32 %v638_v45  ;;  %v653_v29 = vsel %vm650_vm14, %v652_v39, %v648_v46  ;;  %vm662_vm2 = vmor %vm660_vm1, %vm661_vm15  ;;  %v681_v58 = vand.u32 2147483648, %v638_v45  ;;  %v679_v9 = vand.u32 2147483647, %v638_v45 }
 0x233   :  { %v657_v47 = vsub.f32 1.0, %v656_v36  ;;  %v700_v49 = vmul.f32 %v653_v29, %v613_v14  ;;  %v1118_v14 = vadd.f32 %v1117_v4, %v5751_v31  ;;  %vm675_vm6 = vweird.f32 %v638_v45 }
 0x234   :  { %v1070_v53 = vpop.f32.mrf.mxu0  ;;  %v682_v19 = vor.u32 1.1754944e-38, %v681_v58  ;;  %vm680_vm8 = vcmp.eq.f32.partialorder %v679_v9, 8.507059e+37  ;;  %v1121_v41 = vadd.f32 %v1120_v18, %v5753_v0  ;;  %v4982_v0 = vmov 64.0  }
 0x235   :  { %v658_v48 = vmul.f32 %v4723_v40, %v657_v47  ;;  %v1112_v55 = vadd.f32 %v1111_v22, %v1070_v53  ;;  %v1127_v27 = vadd.f32 %v5767_v54, %v1118_v14 }
 0x237   :  { %v4725_v56 = vpop.eup %4724  ;;  %v659_v60 = vadd.f32 %v4723_v40, %v658_v48  ;;  %v1125_v62 = vadd.f32 %v5767_v54, %v1112_v55 }
 0x238   :  { %v4727_v63 = vpop.eup %4726  ;;  %v639_v30 = vadd.f32 1.0, %v4725_v56 }
 0x239   :  { %v663_v51 = vsel %vm662_vm2, %v4723_v40, %v659_v60  ;;  %v671_v59 = vmul.f32 %v4727_v63, %v638_v45  ;;  %v5770_v1 = vadd.f32 %v1125_v62, %v700_v49  ;;  %vm676_vm5 = vweird.f32 %v4727_v63 }
 0x23a   :  { %4728 = vrcp.f32 %v639_v30  ;;  %v668_v57 = vsel %vm665_vm3, %v667_v2, %v663_v51  ;;  %vm677_vm7 = vmor %vm675_vm6, %vm676_vm5  ;;  %v696_v32 = vand.u32 2147483648, %v639_v30  ;;  %v694_v38 = vand.u32 2147483647, %v639_v30 }
 0x23b   :  { %v672_v6 = vsub.f32 1.0, %v671_v59  ;;  %v1147_v3 = vsel %vm582_vm0, %v5770_v1, 0.0  ;;  %v701_v16 = vmul.f32 %v668_v57, %v5755_v17  ;;  %vm690_vm10 = vweird.f32 %v639_v30 }
 0x23c   :  { %1148 = vadd.xlane.f32.xlu2 %v1147_v3  ;;  %v1073_v8 = vpop.f32.mrf.mxu0  ;;  %v697_v42 = vor.u32 1.1754944e-38, %v696_v32  ;;  %vm695_vm12 = vcmp.eq.f32.partialorder %v694_v38, 8.507059e+37  ;;  %v1128_v45 = vadd.f32 %v5767_v54, %v1121_v41  ;;  %4730 = vrcp.f32 %v4982_v0  ;;  %v1416_v38 = vld [vmem:[%s7595_s16 + $0x20] sm:$0xff] }
 0x23d   :  { %v673_v11 = vmul.f32 %v4727_v63, %v672_v6  ;;  %v1115_v61 = vadd.f32 %v1114_v43, %v1073_v8 }
 0x23f   :  { %v674_v10 = vadd.f32 %v4727_v63, %v673_v11  ;;  %v1126_v35 = vadd.f32 %v5767_v54, %v1115_v61 }
 0x240   :  { %v4729_v5 = vpop.eup %4728 }
 0x241   :  { %v678_v20 = vsel %vm677_vm7, %v4727_v63, %v674_v10  ;;  %v686_v22 = vmul.f32 %v4729_v5, %v639_v30  ;;  %v5777_v23 = vadd.f32 %v1126_v35, %v701_v16  ;;  %vm691_vm9 = vweird.f32 %v4729_v5 }
 0x242   :  { %v683_v15 = vsel %vm680_vm8, %v682_v19, %v678_v20  ;;  %vm692_vm11 = vmor %vm690_vm10, %vm691_vm9  ;;  %v4731_v39 = vpop.eup %4730 }
 0x243   :  { %v702_v25 = vmul.f32 %v683_v15, %v5758_v21  ;;  %v687_v31 = vsub.f32 1.0, %v686_v22  ;;  %v1150_v17 = vsel %vm582_vm0, %v5777_v23, 0.0  ;;  %v1160_v47 = vmul.f32 64.0, %v4731_v39  ;;  %v1419_v22 = vld [vmem:[%s7595_s16 + $0x38] sm:$0xff]  ;;  %v1418_v15 = vld [vmem:[%s7595_s16 + $0x30] sm:$0xff] }
 0x244   :  { %1151 = vadd.xlane.f32.xlu2 %v1150_v17  ;;  %vm1164_vm13 = vweird.f32 %v4731_v39  ;;  %1442 = vmatpush.msra.mxu3 %v1419_v22  ;;  %v1417_v17 = vld [vmem:[%s7595_s16 + $0x28] sm:$0xff] }
 0x245   :  { %v5783_v34 = vadd.f32 %v1127_v27, %v702_v25  ;;  %v688_v37 = vmul.f32 %v4729_v5, %v687_v31  ;;  %v1161_v29 = vsub.f32 1.0, %v1160_v47 }
 0x246   :  { %1443 = vmatpush.msra.mxu3 %v1418_v15 }
 0x247   :  { %v689_v13 = vadd.f32 %v4729_v5, %v688_v37  ;;  %v1153_v21 = vsel %vm582_vm0, %v5783_v34, 0.0  ;;  %v1162_v53 = vmul.f32 %v4731_v39, %v1161_v29 }
 0x248   :  { %1154 = vadd.xlane.f32.xlu0 %v1153_v21  ;;  %1444 = vmatpush.msra.mxu3 %v1417_v17  ;;  %v5838_v21 = vld [vmem:[%s7599_s20] ss:$0 sm:$0xff] }
 0x249   :  { %v693_v28 = vsel %vm692_vm11, %v4729_v5, %v689_v13  ;;  %v1163_v48 = vadd.f32 %v4731_v39, %v1162_v53  ;;  %v1413_v53 = vld [vmem:[%s7595_s16 + $0x8] sm:$0xff] }
 0x24a   :  { %v698_v40 = vsel %vm695_vm12, %v697_v42, %v693_v28  ;;  %v1415_v42 = vld [vmem:[%s7595_s16 + $0x18] sm:$0xff]  ;;  %1445 = vmatpush.msra.mxu3 %v1416_v38 }
 0x24b   :  { %v703_v43 = vmul.f32 %v698_v40, %v5761_v26  ;;  %v5794_v55 = vsel %vm1164_vm13, %v4731_v39, %v1163_v48 }
 0x24c   :  { %1446 = vmatpush.msra.mxu3 %v1415_v42 }
 0x24d   :  { %v5790_v46 = vadd.f32 %v1128_v45, %v703_v43  ;;  %v5846_v43 = vld [vmem:[%s7599_s20 + $0x1] ss:$0 sm:$0xff] }
 0x24f   :  { %v1156_v36 = vsel %vm582_vm0, %v5790_v46, 0.0 }
 0x250   :  { %1157 = vadd.xlane.f32.xlu1 %v1156_v36  ;;  %v1414_v36 = vld [vmem:[%s7595_s16 + $0x10] sm:$0xff] }
 0x251   :  { %1447 = vmatpush.msra.mxu3 %v1414_v36 }
 0x253   :  { %1448 = vmatpush.msra.mxu3 %v1413_v53 }
 0x2af   :  { %v1149_v33 = vpop.xlane.xlu2 %1148 }
 0x2b0   :  { %v1166_v26 = vmul.f32 %v5794_v55, %v1149_v33 }
 0x2b2   :  { %v1170_v54 = vsub.f32 %v5770_v1, %v1166_v26 }
 0x2b4   :  { %v1174_v56 = vmul.f32 %v1170_v54, %v1170_v54 }
 0x2b6   :  { %v1178_v49 = vsel %vm582_vm0, %v1174_v56, 0.0  ;;  %v1412_v56 = vld [vmem:[%s7595_s16] sm:$0xff] }
 0x2b7   :  { %1179 = vadd.xlane.f32.xlu2 %v1178_v49  ;;  %v1152_v60 = vpop.xlane.xlu2 %1151  ;;  %1449 = vmatpush.msra.mxu3 %v1412_v56 }
 0x2b8   :  { %v1167_v50 = vmul.f32 %v5794_v55, %v1152_v60 }
 0x2ba   :  { %v5801_v62 = vsub.f32 %v5777_v23, %v1167_v50 }
 0x2bb   :  { %v1155_v63 = vpop.xlane.xlu0 %1154 }
 0x2bc   :  { %v1168_v30 = vmul.f32 %v5794_v55, %v1155_v63  ;;  %v1175_v51 = vmul.f32 %v5801_v62, %v5801_v62 }
 0x2be   :  { %v5807_v59 = vsub.f32 %v5783_v34, %v1168_v30  ;;  %v1181_v2 = vsel %vm582_vm0, %v1175_v51, 0.0 }
 0x2bf   :  { %1182 = vadd.xlane.f32.xlu2 %v1181_v2 }
 0x2c0   :  { %v1176_v4 = vmul.f32 %v5807_v59, %v5807_v59 }
 0x2c2   :  { %v1184_v58 = vsel %vm582_vm0, %v1176_v4, 0.0 }
 0x2c3   :  { %v1158_v6 = vpop.xlane.xlu1 %1157 }
 0x2c4   :  { %v1169_v3 = vmul.f32 %v5794_v55, %v1158_v6 }
 0x2c6   :  { %v5814_v57 = vsub.f32 %v5790_v46, %v1169_v3 }
 0x2c7   :  { %1185 = vadd.xlane.f32.xlu2 %v1184_v58 }
 0x2c8   :  { %v1177_v8 = vmul.f32 %v5814_v57, %v5814_v57 }
 0x2ca   :  { %v1187_v11 = vsel %vm582_vm0, %v1177_v8, 0.0 }
 0x2cf   :  { %1188 = vadd.xlane.f32.xlu2 %v1187_v11 }
 0x32a   :  { %v1180_v9 = vpop.xlane.xlu2 %1179 }
 0x32b   :  { %v1190_v61 = vmul.f32 %v1180_v9, %v5794_v55 }
 0x32d   :  { %v1194_v14 = vadd.f32 1e-05, %v1190_v61 }
 0x32f   :  { %4732 = vrsqrt.f32 %v1194_v14  ;;  %vm1204_vm15 = vweird.f32 %v1194_v14 }
 0x332   :  { %v1183_v16 = vpop.xlane.xlu2 %1182 }
 0x333   :  { %v1191_v10 = vmul.f32 %v1183_v16, %v5794_v55 }
 0x335   :  { %v4733_v35 = vpop.eup %4732  ;;  %v1195_v5 = vadd.f32 1e-05, %v1191_v10 }
 0x336   :  { %v1199_v19 = vmul.f32 %v4733_v35, %v1194_v14  ;;  %vm1205_vm14 = vweird.f32 %v4733_v35 }
 0x337   :  { %4734 = vrsqrt.f32 %v1195_v5  ;;  %vm1206_vm1 = vmor %vm1204_vm15, %vm1205_vm14  ;;  %vm1214_vm3 = vweird.f32 %v1195_v5 }
 0x338   :  { %v1200_v20 = vmul.f32 %v4733_v35, %v1199_v19 }
 0x33a   :  { %v1201_v25 = vmul.f32 0.5, %v1200_v20  ;;  %v1186_v27 = vpop.xlane.xlu2 %1185 }
 0x33b   :  { %v1192_v31 = vmul.f32 %v1186_v27, %v5794_v55 }
 0x33c   :  { %v1202_v32 = vsub.f32 1.5, %v1201_v25 }
 0x33d   :  { %v4735_v18 = vpop.eup %4734  ;;  %v1196_v37 = vadd.f32 1e-05, %v1192_v31 }
 0x33e   :  { %v1203_v13 = vmul.f32 %v4733_v35, %v1202_v32  ;;  %v1209_v41 = vmul.f32 %v4735_v18, %v1195_v5  ;;  %vm1215_vm2 = vweird.f32 %v4735_v18  ;;  %v911_v32 = vpop.f32.mrf.mxu2 }
 0x33f   :  { %4736 = vrsqrt.f32 %v1196_v37  ;;  %vm1216_vm5 = vmor %vm1214_vm3, %vm1215_vm2  ;;  %vm1224_vm7 = vweird.f32 %v1196_v37 }
 0x340   :  { %v1207_v28 = vsel %vm1206_vm1, %v4733_v35, %v1203_v13  ;;  %v1210_v40 = vmul.f32 %v4735_v18, %v1209_v41 }
 0x341   :  { %v1238_v45 = vmul.f32 %v1207_v28, %v1170_v54 }
 0x342   :  { %v1211_v0 = vmul.f32 0.5, %v1210_v40  ;;  %v1189_v39 = vpop.xlane.xlu2 %1188 }
 0x343   :  { %v1243_v47 = vmul.f32 %v5838_v21, %v1238_v45  ;;  %v1193_v29 = vmul.f32 %v1189_v39, %v5794_v55 }
 0x344   :  { %v1212_v48 = vsub.f32 1.5, %v1211_v0 }
 0x345   :  { %v4737_v33 = vpop.eup %4736  ;;  %v5857_v26 = vadd.f32 %v5846_v43, %v1243_v47  ;;  %v1197_v54 = vadd.f32 1e-05, %v1193_v29 }
 0x346   :  { %v1213_v49 = vmul.f32 %v4735_v18, %v1212_v48  ;;  %v1219_v60 = vmul.f32 %v4737_v33, %v1196_v37  ;;  %vm1225_vm6 = vweird.f32 %v4737_v33 }
 0x347   :  { %v5863_v50 = vmul.f32 0.70710677, %v5857_v26  ;;  %4738 = vrsqrt.f32 %v1197_v54  ;;  %vm1226_vm8 = vmor %vm1224_vm7, %vm1225_vm6  ;;  %vm1234_vm10 = vweird.f32 %v1197_v54 }
 0x348   :  { %v1217_v63 = vsel %vm1216_vm5, %v4735_v18, %v1213_v49  ;;  %v1220_v30 = vmul.f32 %v4737_v33, %v1219_v60 }
 0x349   :  { %v5866_v51 = vand.u32 2147483647, %v5863_v50  ;;  %v1239_v2 = vmul.f32 %v1217_v63, %v5801_v62 }
 0x34a   :  { %v1221_v4 = vmul.f32 0.5, %v1220_v30  ;;  %v914_v30 = vpop.f32.mrf.mxu2 }
 0x34b   :  { %v1272_v6 = vmul.f32 0.3275911, %v5866_v51  ;;  %v1244_v3 = vmul.f32 %v5838_v21, %v1239_v2 }
 0x34c   :  { %v1222_v58 = vsub.f32 1.5, %v1221_v4 }
 0x34d   :  { %v4739_v8 = vpop.eup %4738  ;;  %v1276_v11 = vadd.f32 1.0, %v1272_v6  ;;  %v5872_v9 = vadd.f32 %v5846_v43, %v1244_v3 }
 0x34e   :  { %v1223_v61 = vmul.f32 %v4737_v33, %v1222_v58  ;;  %v1229_v14 = vmul.f32 %v4739_v8, %v1197_v54  ;;  %vm1235_vm9 = vweird.f32 %v4739_v8  ;;  %v1376_v54 = vsub.f32 0.0, %v5866_v51 }
 0x34f   :  { %4740 = vrcp.f32 %v1276_v11  ;;  %v5876_v35 = vmul.f32 0.70710677, %v5872_v9  ;;  %vm1236_vm11 = vmor %vm1234_vm10, %vm1235_vm9  ;;  %v1291_v42 = vand.u32 2147483648, %v1276_v11  ;;  %v1289_v45 = vand.u32 2147483647, %v1276_v11 }
 0x350   :  { %v1227_v16 = vsel %vm1226_vm8, %v4737_v33, %v1223_v61  ;;  %v1230_v10 = vmul.f32 %v4739_v8, %v1229_v14  ;;  %vm1285_vm13 = vweird.f32 %v1276_v11  ;;  %v1380_v4 = vmul.f32 %v1376_v54, %v5866_v51 }
 0x351   :  { %v1240_v62 = vmul.f32 %v1227_v16, %v5807_v59  ;;  %v5879_v19 = vand.u32 2147483647, %v5876_v35  ;;  %v5889_v59 = vld [vmem:[%s7590_s11 + $0x5] ss:$0 sm:$0xff]  ;;  %v1292_v47 = vor.u32 1.1754944e-38, %v1291_v42  ;;  %vm1290_vm15 = vcmp.eq.f32.partialorder %v1289_v45, 8.507059e+37 }
 0x352   :  { %v1231_v5 = vmul.f32 0.5, %v1230_v10  ;;  %v5896_v28 = vadd.f32 %v5889_v59, %v911_v32  ;;  %v5916_v61 = vadd.f32 %v5889_v59, %v914_v30  ;;  %vm1260_vm10 = vcmp.ge.f32.partialorder %v5863_v50, 0.0  ;;  %v2732_v50 = vld [vmem:[%s7598_s19 + $0x10] sm:$0xff] }
 0x353   :  { %v1245_v20 = vmul.f32 %v5838_v21, %v1240_v62  ;;  %v1273_v25 = vmul.f32 0.3275911, %v5879_v19 }
 0x354   :  { %v1232_v22 = vsub.f32 1.5, %v1231_v5  ;;  %v4506_v53 = vmul.f32 -1.442695, %v5896_v28  ;;  %v1384_v5 = vmul.f32 1.442695, %v1380_v4 }
 0x355   :  { %v4741_v15 = vpop.eup %4740  ;;  %v5884_v27 = vadd.f32 %v5846_v43, %v1245_v20  ;;  %v1277_v18 = vadd.f32 1.0, %v1273_v25 }
 0x356   :  { %v1281_v31 = vmul.f32 %v4741_v15, %v1276_v11  ;;  %v1233_v17 = vmul.f32 %v4739_v8, %v1232_v22  ;;  %vm1286_vm12 = vweird.f32 %v4741_v15 }
 0x357   :  { %v5892_v37 = vmul.f32 0.70710677, %v5884_v27  ;;  %4742 = vrcp.f32 %v1277_v18  ;;  %vm1287_vm14 = vmor %vm1285_vm13, %vm1286_vm12  ;;  %v1306_v6 = vand.u32 2147483648, %v1277_v18  ;;  %v1304_v11 = vand.u32 2147483647, %v1277_v18 }
 0x358   :  { %v1282_v38 = vsub.f32 1.0, %v1281_v31  ;;  %v1237_v13 = vsel %vm1236_vm11, %v4739_v8, %v1233_v17  ;;  %vm1300_vm2 = vweird.f32 %v1277_v18  ;;  %v4507_v17 = vmul.f32 -1.442695, %v5916_v61 }
 0x359   :  { %v1241_v41 = vmul.f32 %v1237_v13, %v5814_v57  ;;  %v5899_v36 = vand.u32 2147483647, %v5892_v37  ;;  %v1307_v51 = vor.u32 1.1754944e-38, %v1306_v6  ;;  %vm1305_vm5 = vcmp.eq.f32.partialorder %v1304_v11, 8.507059e+37 }
 0x35a   :  { %v1283_v40 = vmul.f32 %v4741_v15, %v1282_v38  ;;  %v1377_v38 = vsub.f32 0.0, %v5879_v19 }
 0x35b   :  { %v1246_v0 = vmul.f32 %v5838_v21, %v1241_v41  ;;  %v1274_v29 = vmul.f32 0.3275911, %v5899_v36 }
 0x35c   :  { %v1284_v39 = vadd.f32 %v4741_v15, %v1283_v40 }
 0x35d   :  { %v5904_v57 = vadd.f32 %v5846_v43, %v1246_v0  ;;  %v4743_v33 = vpop.eup %4742  ;;  %v1278_v49 = vadd.f32 1.0, %v1274_v29  ;;  %v1381_v29 = vmul.f32 %v1377_v38, %v5879_v19 }
 0x35e   :  { %v1288_v48 = vsel %vm1287_vm14, %v4741_v15, %v1284_v39  ;;  %v1296_v21 = vmul.f32 %v4743_v33, %v1277_v18  ;;  %vm1301_vm1 = vweird.f32 %v4743_v33 }
 0x35f   :  { %v1293_v56 = vsel %vm1290_vm15, %v1292_v47, %v1288_v48  ;;  %v5909_v63 = vmul.f32 0.70710677, %v5904_v57  ;;  %4744 = vrcp.f32 %v1278_v49  ;;  %vm1302_vm3 = vmor %vm1300_vm2, %vm1301_vm1  ;;  %v1319_v40 = vand.u32 2147483647, %v1278_v49 }
 0x360   :  { %v1340_v60 = vmul.f32 1.0614054, %v1293_v56  ;;  %4746 = vpow2.f32 %v4506_v53  ;;  %v1297_v43 = vsub.f32 1.0, %v1296_v21  ;;  %v1321_v45 = vand.u32 2147483648, %v1278_v49  ;;  %v917_v53 = vpop.f32.mrf.mxu2 }
 0x361   :  { %v5913_v3 = vand.u32 2147483647, %v5909_v63  ;;  %vm1315_vm7 = vweird.f32 %v1278_v49  ;;  %vm1320_vm9 = vcmp.eq.f32.partialorder %v1319_v40, 8.507059e+37  ;;  %v1386_v19 = vmul.f32 1.442695, %v1381_v29 }
 0x362   :  { %v1344_v2 = vadd.f32 -1.4531521, %v1340_v60  ;;  %v1298_v8 = vmul.f32 %v4743_v33, %v1297_v43  ;;  %v1322_v21 = vor.u32 1.1754944e-38, %v1321_v45  ;;  %vm1261_vm15 = vcmp.ge.f32.partialorder %v5876_v35, 0.0 }
 0x363   :  { %v1275_v14 = vmul.f32 0.3275911, %v5913_v3  ;;  %vm1262_vm1 = vcmp.ge.f32.partialorder %v5892_v37, 0.0 }
 0x364   :  { %v1348_v58 = vmul.f32 %v1344_v2, %v1293_v56  ;;  %v1299_v10 = vadd.f32 %v4743_v33, %v1298_v8  ;;  %v1378_v8 = vsub.f32 0.0, %v5899_v36 }
 0x365   :  { %v4745_v62 = vpop.eup %4744  ;;  %v5919_v20 = vadd.f32 1.0, %v1275_v14 }
 0x366   :  { %v1352_v16 = vadd.f32 1.4214138, %v1348_v58  ;;  %v4747_v22 = vpop.eup %4746  ;;  %v1303_v25 = vsel %vm1302_vm3, %v4743_v33, %v1299_v10  ;;  %v1311_v31 = vmul.f32 %v4745_v62, %v1278_v49  ;;  %vm1316_vm6 = vweird.f32 %v4745_v62 }
 0x367   :  { %v5922_v32 = vsel %vm1305_vm5, %v1307_v51, %v1303_v25  ;;  %4748 = vrcp.f32 %v5919_v20  ;;  %v5927_v42 = vadd.f32 1.0, %v4747_v22  ;;  %vm1317_vm8 = vmor %vm1315_vm7, %vm1316_vm6  ;;  %vm1330_vm12 = vweird.f32 %v5919_v20 }
 0x368   :  { %v1356_v15 = vmul.f32 %v1352_v16, %v1293_v56  ;;  %v1341_v13 = vmul.f32 1.0614054, %v5922_v32  ;;  %v1312_v41 = vsub.f32 1.0, %v1311_v31  ;;  %4750 = vpow2.f32 %v1384_v5 }
 0x369   :  { %4752 = vpow2.f32 %v4507_v17  ;;  %v1336_v5 = vand.u32 2147483648, %v5919_v20  ;;  %v7627_v17 = vmov -1.0   ;;  %vm944_vm2 = vweird.f32 %v5927_v42 }
 0x36a   :  { %v1360_v18 = vadd.f32 -0.28449672, %v1356_v15  ;;  %v1345_v39 = vadd.f32 -1.4531521, %v1341_v13  ;;  %v1313_v47 = vmul.f32 %v4745_v62, %v1312_v41  ;;  %4754 = vrcp.f32 %v5927_v42 }
 0x36b   :  { %v1264_v38 = vsel %vm1260_vm10, 1.0, %v7627_v17  ;;  %4756 = vpow2.f32 %v1386_v19  ;;  %v2730_v19 = vld [vmem:[%s7598_s19] sm:$0xff]  ;;  %vm1263_vm5 = vcmp.ge.f32.partialorder %v5909_v63, 0.0 }
 0x36c   :  { %v1364_v0 = vmul.f32 %v1360_v18, %v1293_v56  ;;  %v1349_v33 = vmul.f32 %v1345_v39, %v5922_v32  ;;  %v1314_v54 = vadd.f32 %v4745_v62, %v1313_v47  ;;  %v1382_v18 = vmul.f32 %v1378_v8, %v5899_v36  ;;  %v920_v47 = vpop.f32.mrf.mxu2 }
 0x36d   :  { %v4749_v60 = vpop.eup %4748  ;;  %v1252_v36 = vmul.f32 0.5, %v5857_v26  ;;  %v5972_v8 = vadd.f32 %v5889_v59, %v920_v47 }
 0x36e   :  { %v1368_v48 = vadd.f32 0.2548296, %v1364_v0  ;;  %v1353_v2 = vadd.f32 1.4214138, %v1349_v33  ;;  %v1318_v43 = vsel %vm1317_vm8, %v4745_v62, %v1314_v54  ;;  %v1326_v4 = vmul.f32 %v4749_v60, %v5919_v20  ;;  %v4751_v6 = vpop.eup %4750  ;;  %v2733_v0 = vld [vmem:[%s7598_s19 + $0x18] sm:$0xff]  ;;  %v2731_v54 = vld [vmem:[%s7598_s19 + $0x8] sm:$0xff] }
 0x36f   :  { %v5934_v58 = vsel %vm1320_vm9, %v1322_v21, %v1318_v43  ;;  %v4753_v10 = vpop.eup %4752  ;;  %vm1331_vm11 = vweird.f32 %v4749_v60  ;;  %v1334_v62 = vand.u32 2147483647, %v5919_v20  ;;  %v1337_v20 = vor.u32 1.1754944e-38, %v1336_v5  ;;  %2760 = vmatpush.msrb.mxu3 %v2733_v0 }
 0x370   :  { %v1372_v30 = vmul.f32 %v1368_v48, %v1293_v56  ;;  %v1357_v11 = vmul.f32 %v1353_v2, %v5922_v32  ;;  %v1342_v14 = vmul.f32 1.0614054, %v5934_v58  ;;  %v1327_v16 = vsub.f32 1.0, %v1326_v4  ;;  %v5944_v31 = vpop.eup %4754  ;;  %vm1332_vm13 = vmor %vm1330_vm12, %vm1331_vm11 }
 0x371   :  { %v5940_v56 = vadd.f32 %v5889_v59, %v917_v53  ;;  %vm1335_vm14 = vcmp.eq.f32.partialorder %v1334_v62, 8.507059e+37  ;;  %v1388_v21 = vmul.f32 1.442695, %v1382_v18  ;;  %v1379_v2 = vsub.f32 0.0, %v5913_v3  ;;  %2761 = vmatpush.msrb.mxu3 %v2732_v50 }
 0x372   :  { %v1392_v49 = vmul.f32 %v4751_v6, %v1372_v30  ;;  %v1361_v22 = vadd.f32 -0.28449672, %v1357_v11  ;;  %v1346_v15 = vadd.f32 -1.4531521, %v1342_v14  ;;  %v1328_v25 = vmul.f32 %v4749_v60, %v1327_v16 }
 0x373   :  { %v4508_v39 = vmul.f32 -1.442695, %v5940_v56  ;;  %2762 = vmatpush.msrb.mxu3 %v2731_v54  ;;  %v5976_v14 = vadd.f32 1.0, %v4753_v10  ;;  %v1383_v16 = vmul.f32 %v1379_v2, %v5913_v3  ;;  %v4509_v59 = vmul.f32 -1.442695, %v5972_v8 }
 0x374   :  { %v1396_v51 = vsub.f32 1.0, %v1392_v49  ;;  %v1365_v41 = vmul.f32 %v1361_v22, %v5922_v32  ;;  %v1350_v40 = vmul.f32 %v1346_v15, %v5934_v58  ;;  %v1329_v45 = vadd.f32 %v4749_v60, %v1328_v25 }
 0x375   :  { %4758 = vpow2.f32 %v4508_v39  ;;  %2763 = vmatpush.msrb.mxu3 %v2730_v19  ;;  %v1265_v22 = vsel %vm1261_vm15, 1.0, %v7627_v17  ;;  %v940_v10 = vmul.f32 %v5944_v31, %v5927_v42  ;;  %v1390_v18 = vmul.f32 1.442695, %v1383_v16 }
 0x376   :  { %v1400_v13 = vmul.f32 %v1396_v51, %v1264_v38  ;;  %v1369_v53 = vadd.f32 0.2548296, %v1365_v41  ;;  %v1354_v48 = vadd.f32 1.4214138, %v1350_v40  ;;  %v1333_v33 = vsel %vm1332_vm13, %v4749_v60, %v1329_v45  ;;  %v4757_v60 = vpop.eup %4756 }
 0x377   :  { %v1338_v30 = vsel %vm1335_vm14, %v1337_v20, %v1333_v33  ;;  %4760 = vpow2.f32 %v1388_v21  ;;  %v1253_v3 = vmul.f32 0.5, %v5872_v9  ;;  %v1254_v21 = vmul.f32 0.5, %v5884_v27 }
 0x378   :  { %v1404_v29 = vadd.f32 1.0, %v1400_v13  ;;  %v1373_v43 = vmul.f32 %v1369_v53, %v5922_v32  ;;  %v1358_v4 = vmul.f32 %v1354_v48, %v5934_v58  ;;  %v1343_v6 = vmul.f32 1.0614054, %v1338_v30 }
 0x379   :  { %4762 = vrcp.f32 %v5976_v14  ;;  %v1266_v53 = vsel %vm1262_vm1, 1.0, %v7627_v17  ;;  %vm945_vm3 = vweird.f32 %v5944_v31  ;;  %vm959_vm8 = vweird.f32 %v5976_v14 }
 0x37a   :  { %v1408_v26 = vmul.f32 %v1404_v29, %v1252_v36  ;;  %v1393_v49 = vmul.f32 %v4757_v60, %v1373_v43  ;;  %v1362_v11 = vadd.f32 -0.28449672, %v1358_v4  ;;  %v1347_v32 = vadd.f32 -1.4531521, %v1343_v6  ;;  %vm6002_vm6 = vmor %vm944_vm2, %vm945_vm3 }
 0x37b   :  { %v4759_v38 = vpop.eup %4758  ;;  %4764 = vpow2.f32 %v4509_v59  ;;  %v941_v36 = vsub.f32 1.0, %v940_v10  ;;  %v948_v60 = vand.u32 2147483647, %v5927_v42 }
 0x37c   :  { %4522 = vmatmul.msk.f32.vlgmr.msra.gmra.mxu3 %vm582_vm0, %v1408_v26  ;;  %v1397_v62 = vsub.f32 1.0, %v1393_v49  ;;  %v1366_v5 = vmul.f32 %v1362_v11, %v5934_v58  ;;  %v1351_v51 = vmul.f32 %v1347_v32, %v1338_v30  ;;  %v5988_v20 = vadd.f32 1.0, %v4759_v38 }
 0x37d   :  { %v4761_v45 = vpop.eup %4760  ;;  %4766 = vpow2.f32 %v1390_v18  ;;  %v942_v54 = vmul.f32 %v5944_v31, %v941_v36  ;;  %v950_v49 = vand.u32 2147483648, %v5927_v42  ;;  %vm949_vm7 = vcmp.eq.f32.partialorder %v948_v60, 8.507059e+37 }
 0x37e   :  { %v1401_v15 = vmul.f32 %v1397_v62, %v1265_v22  ;;  %v1370_v25 = vadd.f32 0.2548296, %v1366_v5  ;;  %v1355_v35 = vadd.f32 1.4214138, %v1351_v51  ;;  %4768 = vrcp.f32 %v5988_v20 }
 0x37f   :  { %v4763_v9 = vpop.eup %4762  ;;  %v943_v19 = vadd.f32 %v5944_v31, %v942_v54  ;;  %v1267_v62 = vsel %vm1263_vm5, 1.0, %v7627_v17  ;;  %v951_v51 = vor.u32 1.1754944e-38, %v950_v49  ;;  %v1255_v22 = vmul.f32 0.5, %v5904_v57 }
 0x380   :  { %v1405_v13 = vadd.f32 1.0, %v1401_v15  ;;  %v1374_v41 = vmul.f32 %v1370_v25, %v5934_v58  ;;  %v1359_v40 = vmul.f32 %v1355_v35, %v1338_v30  ;;  %v955_v37 = vmul.f32 %v4763_v9, %v5976_v14 }
 0x381   :  { %v4765_v33 = vpop.eup %4764  ;;  %v947_v5 = vsel %vm6002_vm6, %v5944_v31, %v943_v19  ;;  %vm960_vm9 = vweird.f32 %v4763_v9  ;;  %v965_v38 = vand.u32 2147483648, %v5976_v14  ;;  %v963_v18 = vand.u32 2147483647, %v5976_v14 }
 0x382   :  { %v1409_v0 = vmul.f32 %v1405_v13, %v1253_v3  ;;  %v1394_v50 = vmul.f32 %v4761_v45, %v1374_v41  ;;  %v1363_v39 = vadd.f32 -0.28449672, %v1359_v40  ;;  %v938_v11 = vadd.f32 1.0, %v4765_v33  ;;  %vm961_vm10 = vmor %vm959_vm8, %vm960_vm9 }
 0x383   :  { %v4767_v43 = vpop.eup %4766  ;;  %v952_v35 = vsel %vm949_vm7, %v951_v51, %v947_v5  ;;  %v966_v41 = vor.u32 1.1754944e-38, %v965_v38  ;;  %vm964_vm11 = vcmp.eq.f32.partialorder %v963_v18, 8.507059e+37  ;;  %vm974_vm12 = vweird.f32 %v5988_v20 }
 0x384   :  { %4523 = vmatmul.msk.f32.gmra.mxu3 %vm582_vm0, %v1409_v0  ;;  %v1398_v47 = vsub.f32 1.0, %v1394_v50  ;;  %v1367_v29 = vmul.f32 %v1363_v39, %v1338_v30  ;;  %v4769_v16 = vpop.eup %4768  ;;  %4770 = vrcp.f32 %v938_v11  ;;  %v999_v13 = vmul.f32 %v952_v35, %v5896_v28 }
 0x385   :  { %v970_v59 = vmul.f32 %v4769_v16, %v5988_v20  ;;  %vm975_vm13 = vweird.f32 %v4769_v16  ;;  %v980_v14 = vand.u32 2147483648, %v5988_v20  ;;  %v978_v36 = vand.u32 2147483647, %v5988_v20 }
 0x386   :  { %v1402_v58 = vmul.f32 %v1398_v47, %v1266_v53  ;;  %v1371_v48 = vadd.f32 0.2548296, %v1367_v29  ;;  %v6019_v0 = vadd.f32 %v999_v13, %v5737_v7  ;;  %vm976_vm14 = vmor %vm974_vm12, %vm975_vm13  ;;  %vm989_vm1 = vweird.f32 %v938_v11 }
 0x387   :  { %v971_v31 = vsub.f32 1.0, %v970_v59  ;;  %v981_v29 = vor.u32 1.1754944e-38, %v980_v14  ;;  %vm979_vm15 = vcmp.eq.f32.partialorder %v978_v36, 8.507059e+37  ;;  %v993_v20 = vand.u32 2147483647, %v938_v11 }
 0x388   :  { %v1406_v2 = vadd.f32 1.0, %v1402_v58  ;;  %v1375_v26 = vmul.f32 %v1371_v48, %v1338_v30  ;;  %v956_v30 = vsub.f32 1.0, %v955_v37  ;;  %v995_v48 = vand.u32 2147483648, %v938_v11 }
 0x389   :  { %v972_v40 = vmul.f32 %v4769_v16, %v971_v31  ;;  %vm994_vm5 = vcmp.eq.f32.partialorder %v993_v20, 8.507059e+37  ;;  %v1139_v20 = vld [vmem:[%s7654_s9 + $0x10] sm:$0xff] }
 0x38a   :  { %v1410_v4 = vmul.f32 %v1406_v2, %v1254_v21  ;;  %v1395_v6 = vmul.f32 %v4767_v43, %v1375_v26  ;;  %v957_v42 = vmul.f32 %v4763_v9, %v956_v30  ;;  %v4771_v3 = vpop.eup %4770 }
 0x38b   :  { %v985_v45 = vmul.f32 %v4771_v3, %v938_v11  ;;  %v973_v39 = vadd.f32 %v4769_v16, %v972_v40  ;;  %vm990_vm2 = vweird.f32 %v4771_v3 }
 0x38c   :  { %4524 = vmatmul.msk.f32.gmra.mxu3 %vm582_vm0, %v1410_v4  ;;  %v1399_v32 = vsub.f32 1.0, %v1395_v6  ;;  %v958_v10 = vadd.f32 %v4763_v9, %v957_v42  ;;  %vm991_vm3 = vmor %vm989_vm1, %vm990_vm2 }
 0x38d   :  { %v986_v47 = vsub.f32 1.0, %v985_v45 }
 0x38e   :  { %v1403_v63 = vmul.f32 %v1399_v32, %v1267_v62  ;;  %v962_v57 = vsel %vm961_vm10, %v4763_v9, %v958_v10  ;;  %v977_v9 = vsel %vm976_vm14, %v4769_v16, %v973_v39  ;;  %v4984_v32 = vmov 32.0  }
 0x38f   :  { %v967_v50 = vsel %vm964_vm11, %v966_v41, %v962_v57  ;;  %v987_v7 = vmul.f32 %v4771_v3, %v986_v47  ;;  %v982_v58 = vsel %vm979_vm15, %v981_v29, %v977_v9  ;;  %4772 = vrcp.f32 %v4984_v32  ;;  %v1137_v29 = vld [vmem:[%s7654_s9] sm:$0xff] }
 0x390   :  { %v1407_v15 = vadd.f32 1.0, %v1403_v63  ;;  %v1000_v28 = vmul.f32 %v967_v50, %v5916_v61  ;;  %v1001_v54 = vmul.f32 %v982_v58, %v5940_v56  ;;  %v996_v61 = vor.u32 1.1754944e-38, %v995_v48  ;;  %v4625_v56 = vld [vmem:[%s7599_s20 + $0x2] ss:$0 sm:$0xff]  ;;  %v6092_v58 = vld [vmem:[%s7653_s10 + $0x8] sm:$0xff] }
 0x391   :  { %v988_v33 = vadd.f32 %v4771_v3, %v987_v7  ;;  %v1138_v48 = vld [vmem:[%s7654_s9 + $0x8] sm:$0xff] }
 0x392   :  { %v1411_v25 = vmul.f32 %v1407_v15, %v1255_v22  ;;  %v6028_v53 = vadd.f32 %v1000_v28, %v5744_v12  ;;  %v6034_v21 = vadd.f32 %v1001_v54, %v5666_v24  ;;  %v6080_v28 = vld [vmem:[%s7653_s10] sm:$0xff] }
 0x393   :  { %v992_v37 = vsel %vm991_vm3, %v4771_v3, %v988_v33  ;;  %vm1864_vm7 = vcmp.ge.s32.totalorder %v6080_v28, 0  ;;  %vm1868_vm8 = vcmp.lt.s32.totalorder %v6080_v28, 16  ;;  %v1913_v7 = vadd.s32 1, %v6080_v28 }
 0x394   :  { %4525 = vmatmul.msk.f32.gmra.mxu3 %vm582_vm0, %v1411_v25  ;;  %v997_v2 = vsel %vm994_vm5, %v996_v61, %v992_v37  ;;  %vm1872_vm9 = vmand %vm1864_vm7, %vm1868_vm8  ;;  %v1914_v33 = vadd.s32 1, %v6092_v58  ;;  %v1824_v54 = vadd.s32 4294967295, %v6080_v28  ;;  %vm1865_vm5 = vcmp.ge.s32.totalorder %v6092_v58, 0 }
 0x395   :  { %v1002_v12 = vmul.f32 %v997_v2, %v5972_v8  ;;  %v4773_v16 = vpop.eup %4772  ;;  %v1876_v9 = vsel %vm1872_vm9, 1, %v7625_v44  ;;  %vm1917_vm10 = vcmp.ge.s32.totalorder %v1913_v7, 0  ;;  %vm1921_vm11 = vcmp.lt.s32.totalorder %v1913_v7, 16  ;;  %v6109_v2 = vld [vmem:[%s7653_s10 + $0x10] sm:$0xff]  ;;  %v6151_v7 = vld [vmem:[%s7599_s20 + $0x4] ss:$0 sm:$0xff] }
 0x396   :  { %v1478_v62 = vmul.f32 32.0, %v4773_v16  ;;  %vm1482_vm6 = vweird.f32 %v4773_v16  ;;  %vm1925_vm12 = vmand %vm1917_vm10, %vm1921_vm11  ;;  %vm1918_vm13 = vcmp.ge.s32.totalorder %v1914_v33, 0  ;;  %vm1922_vm14 = vcmp.lt.s32.totalorder %v1914_v33, 16 }
 0x397   :  { %v6040_v26 = vadd.f32 %v1002_v12, %v5684_v52  ;;  %vm1828_vm15 = vcmp.ge.s32.totalorder %v1824_v54, 0  ;;  %vm1832_vm1 = vcmp.lt.s32.totalorder %v1824_v54, 16  ;;  %v1929_v37 = vsel %vm1925_vm12, 1, %v7625_v44  ;;  %vm1926_vm3 = vmand %vm1918_vm13, %vm1922_vm14 }
 0x398   :  { %v1479_v63 = vsub.f32 1.0, %v1478_v62  ;;  %vm1836_vm2 = vmand %vm1828_vm15, %vm1832_vm1  ;;  %v1930_v12 = vsel %vm1926_vm3, 1, %v7625_v44  ;;  %vm1866_vm8 = vcmp.ge.s32.totalorder %v6109_v2, 0  ;;  %vm1870_vm9 = vcmp.lt.s32.totalorder %v6109_v2, 16 }
 0x399   :  { %v1840_v61 = vsel %vm1836_vm2, 1, %v7625_v44  ;;  %vm1874_vm13 = vmand %vm1866_vm8, %vm1870_vm9 }
 0x39a   :  { %v1480_v5 = vmul.f32 %v4773_v16, %v1479_v63 }
 0x39c   :  { %4534 = vmatmul.msk.f32.vlgmr.msrb.gmra.mxu3 %vm270_vm4, %v6019_v0  ;;  %v1481_v51 = vadd.f32 %v4773_v16, %v1480_v5 }
 0x39e   :  { %v6051_v42 = vsel %vm1482_vm6, %v4773_v16, %v1481_v51  ;;  %vm1869_vm6 = vcmp.lt.s32.totalorder %v6092_v58, 16 }
 0x39f   :  { %vm1873_vm7 = vmand %vm1865_vm5, %vm1869_vm6 }
 0x3a4   :  { %4535 = vmatmul.msk.f32.gmra.mxu3 %vm270_vm4, %v6028_v53 }
 0x3ac   :  { %4536 = vmatmul.msk.f32.gmra.mxu3 %vm270_vm4, %v6034_v21 }
 0x3b4   :  { %4537 = vmatmul.msk.f32.gmra.mxu3 %vm270_vm4, %v6040_v26 }
 0x3ff   :  { %v1451_v43 = vpop.f32.mrf.mxu3 }
 0x400   :  { %v1452_v4 = vadd.f32 %v4625_v56, %v1451_v43  ;;  %v1826_v43 = vadd.s32 4294967295, %v6109_v2 }
 0x402   :  { %v1465_v24 = vsel %vm270_vm4, %v1452_v4, 0.0  ;;  %vm1830_vm14 = vcmp.ge.s32.totalorder %v1826_v43, 0  ;;  %vm1834_vm15 = vcmp.lt.s32.totalorder %v1826_v43, 16 }
 0x403   :  { %1466 = vadd.xlane.f32.xlu2 %v1465_v24  ;;  %v1877_v24 = vsel %vm1873_vm7, 1, %v7625_v44  ;;  %vm1838_vm1 = vmand %vm1830_vm14, %vm1834_vm15 }
 0x407   :  { %v1454_v6 = vpop.f32.mrf.mxu3 }
 0x408   :  { %v1455_v19 = vadd.f32 %v4625_v56, %v1454_v6  ;;  %v6121_v6 = vld [vmem:[%s7653_s10 + $0x18] sm:$0xff] }
 0x409   :  { %vm1867_vm2 = vcmp.ge.s32.totalorder %v6121_v6, 0  ;;  %vm1871_vm3 = vcmp.lt.s32.totalorder %v6121_v6, 16 }
 0x40a   :  { %v1468_v60 = vsel %vm270_vm4, %v1455_v19, 0.0  ;;  %vm1875_vm5 = vmand %vm1867_vm2, %vm1871_vm3 }
 0x40b   :  { %1469 = vadd.xlane.f32.xlu2 %v1468_v60  ;;  %v1915_v60 = vadd.s32 1, %v6109_v2 }
 0x40d   :  { %vm1919_vm6 = vcmp.ge.s32.totalorder %v1915_v60, 0  ;;  %vm1923_vm7 = vcmp.lt.s32.totalorder %v1915_v60, 16 }
 0x40f   :  { %v1457_v8 = vpop.f32.mrf.mxu3 }
 0x410   :  { %v1458_v52 = vadd.f32 %v4625_v56, %v1457_v8  ;;  %v1827_v8 = vadd.s32 4294967295, %v6121_v6 }
 0x412   :  { %v1471_v49 = vsel %vm270_vm4, %v1458_v52, 0.0  ;;  %vm1831_vm8 = vcmp.ge.s32.totalorder %v1827_v8, 0  ;;  %vm1835_vm9 = vcmp.lt.s32.totalorder %v1827_v8, 16 }
 0x413   :  { %1472 = vadd.xlane.f32.xlu0 %v1471_v49  ;;  %v1842_v49 = vsel %vm1838_vm1, 1, %v7625_v44 }
 0x417   :  { %v1460_v11 = vpop.f32.mrf.mxu3 }
 0x418   :  { %v1461_v27 = vadd.f32 %v4625_v56, %v1460_v11  ;;  %v1825_v56 = vadd.s32 4294967295, %v6092_v58  ;;  %v1879_v11 = vsel %vm1875_vm5, 1, %v7625_v44 }
 0x41a   :  { %v1474_v30 = vsel %vm270_vm4, %v1461_v27, 0.0  ;;  %vm1829_vm10 = vcmp.ge.s32.totalorder %v1825_v56, 0  ;;  %vm1833_vm11 = vcmp.lt.s32.totalorder %v1825_v56, 16 }
 0x41b   :  { %1475 = vadd.xlane.f32.xlu1 %v1474_v30  ;;  %vm1837_vm12 = vmand %vm1829_vm10, %vm1833_vm11  ;;  %v1771_v30 = vadd.s32 4294967294, %v6080_v28 }
 0x41c   :  { %vm1927_vm10 = vmand %vm1919_vm6, %vm1923_vm7 }
 0x41d   :  { %vm1839_vm11 = vmand %vm1831_vm8, %vm1835_vm9  ;;  %v1931_v32 = vsel %vm1927_vm10, 1, %v7625_v44  ;;  %vm1775_vm14 = vcmp.ge.s32.totalorder %v1771_v30, 0  ;;  %vm1779_vm15 = vcmp.lt.s32.totalorder %v1771_v30, 16 }
 0x41e   :  { %v1843_v16 = vsel %vm1839_vm11, 1, %v7625_v44  ;;  %vm1783_vm2 = vmand %vm1775_vm14, %vm1779_vm15 }
 0x41f   :  { %v1787_v63 = vsel %vm1783_vm2, 1, %v7625_v44 }
 0x476   :  { %v1467_v59 = vpop.xlane.xlu2 %1466 }
 0x477   :  { %v1484_v22 = vmul.f32 %v6051_v42, %v1467_v59 }
 0x479   :  { %v6054_v15 = vsub.f32 %v1452_v4, %v1484_v22  ;;  %v1841_v4 = vsel %vm1837_vm12, 1, %v7625_v44 }
 0x47b   :  { %v1492_v25 = vmul.f32 %v6054_v15, %v6054_v15 }
 0x47d   :  { %v1496_v35 = vsel %vm270_vm4, %v1492_v25, 0.0 }
 0x47e   :  { %1497 = vadd.xlane.f32.xlu2 %v1496_v35  ;;  %v1470_v38 = vpop.xlane.xlu2 %1469 }
 0x47f   :  { %v1485_v10 = vmul.f32 %v6051_v42, %v1470_v38 }
 0x481   :  { %v6060_v18 = vsub.f32 %v1455_v19, %v1485_v10  ;;  %v1878_v19 = vsel %vm1874_vm13, 1, %v7625_v44 }
 0x483   :  { %v1493_v31 = vmul.f32 %v6060_v18, %v6060_v18 }
 0x485   :  { %v1499_v3 = vsel %vm270_vm4, %v1493_v31, 0.0 }
 0x486   :  { %v1473_v13 = vpop.xlane.xlu0 %1472  ;;  %1500 = vadd.xlane.f32.xlu0 %v1499_v3 }
 0x487   :  { %v1486_v41 = vmul.f32 %v6051_v42, %v1473_v13 }
 0x489   :  { %v6066_v57 = vsub.f32 %v1458_v52, %v1486_v41  ;;  %v1140_v52 = vld [vmem:[%s7654_s9 + $0x18] sm:$0xff]  ;;  %s4987_s9 = smov 96  }
 0x48b   :  { %v1494_v40 = vmul.f32 %v6066_v57, %v6066_v57 }
 0x48d   :  { %v1502_v45 = vsel %vm270_vm4, %v1494_v40, 0.0 }
 0x48e   :  { %1503 = vadd.xlane.f32.xlu1 %v1502_v45  ;;  %v1476_v50 = vpop.xlane.xlu1 %1475 }
 0x48f   :  { %v1487_v14 = vmul.f32 %v6051_v42, %v1476_v50 }
 0x491   :  { %v6072_v39 = vsub.f32 %v1461_v27, %v1487_v14  ;;  %v1916_v27 = vadd.s32 1, %v6121_v6 }
 0x493   :  { %v1495_v36 = vmul.f32 %v6072_v39, %v6072_v39  ;;  %vm1920_vm12 = vcmp.ge.s32.totalorder %v1916_v27, 0  ;;  %vm1924_vm13 = vcmp.lt.s32.totalorder %v1916_v27, 16 }
 0x494   :  { %vm1928_vm1 = vmand %vm1920_vm12, %vm1924_vm13 }
 0x495   :  { %v1505_v47 = vsel %vm270_vm4, %v1495_v36, 0.0  ;;  %v1932_v62 = vsel %vm1928_vm1, 1, %v7625_v44  ;;  %v6145_v36 = vld [vmem:[%s7599_s20 + $0x3] ss:$0 sm:$0xff] }
 0x496   :  { %1506 = vadd.xlane.f32.xlu2 %v1505_v47 }
 0x49a   :  { %1732 = vperm.xlu0 %4573, %v1137_v29  }
 0x4a2   :  { %1881 = vperm.xlu0 %4573, %v1876_v9  }
 0x4a7   :  { %1737 = vperm.xlu1 %4574, %v1138_v48  }
 0x4aa   :  { %1742 = vperm.xlu0 %4573, %v1139_v20  }
 0x4ae   :  { %1845 = vperm.xlu2 %4575, %v1840_v61  }
 0x4af   :  { %1934 = vperm.xlu1 %4574, %v1929_v37  }
 0x4b2   :  { %1937 = vperm.xlu0 %4573, %v1930_v12  }
 0x4b6   :  { %1848 = vperm.xlu2 %4575, %v1841_v4  }
 0x4b7   :  { %1884 = vperm.xlu1 %4574, %v1877_v24  }
 0x4ba   :  { %1887 = vperm.xlu0 %4573, %v1878_v19  }
 0x4be   :  { %1747 = vperm.xlu2 %4575, %v1140_v52  }
 0x4bf   :  { %1851 = vperm.xlu1 %4574, %v1842_v49  }
 0x4c2   :  { %1890 = vperm.xlu0 %4573, %v1879_v11  }
 0x4c6   :  { %1940 = vperm.xlu2 %4575, %v1931_v32  }
 0x4c7   :  { %1854 = vperm.xlu1 %4574, %v1843_v16  }
 0x4ce   :  { %1943 = vperm.xlu2 %4575, %v1932_v62  }
 0x4cf   :  { %1792 = vperm.xlu1 %4574, %v1787_v63  }
 0x4f1   :  { %v1498_v5 = vpop.xlane.xlu2 %1497 }
 0x4f2   :  { %v1508_v51 = vmul.f32 %v1498_v5, %v6051_v42 }
 0x4f4   :  { %v1512_v59 = vadd.f32 1e-05, %v1508_v51 }
 0x4f6   :  { %4774 = vrsqrt.f32 %v1512_v59  ;;  %vm1522_vm5 = vweird.f32 %v1512_v59 }
 0x4f9   :  { %v1501_v22 = vpop.xlane.xlu0 %1500 }
 0x4fa   :  { %v1509_v35 = vmul.f32 %v1501_v22, %v6051_v42 }
 0x4fc   :  { %v4775_v25 = vpop.eup %4774  ;;  %v1513_v10 = vadd.f32 1e-05, %v1509_v35 }
 0x4fd   :  { %v1517_v38 = vmul.f32 %v4775_v25, %v1512_v59  ;;  %vm1523_vm3 = vweird.f32 %v4775_v25 }
 0x4fe   :  { %4776 = vrsqrt.f32 %v1513_v10  ;;  %vm1524_vm6 = vmor %vm1522_vm5, %vm1523_vm3  ;;  %vm1532_vm8 = vweird.f32 %v1513_v10 }
 0x4ff   :  { %v1518_v31 = vmul.f32 %v4775_v25, %v1517_v38 }
 0x501   :  { %v1519_v3 = vmul.f32 0.5, %v1518_v31  ;;  %v1504_v41 = vpop.xlane.xlu1 %1503 }
 0x502   :  { %v1510_v40 = vmul.f32 %v1504_v41, %v6051_v42 }
 0x503   :  { %v1520_v13 = vsub.f32 1.5, %v1519_v3 }
 0x504   :  { %v4777_v50 = vpop.eup %4776  ;;  %v1514_v14 = vadd.f32 1e-05, %v1510_v40 }
 0x505   :  { %v1521_v45 = vmul.f32 %v4775_v25, %v1520_v13  ;;  %v1527_v29 = vmul.f32 %v4777_v50, %v1513_v10  ;;  %vm1533_vm7 = vweird.f32 %v4777_v50 }
 0x506   :  { %4778 = vrsqrt.f32 %v1514_v14  ;;  %vm1534_vm9 = vmor %vm1532_vm8, %vm1533_vm7  ;;  %vm1542_vm11 = vweird.f32 %v1514_v14 }
 0x507   :  { %v1525_v47 = vsel %vm1524_vm6, %v4775_v25, %v1521_v45  ;;  %v1528_v48 = vmul.f32 %v4777_v50, %v1527_v29 }
 0x508   :  { %v1556_v9 = vmul.f32 %v1525_v47, %v6054_v15 }
 0x509   :  { %v1529_v20 = vmul.f32 0.5, %v1528_v48  ;;  %v1507_v54 = vpop.xlane.xlu2 %1506 }
 0x50a   :  { %v1561_v33 = vmul.f32 %v6145_v36, %v1556_v9  ;;  %v1511_v61 = vmul.f32 %v1507_v54, %v6051_v42 }
 0x50b   :  { %v1530_v12 = vsub.f32 1.5, %v1529_v20 }
 0x50c   :  { %v6156_v37 = vadd.f32 %v6151_v7, %v1561_v33  ;;  %v4779_v56 = vpop.eup %4778  ;;  %v1515_v15 = vadd.f32 1e-05, %v1511_v61 }
 0x50d   :  { %v1531_v4 = vmul.f32 %v4777_v50, %v1530_v12  ;;  %v1537_v24 = vmul.f32 %v4779_v56, %v1514_v14  ;;  %vm1543_vm10 = vweird.f32 %v4779_v56 }
 0x50e   :  { %v6159_v43 = vmul.f32 0.70710677, %v6156_v37  ;;  %4780 = vrsqrt.f32 %v1515_v15  ;;  %vm1544_vm12 = vmor %vm1542_vm11, %vm1543_vm10  ;;  %vm1552_vm14 = vweird.f32 %v1515_v15 }
 0x50f   :  { %v1535_v60 = vsel %vm1534_vm9, %v4777_v50, %v1531_v4  ;;  %v1538_v8 = vmul.f32 %v4779_v56, %v1537_v24 }
 0x510   :  { %v1586_v19 = vand.u32 2147483647, %v6159_v43  ;;  %v1557_v52 = vmul.f32 %v1535_v60, %v6060_v18 }
 0x511   :  { %v1539_v11 = vmul.f32 0.5, %v1538_v8 }
 0x512   :  { %v1590_v49 = vmul.f32 0.3275911, %v1586_v19  ;;  %v1562_v30 = vmul.f32 %v6145_v36, %v1557_v52 }
 0x513   :  { %v1540_v32 = vsub.f32 1.5, %v1539_v11 }
 0x514   :  { %v1594_v27 = vadd.f32 1.0, %v1590_v49  ;;  %v4781_v16 = vpop.eup %4780  ;;  %v6165_v5 = vadd.f32 %v6151_v7, %v1562_v30 }
 0x515   :  { %v1541_v62 = vmul.f32 %v4779_v56, %v1540_v32  ;;  %v1547_v63 = vmul.f32 %v4781_v16, %v1515_v15  ;;  %vm1553_vm13 = vweird.f32 %v4781_v16  ;;  %v1694_v15 = vsub.f32 0.0, %v1586_v19 }
 0x516   :  { %4782 = vrcp.f32 %v1594_v27  ;;  %v6169_v22 = vmul.f32 0.70710677, %v6165_v5  ;;  %vm1554_vm15 = vmor %vm1552_vm14, %vm1553_vm13  ;;  %v1609_v45 = vand.u32 2147483648, %v1594_v27  ;;  %v1607_v9 = vand.u32 2147483647, %v1594_v27 }
 0x517   :  { %v1545_v51 = vsel %vm1544_vm12, %v4779_v56, %v1541_v62  ;;  %v1548_v59 = vmul.f32 %v4781_v16, %v1547_v63  ;;  %vm1603_vm2 = vweird.f32 %v1594_v27  ;;  %v1698_v11 = vmul.f32 %v1694_v15, %v1586_v19  ;;  %v6205_v15 = vpop.permute.xlu0 %1732 }
 0x518   :  { %v1558_v18 = vmul.f32 %v1545_v51, %v6066_v57  ;;  %v6172_v38 = vand.u32 2147483647, %v6169_v22  ;;  %v1610_v20 = vor.u32 1.1754944e-38, %v1609_v45  ;;  %vm1608_vm5 = vcmp.eq.f32.partialorder %v1607_v9, 8.507059e+37 }
 0x519   :  { %v1549_v25 = vmul.f32 0.5, %v1548_v59  ;;  %v1702_v51 = vmul.f32 1.442695, %v1698_v11  ;;  %vm1578_vm12 = vcmp.ge.f32.partialorder %v6159_v43, 0.0 }
 0x51a   :  { %v1563_v10 = vmul.f32 %v6145_v36, %v1558_v18  ;;  %v1591_v13 = vmul.f32 0.3275911, %v6172_v38 }
 0x51b   :  { %v1550_v31 = vsub.f32 1.5, %v1549_v25 }
 0x51c   :  { %v4783_v35 = vpop.eup %4782  ;;  %v6177_v41 = vadd.f32 %v6151_v7, %v1563_v10  ;;  %v1595_v50 = vadd.f32 1.0, %v1591_v13  ;;  %v1695_v13 = vsub.f32 0.0, %v6172_v38 }
 0x51d   :  { %v1599_v3 = vmul.f32 %v4783_v35, %v1594_v27  ;;  %v1551_v40 = vmul.f32 %v4781_v16, %v1550_v31  ;;  %vm1604_vm1 = vweird.f32 %v4783_v35 }
 0x51e   :  { %v6180_v14 = vmul.f32 0.70710677, %v6177_v41  ;;  %4784 = vrcp.f32 %v1595_v50  ;;  %vm1605_vm3 = vmor %vm1603_vm2, %vm1604_vm1  ;;  %v1622_v32 = vand.u32 2147483647, %v1595_v50  ;;  %vm1618_vm7 = vweird.f32 %v1595_v50 }
 0x51f   :  { %v1600_v57 = vsub.f32 1.0, %v1599_v3  ;;  %v1555_v47 = vsel %vm1554_vm15, %v4781_v16, %v1551_v40  ;;  %v1624_v16 = vand.u32 2147483648, %v1595_v50  ;;  %vm1579_vm1 = vcmp.ge.f32.partialorder %v6169_v22, 0.0 }
 0x520   :  { %v1559_v48 = vmul.f32 %v1555_v47, %v6072_v39  ;;  %v6184_v54 = vand.u32 2147483647, %v6180_v14  ;;  %vm1623_vm9 = vcmp.eq.f32.partialorder %v1622_v32, 8.507059e+37 }
 0x521   :  { %v1601_v29 = vmul.f32 %v4783_v35, %v1600_v57 }
 0x522   :  { %v1564_v12 = vmul.f32 %v6145_v36, %v1559_v48  ;;  %v1592_v4 = vmul.f32 0.3275911, %v6184_v54 }
 0x523   :  { %v1602_v33 = vadd.f32 %v4783_v35, %v1601_v29 }
 0x524   :  { %v4785_v60 = vpop.eup %4784  ;;  %v1596_v8 = vadd.f32 1.0, %v1592_v4  ;;  %v6189_v49 = vadd.f32 %v6151_v7, %v1564_v12  ;;  %v1625_v7 = vor.u32 1.1754944e-38, %v1624_v16  ;;  %v1699_v12 = vmul.f32 %v1695_v13, %v6172_v38 }
 0x525   :  { %v1606_v61 = vsel %vm1605_vm3, %v4783_v35, %v1602_v33  ;;  %v1614_v52 = vmul.f32 %v4785_v60, %v1595_v50  ;;  %vm1619_vm6 = vweird.f32 %v4785_v60  ;;  %v1696_v38 = vsub.f32 0.0, %v6184_v54 }
 0x526   :  { %v1611_v56 = vsel %vm1608_vm5, %v1610_v20, %v1606_v61  ;;  %4786 = vrcp.f32 %v1596_v8  ;;  %v6192_v63 = vmul.f32 0.70710677, %v6189_v49  ;;  %vm1620_vm8 = vmor %vm1618_vm7, %vm1619_vm6  ;;  %v1637_v50 = vand.u32 2147483647, %v1596_v8  ;;  %v6201_v61 = vpop.permute.xlu1 %1737 }
 0x527   :  { %v1658_v24 = vmul.f32 1.0614054, %v1611_v56  ;;  %v1615_v30 = vsub.f32 1.0, %v1614_v52  ;;  %4788 = vpow2.f32 %v1702_v51  ;;  %v1639_v29 = vand.u32 2147483648, %v1596_v8 }
 0x528   :  { %v6195_v19 = vand.u32 2147483647, %v6192_v63  ;;  %vm1633_vm11 = vweird.f32 %v1596_v8  ;;  %vm1638_vm14 = vcmp.eq.f32.partialorder %v1637_v50, 8.507059e+37  ;;  %v1704_v32 = vmul.f32 1.442695, %v1699_v12 }
 0x529   :  { %v1662_v39 = vadd.f32 -1.4531521, %v1658_v24  ;;  %v1616_v36 = vmul.f32 %v4785_v60, %v1615_v30  ;;  %v1640_v52 = vor.u32 1.1754944e-38, %v1639_v29  ;;  %vm1580_vm6 = vcmp.ge.f32.partialorder %v6180_v14, 0.0 }
 0x52a   :  { %v1593_v40 = vmul.f32 0.3275911, %v6195_v19  ;;  %v1584_v14 = vsel %vm1580_vm6, 1.0, %v7627_v17 }
 0x52b   :  { %v1666_v27 = vmul.f32 %v1662_v39, %v1611_v56  ;;  %v1617_v18 = vadd.f32 %v4785_v60, %v1616_v36 }
 0x52c   :  { %v4787_v25 = vpop.eup %4786  ;;  %v6199_v9 = vadd.f32 1.0, %v1593_v40 }
 0x52d   :  { %v1670_v62 = vadd.f32 1.4214138, %v1666_v27  ;;  %v1621_v10 = vsel %vm1620_vm8, %v4785_v60, %v1617_v18  ;;  %v1629_v31 = vmul.f32 %v4787_v25, %v1596_v8  ;;  %vm1634_vm10 = vweird.f32 %v4787_v25  ;;  %v4789_v39 = vpop.eup %4788 }
 0x52e   :  { %v1626_v3 = vsel %vm1623_vm9, %v1625_v7, %v1621_v10  ;;  %4790 = vrcp.f32 %v6199_v9  ;;  %vm1635_vm13 = vmor %vm1633_vm11, %vm1634_vm10  ;;  %v6212_v13 = vpop.permute.xlu1 %1934  ;;  %v1654_v40 = vand.u32 2147483648, %v6199_v9  ;;  %vm1648_vm2 = vweird.f32 %v6199_v9 }
 0x52f   :  { %v1674_v59 = vmul.f32 %v1670_v62, %v1611_v56  ;;  %v1659_v45 = vmul.f32 1.0614054, %v1626_v3  ;;  %v1630_v47 = vsub.f32 1.0, %v1629_v31  ;;  %4792 = vpow2.f32 %v1704_v32 }
 0x530   :  { %vm1811_vm8 = vcmask 1040384   ;;  %vm1945_vm6 = vcmp.eq.s32.totalorder %v6212_v13, 1  ;;  %v1774_v13 = vadd.s32 4294967294, %v6121_v6 }
 0x531   :  { %v1678_v35 = vadd.f32 -0.28449672, %v1674_v59  ;;  %v1663_v33 = vadd.f32 -1.4531521, %v1659_v45  ;;  %v1631_v20 = vmul.f32 %v4787_v25, %v1630_v47  ;;  %v1582_v59 = vsel %vm1578_vm12, 1.0, %v7627_v17  ;;  %v6215_v45 = vpop.permute.xlu0 %1881 }
 0x532   :  { %vm1892_vm7 = vcmp.eq.s32.totalorder %v6215_v45, 1  ;;  %vm1758_vm12 = vcmask 1041408  }
 0x533   :  { %v1682_v57 = vmul.f32 %v1678_v35, %v1611_v56  ;;  %v1667_v24 = vmul.f32 %v1663_v33, %v1626_v3  ;;  %v1632_v60 = vadd.f32 %v4787_v25, %v1631_v20  ;;  %v1700_v35 = vmul.f32 %v1696_v38, %v6184_v54 }
 0x534   :  { %v1652_v20 = vand.u32 2147483647, %v6199_v9 }
 0x535   :  { %v1686_v48 = vadd.f32 0.2548296, %v1682_v57  ;;  %v1671_v27 = vadd.f32 1.4214138, %v1667_v24  ;;  %v1636_v30 = vsel %vm1635_vm13, %v4787_v25, %v1632_v60  ;;  %v1706_v33 = vmul.f32 1.442695, %v1700_v35 }
 0x536   :  { %v1641_v16 = vsel %vm1638_vm14, %v1640_v52, %v1636_v30  ;;  %v1697_v60 = vsub.f32 0.0, %v6195_v19  ;;  %vm1653_vm5 = vcmp.eq.f32.partialorder %v1652_v20, 8.507059e+37  ;;  %vm1953_vm13 = vcmask 1045504  }
 0x537   :  { %v1690_v4 = vmul.f32 %v1686_v48, %v1611_v56  ;;  %v1675_v36 = vmul.f32 %v1671_v27, %v1626_v3  ;;  %v1660_v51 = vmul.f32 1.0614054, %v1641_v16  ;;  %v4791_v56 = vpop.eup %4790  ;;  %v1570_v48 = vmul.f32 0.5, %v6156_v37 }
 0x538   :  { %v1644_v43 = vmul.f32 %v4791_v56, %v6199_v9  ;;  %vm1649_vm15 = vweird.f32 %v4791_v56  ;;  %v1655_v37 = vor.u32 1.1754944e-38, %v1654_v40  ;;  %4794 = vpow2.f32 %v1706_v33 }
 0x539   :  { %v1710_v11 = vmul.f32 %v4789_v39, %v1690_v4  ;;  %v1679_v18 = vadd.f32 -0.28449672, %v1675_v36  ;;  %v1664_v7 = vadd.f32 -1.4531521, %v1660_v51  ;;  %v6219_v4 = vpop.permute.xlu2 %1845  ;;  %v4793_v39 = vpop.eup %4792  ;;  %vm1650_vm3 = vmor %vm1648_vm2, %vm1649_vm15  ;;  %v1583_v36 = vsel %vm1579_vm1, 1.0, %v7627_v17 }
 0x53a   :  { %v1645_v31 = vsub.f32 1.0, %v1644_v43  ;;  %v6238_v35 = vpop.permute.xlu0 %1742  ;;  %vm1856_vm9 = vcmp.eq.s32.totalorder %v6219_v4, 1  ;;  %v1772_v33 = vadd.s32 4294967294, %v6092_v58  ;;  %vm1900_vm1 = vcmask 1046528  }
 0x53b   :  { %v1714_v62 = vsub.f32 1.0, %v1710_v11  ;;  %v1683_v25 = vmul.f32 %v1679_v18, %v1626_v3  ;;  %v1668_v10 = vmul.f32 %v1664_v7, %v1641_v16  ;;  %v6236_v18 = vpop.permute.xlu1 %1884 }
 0x53c   :  { %v1646_v29 = vmul.f32 %v4791_v56, %v1645_v31  ;;  %vm1893_vm10 = vcmp.eq.s32.totalorder %v6236_v18, 1 }
 0x53d   :  { %v1718_v8 = vmul.f32 %v1714_v62, %v1582_v59  ;;  %v1687_v47 = vadd.f32 0.2548296, %v1683_v25  ;;  %v1672_v50 = vadd.f32 1.4214138, %v1668_v10  ;;  %v1701_v62 = vmul.f32 %v1697_v60, %v6195_v19 }
 0x53e   :  { %v1647_v24 = vadd.f32 %v4791_v56, %v1646_v29  ;;  %v1966_v10 = vadd.s32 2, %v6080_v28  ;;  %v4795_v31 = vpop.eup %4794 }
 0x53f   :  { %v1722_v57 = vadd.f32 1.0, %v1718_v8  ;;  %v1691_v54 = vmul.f32 %v1687_v47, %v1626_v3  ;;  %v1676_v12 = vmul.f32 %v1672_v50, %v1641_v16  ;;  %v1572_v8 = vmul.f32 0.5, %v6177_v41 }
 0x540   :  { %v1651_v30 = vsel %vm1650_vm3, %v4791_v56, %v1647_v24  ;;  %v1571_v56 = vmul.f32 0.5, %v6165_v5  ;;  %v1708_v25 = vmul.f32 1.442695, %v1701_v62  ;;  %vm1970_vm14 = vcmp.ge.s32.totalorder %v1966_v10, 0 }
 0x541   :  { %v1726_v52 = vmul.f32 %v1722_v57, %v1570_v48  ;;  %v1711_v11 = vmul.f32 %v4793_v39, %v1691_v54  ;;  %v1680_v27 = vadd.f32 -0.28449672, %v1676_v12  ;;  %v6224_v38 = vsel %vm1653_vm5, %v1655_v37, %v1651_v30 }
 0x542   :  { %v1661_v22 = vmul.f32 1.0614054, %v6224_v38  ;;  %4796 = vpow2.f32 %v1708_v25  ;;  %vm1974_vm15 = vcmp.lt.s32.totalorder %v1966_v10, 16  ;;  %vm1776_vm3 = vcmp.ge.s32.totalorder %v1772_v33, 0 }
 0x543   :  { %v1715_v3 = vsub.f32 1.0, %v1711_v11  ;;  %v1684_v32 = vmul.f32 %v1680_v27, %v1641_v16  ;;  %v6230_v9 = vmul.f32 %v6205_v15, %v1726_v52  ;;  %vm1978_vm2 = vmand %vm1970_vm14, %vm1974_vm15  ;;  %vm1780_vm5 = vcmp.lt.s32.totalorder %v1772_v33, 16 }
 0x544   :  { %v1665_v19 = vadd.f32 -1.4531521, %v1661_v22  ;;  %vm1581_vm14 = vcmp.ge.f32.partialorder %v6192_v63, 0.0 }
 0x545   :  { %v1719_v51 = vmul.f32 %v1715_v3, %v1583_v36  ;;  %v1688_v59 = vadd.f32 0.2548296, %v1684_v32  ;;  %v1812_v57 = vrot.slane %v6230_v9, 7  ;;  %v1896_v29 = vsel %vm1892_vm7, %v6230_v9, 0.0 }
 0x546   :  { %v1669_v5 = vmul.f32 %v1665_v19, %v6224_v38  ;;  %v1759_v52 = vrot.slane %v6230_v9, 6  ;;  %v1954_v30 = vrot.slane %v6230_v9, 2 }
 0x547   :  { %v1723_v7 = vadd.f32 1.0, %v1719_v51  ;;  %v1692_v43 = vmul.f32 %v1688_v59, %v1641_v16  ;;  %v1849_v16 = vpop.permute.xlu2 %1848  ;;  %v1823_v54 = vsel %vm1811_vm8, 0.0, %v1812_v57 }
 0x548   :  { %vm1857_vm11 = vcmp.eq.s32.totalorder %v1849_v16, 1  ;;  %v1673_v47 = vadd.f32 1.4214138, %v1669_v5  ;;  %v1860_v62 = vsel %vm1856_vm9, %v1823_v54, 0.0  ;;  %v4797_v51 = vpop.eup %4796  ;;  %v1773_v16 = vadd.s32 4294967294, %v6109_v2 }
 0x549   :  { %v1727_v40 = vmul.f32 %v1723_v7, %v1571_v56  ;;  %v1712_v41 = vmul.f32 %v4795_v31, %v1692_v43  ;;  %v1938_v56 = vpop.permute.xlu0 %1937  ;;  %v1967_v31 = vadd.s32 2, %v6092_v58 }
 0x54a   :  { %v1677_v48 = vmul.f32 %v1673_v47, %v6224_v38  ;;  %vm1946_vm9 = vcmp.eq.s32.totalorder %v1938_v56, 1 }
 0x54b   :  { %v6247_v28 = vmul.f32 %v6201_v61, %v1727_v40  ;;  %v1716_v50 = vsub.f32 1.0, %v1712_v41  ;;  %v1982_v40 = vsel %vm1978_vm2, 1, %v7625_v44  ;;  %vm1971_vm15 = vcmp.ge.s32.totalorder %v1967_v31, 0 }
 0x54c   :  { %v1681_v39 = vadd.f32 -0.28449672, %v1677_v48  ;;  %vm1975_vm2 = vcmp.lt.s32.totalorder %v1967_v31, 16  ;;  %v1968_v41 = vadd.s32 2, %v6109_v2 }
 0x54d   :  { %v1720_v20 = vmul.f32 %v1716_v50, %v1584_v14  ;;  %v1897_v12 = vsel %vm1893_vm10, %v6247_v28, 0.0  ;;  %v1813_v24 = vrot.slane %v6247_v28, 7  ;;  %v1955_v11 = vrot.slane %v6247_v28, 2  ;;  %v1852_v50 = vpop.permute.xlu1 %1851 }
 0x54e   :  { %v4576_v60 = vpack.i.bf16 %v1897_v12, %v1896_v29  ;;  %v1760_v3 = vrot.slane %v6247_v28, 6  ;;  %v1902_v32 = vrot.slane %v6247_v28, 1  ;;  %v1685_v22 = vmul.f32 %v1681_v39, %v6224_v38 }
 0x54f   :  { %v1724_v27 = vadd.f32 1.0, %v1720_v20  ;;  %v1814_v37 = vsel %vm1811_vm8, %v1812_v57, %v1813_v24  ;;  %v6273_v7 = vsel %vm1953_vm13, %v1954_v30, %v1955_v11  ;;  %v6304_v29 = vpop.permute.xlu2 %1747  ;;  %v1585_v39 = vsel %vm1581_vm14, 1.0, %v7627_v17 }
 0x550   :  { %v1861_v36 = vsel %vm1857_vm11, %v1814_v37, 0.0  ;;  %4577 = vrot.lane.b32.xlu2 %v4576_v60, %s4985_s8  ;;  %v6278_v43 = vsel %vm1758_vm12, %v1759_v52, %v1760_v3  ;;  %v1689_v4 = vadd.f32 0.2548296, %v1685_v22  ;;  %vm6293_vm11 = vmand %vm1776_vm3, %vm1780_vm5  ;;  %vm1777_vm5 = vcmp.ge.s32.totalorder %v1773_v16, 0 }
 0x551   :  { %v1728_v59 = vmul.f32 %v1724_v27, %v1572_v8  ;;  %v4581_v19 = vpack.i.bf16 %v1861_v36, %v1860_v62  ;;  %v1901_v8 = vrot.slane %v6230_v9, 1  ;;  %v1788_v12 = vsel %vm6293_vm11, 1, %v7625_v44  ;;  %vm1979_vm3 = vmand %vm1971_vm15, %vm1975_vm2 }
 0x552   :  { %v1693_v14 = vmul.f32 %v1689_v4, %v6224_v38  ;;  %v1573_v37 = vmul.f32 0.5, %v6189_v49  ;;  %vm1778_vm11 = vcmp.ge.s32.totalorder %v1774_v13, 0  ;;  %vm1782_vm14 = vcmp.lt.s32.totalorder %v1774_v13, 16  ;;  %v2083_v13 = vld [vmem:[%s7596_s17 + $0x80] sm:$0xff] }
 0x553   :  { %v6283_v25 = vmul.f32 %v6238_v35, %v1728_v59  ;;  %4582 = vrot.lane.b32.xlu0 %v4581_v19, %s4986_s0  ;;  %v1903_v10 = vsel %vm1900_vm1, %v1901_v8, %v1902_v32  ;;  %vm1786_vm15 = vmand %vm1778_vm11, %vm1782_vm14  ;;  %vm1858_vm2 = vcmp.eq.s32.totalorder %v1852_v50, 1 }
 0x554   :  { %v1713_v58 = vmul.f32 %v4797_v51, %v1693_v14  ;;  %v1949_v33 = vsel %vm1945_vm6, %v1903_v10, 0.0  ;;  %vm1781_vm6 = vcmp.lt.s32.totalorder %v1773_v16, 16  ;;  %v1790_v28 = vsel %vm1786_vm15, 1, %v7625_v44  ;;  %v6346_v10 = vpop.permute.xlu0 %1887 }
 0x555   :  { %v1904_v5 = vrot.slane %v6283_v25, 1  ;;  %v1957_v57 = vrot.slane %v6283_v25, 2  ;;  %v1762_v47 = vrot.slane %v6283_v25, 6  ;;  %v1815_v63 = vrot.slane %v6283_v25, 7  ;;  %v1855_v22 = vpop.permute.xlu1 %1854 }
 0x556   :  { %v1717_v54 = vsub.f32 1.0, %v1713_v58 }
 0x557   :  { %v1905_v38 = vsel %vm1900_vm1, %v1902_v32, %v1904_v5  ;;  %v6307_v48 = vsel %vm1953_vm13, %v1955_v11, %v1957_v57  ;;  %v6319_v27 = vsel %vm1758_vm12, %v1760_v3, %v1762_v47  ;;  %v1983_v32 = vsel %vm1979_vm3, 1, %v7625_v44  ;;  %v1941_v51 = vpop.permute.xlu2 %1940 }
 0x558   :  { %v1950_v20 = vsel %vm1946_vm9, %v1905_v38, 0.0  ;;  %1987 = vperm.xlu2 %4575, %v1982_v40   ;;  %v1721_v11 = vmul.f32 %v1717_v54, %v1585_v39  ;;  %vm1785_vm9 = vmand %vm1777_vm5, %vm1781_vm6  ;;  %v1816_v49 = vsel %vm1811_vm8, %v1813_v24, %v1815_v63  ;;  %vm1859_vm3 = vcmp.eq.s32.totalorder %v1855_v22, 1  ;;  %v2086_v54 = vld [vmem:[%s7596_s17 + $0x98] sm:$0xff]  ;;  %v2084_v39 = vld [vmem:[%s7596_s17 + $0x88] sm:$0xff] }
 0x559   :  { %v4586_v60 = vpack.i.bf16 %v1950_v20, %v1949_v33  ;;  %v1789_v36 = vsel %vm1785_vm9, 1, %v7625_v44  ;;  %v1862_v31 = vsel %vm1858_vm2, %v1816_v49, 0.0  ;;  %vm1972_vm5 = vcmp.ge.s32.totalorder %v1968_v41, 0  ;;  %2142 = vmatpush.msrb.mxu0 %v2086_v54  ;;  %v2074_v22 = vld [vmem:[%s7596_s17 + $0x38] sm:$0xff]  ;;  %v2072_v49 = vld [vmem:[%s7596_s17 + $0x28] sm:$0xff] }
 0x55a   :  { %v1725_v30 = vadd.f32 1.0, %v1721_v11  ;;  %vm1976_vm6 = vcmp.lt.s32.totalorder %v1968_v41, 16  ;;  %vm1947_vm11 = vcmp.eq.s32.totalorder %v1941_v51, 1  ;;  %v1969_v38 = vadd.s32 2, %v6121_v6  ;;  %v2081_v11 = vld [vmem:[%s7596_s17 + $0x70] sm:$0xff] }
 0x55b   :  { %4587 = vrot.lane.b32.xlu1 %v4586_v60, %s4987_s9  ;;  %1795 = vperm.xlu0 %4573, %v1788_v12   ;;  %vm1980_vm9 = vmand %vm1972_vm5, %vm1976_vm6  ;;  %v2085_v12 = vld [vmem:[%s7596_s17 + $0x90] sm:$0xff]  ;;  %v2082_v60 = vld [vmem:[%s7596_s17 + $0x78] sm:$0xff] }
 0x55c   :  { %v1729_v3 = vmul.f32 %v1725_v30, %v1573_v37  ;;  %v1984_v20 = vsel %vm1980_vm9, 1, %v7625_v44  ;;  %vm1973_vm15 = vcmp.ge.s32.totalorder %v1969_v38, 0  ;;  %vm1977_vm2 = vcmp.lt.s32.totalorder %v1969_v38, 16  ;;  %2101 = vmatpush.msrb.mxu2 %v2082_v60  ;;  %2143 = vmatpush.msrb.mxu0 %v2085_v12  ;;  %v2080_v37 = vld [vmem:[%s7596_s17 + $0x68] sm:$0xff]  ;;  %v2079_v30 = vld [vmem:[%s7596_s17 + $0x60] sm:$0xff]  ;;  %v2073_v51 = vld [vmem:[%s7596_s17 + $0x30] sm:$0xff] }
 0x55e   :  { %v6327_v62 = vmul.f32 %v6304_v29, %v1729_v3  ;;  %2144 = vmatpush.msrb.mxu0 %v2084_v39  ;;  %2102 = vmatpush.msrb.mxu2 %v2081_v11  ;;  %v2076_v3 = vld [vmem:[%s7596_s17 + $0x48] sm:$0xff] }
 0x560   :  { %1990 = vperm.xlu2 %4575, %v1983_v32   ;;  %v1817_v59 = vrot.slane %v6327_v62, 7  ;;  %v1764_v56 = vrot.slane %v6327_v62, 6  ;;  %v1959_v19 = vrot.slane %v6327_v62, 2  ;;  %v1906_v58 = vrot.slane %v6327_v62, 1  ;;  %2145 = vmatpush.msrb.mxu0 %v2083_v13  ;;  %v2078_v32 = vld [vmem:[%s7596_s17 + $0x58] sm:$0xff] }
 0x561   :  { %2103 = vmatpush.msrb.mxu2 %v2080_v37 }
 0x562   :  { %v1818_v4 = vsel %vm1811_vm8, %v1815_v63, %v1817_v59  ;;  %v6338_v8 = vsel %vm1758_vm12, %v1762_v47, %v1764_v56  ;;  %v6344_v24 = vsel %vm1953_vm13, %v1957_v57, %v1959_v19  ;;  %vm7620_vm8 = vcmp.eq.s32.totalorder %v6346_v10, 1  ;;  %v1944_v57 = vpop.permute.xlu2 %1943  ;;  %v2077_v63 = vld [vmem:[%s7596_s17 + $0x50] sm:$0xff]  ;;  %v2071_v59 = vld [vmem:[%s7596_s17 + $0x20] sm:$0xff]  ;;  %v2070_v56 = vld [vmem:[%s7596_s17 + $0x18] sm:$0xff] }
 0x563   :  { %1798 = vperm.xlu1 %4574, %v1789_v36   ;;  %v1863_v14 = vsel %vm1859_vm3, %v1818_v4, 0.0  ;;  %v1898_v16 = vsel %vm7620_vm8, %v6283_v25, 0.0  ;;  %v1907_v2 = vsel %vm1900_vm1, %v1904_v5, %v1906_v58  ;;  %v1912_v47 = vsel %vm1900_vm1, %v1906_v58, 0.0  ;;  %v6364_v25 = vpop.permute.xlu0 %1890  ;;  %vm1981_vm3 = vmand %vm1973_vm15, %vm1977_vm2  ;;  %2104 = vmatpush.msrb.mxu2 %v2079_v30  ;;  %v2075_v36 = vld [vmem:[%s7596_s17 + $0x40] sm:$0xff] }
 0x564   :  { %v4591_v40 = vpack.i.bf16 %v1863_v14, %v1862_v31  ;;  %vm1948_vm14 = vcmp.eq.s32.totalorder %v1944_v57, 1  ;;  %v1951_v50 = vsel %vm1947_vm11, %v1907_v2, 0.0  ;;  %7657 = vst [vmem:[#allocation5_spill] sm:$0xff] %v6364_v25  ;;  %vm7617_vm1 = vcmp.eq.s32.totalorder %v6364_v25, 1  ;;  %v2069_v31 = vld [vmem:[%s7596_s17 + $0x10] sm:$0xff]  ;;  %v2068_v14 = vld [vmem:[%s7596_s17 + $0x8] sm:$0xff]  ;;  %v6446_v57 = vpop.permute.xlu1 %1792 }
 0x565   :  { %v1952_v33 = vsel %vm1948_vm14, %v1912_v47, 0.0  ;;  %v1899_v6 = vsel %vm7617_vm1, %v6327_v62, 0.0  ;;  %v1985_v5 = vsel %vm1981_vm3, 1, %v7625_v44  ;;  %2105 = vmatpush.msrb.mxu2 %v2078_v32  ;;  %v1770_v47 = vsel %vm1758_vm12, 0.0, %v1759_v52 }
 0x566   :  { %4592 = vrot.lane.b32.xlu0 %v4591_v40, %s4986_s0  ;;  %vm1803_vm9 = vcmp.eq.s32.totalorder %v6446_v57, 1  ;;  %vm7618_vm11 = vcmask 785408  }
 0x567   :  { %2106 = vmatpush.msrb.mxu2 %v2077_v63  ;;  %v1807_v38 = vsel %vm1803_vm9, %v1770_v47, 0.0  ;;  %v4629_v47 = vld [vmem:[%s7599_s20 + $0x5] ss:$0 sm:$0xff] }
 0x568   :  { %1801 = vperm.xlu2 %4575, %v1790_v28   ;;  %v2067_v28 = vld [vmem:[%s7596_s17] sm:$0xff] }
 0x569   :  { %2107 = vmatpush.msrb.mxu2 %v2076_v3 }
 0x56b   :  { %2030 = vrot.lane.b32.xlu1 %v1898_v16, %s4985_s8  ;;  %2108 = vmatpush.msrb.mxu2 %v2075_v36 }
 0x56d   :  { %2109 = vmatpush.msrb.mxu2 %v2074_v22 }
 0x56e   :  { %2046 = vrot.lane.b32.xlu0 %v1951_v50, %s4987_s9 }
 0x56f   :  { %2110 = vmatpush.msrb.mxu2 %v2073_v51 }
 0x570   :  { %2048 = vrot.lane.b32.xlu2 %v1952_v33, %s4987_s9 }
 0x571   :  { %2111 = vmatpush.msrb.mxu2 %v2072_v49 }
 0x573   :  { %1993 = vperm.xlu1 %4574, %v1984_v20   ;;  %2112 = vmatpush.msrb.mxu2 %v2071_v59 }
 0x575   :  { %2113 = vmatpush.msrb.mxu2 %v2070_v56 }
 0x576   :  { %2032 = vrot.lane.b32.xlu0 %v1899_v6, %s4985_s8 }
 0x577   :  { %2114 = vmatpush.msrb.mxu2 %v2069_v31 }
 0x579   :  { %2115 = vmatpush.msrb.mxu2 %v2068_v14 }
 0x57b   :  { %1996 = vperm.xlu1 %4574, %v1985_v5   ;;  %2116 = vmatpush.msrb.mxu2 %v2067_v28 }
 0x5aa   :  { %v4578_v4 = vpop.permute.xlu2 %4577 }
 0x5ab   :  { %v4579_v33 = vunpack.i.l.bf16 %v4578_v4  ;;  %v4580_v60 = vunpack.i.h.bf16 %v4578_v4 }
 0x5b2   :  { %v6432_v40 = vpop.permute.xlu2 %1987 }
 0x5b3   :  { %vm1998_vm5 = vcmp.eq.s32.totalorder %v6432_v40, 1 }
 0x5b4   :  { %v2002_v41 = vsel %vm1998_vm5, %v6273_v7, 0.0 }
 0x5b5   :  { %4526 = vmatmul.msk.f32.vlgmr.msrb.gmra.mxu0 %vm270_vm4, %v2002_v41 }
 0x5ba   :  { %v6439_v58 = vpop.permute.xlu2 %1990 }
 0x5bb   :  { %vm7624_vm6 = vcmp.eq.s32.totalorder %v6439_v58, 1 }
 0x5bc   :  { %v2003_v16 = vsel %vm7624_vm6, %v6307_v48, 0.0 }
 0x5bd   :  { %4527 = vmatmul.msk.f32.gmra.mxu0 %vm270_vm4, %v2003_v16 }
 0x5c2   :  { %v6474_v22 = vpop.permute.xlu2 %1801 }
 0x5c3   :  { %vm7621_vm2 = vcmp.eq.s32.totalorder %v6474_v22, 1 }
 0x5c4   :  { %v1810_v4 = vsel %vm7621_vm2, %v6338_v8, 0.0 }
 0x5c5   :  { %v4583_v2 = vpop.permute.xlu0 %4582 }
 0x5c6   :  { %v4584_v7 = vunpack.i.l.bf16 %v4583_v2  ;;  %v4585_v5 = vunpack.i.h.bf16 %v4583_v2 }
 0x5c8   :  { %v2054_v50 = vsel %vm270_vm4, %v1807_v38, %v4584_v7 }
 0x5c9   :  { %v2058_v52 = vsel %vm582_vm0, %v2054_v50, %v4579_v33 }
 0x5ca   :  { %v2049_v28 = vpop.permute.xlu2 %2048 }
 0x5cd   :  { %v4588_v20 = vpop.permute.xlu1 %4587  ;;  %v6455_v48 = vpop.permute.xlu0 %1795 }
 0x5ce   :  { %v4589_v6 = vunpack.i.l.bf16 %v4588_v20  ;;  %vm1804_vm14 = vcmp.eq.s32.totalorder %v6455_v48, 1  ;;  %v4590_v13 = vunpack.i.h.bf16 %v4588_v20 }
 0x5cf   :  { %v1808_v9 = vsel %vm1804_vm14, %v6278_v43, 0.0 }
 0x5d0   :  { %v2063_v54 = vsel %vm7618_vm11, %v2058_v52, %v4589_v6  ;;  %v2055_v12 = vsel %vm270_vm4, %v1808_v9, %v4585_v5 }
 0x5d1   :  { %2117 = vmatmul.f32.vlgmr.msrb.gmra.mxu2 %v2063_v54  ;;  %v2059_v11 = vsel %vm582_vm0, %v2055_v12, %v4580_v60 }
 0x5d2   :  { %v2064_v37 = vsel %vm7618_vm11, %v2059_v11, %v4590_v13 }
 0x5d5   :  { %v6464_v39 = vpop.permute.xlu1 %1798 }
 0x5d6   :  { %vm7622_vm15 = vcmp.eq.s32.totalorder %v6464_v39, 1 }
 0x5d7   :  { %v1809_v32 = vsel %vm7622_vm15, %v6319_v27, 0.0 }
 0x5d8   :  { %v4593_v43 = vpop.permute.xlu0 %4592 }
 0x5d9   :  { %2120 = vmatmul.f32.gmra.mxu2 %v2064_v37  ;;  %v4594_v30 = vunpack.i.l.bf16 %v4593_v43  ;;  %v4595_v56 = vunpack.i.h.bf16 %v4593_v43 }
 0x5db   :  { %v2056_v3 = vsel %vm270_vm4, %v1809_v32, %v4594_v30  ;;  %v2057_v14 = vsel %vm270_vm4, %v1810_v4, %v4595_v56 }
 0x5dd   :  { %v2031_v63 = vpop.permute.xlu1 %2030 }
 0x5de   :  { %v2060_v36 = vsel %vm582_vm0, %v2056_v3, %v2031_v63 }
 0x5e0   :  { %v2047_v51 = vpop.permute.xlu0 %2046 }
 0x5e1   :  { %v2065_v49 = vsel %vm7618_vm11, %v2060_v36, %v2047_v51 }
 0x5e2   :  { %2123 = vmatmul.f32.gmra.mxu2 %v2065_v49 }
 0x5e5   :  { %v6477_v59 = vpop.permute.xlu1 %1993 }
 0x5e6   :  { %vm7623_vm3 = vcmp.eq.s32.totalorder %v6477_v59, 1 }
 0x5e7   :  { %v2004_v27 = vsel %vm7623_vm3, %v6344_v24, 0.0  ;;  %v1965_v24 = vsel %vm1953_vm13, %v1959_v19, 0.0 }
 0x5e8   :  { %4528 = vmatmul.msk.f32.gmra.mxu0 %vm270_vm4, %v2004_v27  ;;  %v2033_v31 = vpop.permute.xlu0 %2032 }
 0x5e9   :  { %v2061_v41 = vsel %vm582_vm0, %v2057_v14, %v2033_v31 }
 0x5ea   :  { %v2066_v16 = vsel %vm7618_vm11, %v2061_v41, %v2049_v28 }
 0x5eb   :  { %2126 = vmatmul.f32.gmra.mxu2 %v2066_v16 }
 0x5ed   :  { %v6491_v2 = vpop.permute.xlu1 %1996 }
 0x5ee   :  { %7658 = vst [vmem:[#allocation6_spill] sm:$0xff] %v6491_v2  ;;  %vm7619_vm1 = vcmp.eq.s32.totalorder %v6491_v2, 1 }
 0x5ef   :  { %v2005_v8 = vsel %vm7619_vm1, %v1965_v24, 0.0 }
 0x5f0   :  { %4529 = vmatmul.msk.f32.gmra.mxu0 %vm270_vm4, %v2005_v8 }
 0x632   :  { %v2147_v7 = vpop.f32.mrf.mxu0 }
 0x63a   :  { %v2150_v6 = vpop.f32.mrf.mxu0 }
 0x654   :  { %v2118_v38 = vpop.f32.mrf.mxu2 }
 0x655   :  { %v2119_v50 = vadd.f32 %v4629_v47, %v2118_v38 }
 0x657   :  { %v2148_v33 = vadd.f32 %v2147_v7, %v2119_v50 }
 0x659   :  { %v2161_v20 = vsel %vm270_vm4, %v2148_v33, 0.0 }
 0x65a   :  { %2162 = vadd.xlane.f32.xlu0 %v2161_v20 }
 0x65c   :  { %v2121_v62 = vpop.f32.mrf.mxu2 }
 0x65d   :  { %v2122_v19 = vadd.f32 %v4629_v47, %v2121_v62 }
 0x65f   :  { %v2151_v9 = vadd.f32 %v2150_v6, %v2122_v19 }
 0x661   :  { %v2164_v52 = vsel %vm270_vm4, %v2151_v9, 0.0 }
 0x662   :  { %2165 = vadd.xlane.f32.xlu2 %v2164_v52 }
 0x665   :  { %v2153_v5 = vpop.f32.mrf.mxu0  ;;  %v2124_v54 = vpop.f32.mrf.mxu2 }
 0x666   :  { %v2125_v12 = vadd.f32 %v4629_v47, %v2124_v54 }
 0x668   :  { %v2154_v60 = vadd.f32 %v2153_v5, %v2125_v12 }
 0x66a   :  { %v2167_v11 = vsel %vm270_vm4, %v2154_v60, 0.0 }
 0x66b   :  { %2168 = vadd.xlane.f32.xlu1 %v2167_v11 }
 0x66d   :  { %v2156_v37 = vpop.f32.mrf.mxu0 }
 0x66e   :  { %v2127_v13 = vpop.f32.mrf.mxu2 }
 0x66f   :  { %v2128_v43 = vadd.f32 %v4629_v47, %v2127_v13 }
 0x671   :  { %v2157_v30 = vadd.f32 %v2156_v37, %v2128_v43 }
 0x673   :  { %v2170_v32 = vsel %vm270_vm4, %v2157_v30, 0.0 }
 0x674   :  { %2171 = vadd.xlane.f32.xlu0 %v2170_v32 }
 0x6cd   :  { %v2163_v63 = vpop.xlane.xlu0 %2162 }
 0x6ce   :  { %v2173_v3 = vmul.f32 %v2163_v63, %v6051_v42  ;;  %v2422_v63 = vld [vmem:[%s7597_s18 + $0x18] sm:$0xff] }
 0x6cf   :  { %2449 = vmatpush.msra.mxu1 %v2422_v63 }
 0x6d0   :  { %v2177_v36 = vsub.f32 %v2148_v33, %v2173_v3  ;;  %v2421_v3 = vld [vmem:[%s7597_s18 + $0x10] sm:$0xff] }
 0x6d1   :  { %2450 = vmatpush.msra.mxu1 %v2421_v3 }
 0x6d2   :  { %v2181_v51 = vmul.f32 %v2177_v36, %v2177_v36 }
 0x6d4   :  { %v2185_v49 = vsel %vm270_vm4, %v2181_v51, 0.0  ;;  %v6539_v51 = vld [vmem:[%s7599_s20 + $0x6] ss:$0 sm:$0xff] }
 0x6d5   :  { %v2166_v56 = vpop.xlane.xlu2 %2165  ;;  %2186 = vadd.xlane.f32.xlu2 %v2185_v49 }
 0x6d6   :  { %v2174_v27 = vmul.f32 %v2166_v56, %v6051_v42 }
 0x6d8   :  { %v6510_v4 = vsub.f32 %v2151_v9, %v2174_v27 }
 0x6da   :  { %v2182_v31 = vmul.f32 %v6510_v4, %v6510_v4 }
 0x6dc   :  { %v2188_v14 = vsel %vm270_vm4, %v2182_v31, 0.0  ;;  %v2420_v31 = vld [vmem:[%s7597_s18 + $0x8] sm:$0xff] }
 0x6dd   :  { %2189 = vadd.xlane.f32.xlu1 %v2188_v14  ;;  %v6547_v14 = vld [vmem:[%s7599_s20 + $0x7] ss:$0 sm:$0xff]  ;;  %2451 = vmatpush.msra.mxu1 %v2420_v31 }
 0x6de   :  { %v2169_v28 = vpop.xlane.xlu1 %2168 }
 0x6df   :  { %v2175_v41 = vmul.f32 %v2169_v28, %v6051_v42 }
 0x6e1   :  { %v6516_v16 = vsub.f32 %v2154_v60, %v2175_v41 }
 0x6e3   :  { %v2183_v24 = vmul.f32 %v6516_v16, %v6516_v16 }
 0x6e5   :  { %v2191_v8 = vsel %vm270_vm4, %v2183_v24, 0.0  ;;  %v2419_v24 = vld [vmem:[%s7597_s18] sm:$0xff] }
 0x6e6   :  { %2192 = vadd.xlane.f32.xlu0 %v2191_v8  ;;  %2452 = vmatpush.msra.mxu1 %v2419_v24 }
 0x6e7   :  { %v2172_v47 = vpop.xlane.xlu0 %2171 }
 0x6e8   :  { %v2176_v7 = vmul.f32 %v2172_v47, %v6051_v42 }
 0x6ea   :  { %v6522_v38 = vsub.f32 %v2157_v30, %v2176_v7 }
 0x6ec   :  { %v2184_v50 = vmul.f32 %v6522_v38, %v6522_v38 }
 0x6ee   :  { %v2194_v33 = vsel %vm270_vm4, %v2184_v50, 0.0 }
 0x6ef   :  { %2195 = vadd.xlane.f32.xlu2 %v2194_v33 }
 0x748   :  { %v2187_v20 = vpop.xlane.xlu2 %2186 }
 0x749   :  { %v2197_v62 = vmul.f32 %v2187_v20, %v6051_v42 }
 0x74b   :  { %v2201_v19 = vadd.f32 1e-05, %v2197_v62 }
 0x74d   :  { %4798 = vrsqrt.f32 %v2201_v19  ;;  %vm2211_vm1 = vweird.f32 %v2201_v19 }
 0x750   :  { %v2190_v6 = vpop.xlane.xlu1 %2189 }
 0x751   :  { %v2198_v9 = vmul.f32 %v2190_v6, %v6051_v42 }
 0x753   :  { %v4799_v52 = vpop.eup %4798  ;;  %v2202_v5 = vadd.f32 1e-05, %v2198_v9 }
 0x754   :  { %v2206_v54 = vmul.f32 %v4799_v52, %v2201_v19  ;;  %vm2212_vm11 = vweird.f32 %v4799_v52 }
 0x755   :  { %4800 = vrsqrt.f32 %v2202_v5  ;;  %vm2213_vm8 = vmor %vm2211_vm1, %vm2212_vm11  ;;  %vm2221_vm1 = vweird.f32 %v2202_v5 }
 0x756   :  { %v2207_v12 = vmul.f32 %v4799_v52, %v2206_v54 }
 0x758   :  { %v2208_v60 = vmul.f32 0.5, %v2207_v12 }
 0x759   :  { %v2193_v37 = vpop.xlane.xlu0 %2192 }
 0x75a   :  { %v2209_v11 = vsub.f32 1.5, %v2208_v60  ;;  %v2199_v32 = vmul.f32 %v2193_v37, %v6051_v42 }
 0x75b   :  { %v4801_v13 = vpop.eup %4800 }
 0x75c   :  { %v2210_v43 = vmul.f32 %v4799_v52, %v2209_v11  ;;  %v2216_v30 = vmul.f32 %v4801_v13, %v2202_v5  ;;  %v2203_v27 = vadd.f32 1e-05, %v2199_v32 }
 0x75e   :  { %v2214_v49 = vsel %vm2213_vm8, %v4799_v52, %v2210_v43  ;;  %v2217_v56 = vmul.f32 %v4801_v13, %v2216_v30  ;;  %4802 = vrsqrt.f32 %v2203_v27  ;;  %vm2222_vm8 = vweird.f32 %v4801_v13 }
 0x75f   :  { %v2245_v28 = vmul.f32 %v2214_v49, %v2177_v36  ;;  %vm2223_vm11 = vmor %vm2221_vm1, %vm2222_vm8  ;;  %vm2231_vm1 = vweird.f32 %v2203_v27 }
 0x760   :  { %v2218_v41 = vmul.f32 0.5, %v2217_v56 }
 0x761   :  { %v2250_v8 = vmul.f32 %v6539_v51, %v2245_v28 }
 0x762   :  { %v2219_v47 = vsub.f32 1.5, %v2218_v41  ;;  %v2196_v33 = vpop.xlane.xlu2 %2195 }
 0x763   :  { %v6554_v7 = vadd.f32 %v6547_v14, %v2250_v8  ;;  %v2200_v20 = vmul.f32 %v2196_v33, %v6051_v42 }
 0x764   :  { %v2220_v50 = vmul.f32 %v4801_v13, %v2219_v47  ;;  %v4803_v62 = vpop.eup %4802 }
 0x765   :  { %v6557_v36 = vmul.f32 0.70710677, %v6554_v7  ;;  %v2226_v52 = vmul.f32 %v4803_v62, %v2203_v27  ;;  %v2204_v54 = vadd.f32 1e-05, %v2200_v20  ;;  %vm2232_vm8 = vweird.f32 %v4803_v62 }
 0x766   :  { %v2224_v19 = vsel %vm2223_vm11, %v4801_v13, %v2220_v50  ;;  %vm2233_vm11 = vmor %vm2231_vm1, %vm2232_vm8 }
 0x767   :  { %v6561_v6 = vand.u32 2147483647, %v6557_v36  ;;  %v2246_v9 = vmul.f32 %v2224_v19, %v6510_v4  ;;  %v2227_v60 = vmul.f32 %v4803_v62, %v2226_v52  ;;  %4804 = vrsqrt.f32 %v2204_v54 }
 0x769   :  { %v2279_v12 = vmul.f32 0.3275911, %v6561_v6  ;;  %v2251_v5 = vmul.f32 %v6539_v51, %v2246_v9  ;;  %v2228_v37 = vmul.f32 0.5, %v2227_v60 }
 0x76b   :  { %v2283_v11 = vadd.f32 1.0, %v2279_v12  ;;  %v6567_v43 = vadd.f32 %v6547_v14, %v2251_v5  ;;  %v2229_v13 = vsub.f32 1.5, %v2228_v37 }
 0x76d   :  { %4806 = vrcp.f32 %v2283_v11  ;;  %v6570_v30 = vmul.f32 0.70710677, %v6567_v43  ;;  %v2230_v4 = vmul.f32 %v4803_v62, %v2229_v13  ;;  %v4805_v32 = vpop.eup %4804  ;;  %v2298_v20 = vand.u32 2147483648, %v2283_v11 }
 0x76e   :  { %v2236_v49 = vmul.f32 %v4805_v32, %v2204_v54  ;;  %vm2242_vm8 = vweird.f32 %v4805_v32  ;;  %vm2292_vm15 = vweird.f32 %v2283_v11 }
 0x76f   :  { %v6573_v63 = vand.u32 2147483647, %v6570_v30  ;;  %v2234_v3 = vsel %vm2233_vm11, %v4803_v62, %v2230_v4  ;;  %vm2241_vm11 = vweird.f32 %v2204_v54  ;;  %v2299_v5 = vor.u32 1.1754944e-38, %v2298_v20 }
 0x770   :  { %v2247_v56 = vmul.f32 %v2234_v3, %v6516_v16  ;;  %v2237_v41 = vmul.f32 %v4805_v32, %v2236_v49  ;;  %v2296_v16 = vand.u32 2147483647, %v2283_v11  ;;  %vm2243_vm2 = vmor %vm2241_vm11, %vm2242_vm8  ;;  %v2383_v49 = vsub.f32 0.0, %v6561_v6 }
 0x771   :  { %v2280_v31 = vmul.f32 0.3275911, %v6573_v63  ;;  %vm2267_vm11 = vcmp.ge.f32.partialorder %v6557_v36, 0.0  ;;  %v2259_v36 = vmul.f32 0.5, %v6554_v7 }
 0x772   :  { %v2238_v47 = vmul.f32 0.5, %v2237_v41  ;;  %v2252_v50 = vmul.f32 %v6539_v51, %v2247_v56  ;;  %vm2297_vm6 = vcmp.eq.f32.partialorder %v2296_v16, 8.507059e+37 }
 0x773   :  { %v4807_v28 = vpop.eup %4806  ;;  %v2284_v8 = vadd.f32 1.0, %v2280_v31 }
 0x774   :  { %v2288_v24 = vmul.f32 %v4807_v28, %v2283_v11  ;;  %v2239_v27 = vsub.f32 1.5, %v2238_v47  ;;  %v6579_v19 = vadd.f32 %v6547_v14, %v2252_v50  ;;  %vm2293_vm1 = vweird.f32 %v4807_v28 }
 0x775   :  { %4808 = vrcp.f32 %v2284_v8  ;;  %vm2294_vm3 = vmor %vm2292_vm15, %vm2293_vm1  ;;  %v2313_v47 = vand.u32 2147483648, %v2284_v8 }
 0x776   :  { %v2289_v33 = vsub.f32 1.0, %v2288_v24  ;;  %v2240_v9 = vmul.f32 %v4805_v32, %v2239_v27  ;;  %v6582_v12 = vmul.f32 0.70710677, %v6579_v19  ;;  %v2311_v27 = vand.u32 2147483647, %v2284_v8 }
 0x778   :  { %v2290_v62 = vmul.f32 %v4807_v28, %v2289_v33  ;;  %v2244_v60 = vsel %vm2243_vm2, %v4805_v32, %v2240_v9  ;;  %v6586_v3 = vand.u32 2147483647, %v6582_v12  ;;  %v2314_v9 = vor.u32 1.1754944e-38, %v2313_v47 }
 0x779   :  { %v2248_v13 = vmul.f32 %v2244_v60, %v6522_v38 }
 0x77a   :  { %v2291_v52 = vadd.f32 %v4807_v28, %v2290_v62  ;;  %v2281_v11 = vmul.f32 0.3275911, %v6586_v3 }
 0x77b   :  { %v4809_v37 = vpop.eup %4808  ;;  %v2253_v41 = vmul.f32 %v6539_v51, %v2248_v13 }
 0x77c   :  { %v2295_v4 = vsel %vm2294_vm3, %v4807_v28, %v2291_v52  ;;  %v2303_v56 = vmul.f32 %v4809_v37, %v2284_v8  ;;  %v2285_v50 = vadd.f32 1.0, %v2281_v11  ;;  %v2387_v28 = vmul.f32 %v2383_v49, %v6561_v6 }
 0x77d   :  { %v2300_v54 = vsel %vm2297_vm6, %v2299_v5, %v2295_v4  ;;  %v6592_v38 = vadd.f32 %v6547_v14, %v2253_v41  ;;  %vm2308_vm15 = vweird.f32 %v4809_v37  ;;  %vm2307_vm6 = vweird.f32 %v2284_v8 }
 0x77e   :  { %v2347_v31 = vmul.f32 1.0614054, %v2300_v54  ;;  %v2304_v32 = vsub.f32 1.0, %v2303_v56  ;;  %4810 = vrcp.f32 %v2285_v50  ;;  %vm2309_vm2 = vmor %vm2307_vm6, %vm2308_vm15  ;;  %v2391_v52 = vmul.f32 1.442695, %v2387_v28 }
 0x77f   :  { %v6596_v51 = vmul.f32 0.70710677, %v6592_v38  ;;  %vm2312_vm3 = vcmp.eq.f32.partialorder %v2311_v27, 8.507059e+37  ;;  %v2384_v6 = vsub.f32 0.0, %v6573_v63  ;;  %vm2322_vm1 = vweird.f32 %v2285_v50 }
 0x780   :  { %v2351_v24 = vadd.f32 -1.4531521, %v2347_v31  ;;  %v2305_v33 = vmul.f32 %v4809_v37, %v2304_v32  ;;  %4812 = vpow2.f32 %v2391_v52 }
 0x781   :  { %v6600_v13 = vand.u32 2147483647, %v6596_v51  ;;  %v2388_v32 = vmul.f32 %v2384_v6, %v6573_v63 }
 0x782   :  { %v2355_v20 = vmul.f32 %v2351_v24, %v2300_v54  ;;  %v2306_v62 = vadd.f32 %v4809_v37, %v2305_v33  ;;  %v2328_v33 = vand.u32 2147483648, %v2285_v50 }
 0x783   :  { %v2282_v8 = vmul.f32 0.3275911, %v6600_v13 }
 0x784   :  { %v2359_v16 = vadd.f32 1.4214138, %v2355_v20  ;;  %v2310_v60 = vsel %vm2309_vm2, %v4809_v37, %v2306_v62  ;;  %v4811_v49 = vpop.eup %4810  ;;  %v2326_v62 = vand.u32 2147483647, %v2285_v50  ;;  %v2329_v63 = vor.u32 1.1754944e-38, %v2328_v33 }
 0x785   :  { %v2315_v5 = vsel %vm2312_vm3, %v2314_v9, %v2310_v60  ;;  %v2318_v11 = vmul.f32 %v4811_v49, %v2285_v50  ;;  %v2286_v37 = vadd.f32 1.0, %v2282_v8  ;;  %vm2323_vm8 = vweird.f32 %v4811_v49 }
 0x786   :  { %v2363_v14 = vmul.f32 %v2359_v16, %v2300_v54  ;;  %v2348_v4 = vmul.f32 1.0614054, %v2315_v5  ;;  %v2393_v9 = vmul.f32 1.442695, %v2388_v32  ;;  %v4813_v60 = vpop.eup %4812  ;;  %vm2324_vm15 = vmor %vm2322_vm1, %vm2323_vm8  ;;  %vm2327_vm6 = vcmp.eq.f32.partialorder %v2326_v62, 8.507059e+37 }
 0x787   :  { %v2319_v47 = vsub.f32 1.0, %v2318_v11  ;;  %4814 = vrcp.f32 %v2286_v37  ;;  %v2341_v62 = vand.u32 2147483647, %v2286_v37  ;;  %vm2268_vm3 = vcmp.ge.f32.partialorder %v6570_v30, 0.0 }
 0x788   :  { %v2367_v56 = vadd.f32 -0.28449672, %v2363_v14  ;;  %v2352_v31 = vadd.f32 -1.4531521, %v2348_v4  ;;  %4816 = vpow2.f32 %v2393_v9  ;;  %vm2337_vm8 = vweird.f32 %v2286_v37 }
 0x789   :  { %v2320_v20 = vmul.f32 %v4811_v49, %v2319_v47 }
 0x78a   :  { %v2371_v41 = vmul.f32 %v2367_v56, %v2300_v54  ;;  %v2356_v24 = vmul.f32 %v2352_v31, %v2315_v5 }
 0x78b   :  { %v2321_v52 = vadd.f32 %v4811_v49, %v2320_v20 }
 0x78c   :  { %v2375_v28 = vadd.f32 0.2548296, %v2371_v41  ;;  %v2360_v27 = vadd.f32 1.4214138, %v2356_v24  ;;  %v2385_v41 = vsub.f32 0.0, %v6586_v3 }
 0x78d   :  { %v2325_v56 = vsel %vm2324_vm15, %v4811_v49, %v2321_v52  ;;  %v4815_v8 = vpop.eup %4814  ;;  %vm2269_vm15 = vcmp.ge.f32.partialorder %v6582_v12, 0.0 }
 0x78e   :  { %v2379_v16 = vmul.f32 %v2375_v28, %v2300_v54  ;;  %v2364_v14 = vmul.f32 %v2360_v27, %v2315_v5  ;;  %v2330_v11 = vsel %vm2327_vm6, %v2329_v63, %v2325_v56  ;;  %v2271_v54 = vsel %vm2267_vm11, 1.0, %v7627_v17  ;;  %v4817_v52 = vpop.eup %4816 }
 0x78f   :  { %v2349_v24 = vmul.f32 1.0614054, %v2330_v11  ;;  %v2333_v47 = vmul.f32 %v4815_v8, %v2286_v37  ;;  %v2389_v49 = vmul.f32 %v2385_v41, %v6586_v3  ;;  %vm2338_vm2 = vweird.f32 %v4815_v8 }
 0x790   :  { %v2399_v4 = vmul.f32 %v4813_v60, %v2379_v16  ;;  %v2368_v6 = vadd.f32 -0.28449672, %v2364_v14  ;;  %v2343_v16 = vand.u32 2147483648, %v2286_v37  ;;  %vm2339_vm1 = vmor %vm2337_vm8, %vm2338_vm2  ;;  %vm2342_vm11 = vcmp.eq.f32.partialorder %v2341_v62, 8.507059e+37 }
 0x791   :  { %v2353_v27 = vadd.f32 -1.4531521, %v2349_v24  ;;  %v2334_v33 = vsub.f32 1.0, %v2333_v47  ;;  %v2395_v7 = vmul.f32 1.442695, %v2389_v49  ;;  %v2386_v24 = vsub.f32 0.0, %v6600_v13 }
 0x792   :  { %v2403_v31 = vsub.f32 1.0, %v2399_v4  ;;  %v2372_v32 = vmul.f32 %v2368_v6, %v2315_v5  ;;  %v2260_v37 = vmul.f32 0.5, %v6567_v43  ;;  %vm2270_vm6 = vcmp.ge.f32.partialorder %v6596_v51, 0.0 }
 0x793   :  { %v2357_v60 = vmul.f32 %v2353_v27, %v2330_v11  ;;  %v2335_v14 = vmul.f32 %v4815_v8, %v2334_v33  ;;  %4818 = vpow2.f32 %v2395_v7  ;;  %v2390_v33 = vmul.f32 %v2386_v24, %v6600_v13 }
 0x794   :  { %v2407_v50 = vmul.f32 %v2403_v31, %v2271_v54  ;;  %v2376_v28 = vadd.f32 0.2548296, %v2372_v32  ;;  %v2344_v31 = vor.u32 1.1754944e-38, %v2343_v16 }
 0x795   :  { %v2361_v6 = vadd.f32 1.4214138, %v2357_v60  ;;  %v2336_v56 = vadd.f32 %v4815_v8, %v2335_v14  ;;  %v2397_v60 = vmul.f32 1.442695, %v2390_v33 }
 0x796   :  { %v2411_v20 = vadd.f32 1.0, %v2407_v50  ;;  %v2380_v9 = vmul.f32 %v2376_v28, %v2315_v5  ;;  %v2272_v5 = vsel %vm2268_vm3, 1.0, %v7627_v17 }
 0x797   :  { %v2365_v41 = vmul.f32 %v2361_v6, %v2330_v11  ;;  %v2340_v54 = vsel %vm2339_vm1, %v4815_v8, %v2336_v56  ;;  %4820 = vpow2.f32 %v2397_v60  ;;  %v2261_v56 = vmul.f32 0.5, %v6579_v19  ;;  %v4632_v19 = vld [vmem:[%s7599_s20 + $0x8] ss:$0 sm:$0xff] }
 0x798   :  { %v2415_v4 = vmul.f32 %v2411_v20, %v2259_v36  ;;  %v2400_v63 = vmul.f32 %v4817_v52, %v2380_v9  ;;  %v2345_v32 = vsel %vm2342_vm11, %v2344_v31, %v2340_v54 }
 0x799   :  { %v2369_v30 = vadd.f32 -0.28449672, %v2365_v41  ;;  %v2350_v50 = vmul.f32 1.0614054, %v2345_v32  ;;  %v4819_v9 = vpop.eup %4818 }
 0x79a   :  { %4530 = vmatmul.msk.f32.vlgmr.msra.gmra.mxu1 %vm270_vm4, %v2415_v4  ;;  %v2404_v3 = vsub.f32 1.0, %v2400_v63  ;;  %v2273_v63 = vsel %vm2269_vm15, 1.0, %v7627_v17 }
 0x79b   :  { %v2373_v28 = vmul.f32 %v2369_v30, %v2330_v11  ;;  %v2354_v27 = vadd.f32 -1.4531521, %v2350_v50 }
 0x79c   :  { %v2408_v47 = vmul.f32 %v2404_v3, %v2272_v5  ;;  %v2274_v5 = vsel %vm2270_vm6, 1.0, %v7627_v17 }
 0x79d   :  { %v2377_v49 = vadd.f32 0.2548296, %v2373_v28  ;;  %v2358_v8 = vmul.f32 %v2354_v27, %v2345_v32  ;;  %v4821_v41 = vpop.eup %4820 }
 0x79e   :  { %v2412_v36 = vadd.f32 1.0, %v2408_v47  ;;  %v2262_v47 = vmul.f32 0.5, %v6592_v38 }
 0x79f   :  { %v2381_v62 = vmul.f32 %v2377_v49, %v2330_v11  ;;  %v2362_v16 = vadd.f32 1.4214138, %v2358_v8 }
 0x7a0   :  { %v2416_v20 = vmul.f32 %v2412_v36, %v2260_v37 }
 0x7a1   :  { %v2401_v14 = vmul.f32 %v4819_v9, %v2381_v62  ;;  %v2366_v52 = vmul.f32 %v2362_v16, %v2345_v32 }
 0x7a2   :  { %4531 = vmatmul.msk.f32.gmra.mxu1 %vm270_vm4, %v2416_v20 }
 0x7a3   :  { %v2405_v4 = vsub.f32 1.0, %v2401_v14  ;;  %v2370_v43 = vadd.f32 -0.28449672, %v2366_v52 }
 0x7a5   :  { %v2409_v6 = vmul.f32 %v2405_v4, %v2273_v63  ;;  %v2374_v13 = vmul.f32 %v2370_v43, %v2345_v32  ;;  %v2765_v43 = vpop.f32.mrf.mxu3 }
 0x7a7   :  { %v2413_v7 = vadd.f32 1.0, %v2409_v6  ;;  %v2378_v31 = vadd.f32 0.2548296, %v2374_v13 }
 0x7a9   :  { %v2417_v3 = vmul.f32 %v2413_v7, %v2261_v56  ;;  %v2382_v11 = vmul.f32 %v2378_v31, %v2345_v32 }
 0x7ab   :  { %4532 = vmatmul.msk.f32.gmra.mxu1 %vm270_vm4, %v2417_v3  ;;  %v2402_v12 = vmul.f32 %v4821_v41, %v2382_v11 }
 0x7ad   :  { %v2406_v54 = vsub.f32 1.0, %v2402_v12  ;;  %v2768_v7 = vpop.f32.mrf.mxu3 }
 0x7af   :  { %v2410_v24 = vmul.f32 %v2406_v54, %v2274_v5  ;;  %v4626_v5 = vld [vmem:[%s7599_s20 + $0xb] ss:$0 sm:$0xff] }
 0x7b1   :  { %v2414_v30 = vadd.f32 1.0, %v2410_v24 }
 0x7b3   :  { %v2418_v50 = vmul.f32 %v2414_v30, %v2262_v47 }
 0x7b5   :  { %4533 = vmatmul.msk.f32.gmra.mxu1 %vm270_vm4, %v2418_v50  ;;  %v2771_v54 = vpop.f32.mrf.mxu3  ;;  %v6651_v50 = vadd.f32 %v4626_v5, %v2765_v43 }
 0x817   :  { %v2454_v32 = vpop.f32.mrf.mxu1 }
 0x818   :  { %v2455_v37 = vadd.f32 %v4632_v19, %v2454_v32 }
 0x81a   :  { %v2468_v36 = vsel %vm582_vm0, %v2455_v37, 0.0 }
 0x81b   :  { %2469 = vadd.xlane.f32.xlu1 %v2468_v36  ;;  %v2774_v36 = vpop.f32.mrf.mxu3 }
 0x81f   :  { %v2457_v51 = vpop.f32.mrf.mxu1 }
 0x820   :  { %v2458_v28 = vadd.f32 %v4632_v19, %v2457_v51  ;;  %v6658_v51 = vadd.f32 %v4626_v5, %v2774_v36 }
 0x822   :  { %v2471_v27 = vsel %vm582_vm0, %v2458_v28, 0.0 }
 0x823   :  { %2472 = vadd.xlane.f32.xlu0 %v2471_v27  ;;  %v6661_v27 = vadd.f32 %v4626_v5, %v2768_v7 }
 0x828   :  { %v2460_v33 = vpop.f32.mrf.mxu1 }
 0x829   :  { %v2461_v38 = vadd.f32 %v4632_v19, %v2460_v33  ;;  %v2778_v33 = vadd.f32 1.0, %v6661_v27 }
 0x82b   :  { %v2474_v20 = vsel %vm582_vm0, %v2461_v38, 0.0 }
 0x82c   :  { %2475 = vadd.xlane.f32.xlu2 %v2474_v20 }
 0x832   :  { %v2463_v49 = vpop.f32.mrf.mxu1 }
 0x833   :  { %v2464_v8 = vadd.f32 %v4632_v19, %v2463_v49 }
 0x835   :  { %v2477_v62 = vsel %vm582_vm0, %v2464_v8, 0.0 }
 0x836   :  { %2478 = vadd.xlane.f32.xlu1 %v2477_v62 }
 0x88e   :  { %v2470_v16 = vpop.xlane.xlu1 %2469 }
 0x88f   :  { %v2480_v9 = vmul.f32 %v2470_v16, %v5794_v55 }
 0x891   :  { %v2484_v60 = vsub.f32 %v2455_v37, %v2480_v9  ;;  %v2777_v37 = vadd.f32 1.0, %v6651_v50 }
 0x893   :  { %v2488_v14 = vmul.f32 %v2484_v60, %v2484_v60 }
 0x895   :  { %v2492_v52 = vsel %vm582_vm0, %v2488_v14, 0.0 }
 0x896   :  { %2493 = vadd.xlane.f32.xlu0 %v2492_v52  ;;  %v2473_v4 = vpop.xlane.xlu0 %2472 }
 0x897   :  { %v2481_v63 = vmul.f32 %v2473_v4, %v5794_v55 }
 0x899   :  { %v6634_v6 = vsub.f32 %v2458_v28, %v2481_v63  ;;  %v2780_v28 = vadd.f32 1.0, %v6658_v51 }
 0x89b   :  { %v2489_v13 = vmul.f32 %v6634_v6, %v6634_v6 }
 0x89d   :  { %v2495_v56 = vsel %vm582_vm0, %v2489_v13, 0.0 }
 0x89e   :  { %2496 = vadd.xlane.f32.xlu2 %v2495_v56 }
 0x89f   :  { %v2476_v31 = vpop.xlane.xlu2 %2475 }
 0x8a0   :  { %v2482_v3 = vmul.f32 %v2476_v31, %v5794_v55 }
 0x8a2   :  { %v6640_v11 = vsub.f32 %v2461_v38, %v2482_v3  ;;  %v6665_v38 = vadd.f32 %v4626_v5, %v2771_v54 }
 0x8a4   :  { %v2490_v41 = vmul.f32 %v6640_v11, %v6640_v11  ;;  %v2779_v20 = vadd.f32 1.0, %v6665_v38 }
 0x8a6   :  { %v2498_v12 = vsel %vm582_vm0, %v2490_v41, 0.0  ;;  %v6675_v41 = vld [vmem:[%s7599_s20 + $0x9] ss:$0 sm:$0xff] }
 0x8a7   :  { %2499 = vadd.xlane.f32.xlu1 %v2498_v12 }
 0x8a9   :  { %v2479_v24 = vpop.xlane.xlu1 %2478 }
 0x8aa   :  { %v2483_v47 = vmul.f32 %v2479_v24, %v5794_v55 }
 0x8ac   :  { %v6649_v30 = vsub.f32 %v2464_v8, %v2483_v47  ;;  %v6681_v47 = vld [vmem:[%s7599_s20 + $0xa] ss:$0 sm:$0xff] }
 0x8ae   :  { %v2491_v19 = vmul.f32 %v6649_v30, %v6649_v30 }
 0x8b0   :  { %v2501_v32 = vsel %vm582_vm0, %v2491_v19, 0.0 }
 0x8b1   :  { %2502 = vadd.xlane.f32.xlu0 %v2501_v32 }
 0x8b6   :  { %2785 = vrot.lane.b32.xlu2 %v2777_v37, %s4985_s8 }
 0x8be   :  { %2791 = vrot.lane.b32.xlu2 %v2780_v28, %s4985_s8 }
 0x8c0   :  { %2787 = vrot.lane.b32.xlu1 %v2778_v33, %s4985_s8 }
 0x8c5   :  { %2789 = vrot.lane.b32.xlu0 %v2779_v20, %s4985_s8 }
 0x909   :  { %v2494_v49 = vpop.xlane.xlu0 %2493 }
 0x90a   :  { %v2504_v8 = vmul.f32 %v2494_v49, %v5794_v55 }
 0x90c   :  { %v2508_v62 = vadd.f32 1e-05, %v2504_v8 }
 0x90e   :  { %4822 = vrsqrt.f32 %v2508_v62  ;;  %vm2518_vm3 = vweird.f32 %v2508_v62 }
 0x911   :  { %v2497_v16 = vpop.xlane.xlu2 %2496 }
 0x912   :  { %v2505_v9 = vmul.f32 %v2497_v16, %v5794_v55 }
 0x914   :  { %v4823_v14 = vpop.eup %4822  ;;  %v2509_v4 = vadd.f32 1e-05, %v2505_v9 }
 0x915   :  { %v2513_v52 = vmul.f32 %v4823_v14, %v2508_v62  ;;  %vm2519_vm2 = vweird.f32 %v4823_v14 }
 0x916   :  { %4824 = vrsqrt.f32 %v2509_v4  ;;  %vm2520_vm8 = vmor %vm2518_vm3, %vm2519_vm2  ;;  %vm2528_vm11 = vweird.f32 %v2509_v4 }
 0x917   :  { %v2514_v43 = vmul.f32 %v4823_v14, %v2513_v52 }
 0x919   :  { %v2515_v63 = vmul.f32 0.5, %v2514_v43 }
 0x91a   :  { %v2500_v3 = vpop.xlane.xlu1 %2499 }
 0x91b   :  { %v2516_v13 = vsub.f32 1.5, %v2515_v63  ;;  %v2506_v54 = vmul.f32 %v2500_v3, %v5794_v55 }
 0x91c   :  { %v4825_v56 = vpop.eup %4824 }
 0x91d   :  { %v2517_v7 = vmul.f32 %v4823_v14, %v2516_v13  ;;  %v2523_v31 = vmul.f32 %v4825_v56, %v2509_v4  ;;  %v2510_v19 = vadd.f32 1e-05, %v2506_v54  ;;  %vm2529_vm1 = vweird.f32 %v4825_v56 }
 0x91e   :  { %vm2530_vm15 = vmor %vm2528_vm11, %vm2529_vm1 }
 0x91f   :  { %v2521_v12 = vsel %vm2520_vm8, %v4823_v14, %v2517_v7  ;;  %v2524_v24 = vmul.f32 %v4825_v56, %v2523_v31  ;;  %4826 = vrsqrt.f32 %v2510_v19  ;;  %vm2538_vm2 = vweird.f32 %v2510_v19 }
 0x920   :  { %v2552_v5 = vmul.f32 %v2521_v12, %v2484_v60 }
 0x921   :  { %v2525_v32 = vmul.f32 0.5, %v2524_v24 }
 0x922   :  { %v2557_v37 = vmul.f32 %v6675_v41, %v2552_v5 }
 0x923   :  { %v2526_v36 = vsub.f32 1.5, %v2525_v32 }
 0x924   :  { %v6685_v28 = vadd.f32 %v6681_v47, %v2557_v37  ;;  %v2503_v8 = vpop.xlane.xlu0 %2502 }
 0x925   :  { %v2527_v33 = vmul.f32 %v4825_v56, %v2526_v36  ;;  %v4827_v62 = vpop.eup %4826  ;;  %v2507_v9 = vmul.f32 %v2503_v8, %v5794_v55 }
 0x926   :  { %v6688_v60 = vmul.f32 0.70710677, %v6685_v28  ;;  %v2533_v14 = vmul.f32 %v4827_v62, %v2510_v19  ;;  %vm2539_vm6 = vweird.f32 %v4827_v62 }
 0x927   :  { %v2531_v20 = vsel %vm2530_vm15, %v4825_v56, %v2527_v33  ;;  %v2511_v43 = vadd.f32 1e-05, %v2507_v9  ;;  %vm2540_vm3 = vmor %vm2538_vm2, %vm2539_vm6 }
 0x928   :  { %v6691_v49 = vand.u32 2147483647, %v6688_v60  ;;  %v2553_v16 = vmul.f32 %v2531_v20, %v6634_v6  ;;  %v2534_v63 = vmul.f32 %v4827_v62, %v2533_v14 }
 0x929   :  { %4828 = vrsqrt.f32 %v2511_v43  ;;  %vm2548_vm6 = vweird.f32 %v2511_v43 }
 0x92a   :  { %v2586_v52 = vmul.f32 0.3275911, %v6691_v49  ;;  %v2558_v4 = vmul.f32 %v6675_v41, %v2553_v16  ;;  %v2535_v7 = vmul.f32 0.5, %v2534_v63 }
 0x92c   :  { %v2590_v13 = vadd.f32 1.0, %v2586_v52  ;;  %v6698_v56 = vadd.f32 %v6681_v47, %v2558_v4  ;;  %v2536_v6 = vsub.f32 1.5, %v2535_v7 }
 0x92e   :  { %4830 = vrcp.f32 %v2590_v13  ;;  %v6701_v31 = vmul.f32 0.70710677, %v6698_v56  ;;  %v2537_v12 = vmul.f32 %v4827_v62, %v2536_v6  ;;  %v2605_v9 = vand.u32 2147483648, %v2590_v13 }
 0x92f   :  { %v4829_v54 = vpop.eup %4828  ;;  %v2603_v19 = vand.u32 2147483647, %v2590_v13  ;;  %vm2599_vm11 = vweird.f32 %v2590_v13 }
 0x930   :  { %v6704_v3 = vand.u32 2147483647, %v6701_v31  ;;  %v2541_v32 = vsel %vm2540_vm3, %v4827_v62, %v2537_v12  ;;  %v2543_v37 = vmul.f32 %v4829_v54, %v2511_v43  ;;  %vm2549_vm1 = vweird.f32 %v4829_v54 }
 0x931   :  { %v2554_v36 = vmul.f32 %v2541_v32, %v6640_v11  ;;  %v2606_v11 = vor.u32 1.1754944e-38, %v2605_v9  ;;  %vm2604_vm2 = vcmp.eq.f32.partialorder %v2603_v19, 8.507059e+37  ;;  %vm2550_vm3 = vmor %vm2548_vm6, %vm2549_vm1  ;;  %vm2574_vm6 = vcmp.ge.f32.partialorder %v6688_v60, 0.0 }
 0x932   :  { %v2587_v5 = vmul.f32 0.3275911, %v6704_v3  ;;  %v2544_v8 = vmul.f32 %v4829_v54, %v2543_v37 }
 0x933   :  { %v2559_v52 = vmul.f32 %v6675_v41, %v2554_v36  ;;  %v2690_v36 = vsub.f32 0.0, %v6691_v49 }
 0x934   :  { %v4831_v24 = vpop.eup %4830  ;;  %v2591_v20 = vadd.f32 1.0, %v2587_v5  ;;  %v2545_v14 = vmul.f32 0.5, %v2544_v8 }
 0x935   :  { %v2595_v33 = vmul.f32 %v4831_v24, %v2590_v13  ;;  %vm2600_vm8 = vweird.f32 %v4831_v24  ;;  %v6710_v7 = vadd.f32 %v6681_v47, %v2559_v52  ;;  %v2694_v19 = vmul.f32 %v2690_v36, %v6691_v49 }
 0x936   :  { %4832 = vrcp.f32 %v2591_v20  ;;  %v2546_v63 = vsub.f32 1.5, %v2545_v14  ;;  %vm2601_vm15 = vmor %vm2599_vm11, %vm2600_vm8  ;;  %vm2614_vm1 = vweird.f32 %v2591_v20 }
 0x937   :  { %v2596_v16 = vsub.f32 1.0, %v2595_v33  ;;  %v6713_v12 = vmul.f32 0.70710677, %v6710_v7 }
 0x938   :  { %v2547_v6 = vmul.f32 %v4829_v54, %v2546_v63 }
 0x939   :  { %v2597_v4 = vmul.f32 %v4831_v24, %v2596_v16  ;;  %v6718_v13 = vand.u32 2147483647, %v6713_v12 }
 0x93a   :  { %v2551_v33 = vsel %vm2550_vm3, %v4829_v54, %v2547_v6 }
 0x93b   :  { %v2598_v62 = vadd.f32 %v4831_v24, %v2597_v4  ;;  %v2555_v14 = vmul.f32 %v2551_v33, %v6649_v30  ;;  %v2620_v4 = vand.u32 2147483648, %v2591_v20 }
 0x93c   :  { %v4833_v5 = vpop.eup %4832 }
 0x93d   :  { %v2602_v32 = vsel %vm2601_vm15, %v4831_v24, %v2598_v62  ;;  %v2610_v8 = vmul.f32 %v4833_v5, %v2591_v20  ;;  %v2560_v52 = vmul.f32 %v6675_v41, %v2555_v14  ;;  %v2588_v24 = vmul.f32 0.3275911, %v6718_v13 }
 0x93e   :  { %v2607_v37 = vsel %vm2604_vm2, %v2606_v11, %v2602_v32  ;;  %vm2615_vm8 = vweird.f32 %v4833_v5  ;;  %v2618_v62 = vand.u32 2147483647, %v2591_v20  ;;  %v2621_v41 = vor.u32 1.1754944e-38, %v2620_v4 }
 0x93f   :  { %v2654_v16 = vmul.f32 1.0614054, %v2607_v37  ;;  %v2611_v9 = vsub.f32 1.0, %v2610_v8  ;;  %v6724_v11 = vadd.f32 %v6681_v47, %v2560_v52  ;;  %v2592_v30 = vadd.f32 1.0, %v2588_v24  ;;  %vm2616_vm11 = vmor %vm2614_vm1, %vm2615_vm8 }
 0x940   :  { %v2698_v8 = vmul.f32 1.442695, %v2694_v19  ;;  %vm2619_vm15 = vcmp.eq.f32.partialorder %v2618_v62, 8.507059e+37  ;;  %v2691_v47 = vsub.f32 0.0, %v6704_v3 }
 0x941   :  { %v2658_v43 = vadd.f32 -1.4531521, %v2654_v16  ;;  %v2612_v63 = vmul.f32 %v4833_v5, %v2611_v9  ;;  %v6727_v33 = vmul.f32 0.70710677, %v6724_v11  ;;  %4834 = vrcp.f32 %v2592_v30 }
 0x942   :  { %4836 = vpow2.f32 %v2698_v8  ;;  %v2695_v19 = vmul.f32 %v2691_v47, %v6704_v3  ;;  %vm2629_vm3 = vweird.f32 %v2592_v30  ;;  %v7659_v47 = vmov -1.0  }
 0x943   :  { %v2662_v54 = vmul.f32 %v2658_v43, %v2607_v37  ;;  %v2613_v6 = vadd.f32 %v4833_v5, %v2612_v63  ;;  %v6730_v36 = vand.u32 2147483647, %v6727_v33 }
 0x945   :  { %v2666_v32 = vadd.f32 1.4214138, %v2662_v54  ;;  %v2617_v16 = vsel %vm2616_vm11, %v4833_v5, %v2613_v6  ;;  %v2589_v20 = vmul.f32 0.3275911, %v6730_v36  ;;  %vm2575_vm11 = vcmp.ge.f32.partialorder %v6701_v31, 0.0 }
 0x946   :  { %v2622_v14 = vsel %vm2619_vm15, %v2621_v41, %v2617_v16  ;;  %v2700_v16 = vmul.f32 1.442695, %v2695_v19 }
 0x947   :  { %v2670_v49 = vmul.f32 %v2666_v32, %v2607_v37  ;;  %v2655_v9 = vmul.f32 1.0614054, %v2622_v14  ;;  %v4835_v24 = vpop.eup %4834  ;;  %v2593_v4 = vadd.f32 1.0, %v2589_v20 }
 0x948   :  { %v2625_v62 = vmul.f32 %v4835_v24, %v2592_v30  ;;  %v4837_v44 = vpop.eup %4836  ;;  %vm2630_vm2 = vweird.f32 %v4835_v24 }
 0x949   :  { %v2674_v43 = vadd.f32 -0.28449672, %v2670_v49  ;;  %v2659_v52 = vadd.f32 -1.4531521, %v2655_v9  ;;  %4838 = vrcp.f32 %v2593_v4  ;;  %v2635_v49 = vand.u32 2147483648, %v2592_v30  ;;  %vm2631_vm8 = vmor %vm2629_vm3, %vm2630_vm2 }
 0x94a   :  { %v2626_v32 = vsub.f32 1.0, %v2625_v62  ;;  %v2633_v9 = vand.u32 2147483647, %v2592_v30  ;;  %4840 = vpow2.f32 %v2700_v16  ;;  %v2650_v16 = vand.u32 2147483648, %v2593_v4 }
 0x94b   :  { %v2678_v63 = vmul.f32 %v2674_v43, %v2607_v37  ;;  %v2663_v5 = vmul.f32 %v2659_v52, %v2622_v14  ;;  %v2578_v52 = vsel %vm2574_vm6, 1.0, %v7659_v47  ;;  %vm2644_vm6 = vweird.f32 %v2593_v4 }
 0x94c   :  { %v2627_v8 = vmul.f32 %v4835_v24, %v2626_v32  ;;  %vm2634_vm1 = vcmp.eq.f32.partialorder %v2633_v9, 8.507059e+37  ;;  %v2651_v31 = vor.u32 1.1754944e-38, %v2650_v16 }
 0x94d   :  { %v2682_v54 = vadd.f32 0.2548296, %v2678_v63  ;;  %v2667_v6 = vadd.f32 1.4214138, %v2663_v5  ;;  %v2636_v5 = vor.u32 1.1754944e-38, %v2635_v49 }
 0x94e   :  { %v2628_v2 = vadd.f32 %v4835_v24, %v2627_v8  ;;  %v2648_v8 = vand.u32 2147483647, %v2593_v4 }
 0x94f   :  { %v2686_v41 = vmul.f32 %v2682_v54, %v2607_v37  ;;  %v2671_v17 = vmul.f32 %v2667_v6, %v2622_v14  ;;  %v4839_v3 = vpop.eup %4838  ;;  %v2692_v6 = vsub.f32 0.0, %v6718_v13 }
 0x950   :  { %v2640_v60 = vmul.f32 %v4839_v3, %v2593_v4  ;;  %v2632_v19 = vsel %vm2631_vm8, %v4835_v24, %v2628_v2  ;;  %vm2645_vm15 = vweird.f32 %v4839_v3  ;;  %v4841_v2 = vpop.eup %4840  ;;  %vm2649_vm3 = vcmp.eq.f32.partialorder %v2648_v8, 8.507059e+37 }
 0x951   :  { %v2706_v43 = vmul.f32 %v4837_v44, %v2686_v41  ;;  %v2675_v20 = vadd.f32 -0.28449672, %v2671_v17  ;;  %v2637_v54 = vsel %vm2634_vm1, %v2636_v5, %v2632_v19  ;;  %v2566_v44 = vmul.f32 0.5, %v6685_v28  ;;  %vm2646_vm2 = vmor %vm2644_vm6, %vm2645_vm15 }
 0x952   :  { %v2656_v32 = vmul.f32 1.0614054, %v2637_v54  ;;  %v2641_v30 = vsub.f32 1.0, %v2640_v60  ;;  %v2696_v9 = vmul.f32 %v2692_v6, %v6718_v13  ;;  %v2579_v5 = vsel %vm2575_vm11, 1.0, %v7659_v47  ;;  %v2786_v60 = vpop.permute.xlu2 %2785 }
 0x953   :  { %v2710_v63 = vsub.f32 1.0, %v2706_v43  ;;  %v2679_v37 = vmul.f32 %v2675_v20, %v2622_v14  ;;  %vm2576_vm8 = vcmp.ge.f32.partialorder %v6713_v12, 0.0  ;;  %vm2577_vm1 = vcmp.ge.f32.partialorder %v6727_v33, 0.0 }
 0x954   :  { %v2660_v49 = vadd.f32 -1.4531521, %v2656_v32  ;;  %v2642_v25 = vmul.f32 %v4839_v3, %v2641_v30 }
 0x955   :  { %v2714_v62 = vmul.f32 %v2710_v63, %v2578_v52  ;;  %v2683_v17 = vadd.f32 0.2548296, %v2679_v37 }
 0x956   :  { %v2664_v52 = vmul.f32 %v2660_v49, %v2637_v54  ;;  %v2643_v63 = vadd.f32 %v4839_v3, %v2642_v25 }
 0x957   :  { %v2718_v41 = vadd.f32 1.0, %v2714_v62  ;;  %v2687_v43 = vmul.f32 %v2683_v17, %v2622_v14  ;;  %v2702_v17 = vmul.f32 1.442695, %v2696_v9 }
 0x958   :  { %v2668_v14 = vadd.f32 1.4214138, %v2664_v52  ;;  %v2647_v19 = vsel %vm2646_vm2, %v4839_v3, %v2643_v63  ;;  %v2788_v52 = vpop.permute.xlu1 %2787 }
 0x959   :  { %v2722_v24 = vmul.f32 %v2718_v41, %v2566_v44  ;;  %v2707_v20 = vmul.f32 %v4841_v2, %v2687_v43  ;;  %v2693_v44 = vsub.f32 0.0, %v6730_v36  ;;  %v2652_v13 = vsel %vm2649_vm3, %v2651_v31, %v2647_v19 }
 0x95a   :  { %v2672_v32 = vmul.f32 %v2668_v14, %v2637_v54  ;;  %v2657_v25 = vmul.f32 1.0614054, %v2652_v13  ;;  %4842 = vpow2.f32 %v2702_v17  ;;  %v2580_v19 = vsel %vm2576_vm8, 1.0, %v7659_v47 }
 0x95b   :  { %v2726_v28 = vadd.f32 %v2722_v24, %v5770_v1  ;;  %v2711_v37 = vsub.f32 1.0, %v2707_v20  ;;  %v2567_v1 = vmul.f32 0.5, %v6698_v56  ;;  %v2697_v43 = vmul.f32 %v2693_v44, %v6730_v36 }
 0x95c   :  { %v2676_v41 = vadd.f32 -0.28449672, %v2672_v32  ;;  %v2661_v16 = vadd.f32 -1.4531521, %v2657_v25  ;;  %v2568_v44 = vmul.f32 0.5, %v6710_v7  ;;  %v2569_v7 = vmul.f32 0.5, %v6724_v11 }
 0x95d   :  { %v2797_v62 = vmul.f32 %v2786_v60, %v2726_v28  ;;  %v2715_v6 = vmul.f32 %v2711_v37, %v2579_v5  ;;  %v2704_v20 = vmul.f32 1.442695, %v2697_v43 }
 0x95e   :  { %v2680_v49 = vmul.f32 %v2676_v41, %v2637_v54  ;;  %v2665_v2 = vmul.f32 %v2661_v16, %v2652_v13  ;;  %v2581_v41 = vsel %vm2577_vm1, 1.0, %v7659_v47 }
 0x95f   :  { %v6745_v4 = vadd.f32 %v2797_v62, %v6651_v50  ;;  %v2719_v30 = vadd.f32 1.0, %v2715_v6  ;;  %4844 = vpow2.f32 %v2704_v20 }
 0x960   :  { %v2684_v9 = vadd.f32 0.2548296, %v2680_v49  ;;  %v2669_v50 = vadd.f32 1.4214138, %v2665_v2  ;;  %v4843_v5 = vpop.eup %4842 }
 0x961   :  { %v2807_v3 = vsel %vm582_vm0, %v6745_v4, 0.0  ;;  %v2723_v8 = vmul.f32 %v2719_v30, %v2567_v1  ;;  %v2790_v30 = vpop.permute.xlu0 %2789 }
 0x962   :  { %2808 = vadd.xlane.f32.xlu0 %v2807_v3  ;;  %v2688_v63 = vmul.f32 %v2684_v9, %v2637_v54  ;;  %v2673_v28 = vmul.f32 %v2669_v50, %v2652_v13 }
 0x963   :  { %v2727_v24 = vadd.f32 %v2723_v8, %v5777_v23 }
 0x964   :  { %v2708_v31 = vmul.f32 %v4843_v5, %v2688_v63  ;;  %v2677_v60 = vadd.f32 -0.28449672, %v2673_v28 }
 0x965   :  { %v2798_v56 = vmul.f32 %v2788_v52, %v2727_v24  ;;  %v4845_v6 = vpop.eup %4844 }
 0x966   :  { %v2712_v37 = vsub.f32 1.0, %v2708_v31  ;;  %v2681_v14 = vmul.f32 %v2677_v60, %v2652_v13 }
 0x967   :  { %v6753_v36 = vadd.f32 %v2798_v56, %v6661_v27 }
 0x968   :  { %v2716_v62 = vmul.f32 %v2712_v37, %v2580_v19  ;;  %v2685_v54 = vadd.f32 0.2548296, %v2681_v14 }
 0x969   :  { %v2810_v23 = vsel %vm582_vm0, %v6753_v36, 0.0 }
 0x96a   :  { %2811 = vadd.xlane.f32.xlu1 %v2810_v23  ;;  %v2720_v17 = vadd.f32 1.0, %v2716_v62  ;;  %v2689_v27 = vmul.f32 %v2685_v54, %v2652_v13 }
 0x96c   :  { %v2724_v32 = vmul.f32 %v2720_v17, %v2568_v44  ;;  %v2709_v12 = vmul.f32 %v4845_v6, %v2689_v27 }
 0x96e   :  { %v2728_v25 = vadd.f32 %v2724_v32, %v5783_v34  ;;  %v2713_v1 = vsub.f32 1.0, %v2709_v12  ;;  %v2792_v34 = vpop.permute.xlu2 %2791 }
 0x970   :  { %v2799_v16 = vmul.f32 %v2790_v30, %v2728_v25  ;;  %v2717_v43 = vmul.f32 %v2713_v1, %v2581_v41 }
 0x972   :  { %v6764_v3 = vadd.f32 %v2799_v16, %v6665_v38  ;;  %v2721_v8 = vadd.f32 1.0, %v2717_v43 }
 0x974   :  { %v2813_v13 = vsel %vm582_vm0, %v6764_v3, 0.0  ;;  %v2725_v49 = vmul.f32 %v2721_v8, %v2569_v7 }
 0x975   :  { %2814 = vadd.xlane.f32.xlu2 %v2813_v13  ;;  %v6804_v13 = vld [vmem:[%s7604_s25] ss:$0 sm:$0xff] }
 0x976   :  { %v2729_v33 = vadd.f32 %v2725_v49, %v5790_v46 }
 0x978   :  { %v2800_v2 = vmul.f32 %v2792_v34, %v2729_v33  ;;  %v3072_v34 = vld [vmem:[%s7600_s21 + $0x38] sm:$0xff] }
 0x979   :  { %3095 = vmatpush.msra.mxu2 %v3072_v34 }
 0x97a   :  { %v6771_v24 = vadd.f32 %v2800_v2, %v6658_v51  ;;  %v3071_v2 = vld [vmem:[%s7600_s21 + $0x30] sm:$0xff] }
 0x97b   :  { %3096 = vmatpush.msra.mxu2 %v3071_v2 }
 0x97c   :  { %v2816_v9 = vsel %vm582_vm0, %v6771_v24, 0.0 }
 0x97d   :  { %2817 = vadd.xlane.f32.xlu0 %v2816_v9  ;;  %v6815_v9 = vld [vmem:[%s7604_s25 + $0x1] ss:$0 sm:$0xff] }
 0x9d5   :  { %v2809_v38 = vpop.xlane.xlu0 %2808 }
 0x9d6   :  { %v2819_v11 = vmul.f32 %v2809_v38, %v5794_v55 }
 0x9d8   :  { %v2823_v50 = vsub.f32 %v6745_v4, %v2819_v11 }
 0x9da   :  { %v2827_v20 = vmul.f32 %v2823_v50, %v2823_v50 }
 0x9dc   :  { %v2831_v52 = vsel %vm582_vm0, %v2827_v20, 0.0 }
 0x9dd   :  { %2832 = vadd.xlane.f32.xlu1 %v2831_v52  ;;  %v2812_v56 = vpop.xlane.xlu1 %2811 }
 0x9de   :  { %v2820_v46 = vmul.f32 %v2812_v56, %v5794_v55  ;;  %v3070_v56 = vld [vmem:[%s7600_s21 + $0x28] sm:$0xff] }
 0x9df   :  { %3097 = vmatpush.msra.mxu2 %v3070_v56 }
 0x9e0   :  { %v6780_v63 = vsub.f32 %v6753_v36, %v2820_v46 }
 0x9e2   :  { %v2828_v51 = vmul.f32 %v6780_v63, %v6780_v63 }
 0x9e4   :  { %v2834_v28 = vsel %vm582_vm0, %v2828_v51, 0.0 }
 0x9e5   :  { %2835 = vadd.xlane.f32.xlu2 %v2834_v28 }
 0x9e8   :  { %v2815_v5 = vpop.xlane.xlu2 %2814 }
 0x9e9   :  { %v2821_v31 = vmul.f32 %v2815_v5, %v5794_v55  ;;  %v3069_v5 = vld [vmem:[%s7600_s21 + $0x20] sm:$0xff] }
 0x9ea   :  { %3098 = vmatpush.msra.mxu2 %v3069_v5 }
 0x9eb   :  { %v6787_v60 = vsub.f32 %v6764_v3, %v2821_v31 }
 0x9ed   :  { %v2829_v37 = vmul.f32 %v6787_v60, %v6787_v60 }
 0x9ef   :  { %v2837_v23 = vsel %vm582_vm0, %v2829_v37, 0.0  ;;  %v3068_v37 = vld [vmem:[%s7600_s21 + $0x18] sm:$0xff] }
 0x9f0   :  { %2838 = vadd.xlane.f32.xlu0 %v2837_v23  ;;  %v2818_v14 = vpop.xlane.xlu0 %2817  ;;  %3099 = vmatpush.msra.mxu2 %v3068_v37 }
 0x9f1   :  { %v2822_v19 = vmul.f32 %v2818_v14, %v5794_v55 }
 0x9f3   :  { %v6794_v62 = vsub.f32 %v6771_v24, %v2822_v19  ;;  %v3067_v19 = vld [vmem:[%s7600_s21 + $0x10] sm:$0xff] }
 0x9f4   :  { %3100 = vmatpush.msra.mxu2 %v3067_v19 }
 0x9f5   :  { %v2830_v54 = vmul.f32 %v6794_v62, %v6794_v62 }
 0x9f7   :  { %v2840_v44 = vsel %vm582_vm0, %v2830_v54, 0.0 }
 0x9f8   :  { %2841 = vadd.xlane.f32.xlu1 %v2840_v44 }
 0xa50   :  { %v2833_v17 = vpop.xlane.xlu1 %2832 }
 0xa51   :  { %v2843_v27 = vmul.f32 %v2833_v17, %v5794_v55 }
 0xa53   :  { %v2847_v6 = vadd.f32 1e-05, %v2843_v27 }
 0xa55   :  { %4846 = vrsqrt.f32 %v2847_v6  ;;  %vm2857_vm15 = vweird.f32 %v2847_v6 }
 0xa58   :  { %v2836_v32 = vpop.xlane.xlu2 %2835 }
 0xa59   :  { %v2844_v12 = vmul.f32 %v2836_v32, %v5794_v55  ;;  %v3066_v32 = vld [vmem:[%s7600_s21 + $0x8] sm:$0xff] }
 0xa5a   :  { %3101 = vmatpush.msra.mxu2 %v3066_v32 }
 0xa5b   :  { %v4847_v25 = vpop.eup %4846  ;;  %v2848_v30 = vadd.f32 1e-05, %v2844_v12 }
 0xa5c   :  { %v2852_v1 = vmul.f32 %v4847_v25, %v2847_v6  ;;  %vm2858_vm11 = vweird.f32 %v4847_v25 }
 0xa5d   :  { %4848 = vrsqrt.f32 %v2848_v30  ;;  %vm2859_vm6 = vmor %vm2857_vm15, %vm2858_vm11  ;;  %vm2867_vm3 = vweird.f32 %v2848_v30 }
 0xa5e   :  { %v2853_v41 = vmul.f32 %v4847_v25, %v2852_v1 }
 0xa60   :  { %v2854_v16 = vmul.f32 0.5, %v2853_v41 }
 0xa62   :  { %v2855_v43 = vsub.f32 1.5, %v2854_v16 }
 0xa63   :  { %v4849_v7 = vpop.eup %4848  ;;  %v2839_v20 = vpop.xlane.xlu0 %2838 }
 0xa64   :  { %v2856_v8 = vmul.f32 %v4847_v25, %v2855_v43  ;;  %v2862_v49 = vmul.f32 %v4849_v7, %v2848_v30  ;;  %v2845_v52 = vmul.f32 %v2839_v20, %v5794_v55  ;;  %vm2868_vm2 = vweird.f32 %v4849_v7  ;;  %v3065_v30 = vld [vmem:[%s7600_s21] sm:$0xff] }
 0xa65   :  { %vm2869_vm8 = vmor %vm2867_vm3, %vm2868_vm2  ;;  %3102 = vmatpush.msra.mxu2 %v3065_v30 }
 0xa66   :  { %v2860_v33 = vsel %vm2859_vm6, %v4847_v25, %v2856_v8  ;;  %v2863_v11 = vmul.f32 %v4849_v7, %v2862_v49  ;;  %v2849_v28 = vadd.f32 1e-05, %v2845_v52 }
 0xa67   :  { %v2891_v38 = vmul.f32 %v2860_v33, %v2823_v50 }
 0xa68   :  { %v2864_v51 = vmul.f32 0.5, %v2863_v11  ;;  %4850 = vrsqrt.f32 %v2849_v28  ;;  %vm2877_vm11 = vweird.f32 %v2849_v28 }
 0xa69   :  { %v2896_v46 = vmul.f32 %v6804_v13, %v2891_v38 }
 0xa6a   :  { %v2865_v31 = vsub.f32 1.5, %v2864_v51 }
 0xa6b   :  { %v6826_v50 = vadd.f32 %v6815_v9, %v2896_v46  ;;  %v2842_v17 = vpop.xlane.xlu1 %2841 }
 0xa6c   :  { %v2866_v14 = vmul.f32 %v4849_v7, %v2865_v31  ;;  %v2846_v6 = vmul.f32 %v2842_v17, %v5794_v55 }
 0xa6d   :  { %v6832_v23 = vmul.f32 0.70710677, %v6826_v50 }
 0xa6e   :  { %v2870_v44 = vsel %vm2869_vm8, %v4849_v7, %v2866_v14  ;;  %v4851_v25 = vpop.eup %4850  ;;  %v2850_v1 = vadd.f32 1e-05, %v2846_v6 }
 0xa6f   :  { %v6838_v54 = vand.u32 2147483647, %v6832_v23  ;;  %v2892_v27 = vmul.f32 %v2870_v44, %v6780_v63  ;;  %v2872_v43 = vmul.f32 %v4851_v25, %v2849_v28  ;;  %vm2878_vm1 = vweird.f32 %v4851_v25 }
 0xa70   :  { %4852 = vrsqrt.f32 %v2850_v1  ;;  %vm2879_vm15 = vmor %vm2877_vm11, %vm2878_vm1  ;;  %vm2887_vm8 = vweird.f32 %v2850_v1 }
 0xa71   :  { %v2925_v12 = vmul.f32 0.3275911, %v6838_v54  ;;  %v2897_v41 = vmul.f32 %v6804_v13, %v2892_v27  ;;  %v2873_v7 = vmul.f32 %v4851_v25, %v2872_v43  ;;  %v3029_v43 = vsub.f32 0.0, %v6838_v54 }
 0xa73   :  { %v2929_v16 = vadd.f32 1.0, %v2925_v12  ;;  %v6851_v63 = vadd.f32 %v6815_v9, %v2897_v41  ;;  %v2874_v49 = vmul.f32 0.5, %v2873_v7 }
 0xa75   :  { %4854 = vrcp.f32 %v2929_v16  ;;  %v6854_v8 = vmul.f32 0.70710677, %v6851_v63  ;;  %v2875_v34 = vsub.f32 1.5, %v2874_v49  ;;  %v2944_v19 = vand.u32 2147483648, %v2929_v16 }
 0xa76   :  { %v4853_v2 = vpop.eup %4852  ;;  %v2942_v17 = vand.u32 2147483647, %v2929_v16  ;;  %vm2938_vm3 = vweird.f32 %v2929_v16 }
 0xa77   :  { %v6857_v33 = vand.u32 2147483647, %v6854_v8  ;;  %v2876_v20 = vmul.f32 %v4851_v25, %v2875_v34  ;;  %v2882_v52 = vmul.f32 %v4853_v2, %v2850_v1  ;;  %vm2888_vm2 = vweird.f32 %v4853_v2 }
 0xa78   :  { %vm2889_vm11 = vmor %vm2887_vm8, %vm2888_vm2 }
 0xa79   :  { %v2926_v38 = vmul.f32 0.3275911, %v6857_v33  ;;  %v2880_v51 = vsel %vm2879_vm15, %v4851_v25, %v2876_v20  ;;  %v2883_v5 = vmul.f32 %v4853_v2, %v2882_v52  ;;  %v2945_v25 = vor.u32 1.1754944e-38, %v2944_v19 }
 0xa7a   :  { %v2893_v37 = vmul.f32 %v2880_v51, %v6787_v60  ;;  %vm2943_vm15 = vcmp.eq.f32.partialorder %v2942_v17, 8.507059e+37 }
 0xa7b   :  { %v4855_v11 = vpop.eup %4854  ;;  %v2930_v46 = vadd.f32 1.0, %v2926_v38  ;;  %v2884_v14 = vmul.f32 0.5, %v2883_v5  ;;  %v3033_v5 = vmul.f32 %v3029_v43, %v6838_v54  ;;  %v3030_v54 = vsub.f32 0.0, %v6857_v33 }
 0xa7c   :  { %v2934_v56 = vmul.f32 %v4855_v11, %v2929_v16  ;;  %vm2939_vm6 = vweird.f32 %v4855_v11  ;;  %v2898_v27 = vmul.f32 %v6804_v13, %v2893_v37 }
 0xa7d   :  { %4856 = vrcp.f32 %v2930_v46  ;;  %v2885_v6 = vsub.f32 1.5, %v2884_v14  ;;  %vm2940_vm1 = vmor %vm2938_vm3, %vm2939_vm6  ;;  %vm2953_vm2 = vweird.f32 %v2930_v46 }
 0xa7e   :  { %v2935_v31 = vsub.f32 1.0, %v2934_v56  ;;  %v6863_v32 = vadd.f32 %v6815_v9, %v2898_v27  ;;  %v2959_v56 = vand.u32 2147483648, %v2930_v46  ;;  %v3037_v27 = vmul.f32 1.442695, %v3033_v5 }
 0xa7f   :  { %v2886_v12 = vmul.f32 %v4853_v2, %v2885_v6 }
 0xa80   :  { %v2936_v44 = vmul.f32 %v4855_v11, %v2935_v31  ;;  %v6866_v41 = vmul.f32 0.70710677, %v6863_v32  ;;  %v2960_v17 = vor.u32 1.1754944e-38, %v2959_v56 }
 0xa81   :  { %v2890_v7 = vsel %vm2889_vm11, %v4853_v2, %v2886_v12  ;;  %v2957_v2 = vand.u32 2147483647, %v2930_v46  ;;  %vm2913_vm11 = vcmp.ge.f32.partialorder %v6832_v23, 0.0 }
 0xa82   :  { %v2937_v28 = vadd.f32 %v4855_v11, %v2936_v44  ;;  %v2894_v16 = vmul.f32 %v2890_v7, %v6794_v62  ;;  %v6871_v20 = vand.u32 2147483647, %v6866_v41 }
 0xa83   :  { %v4857_v60 = vpop.eup %4856  ;;  %vm2958_vm8 = vcmp.eq.f32.partialorder %v2957_v2, 8.507059e+37 }
 0xa84   :  { %v2941_v30 = vsel %vm2940_vm1, %v4855_v11, %v2937_v28  ;;  %v2949_v34 = vmul.f32 %v4857_v60, %v2930_v46  ;;  %v2927_v11 = vmul.f32 0.3275911, %v6871_v20  ;;  %v2899_v51 = vmul.f32 %v6804_v13, %v2894_v16 }
 0xa85   :  { %v2946_v49 = vsel %vm2943_vm15, %v2945_v25, %v2941_v30  ;;  %vm2954_vm6 = vweird.f32 %v4857_v60 }
 0xa86   :  { %v2993_v38 = vmul.f32 1.0614054, %v2946_v49  ;;  %v2950_v1 = vsub.f32 1.0, %v2949_v34  ;;  %v2931_v14 = vadd.f32 1.0, %v2927_v11  ;;  %v6877_v62 = vadd.f32 %v6815_v9, %v2899_v51  ;;  %vm2955_vm3 = vmor %vm2953_vm2, %vm2954_vm6 }
 0xa87   :  { %v3034_v34 = vmul.f32 %v3030_v54, %v6857_v33 }
 0xa88   :  { %v2997_v52 = vadd.f32 -1.4531521, %v2993_v38  ;;  %v2951_v31 = vmul.f32 %v4857_v60, %v2950_v1  ;;  %4858 = vrcp.f32 %v2931_v14  ;;  %v6881_v12 = vmul.f32 0.70710677, %v6877_v62 }
 0xa89   :  { %4860 = vpow2.f32 %v3037_v27  ;;  %v3039_v5 = vmul.f32 1.442695, %v3034_v34  ;;  %vm2968_vm15 = vweird.f32 %v2931_v14  ;;  %v3031_v34 = vsub.f32 0.0, %v6871_v20 }
 0xa8a   :  { %v3001_v37 = vmul.f32 %v2997_v52, %v2946_v49  ;;  %v2952_v19 = vadd.f32 %v4857_v60, %v2951_v31  ;;  %v6884_v9 = vand.u32 2147483647, %v6881_v12  ;;  %v2974_v31 = vand.u32 2147483648, %v2931_v14 }
 0xa8c   :  { %v3005_v44 = vadd.f32 1.4214138, %v3001_v37  ;;  %v2956_v6 = vsel %vm2955_vm3, %v4857_v60, %v2952_v19  ;;  %v2928_v60 = vmul.f32 0.3275911, %v6884_v9  ;;  %vm2914_vm3 = vcmp.ge.f32.partialorder %v6854_v8, 0.0 }
 0xa8d   :  { %v2961_v28 = vsel %vm2958_vm8, %v2960_v17, %v2956_v6 }
 0xa8e   :  { %v3009_v13 = vmul.f32 %v3005_v44, %v2946_v49  ;;  %v2994_v25 = vmul.f32 1.0614054, %v2961_v28  ;;  %v4859_v43 = vpop.eup %4858  ;;  %v6888_v52 = vadd.f32 1.0, %v2928_v60  ;;  %v2972_v44 = vand.u32 2147483647, %v2931_v14 }
 0xa8f   :  { %v2964_v38 = vmul.f32 %v4859_v43, %v2931_v14  ;;  %v4861_v2 = vpop.eup %4860  ;;  %vm2969_vm1 = vweird.f32 %v4859_v43  ;;  %v2905_v14 = vmul.f32 0.5, %v6826_v50 }
 0xa90   :  { %v3013_v30 = vadd.f32 -0.28449672, %v3009_v13  ;;  %v2998_v46 = vadd.f32 -1.4531521, %v2994_v25  ;;  %4862 = vrcp.f32 %v6888_v52  ;;  %vm2970_vm6 = vmor %vm2968_vm15, %vm2969_vm1  ;;  %v2975_v13 = vor.u32 1.1754944e-38, %v2974_v31 }
 0xa91   :  { %v2965_v11 = vsub.f32 1.0, %v2964_v38  ;;  %4864 = vpow2.f32 %v3039_v5  ;;  %vm2973_vm2 = vcmp.eq.f32.partialorder %v2972_v44, 8.507059e+37  ;;  %v3035_v5 = vmul.f32 %v3031_v34, %v6871_v20  ;;  %v4240_v20 = vld [vmem:[%s7603_s24 + $0x10] sm:$0xff] }
 0xa92   :  { %v3017_v7 = vmul.f32 %v3013_v30, %v2946_v49  ;;  %v3002_v16 = vmul.f32 %v2998_v46, %v2961_v28  ;;  %v2987_v31 = vand.u32 2147483647, %v6888_v52  ;;  %vm2983_vm1 = vweird.f32 %v6888_v52 }
 0xa93   :  { %v2966_v19 = vmul.f32 %v4859_v43, %v2965_v11 }
 0xa94   :  { %v3021_v1 = vadd.f32 0.2548296, %v3017_v7  ;;  %v3006_v56 = vadd.f32 1.4214138, %v3002_v16  ;;  %vm2988_vm15 = vcmp.eq.f32.partialorder %v2987_v31, 8.507059e+37 }
 0xa95   :  { %v2967_v27 = vadd.f32 %v4859_v43, %v2966_v19 }
 0xa96   :  { %v3025_v51 = vmul.f32 %v3021_v1, %v2946_v49  ;;  %v3010_v37 = vmul.f32 %v3006_v56, %v2961_v28  ;;  %v2917_v49 = vsel %vm2913_vm11, 1.0, %v7659_v47  ;;  %v4863_v30 = vpop.eup %4862 }
 0xa97   :  { %v2971_v25 = vsel %vm2970_vm6, %v4859_v43, %v2967_v27  ;;  %v2979_v16 = vmul.f32 %v4863_v30, %v6888_v52  ;;  %vm2984_vm8 = vweird.f32 %v4863_v30  ;;  %v2918_v27 = vsel %vm2914_vm3, 1.0, %v7659_v47 }
 0xa98   :  { %v3045_v33 = vmul.f32 %v4861_v2, %v3025_v51  ;;  %v3014_v17 = vadd.f32 -0.28449672, %v3010_v37  ;;  %v2976_v7 = vsel %vm2973_vm2, %v2975_v13, %v2971_v25  ;;  %v4865_v51 = vpop.eup %4864  ;;  %v2989_v2 = vand.u32 2147483648, %v6888_v52  ;;  %vm2985_vm11 = vmor %vm2983_vm1, %vm2984_vm8  ;;  %v4239_v52 = vld [vmem:[%s7603_s24 + $0x8] sm:$0xff] }
 0xa99   :  { %v2995_v23 = vmul.f32 1.0614054, %v2976_v7  ;;  %v2980_v11 = vsub.f32 1.0, %v2979_v16  ;;  %vm2915_vm6 = vcmp.ge.f32.partialorder %v6866_v41, 0.0  ;;  %vm2916_vm2 = vcmp.ge.f32.partialorder %v6881_v12, 0.0 }
 0xa9a   :  { %v3049_v6 = vsub.f32 1.0, %v3045_v33  ;;  %v3018_v54 = vmul.f32 %v3014_v17, %v2961_v28  ;;  %v2990_v13 = vor.u32 1.1754944e-38, %v2989_v2 }
 0xa9b   :  { %v2999_v56 = vadd.f32 -1.4531521, %v2995_v23  ;;  %v2981_v44 = vmul.f32 %v4863_v30, %v2980_v11 }
 0xa9c   :  { %v3053_v46 = vmul.f32 %v3049_v6, %v2917_v49  ;;  %v3022_v60 = vadd.f32 0.2548296, %v3018_v54  ;;  %v3041_v6 = vmul.f32 1.442695, %v3035_v5 }
 0xa9d   :  { %v3003_v19 = vmul.f32 %v2999_v56, %v2976_v7  ;;  %v2982_v17 = vadd.f32 %v4863_v30, %v2981_v44 }
 0xa9e   :  { %v3057_v38 = vadd.f32 1.0, %v3053_v46  ;;  %v3026_v1 = vmul.f32 %v3022_v60, %v2961_v28  ;;  %v4241_v28 = vld [vmem:[%s7603_s24 + $0x18] sm:$0xff]  ;;  %v2906_v46 = vmul.f32 0.5, %v6851_v63  ;;  %v3032_v60 = vsub.f32 0.0, %v6884_v9 }
 0xa9f   :  { %v3007_v33 = vadd.f32 1.4214138, %v3003_v19  ;;  %4256 = vmatpush.msrb.mxu2 %v4241_v28  ;;  %v2986_v25 = vsel %vm2985_vm11, %v4863_v30, %v2982_v17  ;;  %4866 = vpow2.f32 %v3041_v6  ;;  %v2907_v17 = vmul.f32 0.5, %v6863_v32  ;;  %v4637_v32 = vld [vmem:[%s7604_s25 + $0x2] ss:$0 sm:$0xff] }
 0xaa0   :  { %v3061_v43 = vmul.f32 %v3057_v38, %v2905_v14  ;;  %v3046_v37 = vmul.f32 %v4865_v51, %v3026_v1  ;;  %v2991_v34 = vsel %vm2988_vm15, %v2990_v13, %v2986_v25  ;;  %v4238_v14 = vld [vmem:[%s7603_s24] sm:$0xff]  ;;  %v3036_v56 = vmul.f32 %v3032_v60, %v6884_v9 }
 0xaa1   :  { %v3011_v54 = vmul.f32 %v3007_v33, %v2976_v7  ;;  %4257 = vmatpush.msrb.mxu2 %v4240_v20  ;;  %v2996_v16 = vmul.f32 1.0614054, %v2991_v34  ;;  %v2908_v25 = vmul.f32 0.5, %v6877_v62 }
 0xaa2   :  { %4538 = vmatmul.msk.f32.vlgmr.msra.gmra.mxu2 %vm582_vm0, %v3061_v43  ;;  %v3050_v50 = vsub.f32 1.0, %v3046_v37  ;;  %v3043_v31 = vmul.f32 1.442695, %v3036_v56 }
 0xaa3   :  { %v3015_v23 = vadd.f32 -0.28449672, %v3011_v54  ;;  %4258 = vmatpush.msrb.mxu2 %v4239_v52  ;;  %v3000_v1 = vadd.f32 -1.4531521, %v2996_v16 }
 0xaa4   :  { %v3054_v49 = vmul.f32 %v3050_v50, %v2918_v27  ;;  %v2919_v50 = vsel %vm2915_vm6, 1.0, %v7659_v47  ;;  %4868 = vpow2.f32 %v3043_v31 }
 0xaa5   :  { %v3019_v38 = vmul.f32 %v3015_v23, %v2976_v7  ;;  %4259 = vmatpush.msrb.mxu2 %v4238_v14  ;;  %v3004_v11 = vmul.f32 %v3000_v1, %v2991_v34  ;;  %v4867_v5 = vpop.eup %4866 }
 0xaa6   :  { %v3058_v8 = vadd.f32 1.0, %v3054_v49  ;;  %v2920_v49 = vsel %vm2916_vm2, 1.0, %v7659_v47 }
 0xaa7   :  { %v3023_v63 = vadd.f32 0.2548296, %v3019_v38  ;;  %v3008_v43 = vadd.f32 1.4214138, %v3004_v11 }
 0xaa8   :  { %v3062_v30 = vmul.f32 %v3058_v8, %v2906_v46 }
 0xaa9   :  { %v3027_v51 = vmul.f32 %v3023_v63, %v2976_v7  ;;  %v3012_v37 = vmul.f32 %v3008_v43, %v2991_v34 }
 0xaaa   :  { %4539 = vmatmul.msk.f32.gmra.mxu2 %vm582_vm0, %v3062_v30  ;;  %v4869_v6 = vpop.eup %4868 }
 0xaab   :  { %v3047_v2 = vmul.f32 %v4867_v5, %v3027_v51  ;;  %v3016_v44 = vadd.f32 -0.28449672, %v3012_v37 }
 0xaad   :  { %v3051_v19 = vsub.f32 1.0, %v3047_v2  ;;  %v3020_v9 = vmul.f32 %v3016_v44, %v2991_v34 }
 0xaaf   :  { %v3055_v33 = vmul.f32 %v3051_v19, %v2919_v50  ;;  %v3024_v20 = vadd.f32 0.2548296, %v3020_v9  ;;  %v4950_v50 = vld [vmem:[%s7653_s10] sm:$0xff] }
 0xab1   :  { %v3059_v28 = vadd.f32 1.0, %v3055_v33  ;;  %v3028_v7 = vmul.f32 %v3024_v20, %v2991_v34  ;;  %v3397_v33 = vadd.s32 4294967292, %v4950_v50 }
 0xab3   :  { %v3063_v27 = vmul.f32 %v3059_v28, %v2907_v17  ;;  %v3048_v41 = vmul.f32 %v4869_v6, %v3028_v7  ;;  %vm3401_vm3 = vcmp.ge.s32.totalorder %v3397_v33, 0  ;;  %vm3405_vm8 = vcmp.lt.s32.totalorder %v3397_v33, 16 }
 0xab4   :  { %vm3409_vm1 = vmand %vm3401_vm3, %vm3405_vm8  ;;  %v7660_v7 = vmov 0  }
 0xab5   :  { %4540 = vmatmul.msk.f32.gmra.mxu2 %vm582_vm0, %v3063_v27  ;;  %v3052_v13 = vsub.f32 1.0, %v3048_v41  ;;  %v3413_v6 = vsel %vm3409_vm1, 1, %v7660_v7 }
 0xab7   :  { %v3056_v54 = vmul.f32 %v3052_v13, %v2920_v49  ;;  %v3475_v13 = vadd.s32 4, %v4950_v50 }
 0xab9   :  { %v3060_v52 = vadd.f32 1.0, %v3056_v54  ;;  %vm3479_vm11 = vcmp.ge.s32.totalorder %v3475_v13, 0  ;;  %vm3483_vm15 = vcmp.lt.s32.totalorder %v3475_v13, 16 }
 0xaba   :  { %vm3487_vm6 = vmand %vm3479_vm11, %vm3483_vm15 }
 0xabb   :  { %v3064_v46 = vmul.f32 %v3060_v52, %v2908_v25  ;;  %v3491_v49 = vsel %vm3487_vm6, 1, %v7660_v7 }
 0xabd   :  { %4541 = vmatmul.msk.f32.gmra.mxu2 %vm582_vm0, %v3064_v46 }
 0xac5   :  { %4550 = vmatmul.msk.f32.vlgmr.msrb.gmra.mxu2 %vm270_vm4, %v6019_v0 }
 0xacd   :  { %4551 = vmatmul.msk.f32.gmra.mxu2 %vm270_vm4, %v6028_v53 }
 0xad5   :  { %4552 = vmatmul.msk.f32.gmra.mxu2 %vm270_vm4, %v6034_v21 }
 0xadd   :  { %4553 = vmatmul.msk.f32.gmra.mxu2 %vm270_vm4, %v6040_v26 }
 0xb25   :  { %v3104_v62 = vpop.f32.mrf.mxu2 }
 0xb26   :  { %v3105_v12 = vadd.f32 %v4637_v32, %v3104_v62 }
 0xb28   :  { %v3118_v34 = vsel %vm270_vm4, %v3105_v12, 0.0 }
 0xb29   :  { %3119 = vadd.xlane.f32.xlu2 %v3118_v34 }
 0xb2d   :  { %v3107_v60 = vpop.f32.mrf.mxu2 }
 0xb2e   :  { %v3108_v0 = vadd.f32 %v4637_v32, %v3107_v60 }
 0xb30   :  { %v3121_v8 = vsel %vm270_vm4, %v3108_v0, 0.0 }
 0xb31   :  { %3122 = vadd.xlane.f32.xlu0 %v3121_v8 }
 0xb38   :  { %v3110_v53 = vpop.f32.mrf.mxu2 }
 0xb39   :  { %v3111_v23 = vadd.f32 %v4637_v32, %v3110_v53 }
 0xb3b   :  { %v3124_v21 = vsel %vm270_vm4, %v3111_v23, 0.0 }
 0xb3c   :  { %3125 = vadd.xlane.f32.xlu1 %v3124_v21  ;;  %v6974_v21 = vld [vmem:[%s7604_s25 + $0x3] ss:$0 sm:$0xff] }
 0xb40   :  { %v3113_v26 = vpop.f32.mrf.mxu2 }
 0xb41   :  { %v3114_v16 = vadd.f32 %v4637_v32, %v3113_v26 }
 0xb43   :  { %v3127_v14 = vsel %vm270_vm4, %v3114_v16, 0.0 }
 0xb44   :  { %3128 = vadd.xlane.f32.xlu2 %v3127_v14  ;;  %v6979_v14 = vld [vmem:[%s7604_s25 + $0x4] ss:$0 sm:$0xff] }
 0xb9c   :  { %v3120_v30 = vpop.xlane.xlu2 %3119 }
 0xb9d   :  { %v3130_v38 = vmul.f32 %v3120_v30, %v6051_v42 }
 0xb9f   :  { %v3134_v1 = vsub.f32 %v3105_v12, %v3130_v38 }
 0xba1   :  { %v3138_v56 = vmul.f32 %v3134_v1, %v3134_v1 }
 0xba3   :  { %v3142_v63 = vsel %vm270_vm4, %v3138_v56, 0.0 }
 0xba4   :  { %3143 = vadd.xlane.f32.xlu0 %v3142_v63  ;;  %v3123_v11 = vpop.xlane.xlu0 %3122 }
 0xba5   :  { %v3131_v51 = vmul.f32 %v3123_v11, %v6051_v42 }
 0xba7   :  { %v6947_v43 = vsub.f32 %v3108_v0, %v3131_v51 }
 0xba9   :  { %v3139_v5 = vmul.f32 %v6947_v43, %v6947_v43 }
 0xbab   :  { %v3145_v31 = vsel %vm270_vm4, %v3139_v5, 0.0 }
 0xbac   :  { %3146 = vadd.xlane.f32.xlu1 %v3145_v31 }
 0xbaf   :  { %v3126_v2 = vpop.xlane.xlu1 %3125 }
 0xbb0   :  { %v3132_v37 = vmul.f32 %v3126_v2, %v6051_v42 }
 0xbb2   :  { %v6953_v19 = vsub.f32 %v3111_v23, %v3132_v37 }
 0xbb4   :  { %v3140_v44 = vmul.f32 %v6953_v19, %v6953_v19 }
 0xbb6   :  { %v3148_v9 = vsel %vm270_vm4, %v3140_v44, 0.0 }
 0xbb7   :  { %3149 = vadd.xlane.f32.xlu2 %v3148_v9  ;;  %v3129_v17 = vpop.xlane.xlu2 %3128 }
 0xbb8   :  { %v3133_v28 = vmul.f32 %v3129_v17, %v6051_v42 }
 0xbba   :  { %v6962_v20 = vsub.f32 %v3114_v16, %v3133_v28 }
 0xbbc   :  { %v3141_v27 = vmul.f32 %v6962_v20, %v6962_v20 }
 0xbbe   :  { %v3151_v41 = vsel %vm270_vm4, %v3141_v27, 0.0 }
 0xbbf   :  { %3152 = vadd.xlane.f32.xlu0 %v3151_v41 }
 0xbc5   :  { %3418 = vperm.xlu1 %4574, %v3413_v6  }
 0xbd3   :  { %3496 = vperm.xlu0 %4573, %v3491_v49  }
 0xc17   :  { %v3144_v54 = vpop.xlane.xlu0 %3143 }
 0xc18   :  { %v3154_v25 = vmul.f32 %v3144_v54, %v6051_v42 }
 0xc1a   :  { %v3158_v52 = vadd.f32 1e-05, %v3154_v25 }
 0xc1c   :  { %4870 = vrsqrt.f32 %v3158_v52  ;;  %vm3168_vm3 = vweird.f32 %v3158_v52 }
 0xc1f   :  { %v3147_v46 = vpop.xlane.xlu1 %3146 }
 0xc20   :  { %v3155_v32 = vmul.f32 %v3147_v46, %v6051_v42 }
 0xc22   :  { %v4871_v62 = vpop.eup %4870  ;;  %v3159_v34 = vadd.f32 1e-05, %v3155_v32 }
 0xc23   :  { %v3163_v12 = vmul.f32 %v4871_v62, %v3158_v52  ;;  %vm3169_vm2 = vweird.f32 %v4871_v62 }
 0xc24   :  { %4872 = vrsqrt.f32 %v3159_v34  ;;  %vm3170_vm8 = vmor %vm3168_vm3, %vm3169_vm2  ;;  %vm3178_vm11 = vweird.f32 %v3159_v34 }
 0xc25   :  { %v3164_v60 = vmul.f32 %v4871_v62, %v3163_v12 }
 0xc27   :  { %v3165_v0 = vmul.f32 0.5, %v3164_v60 }
 0xc29   :  { %v3166_v8 = vsub.f32 1.5, %v3165_v0 }
 0xc2a   :  { %v4873_v53 = vpop.eup %4872  ;;  %v3150_v56 = vpop.xlane.xlu2 %3149 }
 0xc2b   :  { %v3167_v23 = vmul.f32 %v4871_v62, %v3166_v8  ;;  %v3173_v26 = vmul.f32 %v4873_v53, %v3159_v34  ;;  %v3156_v63 = vmul.f32 %v3150_v56, %v6051_v42  ;;  %vm3179_vm1 = vweird.f32 %v4873_v53 }
 0xc2c   :  { %vm3180_vm15 = vmor %vm3178_vm11, %vm3179_vm1 }
 0xc2d   :  { %v3171_v16 = vsel %vm3170_vm8, %v4871_v62, %v3167_v23  ;;  %v3174_v38 = vmul.f32 %v4873_v53, %v3173_v26  ;;  %v3160_v5 = vadd.f32 1e-05, %v3156_v63 }
 0xc2e   :  { %v3202_v30 = vmul.f32 %v3171_v16, %v3134_v1 }
 0xc2f   :  { %v3175_v51 = vmul.f32 0.5, %v3174_v38  ;;  %4874 = vrsqrt.f32 %v3160_v5  ;;  %vm3188_vm2 = vweird.f32 %v3160_v5 }
 0xc30   :  { %v3207_v11 = vmul.f32 %v6974_v21, %v3202_v30 }
 0xc31   :  { %v3176_v2 = vsub.f32 1.5, %v3175_v51 }
 0xc32   :  { %v6984_v31 = vadd.f32 %v6979_v14, %v3207_v11  ;;  %v3153_v17 = vpop.xlane.xlu0 %3152 }
 0xc33   :  { %v3177_v44 = vmul.f32 %v4873_v53, %v3176_v2  ;;  %v3157_v6 = vmul.f32 %v3153_v17, %v6051_v42 }
 0xc34   :  { %v6987_v37 = vmul.f32 0.70710677, %v6984_v31 }
 0xc35   :  { %v3181_v50 = vsel %vm3180_vm15, %v4873_v53, %v3177_v44  ;;  %v4875_v28 = vpop.eup %4874  ;;  %v3161_v54 = vadd.f32 1e-05, %v3157_v6 }
 0xc36   :  { %v6990_v1 = vand.u32 2147483647, %v6987_v37  ;;  %v3203_v33 = vmul.f32 %v3181_v50, %v6947_v43  ;;  %v3183_v13 = vmul.f32 %v4875_v28, %v3160_v5  ;;  %vm3189_vm6 = vweird.f32 %v4875_v28 }
 0xc37   :  { %vm3190_vm3 = vmor %vm3188_vm2, %vm3189_vm6  ;;  %vm3198_vm6 = vweird.f32 %v3161_v54 }
 0xc38   :  { %v3236_v9 = vmul.f32 0.3275911, %v6990_v1  ;;  %v3208_v27 = vmul.f32 %v6974_v21, %v3203_v33  ;;  %v3184_v25 = vmul.f32 %v4875_v28, %v3183_v13 }
 0xc3a   :  { %v3240_v41 = vadd.f32 1.0, %v3236_v9  ;;  %v6997_v49 = vadd.f32 %v6979_v14, %v3208_v27  ;;  %v3185_v43 = vmul.f32 0.5, %v3184_v25  ;;  %v3340_v25 = vsub.f32 0.0, %v6990_v1 }
 0xc3c   :  { %4876 = vrcp.f32 %v3240_v41  ;;  %v7000_v52 = vmul.f32 0.70710677, %v6997_v49  ;;  %v3186_v32 = vsub.f32 1.5, %v3185_v43  ;;  %v3255_v56 = vand.u32 2147483648, %v3240_v41 }
 0xc3d   :  { %4878 = vrsqrt.f32 %v3161_v54  ;;  %v3253_v51 = vand.u32 2147483647, %v3240_v41  ;;  %vm3249_vm1 = vweird.f32 %v3240_v41 }
 0xc3e   :  { %v7003_v46 = vand.u32 2147483647, %v7000_v52  ;;  %v3187_v34 = vmul.f32 %v4875_v28, %v3186_v32 }
 0xc3f   :  { %vm3254_vm2 = vcmp.eq.f32.partialorder %v3253_v51, 8.507059e+37 }
 0xc40   :  { %v3237_v62 = vmul.f32 0.3275911, %v7003_v46  ;;  %v3191_v53 = vsel %vm3190_vm3, %v4875_v28, %v3187_v34 }
 0xc41   :  { %v3204_v16 = vmul.f32 %v3191_v53, %v6953_v19  ;;  %v3256_v19 = vor.u32 1.1754944e-38, %v3255_v56 }
 0xc42   :  { %v4877_v12 = vpop.eup %4876  ;;  %v3241_v8 = vadd.f32 1.0, %v3237_v62 }
 0xc43   :  { %v4879_v60 = vpop.eup %4878  ;;  %v3245_v0 = vmul.f32 %v4877_v12, %v3240_v41  ;;  %vm3250_vm8 = vweird.f32 %v4877_v12  ;;  %v3209_v63 = vmul.f32 %v6974_v21, %v3204_v16  ;;  %v3344_v16 = vmul.f32 %v3340_v25, %v6990_v1 }
 0xc44   :  { %v3193_v23 = vmul.f32 %v4879_v60, %v3161_v54  ;;  %4880 = vrcp.f32 %v3241_v8  ;;  %vm3199_vm11 = vweird.f32 %v4879_v60  ;;  %vm3251_vm15 = vmor %vm3249_vm1, %vm3250_vm8  ;;  %vm3264_vm1 = vweird.f32 %v3241_v8 }
 0xc45   :  { %v3246_v26 = vsub.f32 1.0, %v3245_v0  ;;  %v7009_v5 = vadd.f32 %v6979_v14, %v3209_v63  ;;  %vm3200_vm3 = vmor %vm3198_vm6, %vm3199_vm11  ;;  %v3270_v0 = vand.u32 2147483648, %v3241_v8  ;;  %v3348_v63 = vmul.f32 1.442695, %v3344_v16 }
 0xc46   :  { %v3194_v30 = vmul.f32 %v4879_v60, %v3193_v23 }
 0xc47   :  { %v3247_v38 = vmul.f32 %v4877_v12, %v3246_v26  ;;  %v7012_v17 = vmul.f32 0.70710677, %v7009_v5  ;;  %v3268_v26 = vand.u32 2147483647, %v3241_v8  ;;  %v3218_v48 = vmul.f32 0.5, %v7009_v5 }
 0xc48   :  { %v3195_v11 = vmul.f32 0.5, %v3194_v30 }
 0xc49   :  { %v3248_v2 = vadd.f32 %v4877_v12, %v3247_v38  ;;  %v7015_v41 = vand.u32 2147483647, %v7012_v17 }
 0xc4a   :  { %v3196_v44 = vsub.f32 1.5, %v3195_v11  ;;  %v4881_v50 = vpop.eup %4880  ;;  %v3341_v11 = vsub.f32 0.0, %v7003_v46 }
 0xc4b   :  { %v3252_v33 = vsel %vm3251_vm15, %v4877_v12, %v3248_v2  ;;  %v3260_v9 = vmul.f32 %v4881_v50, %v3241_v8  ;;  %v3238_v62 = vmul.f32 0.3275911, %v7015_v41  ;;  %vm3265_vm8 = vweird.f32 %v4881_v50 }
 0xc4c   :  { %v3197_v28 = vmul.f32 %v4879_v60, %v3196_v44  ;;  %v3257_v27 = vsel %vm3254_vm2, %v3256_v19, %v3252_v33  ;;  %vm3266_vm11 = vmor %vm3264_vm1, %vm3265_vm8  ;;  %vm3269_vm15 = vcmp.eq.f32.partialorder %v3268_v26, 8.507059e+37  ;;  %v3594_v44 = vld [vmem:[%s7601_s22 + $0x98] sm:$0xff]  ;;  %v3591_v26 = vld [vmem:[%s7601_s22 + $0x80] sm:$0xff] }
 0xc4d   :  { %v3261_v6 = vsub.f32 1.0, %v3260_v9  ;;  %v3304_v54 = vmul.f32 1.0614054, %v3257_v27  ;;  %v3242_v53 = vadd.f32 1.0, %v3238_v62  ;;  %3650 = vmatpush.msrb.mxu1 %v3594_v44  ;;  %v3345_v9 = vmul.f32 %v3341_v11, %v7003_v46 }
 0xc4e   :  { %v3201_v13 = vsel %vm3200_vm3, %v4879_v60, %v3197_v28  ;;  %vm3224_vm3 = vcmp.ge.f32.partialorder %v6987_v37, 0.0 }
 0xc4f   :  { %v3205_v43 = vmul.f32 %v3201_v13, %v6962_v20  ;;  %v3262_v32 = vmul.f32 %v4881_v50, %v3261_v6  ;;  %v3308_v34 = vadd.f32 -1.4531521, %v3304_v54  ;;  %4882 = vrcp.f32 %v3242_v53  ;;  %v3593_v13 = vld [vmem:[%s7601_s22 + $0x90] sm:$0xff] }
 0xc50   :  { %4884 = vpow2.f32 %v3348_v63  ;;  %3651 = vmatpush.msrb.mxu1 %v3593_v13  ;;  %v3285_v62 = vand.u32 2147483648, %v3242_v53  ;;  %vm3279_vm2 = vweird.f32 %v3242_v53 }
 0xc51   :  { %v3210_v12 = vmul.f32 %v6974_v21, %v3205_v43  ;;  %v3263_v23 = vadd.f32 %v4881_v50, %v3262_v32  ;;  %v3312_v30 = vmul.f32 %v3308_v34, %v3257_v27  ;;  %v3271_v21 = vor.u32 1.1754944e-38, %v3270_v0  ;;  %v3592_v32 = vld [vmem:[%s7601_s22 + $0x88] sm:$0xff] }
 0xc52   :  { %3652 = vmatpush.msrb.mxu1 %v3592_v32  ;;  %v3350_v34 = vmul.f32 1.442695, %v3345_v9  ;;  %v3216_v9 = vmul.f32 0.5, %v6984_v31 }
 0xc53   :  { %v7023_v60 = vadd.f32 %v6979_v14, %v3210_v12  ;;  %v3267_v38 = vsel %vm3266_vm11, %v4881_v50, %v3263_v23  ;;  %v3316_v56 = vadd.f32 1.4214138, %v3312_v30  ;;  %v3283_v23 = vand.u32 2147483647, %v3242_v53 }
 0xc54   :  { %v3272_v1 = vsel %vm3269_vm15, %v3271_v21, %v3267_v38  ;;  %3653 = vmatpush.msrb.mxu1 %v3591_v26  ;;  %vm3225_vm11 = vcmp.ge.f32.partialorder %v7000_v52, 0.0 }
 0xc55   :  { %v7026_v20 = vmul.f32 0.70710677, %v7023_v60  ;;  %v3320_v8 = vmul.f32 %v3316_v56, %v3257_v27  ;;  %v3305_v14 = vmul.f32 1.0614054, %v3272_v1  ;;  %v4883_v33 = vpop.eup %4882  ;;  %v3286_v56 = vor.u32 1.1754944e-38, %v3285_v62 }
 0xc56   :  { %v3275_v28 = vmul.f32 %v4883_v33, %v3242_v53  ;;  %vm3280_vm6 = vweird.f32 %v4883_v33  ;;  %v4885_v38 = vpop.eup %4884  ;;  %vm3284_vm1 = vcmp.eq.f32.partialorder %v3283_v23, 8.507059e+37 }
 0xc57   :  { %v7030_v51 = vand.u32 2147483647, %v7026_v20  ;;  %v3324_v50 = vadd.f32 -0.28449672, %v3320_v8  ;;  %v3309_v19 = vadd.f32 -1.4531521, %v3305_v14  ;;  %vm3281_vm8 = vmor %vm3279_vm2, %vm3280_vm6 }
 0xc58   :  { %v3276_v54 = vsub.f32 1.0, %v3275_v28  ;;  %v3228_v28 = vsel %vm3224_vm3, 1.0, %v7659_v47 }
 0xc59   :  { %v3239_v2 = vmul.f32 0.3275911, %v7030_v51  ;;  %v3328_v25 = vmul.f32 %v3324_v50, %v3257_v27  ;;  %v3313_v43 = vmul.f32 %v3309_v19, %v3272_v1 }
 0xc5a   :  { %v3277_v0 = vmul.f32 %v4883_v33, %v3276_v54 }
 0xc5b   :  { %v7037_v6 = vadd.f32 1.0, %v3239_v2  ;;  %v3332_v12 = vadd.f32 0.2548296, %v3328_v25  ;;  %v3317_v46 = vadd.f32 1.4214138, %v3313_v43  ;;  %v3342_v2 = vsub.f32 0.0, %v7015_v41 }
 0xc5c   :  { %v3278_v21 = vadd.f32 %v4883_v33, %v3277_v0 }
 0xc5d   :  { %4886 = vrcp.f32 %v7037_v6  ;;  %v3336_v16 = vmul.f32 %v3332_v12, %v3257_v27  ;;  %v3321_v30 = vmul.f32 %v3317_v46, %v3272_v1  ;;  %v3346_v54 = vmul.f32 %v3342_v2, %v7015_v41 }
 0xc5e   :  { %4888 = vpow2.f32 %v3350_v34  ;;  %v3282_v14 = vsel %vm3281_vm8, %v4883_v33, %v3278_v21  ;;  %v3300_v32 = vand.u32 2147483648, %v7037_v6  ;;  %v3298_v62 = vand.u32 2147483647, %v7037_v6 }
 0xc5f   :  { %v3356_v63 = vmul.f32 %v4885_v38, %v3336_v16  ;;  %v3325_v11 = vadd.f32 -0.28449672, %v3321_v30  ;;  %v3287_v44 = vsel %vm3284_vm1, %v3286_v56, %v3282_v14  ;;  %vm3294_vm6 = vweird.f32 %v7037_v6 }
 0xc60   :  { %v3306_v53 = vmul.f32 1.0614054, %v3287_v44  ;;  %v3229_v16 = vsel %vm3225_vm11, 1.0, %v7659_v47  ;;  %v3352_v30 = vmul.f32 1.442695, %v3346_v54  ;;  %v3301_v38 = vor.u32 1.1754944e-38, %v3300_v32 }
 0xc61   :  { %v3360_v50 = vsub.f32 1.0, %v3356_v63  ;;  %v3329_v19 = vmul.f32 %v3325_v11, %v3272_v1  ;;  %vm3299_vm3 = vcmp.eq.f32.partialorder %v3298_v62, 8.507059e+37  ;;  %vm3384_vm8 = vcmask 1043456   ;;  %v7086_v54 = vld [vmem:[%s7653_s10 + $0x10] sm:$0xff] }
 0xc62   :  { %v3310_v43 = vadd.f32 -1.4531521, %v3306_v53  ;;  %4890 = vpow2.f32 %v3352_v30  ;;  %v3497_v53 = vpop.permute.xlu0 %3496  ;;  %vm3226_vm1 = vcmp.ge.f32.partialorder %v7012_v17, 0.0 }
 0xc63   :  { %v4887_v8 = vpop.eup %4886  ;;  %v3364_v25 = vmul.f32 %v3360_v50, %v3228_v28  ;;  %v3333_v33 = vadd.f32 0.2548296, %v3329_v19  ;;  %v3217_v50 = vmul.f32 0.5, %v6997_v49  ;;  %vm3507_vm11 = vcmp.eq.s32.totalorder %v3497_v53, 1 }
 0xc64   :  { %v3290_v27 = vmul.f32 %v4887_v8, %v7037_v6  ;;  %vm3295_vm15 = vweird.f32 %v4887_v8  ;;  %v4889_v34 = vpop.eup %4888  ;;  %v3314_v0 = vmul.f32 %v3310_v43, %v3287_v44  ;;  %v3343_v6 = vsub.f32 0.0, %v7030_v51 }
 0xc65   :  { %v3368_v46 = vadd.f32 1.0, %v3364_v25  ;;  %v3337_v31 = vmul.f32 %v3333_v33, %v3272_v1  ;;  %vm3296_vm2 = vmor %vm3294_vm6, %vm3295_vm15 }
 0xc66   :  { %v3291_v13 = vsub.f32 1.0, %v3290_v27  ;;  %v3318_v41 = vadd.f32 1.4214138, %v3314_v0 }
 0xc67   :  { %v3372_v37 = vmul.f32 %v3368_v46, %v3216_v9  ;;  %v3357_v23 = vmul.f32 %v4889_v34, %v3337_v31  ;;  %v3347_v9 = vmul.f32 %v3343_v6, %v7030_v51  ;;  %v3399_v51 = vadd.s32 4294967292, %v7086_v54 }
 0xc68   :  { %v3292_v12 = vmul.f32 %v4887_v8, %v3291_v13  ;;  %v3322_v63 = vmul.f32 %v3318_v41, %v3287_v44  ;;  %v4891_v31 = vpop.eup %4890 }
 0xc69   :  { %v7065_v21 = vmul.f32 %v3372_v37, %v6205_v15  ;;  %v3361_v1 = vsub.f32 1.0, %v3357_v23  ;;  %v3354_v62 = vmul.f32 1.442695, %v3347_v9 }
 0xc6a   :  { %v3293_v26 = vadd.f32 %v4887_v8, %v3292_v12  ;;  %v3326_v2 = vadd.f32 -0.28449672, %v3322_v63  ;;  %v3230_v63 = vsel %vm3226_vm1, 1.0, %v7659_v47 }
 0xc6b   :  { %v3385_v14 = vrot.slane %v7065_v21, 4  ;;  %v3365_v52 = vmul.f32 %v3361_v1, %v3229_v16  ;;  %v3437_v25 = vrot.slane %v7065_v21, 6  ;;  %v3453_v12 = vsel %vm1892_vm7, %v7065_v21, 0.0 }
 0xc6c   :  { %v3297_v56 = vsel %vm3296_vm2, %v4887_v8, %v3293_v26  ;;  %v3330_v19 = vmul.f32 %v3326_v2, %v3287_v44  ;;  %vm3403_vm7 = vcmp.ge.s32.totalorder %v3399_v51, 0  ;;  %4892 = vpow2.f32 %v3354_v62 }
 0xc6d   :  { %v7068_v11 = vsel %vm3299_vm3, %v3301_v38, %v3297_v56  ;;  %v7074_v15 = vsel %vm3384_vm8, 0.0, %v3385_v14  ;;  %v3369_v8 = vadd.f32 1.0, %v3365_v52  ;;  %v3448_v37 = vsel %vm1758_vm12, 0.0, %v3437_v25 }
 0xc6e   :  { %v3307_v27 = vmul.f32 1.0614054, %v7068_v11  ;;  %v3334_v33 = vadd.f32 0.2548296, %v3330_v19  ;;  %v3449_v1 = vsel %vm1803_vm9, %v3448_v37, 0.0  ;;  %vm7661_vm3 = vcmp.eq.s32.totalorder %v6439_v58, 1 }
 0xc6f   :  { %v3373_v13 = vmul.f32 %v3369_v8, %v3217_v50 }
 0xc70   :  { %v3311_v28 = vadd.f32 -1.4531521, %v3307_v27  ;;  %v3338_v32 = vmul.f32 %v3334_v33, %v3287_v44  ;;  %v4952_v44 = vld [vmem:[%s7653_s10 + $0x8] sm:$0xff] }
 0xc71   :  { %v7081_v49 = vmul.f32 %v3373_v13, %v6201_v61  ;;  %v3398_v45 = vadd.s32 4294967292, %v4952_v44 }
 0xc72   :  { %v3315_v43 = vmul.f32 %v3311_v28, %v7068_v11  ;;  %v3358_v23 = vmul.f32 %v4891_v31, %v3338_v32  ;;  %v4893_v9 = vpop.eup %4892  ;;  %v3457_v28 = vrot.slane %v7065_v21, 2  ;;  %v3219_v31 = vmul.f32 0.5, %v7023_v60 }
 0xc73   :  { %v3386_v34 = vrot.slane %v7081_v49, 4  ;;  %v3454_v61 = vsel %vm1893_vm10, %v7081_v49, 0.0  ;;  %v3438_v0 = vrot.slane %v7081_v49, 6  ;;  %vm3407_vm10 = vcmp.lt.s32.totalorder %v3399_v51, 16 }
 0xc74   :  { %v3319_v46 = vadd.f32 1.4214138, %v3315_v43  ;;  %v4596_v26 = vpack.i.bf16 %v3454_v61, %v3453_v12  ;;  %v3362_v30 = vsub.f32 1.0, %v3358_v23  ;;  %vm3411_vm15 = vmand %vm3403_vm7, %vm3407_vm10  ;;  %vm3402_vm6 = vcmp.ge.s32.totalorder %v3398_v45, 0 }
 0xc75   :  { %v7103_v41 = vsel %vm3384_vm8, %v3385_v14, %v3386_v34  ;;  %v3439_v18 = vsel %vm1758_vm12, %v3437_v25, %v3438_v0  ;;  %vm3406_vm2 = vcmp.lt.s32.totalorder %v3398_v45, 16  ;;  %v3415_v27 = vsel %vm3411_vm15, 1, %v7660_v7 }
 0xc76   :  { %v3323_v16 = vmul.f32 %v3319_v46, %v7068_v11  ;;  %v3511_v38 = vsel %vm3507_vm11, %v7103_v41, 0.0  ;;  %4597 = vrot.lane.b32.xlu0 %v4596_v26, %s4985_s8  ;;  %v3450_v56 = vsel %vm1804_vm14, %v3439_v18, 0.0  ;;  %v3366_v52 = vmul.f32 %v3362_v30, %v3230_v63  ;;  %vm3410_vm9 = vmand %vm3402_vm6, %vm3406_vm2 }
 0xc77   :  { %4542 = vmatmul.msk.f32.vlgmr.msrb.gmra.mxu1 %vm270_vm4, %v3511_v38  ;;  %v4601_v6 = vpack.i.bf16 %v3450_v56, %v3449_v1  ;;  %v3458_v8 = vrot.slane %v7081_v49, 2  ;;  %v3414_v13 = vsel %vm3410_vm9, 1, %v7660_v7  ;;  %vm3227_vm14 = vcmp.ge.f32.partialorder %v7026_v20, 0.0 }
 0xc78   :  { %v3327_v14 = vadd.f32 -0.28449672, %v3323_v16  ;;  %v3370_v2 = vadd.f32 1.0, %v3366_v52  ;;  %v3476_v43 = vadd.s32 4, %v4952_v44  ;;  %v3477_v16 = vadd.s32 4, %v7086_v54 }
 0xc79   :  { %4602 = vrot.lane.b32.xlu2 %v4601_v6, %s4986_s0  ;;  %v3459_v25 = vsel %vm1953_vm13, %v3457_v28, %v3458_v8  ;;  %vm7663_vm10 = vcmp.eq.s32.totalorder %v6464_v39, 1  ;;  %vm7664_vm15 = vcmp.eq.s32.totalorder %v6474_v22, 1  ;;  %vm7665_vm9 = vcmp.eq.s32.totalorder %v6346_v10, 1  ;;  %v7666_v22 = vld [vmem:[#allocation5_spill] sm:$0xff]  ;;  %v7668_v10 = vld [vmem:[#allocation6_spill] sm:$0xff]  ;;  %v3581_v28 = vld [vmem:[%s7601_s22 + $0x30] sm:$0xff] }
 0xc7a   :  { %v3331_v57 = vmul.f32 %v3327_v14, %v7068_v11  ;;  %v3374_v50 = vmul.f32 %v3370_v2, %v3218_v48  ;;  %v3469_v21 = vsel %vm1998_vm5, %v3459_v25, 0.0  ;;  %vm3480_vm1 = vcmp.ge.s32.totalorder %v3476_v43, 0  ;;  %v3590_v2 = vld [vmem:[%s7601_s22 + $0x78] sm:$0xff] }
 0xc7b   :  { %vm3484_vm11 = vcmp.lt.s32.totalorder %v3476_v43, 16  ;;  %vm7662_vm5 = vcmp.eq.s32.totalorder %v6477_v59, 1  ;;  %vm3485_vm6 = vcmp.lt.s32.totalorder %v3477_v16, 16  ;;  %v4953_v59 = vld [vmem:[%s7653_s10 + $0x18] sm:$0xff]  ;;  %3609 = vmatpush.msra.mxu0 %v3590_v2  ;;  %v3576_v43 = vld [vmem:[%s7601_s22 + $0x8] sm:$0xff]  ;;  %s4462_s10 = sshll.u32 %s7605_s26, 4  ;;  %s4463_s10 = int_to_ptr.hbm [resolvable:$true] %s4462_s10 }
 0xc7c   :  { %v3335_v17 = vadd.f32 0.2548296, %v3331_v57  ;;  %v3378_v53 = vmul.f32 %v3374_v50, %v6238_v35  ;;  %vm3488_vm7 = vmand %vm3480_vm1, %vm3484_vm11  ;;  %v3400_v1 = vadd.s32 4294967292, %v4953_v59  ;;  %v3478_v6 = vadd.s32 4, %v4953_v59  ;;  %v3587_v50 = vld [vmem:[%s7601_s22 + $0x60] sm:$0xff]  ;;  %v3578_v25 = vld [vmem:[%s7601_s22 + $0x18] sm:$0xff] }
 0xc7d   :  { %v3492_v40 = vsel %vm3488_vm7, 1, %v7660_v7 }
 0xc7e   :  { %v3339_v19 = vmul.f32 %v3335_v17, %v7068_v11  ;;  %3424 = vperm.xlu0 %4573, %v3415_v27   ;;  %v3460_v33 = vrot.slane %v3378_v53, 2  ;;  %v3388_v51 = vrot.slane %v3378_v53, 4  ;;  %v3231_v11 = vsel %vm3227_vm14, 1.0, %v7659_v47  ;;  %v3589_v27 = vld [vmem:[%s7601_s22 + $0x70] sm:$0xff]  ;;  %v3588_v17 = vld [vmem:[%s7601_s22 + $0x68] sm:$0xff] }
 0xc7f   :  { %v3440_v23 = vrot.slane %v3378_v53, 6  ;;  %v3455_v39 = vsel %vm7665_vm9, %v3378_v53, 0.0  ;;  %vm3404_vm14 = vcmp.ge.s32.totalorder %v3400_v1, 0  ;;  %vm3482_vm11 = vcmp.ge.s32.totalorder %v3478_v6, 0  ;;  %3610 = vmatpush.msra.mxu0 %v3589_v27  ;;  %v3582_v53 = vld [vmem:[%s7601_s22 + $0x38] sm:$0xff] }
 0xc80   :  { %v3359_v5 = vmul.f32 %v4893_v9, %v3339_v19  ;;  %v3461_v62 = vsel %vm1953_vm13, %v3458_v8, %v3460_v33  ;;  %v7133_v35 = vsel %vm3384_vm8, %v3386_v34, %v3388_v51  ;;  %vm3486_vm7 = vcmp.lt.s32.totalorder %v3478_v6, 16  ;;  %v3585_v8 = vld [vmem:[%s7601_s22 + $0x50] sm:$0xff]  ;;  %v3584_v19 = vld [vmem:[%s7601_s22 + $0x48] sm:$0xff]  ;;  %v3583_v9 = vld [vmem:[%s7601_s22 + $0x40] sm:$0xff] }
 0xc81   :  { %3421 = vperm.xlu2 %4575, %v3414_v13   ;;  %v3470_v20 = vsel %vm7661_vm3, %v3461_v62, 0.0  ;;  %v3441_v58 = vsel %vm1758_vm12, %v3438_v0, %v3440_v23  ;;  %vm3408_vm3 = vcmp.lt.s32.totalorder %v3400_v1, 16  ;;  %3611 = vmatpush.msra.mxu0 %v3588_v17  ;;  %v3580_v13 = vld [vmem:[%s7601_s22 + $0x28] sm:$0xff] }
 0xc82   :  { %v3363_v32 = vsub.f32 1.0, %v3359_v5  ;;  %v4606_v46 = vpack.i.bf16 %v3470_v20, %v3469_v21  ;;  %v3451_v49 = vsel %vm7663_vm10, %v3441_v58, 0.0  ;;  %vm3412_vm1 = vmand %vm3404_vm14, %vm3408_vm3  ;;  %v3579_v5 = vld [vmem:[%s7601_s22 + $0x20] sm:$0xff] }
 0xc83   :  { %v3416_v14 = vsel %vm3412_vm1, 1, %v7660_v7  ;;  %vm3490_vm10 = vmand %vm3482_vm11, %vm3486_vm7  ;;  %3612 = vmatpush.msra.mxu0 %v3587_v50  ;;  %v4641_v50 = vld [vmem:[%s7604_s25 + $0x5] ss:$0 sm:$0xff] }
 0xc84   :  { %v3367_v12 = vmul.f32 %v3363_v32, %v3231_v11  ;;  %4607 = vrot.lane.b32.xlu1 %v4606_v46, %s4987_s9  ;;  %v3494_v48 = vsel %vm3490_vm10, 1, %v7660_v7  ;;  %v3419_v11 = vpop.permute.xlu1 %3418 }
 0xc86   :  { %v3371_v61 = vadd.f32 1.0, %v3367_v12 }
 0xc88   :  { %v3375_v37 = vmul.f32 %v3371_v61, %v3219_v31 }
 0xc8a   :  { %v3379_v34 = vmul.f32 %v3375_v37, %v6304_v29 }
 0xc8c   :  { %v3462_v26 = vrot.slane %v3379_v34, 2  ;;  %v3442_v44 = vrot.slane %v3379_v34, 6  ;;  %v3390_v45 = vrot.slane %v3379_v34, 4  ;;  %3499 = vperm.xlu1 %4574, %v3492_v40  }
 0xc8e   :  { %v3463_v60 = vsel %vm1953_vm13, %v3460_v33, %v3462_v26  ;;  %v3443_v18 = vsel %vm1758_vm12, %v3440_v23, %v3442_v44  ;;  %v7150_v30 = vsel %vm3384_vm8, %v3388_v51, %v3390_v45  ;;  %v7159_v38 = vsel %vm3384_vm8, %v3390_v45, 0.0  ;;  %v3577_v33 = vld [vmem:[%s7601_s22 + $0x10] sm:$0xff]  ;;  %v3575_v51 = vld [vmem:[%s7601_s22] sm:$0xff] }
 0xc8f   :  { %v3471_v29 = vsel %vm7662_vm5, %v3463_v60, 0.0  ;;  %v3452_v0 = vsel %vm7664_vm15, %v3443_v18, 0.0  ;;  %vm3481_vm12 = vcmp.ge.s32.totalorder %v3477_v16, 0  ;;  %vm7667_vm8 = vcmp.eq.s32.totalorder %v7666_v22, 1 }
 0xc90   :  { %3555 = vrot.lane.b32.xlu0 %v3471_v29, %s4987_s9  ;;  %v4611_v54 = vpack.i.bf16 %v3452_v0, %v3451_v49  ;;  %vm3489_vm2 = vmand %vm3481_vm12, %vm3485_vm6  ;;  %v3456_v56 = vsel %vm7667_vm8, %v3379_v34, 0.0  ;;  %v3468_v52 = vsel %vm1953_vm13, %v3462_v26, 0.0  ;;  %vm7669_vm5 = vcmp.eq.s32.totalorder %v7668_v10, 1 }
 0xc91   :  { %v3493_v63 = vsel %vm3489_vm2, 1, %v7660_v7  ;;  %v3472_v57 = vsel %vm7669_vm5, %v3468_v52, 0.0  ;;  %v3586_v7 = vld [vmem:[%s7601_s22 + $0x58] sm:$0xff]  ;;  %vm3429_vm13 = vcmp.eq.s32.totalorder %v3419_v11, 1  ;;  %vm7670_vm12 = vcmask 785408  }
 0xc92   :  { %4612 = vrot.lane.b32.xlu2 %v4611_v54, %s4986_s0  ;;  %3613 = vmatpush.msra.mxu0 %v3586_v7  ;;  %v3433_v46 = vsel %vm3429_vm13, %v7074_v15, 0.0  ;;  %vm7671_vm9 = vmmov %vm7670_vm12  ;;  %s4990_s0 = smov 8  }
 0xc93   :  { %vm7672_vm3 = vmmov %vm7671_vm9 }
 0xc94   :  { %3539 = vrot.lane.b32.xlu1 %v3455_v39, %s4985_s8  ;;  %3614 = vmatpush.msra.mxu0 %v3585_v8  ;;  %vm7673_vm1 = vmmov %vm7672_vm3 }
 0xc96   :  { %3615 = vmatpush.msra.mxu0 %v3584_v19 }
 0xc98   :  { %3541 = vrot.lane.b32.xlu0 %v3456_v56, %s4985_s8  ;;  %3616 = vmatpush.msra.mxu0 %v3583_v9 }
 0xc9a   :  { %3502 = vperm.xlu2 %4575, %v3493_v63   ;;  %3617 = vmatpush.msra.mxu0 %v3582_v53 }
 0xc9c   :  { %3427 = vperm.xlu1 %4574, %v3416_v14   ;;  %3618 = vmatpush.msra.mxu0 %v3581_v28 }
 0xc9e   :  { %3619 = vmatpush.msra.mxu0 %v3580_v13 }
 0xca0   :  { %3620 = vmatpush.msra.mxu0 %v3579_v5 }
 0xca2   :  { %3557 = vrot.lane.b32.xlu2 %v3472_v57, %s4987_s9  ;;  %3621 = vmatpush.msra.mxu0 %v3578_v25 }
 0xca4   :  { %3505 = vperm.xlu1 %4574, %v3494_v48   ;;  %3622 = vmatpush.msra.mxu0 %v3577_v33 }
 0xca6   :  { %3623 = vmatpush.msra.mxu0 %v3576_v43 }
 0xca8   :  { %3624 = vmatpush.msra.mxu0 %v3575_v51 }
 0xcd3   :  { %v4603_v32 = vpop.permute.xlu2 %4602 }
 0xcd4   :  { %v4604_v20 = vunpack.i.l.bf16 %v4603_v32  ;;  %v4605_v44 = vunpack.i.h.bf16 %v4603_v32 }
 0xcd6   :  { %v3563_v61 = vsel %vm270_vm4, %v3433_v46, %v4604_v20 }
 0xcdb   :  { %v3422_v62 = vpop.permute.xlu2 %3421 }
 0xcdc   :  { %vm3430_vm15 = vcmp.eq.s32.totalorder %v3422_v62, 1 }
 0xcdd   :  { %v3434_v26 = vsel %vm3430_vm15, %v7103_v41, 0.0 }
 0xcde   :  { %v3564_v15 = vsel %vm270_vm4, %v3434_v26, %v4605_v44 }
 0xce8   :  { %v4598_v21 = vpop.permute.xlu0 %4597 }
 0xce9   :  { %v4599_v12 = vunpack.i.l.bf16 %v4598_v21  ;;  %v4600_v58 = vunpack.i.h.bf16 %v4598_v21 }
 0xceb   :  { %v3567_v34 = vsel %vm582_vm0, %v3563_v61, %v4599_v12  ;;  %v3568_v29 = vsel %vm582_vm0, %v3564_v15, %v4600_v58 }
 0xcec   :  { %v4613_v23 = vpop.permute.xlu2 %4612 }
 0xced   :  { %v4614_v54 = vunpack.i.l.bf16 %v4613_v23  ;;  %v4615_v14 = vunpack.i.h.bf16 %v4613_v23 }
 0xcf0   :  { %v3425_v45 = vpop.permute.xlu0 %3424 }
 0xcf1   :  { %vm3431_vm2 = vcmp.eq.s32.totalorder %v3425_v45, 1 }
 0xcf2   :  { %v3435_v41 = vsel %vm3431_vm2, %v7133_v35, 0.0 }
 0xcf3   :  { %v3565_v59 = vsel %vm270_vm4, %v3435_v41, %v4614_v54 }
 0xcf4   :  { %v3503_v0 = vpop.permute.xlu2 %3502 }
 0xcf5   :  { %vm3509_vm14 = vcmp.eq.s32.totalorder %v3503_v0, 1 }
 0xcf6   :  { %v4608_v31 = vpop.permute.xlu1 %4607  ;;  %v3513_v56 = vsel %vm3509_vm14, %v7150_v30, 0.0 }
 0xcf7   :  { %v4609_v37 = vunpack.i.l.bf16 %v4608_v31  ;;  %v4610_v16 = vunpack.i.h.bf16 %v4608_v31 }
 0xcf9   :  { %v3571_v40 = vsel %vm7670_vm12, %v3567_v34, %v4609_v37  ;;  %v3572_v49 = vsel %vm7671_vm9, %v3568_v29, %v4610_v16 }
 0xcfa   :  { %3625 = vmatmul.f32.vlgmr.msra.gmra.mxu0 %v3571_v40 }
 0xcfc   :  { %v3558_v57 = vpop.permute.xlu2 %3557 }
 0xcfe   :  { %v3500_v60 = vpop.permute.xlu1 %3499 }
 0xcff   :  { %vm3508_vm6 = vcmp.eq.s32.totalorder %v3500_v60, 1 }
 0xd00   :  { %v3512_v18 = vsel %vm3508_vm6, %v7133_v35, 0.0 }
 0xd01   :  { %4543 = vmatmul.msk.f32.gmra.mxu1 %vm270_vm4, %v3512_v18 }
 0xd02   :  { %3628 = vmatmul.f32.gmra.mxu0 %v3572_v49  ;;  %v3556_v39 = vpop.permute.xlu0 %3555 }
 0xd06   :  { %v3540_v1 = vpop.permute.xlu1 %3539 }
 0xd07   :  { %v3569_v22 = vsel %vm582_vm0, %v3565_v59, %v3540_v1 }
 0xd08   :  { %v3573_v63 = vsel %vm7672_vm3, %v3569_v22, %v3556_v39 }
 0xd09   :  { %4544 = vmatmul.msk.f32.gmra.mxu1 %vm270_vm4, %v3513_v56 }
 0xd0a   :  { %3631 = vmatmul.f32.gmra.mxu0 %v3573_v63  ;;  %v3542_v52 = vpop.permute.xlu0 %3541 }
 0xd0e   :  { %v3428_v6 = vpop.permute.xlu1 %3427 }
 0xd0f   :  { %vm3432_vm8 = vcmp.eq.s32.totalorder %v3428_v6, 1 }
 0xd10   :  { %v3436_v35 = vsel %vm3432_vm8, %v7150_v30, 0.0  ;;  %v3655_v30 = vpop.f32.mrf.mxu1 }
 0xd11   :  { %v3566_v10 = vsel %vm270_vm4, %v3436_v35, %v4615_v14 }
 0xd12   :  { %v3570_v48 = vsel %vm582_vm0, %v3566_v10, %v3542_v52 }
 0xd13   :  { %v3574_v2 = vsel %vm7673_vm1, %v3570_v48, %v3558_v57 }
 0xd14   :  { %3634 = vmatmul.f32.gmra.mxu0 %v3574_v2 }
 0xd16   :  { %v3506_v27 = vpop.permute.xlu1 %3505 }
 0xd17   :  { %vm3510_vm11 = vcmp.eq.s32.totalorder %v3506_v27, 1 }
 0xd18   :  { %v3514_v17 = vsel %vm3510_vm11, %v7159_v38, 0.0 }
 0xd19   :  { %4545 = vmatmul.msk.f32.gmra.mxu1 %vm270_vm4, %v3514_v17 }
 0xd77   :  { %v3626_v7 = vpop.f32.mrf.mxu0 }
 0xd78   :  { %v3627_v8 = vadd.f32 %v4641_v50, %v3626_v7  ;;  %v3929_v7 = vld [vmem:[%s7602_s23 + $0x10] sm:$0xff] }
 0xd7a   :  { %v3656_v19 = vadd.f32 %v3655_v30, %v3627_v8  ;;  %v3930_v30 = vld [vmem:[%s7602_s23 + $0x18] sm:$0xff]  ;;  %v7288_v8 = vld [vmem:[%s7604_s25 + $0x6] ss:$0 sm:$0xff] }
 0xd7b   :  { %3957 = vmatpush.msra.mxu3 %v3930_v30 }
 0xd7c   :  { %v3669_v9 = vsel %vm270_vm4, %v3656_v19, 0.0 }
 0xd7d   :  { %3670 = vadd.xlane.f32.xlu0 %v3669_v9  ;;  %3958 = vmatpush.msra.mxu3 %v3929_v7 }
 0xd7e   :  { %v3658_v53 = vpop.f32.mrf.mxu1 }
 0xd7f   :  { %v3629_v28 = vpop.f32.mrf.mxu0 }
 0xd80   :  { %v3630_v13 = vadd.f32 %v4641_v50, %v3629_v28  ;;  %v7296_v28 = vld [vmem:[%s7604_s25 + $0x7] ss:$0 sm:$0xff] }
 0xd82   :  { %v3659_v5 = vadd.f32 %v3658_v53, %v3630_v13  ;;  %v3928_v53 = vld [vmem:[%s7602_s23 + $0x8] sm:$0xff] }
 0xd83   :  { %3959 = vmatpush.msra.mxu3 %v3928_v53 }
 0xd84   :  { %v3672_v25 = vsel %vm270_vm4, %v3659_v5, 0.0 }
 0xd85   :  { %3673 = vadd.xlane.f32.xlu2 %v3672_v25  ;;  %v3927_v25 = vld [vmem:[%s7602_s23] sm:$0xff] }
 0xd86   :  { %v3661_v43 = vpop.f32.mrf.mxu1  ;;  %3960 = vmatpush.msra.mxu3 %v3927_v25 }
 0xd87   :  { %v3632_v38 = vpop.f32.mrf.mxu0 }
 0xd88   :  { %v3633_v33 = vadd.f32 %v4641_v50, %v3632_v38 }
 0xd8a   :  { %v3662_v51 = vadd.f32 %v3661_v43, %v3633_v33 }
 0xd8c   :  { %v3675_v32 = vsel %vm270_vm4, %v3662_v51, 0.0 }
 0xd8d   :  { %3676 = vadd.xlane.f32.xlu1 %v3675_v32 }
 0xd91   :  { %v3635_v11 = vpop.f32.mrf.mxu0 }
 0xd92   :  { %v3636_v62 = vadd.f32 %v4641_v50, %v3635_v11 }
 0xd96   :  { %v3664_v21 = vpop.f32.mrf.mxu1 }
 0xd97   :  { %v3665_v20 = vadd.f32 %v3664_v21, %v3636_v62 }
 0xd99   :  { %v3678_v12 = vsel %vm270_vm4, %v3665_v20, 0.0 }
 0xd9a   :  { %3679 = vadd.xlane.f32.xlu2 %v3678_v12 }
 0xdf0   :  { %v3671_v46 = vpop.xlane.xlu0 %3670 }
 0xdf1   :  { %v3681_v31 = vmul.f32 %v3671_v46, %v6051_v42 }
 0xdf3   :  { %v3685_v61 = vsub.f32 %v3656_v19, %v3681_v31 }
 0xdf5   :  { %v3689_v37 = vmul.f32 %v3685_v61, %v3685_v61 }
 0xdf7   :  { %v3693_v23 = vsel %vm270_vm4, %v3689_v37, 0.0 }
 0xdf8   :  { %v3674_v34 = vpop.xlane.xlu2 %3673  ;;  %3694 = vadd.xlane.f32.xlu0 %v3693_v23 }
 0xdf9   :  { %v3682_v40 = vmul.f32 %v3674_v34, %v6051_v42 }
 0xdfb   :  { %v7259_v26 = vsub.f32 %v3659_v5, %v3682_v40 }
 0xdfd   :  { %v3690_v58 = vmul.f32 %v7259_v26, %v7259_v26 }
 0xdff   :  { %v3696_v44 = vsel %vm270_vm4, %v3690_v58, 0.0 }
 0xe00   :  { %v3677_v45 = vpop.xlane.xlu1 %3676  ;;  %3697 = vadd.xlane.f32.xlu1 %v3696_v44 }
 0xe01   :  { %v3683_v16 = vmul.f32 %v3677_v45, %v6051_v42 }
 0xe03   :  { %v7265_v60 = vsub.f32 %v3662_v51, %v3683_v16 }
 0xe05   :  { %v3691_v15 = vmul.f32 %v7265_v60, %v7265_v60 }
 0xe07   :  { %v3699_v18 = vsel %vm270_vm4, %v3691_v15, 0.0 }
 0xe08   :  { %3700 = vadd.xlane.f32.xlu2 %v3699_v18 }
 0xe0d   :  { %v3680_v29 = vpop.xlane.xlu2 %3679 }
 0xe0e   :  { %v3684_v49 = vmul.f32 %v3680_v29, %v6051_v42 }
 0xe10   :  { %v7271_v0 = vsub.f32 %v3665_v20, %v3684_v49 }
 0xe12   :  { %v3692_v41 = vmul.f32 %v7271_v0, %v7271_v0 }
 0xe14   :  { %v3702_v54 = vsel %vm270_vm4, %v3692_v41, 0.0 }
 0xe15   :  { %3703 = vadd.xlane.f32.xlu0 %v3702_v54 }
 0xe6b   :  { %v3695_v59 = vpop.xlane.xlu0 %3694 }
 0xe6c   :  { %v3705_v1 = vmul.f32 %v3695_v59, %v6051_v42 }
 0xe6e   :  { %v3709_v39 = vadd.f32 1e-05, %v3705_v1 }
 0xe70   :  { %4894 = vrsqrt.f32 %v3709_v39  ;;  %vm3719_vm5 = vweird.f32 %v3709_v39 }
 0xe73   :  { %v3698_v22 = vpop.xlane.xlu1 %3697 }
 0xe74   :  { %v3706_v56 = vmul.f32 %v3698_v22, %v6051_v42 }
 0xe76   :  { %v4895_v63 = vpop.eup %4894  ;;  %v3710_v6 = vadd.f32 1e-05, %v3706_v56 }
 0xe77   :  { %v3714_v14 = vmul.f32 %v4895_v63, %v3709_v39  ;;  %vm3720_vm7 = vweird.f32 %v4895_v63 }
 0xe78   :  { %4896 = vrsqrt.f32 %v3710_v6  ;;  %vm3721_vm10 = vmor %vm3719_vm5, %vm3720_vm7  ;;  %vm3729_vm15 = vweird.f32 %v3710_v6 }
 0xe79   :  { %v3715_v35 = vmul.f32 %v4895_v63, %v3714_v14 }
 0xe7b   :  { %v3716_v52 = vmul.f32 0.5, %v3715_v35  ;;  %v3701_v10 = vpop.xlane.xlu2 %3700 }
 0xe7c   :  { %v3707_v57 = vmul.f32 %v3701_v10, %v6051_v42 }
 0xe7d   :  { %v3717_v48 = vsub.f32 1.5, %v3716_v52 }
 0xe7e   :  { %v4897_v2 = vpop.eup %4896  ;;  %v3711_v27 = vadd.f32 1e-05, %v3707_v57 }
 0xe7f   :  { %v3718_v17 = vmul.f32 %v4895_v63, %v3717_v48  ;;  %v3724_v50 = vmul.f32 %v4897_v2, %v3710_v6  ;;  %vm3730_vm13 = vweird.f32 %v4897_v2 }
 0xe80   :  { %4898 = vrsqrt.f32 %v3711_v27  ;;  %vm3731_vm12 = vmor %vm3729_vm15, %vm3730_vm13  ;;  %vm3739_vm2 = vweird.f32 %v3711_v27 }
 0xe81   :  { %v3722_v19 = vsel %vm3721_vm10, %v4895_v63, %v3718_v17  ;;  %v3725_v9 = vmul.f32 %v4897_v2, %v3724_v50 }
 0xe82   :  { %v3753_v13 = vmul.f32 %v3722_v19, %v3685_v61 }
 0xe83   :  { %v3726_v5 = vmul.f32 0.5, %v3725_v9 }
 0xe84   :  { %v3758_v38 = vmul.f32 %v7288_v8, %v3753_v13 }
 0xe85   :  { %v3727_v33 = vsub.f32 1.5, %v3726_v5 }
 0xe86   :  { %v4899_v43 = vpop.eup %4898  ;;  %v7303_v51 = vadd.f32 %v7296_v28, %v3758_v38 }
 0xe87   :  { %v3728_v32 = vmul.f32 %v4897_v2, %v3727_v33  ;;  %v3734_v11 = vmul.f32 %v4899_v43, %v3711_v27  ;;  %vm3740_vm6 = vweird.f32 %v4899_v43 }
 0xe88   :  { %v7306_v62 = vmul.f32 0.70710677, %v7303_v51  ;;  %v3704_v21 = vpop.xlane.xlu0 %3703  ;;  %vm3741_vm9 = vmor %vm3739_vm2, %vm3740_vm6 }
 0xe89   :  { %v3732_v20 = vsel %vm3731_vm12, %v4897_v2, %v3728_v32  ;;  %v3735_v12 = vmul.f32 %v4899_v43, %v3734_v11  ;;  %v3708_v46 = vmul.f32 %v3704_v21, %v6051_v42 }
 0xe8a   :  { %v3783_v31 = vand.u32 2147483647, %v7306_v62  ;;  %v3754_v61 = vmul.f32 %v3732_v20, %v7259_v26 }
 0xe8b   :  { %v3736_v37 = vmul.f32 0.5, %v3735_v12  ;;  %v3712_v23 = vadd.f32 1e-05, %v3708_v46 }
 0xe8c   :  { %v3787_v34 = vmul.f32 0.3275911, %v3783_v31  ;;  %v3759_v40 = vmul.f32 %v7288_v8, %v3754_v61  ;;  %v3891_v17 = vsub.f32 0.0, %v3783_v31 }
 0xe8d   :  { %v3737_v58 = vsub.f32 1.5, %v3736_v37  ;;  %4900 = vrsqrt.f32 %v3712_v23  ;;  %vm3749_vm8 = vweird.f32 %v3712_v23 }
 0xe8e   :  { %v3791_v44 = vadd.f32 1.0, %v3787_v34  ;;  %v7313_v45 = vadd.f32 %v7296_v28, %v3759_v40 }
 0xe8f   :  { %v3738_v16 = vmul.f32 %v4899_v43, %v3737_v58 }
 0xe90   :  { %4902 = vrcp.f32 %v3791_v44  ;;  %v7316_v15 = vmul.f32 0.70710677, %v7313_v45  ;;  %v3806_v35 = vand.u32 2147483648, %v3791_v44  ;;  %v3804_v10 = vand.u32 2147483647, %v3791_v44 }
 0xe91   :  { %v3742_v42 = vsel %vm3741_vm9, %v4899_v43, %v3738_v16  ;;  %vm3800_vm11 = vweird.f32 %v3791_v44  ;;  %v3895_v43 = vmul.f32 %v3891_v17, %v3783_v31 }
 0xe92   :  { %v3755_v26 = vmul.f32 %v3742_v42, %v7265_v60  ;;  %v7320_v29 = vand.u32 2147483647, %v7316_v15  ;;  %v3807_v30 = vor.u32 1.1754944e-38, %v3806_v35  ;;  %vm3805_vm5 = vcmp.eq.f32.partialorder %v3804_v10, 8.507059e+37 }
 0xe93   :  { %v4901_v18 = vpop.eup %4900 }
 0xe94   :  { %v3744_v49 = vmul.f32 %v4901_v18, %v3712_v23  ;;  %v3760_v41 = vmul.f32 %v7288_v8, %v3755_v26  ;;  %v3788_v54 = vmul.f32 0.3275911, %v7320_v29  ;;  %vm3750_vm14 = vweird.f32 %v4901_v18 }
 0xe95   :  { %vm3751_vm1 = vmor %vm3749_vm8, %vm3750_vm14  ;;  %v3899_v23 = vmul.f32 1.442695, %v3895_v43  ;;  %v3892_v16 = vsub.f32 0.0, %v7320_v29 }
 0xe96   :  { %v4903_v59 = vpop.eup %4902  ;;  %v3745_v1 = vmul.f32 %v4901_v18, %v3744_v49  ;;  %v7325_v39 = vadd.f32 %v7296_v28, %v3760_v41  ;;  %v3792_v56 = vadd.f32 1.0, %v3788_v54 }
 0xe97   :  { %v3796_v22 = vmul.f32 %v4903_v59, %v3791_v44  ;;  %vm3801_vm3 = vweird.f32 %v4903_v59 }
 0xe98   :  { %v3746_v63 = vmul.f32 0.5, %v3745_v1  ;;  %v7328_v6 = vmul.f32 0.70710677, %v7325_v39  ;;  %4904 = vrcp.f32 %v3792_v56  ;;  %vm3802_vm7 = vmor %vm3800_vm11, %vm3801_vm3  ;;  %v3821_v11 = vand.u32 2147483648, %v3792_v56 }
 0xe99   :  { %v3797_v60 = vsub.f32 1.0, %v3796_v22  ;;  %v3819_v20 = vand.u32 2147483647, %v3792_v56  ;;  %vm3815_vm13 = vweird.f32 %v3792_v56  ;;  %vm3775_vm3 = vcmp.ge.f32.partialorder %v7306_v62, 0.0 }
 0xe9a   :  { %v3747_v14 = vsub.f32 1.5, %v3746_v63  ;;  %v7331_v57 = vand.u32 2147483647, %v7328_v6 }
 0xe9b   :  { %v3798_v52 = vmul.f32 %v4903_v59, %v3797_v60  ;;  %vm3820_vm12 = vcmp.eq.f32.partialorder %v3819_v20, 8.507059e+37 }
 0xe9c   :  { %v3748_v48 = vmul.f32 %v4901_v18, %v3747_v14  ;;  %v3789_v27 = vmul.f32 0.3275911, %v7331_v57 }
 0xe9d   :  { %v3799_v2 = vadd.f32 %v4903_v59, %v3798_v52 }
 0xe9e   :  { %v3752_v50 = vsel %vm3751_vm1, %v4901_v18, %v3748_v48  ;;  %v4905_v7 = vpop.eup %4904  ;;  %v3793_v53 = vadd.f32 1.0, %v3789_v27  ;;  %vm3776_vm1 = vcmp.ge.f32.partialorder %v7316_v15, 0.0 }
 0xe9f   :  { %v3756_v19 = vmul.f32 %v3752_v50, %v7271_v0  ;;  %v3803_v9 = vsel %vm3802_vm7, %v4903_v59, %v3799_v2  ;;  %v3811_v5 = vmul.f32 %v4905_v7, %v3792_v56  ;;  %vm3816_vm10 = vweird.f32 %v4905_v7 }
 0xea0   :  { %v3808_v13 = vsel %vm3805_vm5, %v3807_v30, %v3803_v9  ;;  %4906 = vrcp.f32 %v3793_v53  ;;  %vm3817_vm15 = vmor %vm3815_vm13, %vm3816_vm10  ;;  %v3836_v49 = vand.u32 2147483648, %v3793_v53  ;;  %v3834_v1 = vand.u32 2147483647, %v3793_v53 }
 0xea1   :  { %v3855_v25 = vmul.f32 1.0614054, %v3808_v13  ;;  %v3812_v38 = vsub.f32 1.0, %v3811_v5  ;;  %v3761_v33 = vmul.f32 %v7288_v8, %v3756_v19  ;;  %v3822_v8 = vor.u32 1.1754944e-38, %v3821_v11 }
 0xea2   :  { %4908 = vpow2.f32 %v3899_v23  ;;  %v3896_v56 = vmul.f32 %v3892_v16, %v7320_v29  ;;  %vm3830_vm2 = vweird.f32 %v3793_v53  ;;  %v3837_v52 = vor.u32 1.1754944e-38, %v3836_v49 }
 0xea3   :  { %v3859_v32 = vadd.f32 -1.4531521, %v3855_v25  ;;  %v3813_v21 = vmul.f32 %v4905_v7, %v3812_v38  ;;  %v7337_v12 = vadd.f32 %v7296_v28, %v3761_v33  ;;  %vm3835_vm14 = vcmp.eq.f32.partialorder %v3834_v1, 8.507059e+37 }
 0xea4   :  { %v3901_v17 = vmul.f32 1.442695, %v3896_v56  ;;  %v3893_v30 = vsub.f32 0.0, %v7331_v57  ;;  %v3779_v33 = vsel %vm3775_vm3, 1.0, %v7659_v47  ;;  %v3768_v56 = vmul.f32 0.5, %v7313_v45 }
 0xea5   :  { %v3863_v0 = vmul.f32 %v3859_v32, %v3808_v13  ;;  %v3814_v46 = vadd.f32 %v4905_v7, %v3813_v21  ;;  %v7340_v61 = vmul.f32 0.70710677, %v7337_v12  ;;  %v3767_v21 = vmul.f32 0.5, %v7303_v51 }
 0xea6   :  { %v4907_v37 = vpop.eup %4906  ;;  %v3897_v38 = vmul.f32 %v3893_v30, %v7331_v57  ;;  %vm3777_vm10 = vcmp.ge.f32.partialorder %v7328_v6, 0.0 }
 0xea7   :  { %v3867_v34 = vadd.f32 1.4214138, %v3863_v0  ;;  %v3818_v31 = vsel %vm3817_vm15, %v4905_v7, %v3814_v46  ;;  %v3826_v40 = vmul.f32 %v4907_v37, %v3793_v53  ;;  %v7344_v28 = vand.u32 2147483647, %v7340_v61 }
 0xea8   :  { %v3823_v44 = vsel %vm3820_vm12, %v3822_v8, %v3818_v31  ;;  %vm3831_vm6 = vweird.f32 %v4907_v37  ;;  %v4909_v2 = vpop.eup %4908  ;;  %v3781_v30 = vsel %vm3777_vm10, 1.0, %v7659_v47  ;;  %vm3778_vm13 = vcmp.ge.f32.partialorder %v7340_v61, 0.0 }
 0xea9   :  { %v3871_v58 = vmul.f32 %v3867_v34, %v3808_v13  ;;  %v3856_v42 = vmul.f32 1.0614054, %v3823_v44  ;;  %v3827_v26 = vsub.f32 1.0, %v3826_v40  ;;  %v3790_v41 = vmul.f32 0.3275911, %v7344_v28  ;;  %vm3832_vm9 = vmor %vm3830_vm2, %vm3831_vm6 }
 0xeab   :  { %v3875_v18 = vadd.f32 -0.28449672, %v3871_v58  ;;  %v3860_v54 = vadd.f32 -1.4531521, %v3856_v42  ;;  %v3828_v59 = vmul.f32 %v4907_v37, %v3827_v26  ;;  %v3794_v63 = vadd.f32 1.0, %v3790_v41 }
 0xead   :  { %v3879_v22 = vmul.f32 %v3875_v18, %v3808_v13  ;;  %v3864_v60 = vmul.f32 %v3860_v54, %v3823_v44  ;;  %v3829_v14 = vadd.f32 %v4907_v37, %v3828_v59  ;;  %4910 = vrcp.f32 %v3794_v63 }
 0xeae   :  { %4912 = vpow2.f32 %v3901_v17  ;;  %v3849_v23 = vand.u32 2147483647, %v3794_v63  ;;  %v3851_v34 = vand.u32 2147483648, %v3794_v63  ;;  %vm3845_vm11 = vweird.f32 %v3794_v63 }
 0xeaf   :  { %v3883_v35 = vadd.f32 0.2548296, %v3879_v22  ;;  %v3868_v10 = vadd.f32 1.4214138, %v3864_v60  ;;  %v3833_v48 = vsel %vm3832_vm9, %v4907_v37, %v3829_v14  ;;  %v3903_v37 = vmul.f32 1.442695, %v3897_v38 }
 0xeb0   :  { %v3838_v50 = vsel %vm3835_vm14, %v3837_v52, %v3833_v48  ;;  %v3852_v51 = vor.u32 1.1754944e-38, %v3851_v34  ;;  %vm3850_vm5 = vcmp.eq.f32.partialorder %v3849_v23, 8.507059e+37  ;;  %v3894_v59 = vsub.f32 0.0, %v7344_v28 }
 0xeb1   :  { %v3887_v27 = vmul.f32 %v3883_v35, %v3808_v13  ;;  %v3872_v7 = vmul.f32 %v3868_v10, %v3823_v44  ;;  %v3857_v19 = vmul.f32 1.0614054, %v3838_v50  ;;  %4914 = vpow2.f32 %v3903_v37 }
 0xeb2   :  { %v3898_v52 = vmul.f32 %v3894_v59, %v7344_v28 }
 0xeb3   :  { %v3907_v29 = vmul.f32 %v4909_v2, %v3887_v27  ;;  %v3876_v9 = vadd.f32 -0.28449672, %v3872_v7  ;;  %v3861_v53 = vadd.f32 -1.4531521, %v3857_v19  ;;  %v4911_v5 = vpop.eup %4910 }
 0xeb4   :  { %v3841_v32 = vmul.f32 %v4911_v5, %v3794_v63  ;;  %vm3846_vm8 = vweird.f32 %v4911_v5  ;;  %v4913_v57 = vpop.eup %4912  ;;  %v3905_v7 = vmul.f32 1.442695, %v3898_v52 }
 0xeb5   :  { %v3911_v25 = vsub.f32 1.0, %v3907_v29  ;;  %v3880_v43 = vmul.f32 %v3876_v9, %v3823_v44  ;;  %v3865_v13 = vmul.f32 %v3861_v53, %v3838_v50  ;;  %vm3847_vm7 = vmor %vm3845_vm11, %vm3846_vm8 }
 0xeb6   :  { %v3842_v46 = vsub.f32 1.0, %v3841_v32  ;;  %4916 = vpow2.f32 %v3905_v7  ;;  %v3770_v32 = vmul.f32 0.5, %v7337_v12 }
 0xeb7   :  { %v3915_v11 = vmul.f32 %v3911_v25, %v3779_v33  ;;  %v3884_v20 = vadd.f32 0.2548296, %v3880_v43  ;;  %v3869_v0 = vadd.f32 1.4214138, %v3865_v13  ;;  %v4915_v35 = vpop.eup %4914  ;;  %v3782_v43 = vsel %vm3778_vm13, 1.0, %v7659_v47 }
 0xeb8   :  { %v3843_v40 = vmul.f32 %v4911_v5, %v3842_v46 }
 0xeb9   :  { %v3919_v62 = vadd.f32 1.0, %v3915_v11  ;;  %v3888_v8 = vmul.f32 %v3884_v20, %v3823_v44  ;;  %v3873_v31 = vmul.f32 %v3869_v0, %v3838_v50  ;;  %v3780_v44 = vsel %vm3776_vm1, 1.0, %v7659_v47 }
 0xeba   :  { %v3844_v26 = vadd.f32 %v4911_v5, %v3843_v40 }
 0xebb   :  { %v3923_v58 = vmul.f32 %v3919_v62, %v3767_v21  ;;  %v3908_v16 = vmul.f32 %v4913_v57, %v3888_v8  ;;  %v3877_v42 = vadd.f32 -0.28449672, %v3873_v31  ;;  %v4644_v21 = vld [vmem:[%s7604_s25 + $0x8] ss:$0 sm:$0xff] }
 0xebc   :  { %v3848_v41 = vsel %vm3847_vm7, %v4911_v5, %v3844_v26  ;;  %v4917_v25 = vpop.eup %4916  ;;  %v4261_v26 = vpop.f32.mrf.mxu2 }
 0xebd   :  { %4546 = vmatmul.msk.f32.vlgmr.msra.gmra.mxu3 %vm270_vm4, %v3923_v58  ;;  %v3912_v18 = vsub.f32 1.0, %v3908_v16  ;;  %v3881_v49 = vmul.f32 %v3877_v42, %v3838_v50  ;;  %v3853_v54 = vsel %vm3850_vm5, %v3852_v51, %v3848_v41 }
 0xebe   :  { %v3858_v22 = vmul.f32 1.0614054, %v3853_v54 }
 0xebf   :  { %v3916_v1 = vmul.f32 %v3912_v18, %v3780_v44  ;;  %v3885_v15 = vadd.f32 0.2548296, %v3881_v49 }
 0xec0   :  { %v3862_v14 = vadd.f32 -1.4531521, %v3858_v22 }
 0xec1   :  { %v3920_v63 = vadd.f32 1.0, %v3916_v1  ;;  %v3889_v60 = vmul.f32 %v3885_v15, %v3838_v50  ;;  %v3769_v50 = vmul.f32 0.5, %v7325_v39 }
 0xec2   :  { %v3866_v2 = vmul.f32 %v3862_v14, %v3853_v54  ;;  %v4638_v14 = vld [vmem:[%s7604_s25 + $0xb] ss:$0 sm:$0xff] }
 0xec3   :  { %v3924_v10 = vmul.f32 %v3920_v63, %v3768_v56  ;;  %v3909_v48 = vmul.f32 %v4915_v35, %v3889_v60  ;;  %v7396_v35 = vadd.f32 %v4638_v14, %v4261_v26 }
 0xec4   :  { %v3870_v17 = vadd.f32 1.4214138, %v3866_v2 }
 0xec5   :  { %4547 = vmatmul.msk.f32.gmra.mxu3 %vm270_vm4, %v3924_v10  ;;  %v3913_v27 = vsub.f32 1.0, %v3909_v48  ;;  %v4273_v2 = vadd.f32 1.0, %v7396_v35 }
 0xec6   :  { %v3874_v45 = vmul.f32 %v3870_v17, %v3853_v54 }
 0xec7   :  { %v3917_v19 = vmul.f32 %v3913_v27, %v3781_v30 }
 0xec8   :  { %v3878_v9 = vadd.f32 -0.28449672, %v3874_v45 }
 0xec9   :  { %v3921_v29 = vadd.f32 1.0, %v3917_v19 }
 0xeca   :  { %v3882_v53 = vmul.f32 %v3878_v9, %v3853_v54 }
 0xecb   :  { %v3925_v28 = vmul.f32 %v3921_v29, %v3769_v50 }
 0xecc   :  { %v3886_v6 = vadd.f32 0.2548296, %v3882_v53 }
 0xecd   :  { %4548 = vmatmul.msk.f32.gmra.mxu3 %vm270_vm4, %v3925_v28 }
 0xece   :  { %v3890_v5 = vmul.f32 %v3886_v6, %v3853_v54  ;;  %v4264_v54 = vpop.f32.mrf.mxu2 }
 0xecf   :  { %v7409_v45 = vadd.f32 %v4638_v14, %v4264_v54 }
 0xed0   :  { %v3910_v38 = vmul.f32 %v4917_v25, %v3890_v5 }
 0xed1   :  { %v4274_v50 = vadd.f32 1.0, %v7409_v45 }
 0xed2   :  { %v3914_v33 = vsub.f32 1.0, %v3910_v38 }
 0xed4   :  { %v3918_v13 = vmul.f32 %v3914_v33, %v3782_v43 }
 0xed6   :  { %v3922_v39 = vadd.f32 1.0, %v3918_v13  ;;  %v4267_v60 = vpop.f32.mrf.mxu2 }
 0xed7   :  { %v7414_v29 = vadd.f32 %v4638_v14, %v4267_v60 }
 0xed8   :  { %v3926_v11 = vmul.f32 %v3922_v39, %v3770_v32 }
 0xed9   :  { %v4275_v9 = vadd.f32 1.0, %v7414_v29 }
 0xeda   :  { %4549 = vmatmul.msk.f32.gmra.mxu3 %vm270_vm4, %v3926_v11 }
 0xede   :  { %v4270_v27 = vpop.f32.mrf.mxu2 }
 0xedf   :  { %v7406_v7 = vadd.f32 %v4638_v14, %v4270_v27 }
 0xee1   :  { %v4276_v19 = vadd.f32 1.0, %v7406_v7 }
 0xf40   :  { %v3962_v20 = vpop.f32.mrf.mxu3 }
 0xf41   :  { %v3963_v0 = vadd.f32 %v4644_v21, %v3962_v20 }
 0xf43   :  { %v3976_v46 = vsel %vm582_vm0, %v3963_v0, 0.0 }
 0xf44   :  { %3977 = vadd.xlane.f32.xlu1 %v3976_v46 }
 0xf48   :  { %v3965_v61 = vpop.f32.mrf.mxu3 }
 0xf49   :  { %v3966_v62 = vadd.f32 %v4644_v21, %v3965_v61 }
 0xf4b   :  { %v3979_v37 = vsel %vm582_vm0, %v3966_v62, 0.0 }
 0xf4c   :  { %3980 = vadd.xlane.f32.xlu2 %v3979_v37 }
 0xf50   :  { %v3968_v23 = vpop.f32.mrf.mxu3 }
 0xf51   :  { %v3969_v12 = vadd.f32 %v4644_v21, %v3968_v23 }
 0xf53   :  { %v3982_v34 = vsel %vm582_vm0, %v3969_v12, 0.0 }
 0xf54   :  { %3983 = vadd.xlane.f32.xlu0 %v3982_v34  ;;  %v7430_v34 = vld [vmem:[%s7604_s25 + $0xa] ss:$0 sm:$0xff] }
 0xf5d   :  { %v3971_v8 = vpop.f32.mrf.mxu3 }
 0xf5e   :  { %v3972_v31 = vadd.f32 %v4644_v21, %v3971_v8 }
 0xf60   :  { %v3985_v40 = vsel %vm582_vm0, %v3972_v31, 0.0 }
 0xf61   :  { %3986 = vadd.xlane.f32.xlu1 %v3985_v40 }
 0xfb7   :  { %v3978_v57 = vpop.xlane.xlu1 %3977 }
 0xfb8   :  { %v3988_v58 = vmul.f32 %v3978_v57, %v5794_v55 }
 0xfba   :  { %v7376_v16 = vsub.f32 %v3963_v0, %v3988_v58 }
 0xfbc   :  { %v3996_v42 = vmul.f32 %v7376_v16, %v7376_v16 }
 0xfbe   :  { %v4000_v51 = vsel %vm582_vm0, %v3996_v42, 0.0 }
 0xfbf   :  { %4001 = vadd.xlane.f32.xlu2 %v4000_v51  ;;  %v3981_v18 = vpop.xlane.xlu2 %3980 }
 0xfc0   :  { %v3989_v49 = vmul.f32 %v3981_v18, %v5794_v55 }
 0xfc2   :  { %v7382_v41 = vsub.f32 %v3966_v62, %v3989_v49  ;;  %v7424_v62 = vld [vmem:[%s7604_s25 + $0x9] ss:$0 sm:$0xff] }
 0xfc4   :  { %v3997_v44 = vmul.f32 %v7382_v41, %v7382_v41 }
 0xfc6   :  { %v4003_v59 = vsel %vm582_vm0, %v3997_v44, 0.0 }
 0xfc7   :  { %4004 = vadd.xlane.f32.xlu0 %v4003_v59  ;;  %v3984_v1 = vpop.xlane.xlu0 %3983 }
 0xfc8   :  { %v3990_v15 = vmul.f32 %v3984_v1, %v5794_v55 }
 0xfca   :  { %v7388_v22 = vsub.f32 %v3969_v12, %v3990_v15 }
 0xfcc   :  { %v3998_v56 = vmul.f32 %v7388_v22, %v7388_v22 }
 0xfce   :  { %v4006_v63 = vsel %vm582_vm0, %v3998_v56, 0.0 }
 0xfcf   :  { %4007 = vadd.xlane.f32.xlu1 %v4006_v63 }
 0xfd4   :  { %v3987_v52 = vpop.xlane.xlu1 %3986 }
 0xfd5   :  { %v3991_v10 = vmul.f32 %v3987_v52, %v5794_v55 }
 0xfd7   :  { %v7399_v48 = vsub.f32 %v3972_v31, %v3991_v10 }
 0xfd9   :  { %v3999_v17 = vmul.f32 %v7399_v48, %v7399_v48 }
 0xfdb   :  { %4281 = vrot.lane.b32.xlu0 %v4273_v2, %s4985_s8  ;;  %v4009_v30 = vsel %vm582_vm0, %v3999_v17, 0.0 }
 0xfdc   :  { %4010 = vadd.xlane.f32.xlu2 %v4009_v30 }
 0xfe3   :  { %4287 = vrot.lane.b32.xlu0 %v4276_v19, %s4985_s8 }
 0xfe8   :  { %4283 = vrot.lane.b32.xlu1 %v4274_v50, %s4985_s8 }
 0xff4   :  { %4285 = vrot.lane.b32.xlu2 %v4275_v9, %s4985_s8 }
0x1032   :  { %v4002_v28 = vpop.xlane.xlu2 %4001 }
0x1033   :  { %v4012_v53 = vmul.f32 %v4002_v28, %v5794_v55 }
0x1035   :  { %v4016_v6 = vadd.f32 1e-05, %v4012_v53 }
0x1037   :  { %4918 = vrsqrt.f32 %v4016_v6  ;;  %vm4026_vm15 = vweird.f32 %v4016_v6 }
0x103a   :  { %v4005_v5 = vpop.xlane.xlu0 %4004 }
0x103b   :  { %v4013_v25 = vmul.f32 %v4005_v5, %v5794_v55 }
0x103d   :  { %v4919_v38 = vpop.eup %4918  ;;  %v4017_v43 = vadd.f32 1e-05, %v4013_v25 }
0x103e   :  { %v4021_v33 = vmul.f32 %v4919_v38, %v4016_v6  ;;  %vm4027_vm4 = vweird.f32 %v4919_v38 }
0x103f   :  { %4920 = vrsqrt.f32 %v4017_v43  ;;  %vm4028_vm12 = vmor %vm4026_vm15, %vm4027_vm4  ;;  %vm4036_vm2 = vweird.f32 %v4017_v43 }
0x1040   :  { %v4022_v13 = vmul.f32 %v4919_v38, %v4021_v33 }
0x1042   :  { %v4023_v32 = vmul.f32 0.5, %v4022_v13  ;;  %v4008_v39 = vpop.xlane.xlu1 %4007 }
0x1043   :  { %v4014_v21 = vmul.f32 %v4008_v39, %v5794_v55 }
0x1044   :  { %v4024_v11 = vsub.f32 1.5, %v4023_v32 }
0x1045   :  { %v4921_v20 = vpop.eup %4920  ;;  %v4018_v46 = vadd.f32 1e-05, %v4014_v21 }
0x1046   :  { %v4025_v0 = vmul.f32 %v4919_v38, %v4024_v11  ;;  %v4031_v61 = vmul.f32 %v4921_v20, %v4017_v43  ;;  %vm4037_vm6 = vweird.f32 %v4921_v20 }
0x1047   :  { %4922 = vrsqrt.f32 %v4018_v46  ;;  %vm4038_vm9 = vmor %vm4036_vm2, %vm4037_vm6  ;;  %vm4046_vm3 = vweird.f32 %v4018_v46 }
0x1048   :  { %v4029_v37 = vsel %vm4028_vm12, %v4919_v38, %v4025_v0  ;;  %v4032_v12 = vmul.f32 %v4921_v20, %v4031_v61 }
0x1049   :  { %v4060_v23 = vmul.f32 %v4029_v37, %v7376_v16 }
0x104a   :  { %v4033_v8 = vmul.f32 0.5, %v4032_v12 }
0x104b   :  { %v4065_v31 = vmul.f32 %v7424_v62, %v4060_v23 }
0x104c   :  { %v4034_v40 = vsub.f32 1.5, %v4033_v8 }
0x104d   :  { %v7434_v57 = vadd.f32 %v7430_v34, %v4065_v31  ;;  %v4923_v58 = vpop.eup %4922 }
0x104e   :  { %v4035_v42 = vmul.f32 %v4921_v20, %v4034_v40  ;;  %v4041_v26 = vmul.f32 %v4923_v58, %v4018_v46  ;;  %vm4047_vm14 = vweird.f32 %v4923_v58 }
0x104f   :  { %v7437_v16 = vmul.f32 0.70710677, %v7434_v57  ;;  %v4011_v49 = vpop.xlane.xlu2 %4010  ;;  %vm4048_vm8 = vmor %vm4046_vm3, %vm4047_vm14 }
0x1050   :  { %v4039_v51 = vsel %vm4038_vm9, %v4921_v20, %v4035_v42  ;;  %v4042_v18 = vmul.f32 %v4923_v58, %v4041_v26  ;;  %v4015_v59 = vmul.f32 %v4011_v49, %v5794_v55 }
0x1051   :  { %v4061_v44 = vmul.f32 %v4039_v51, %v7382_v41  ;;  %v4090_v54 = vand.u32 2147483647, %v7437_v16 }
0x1052   :  { %v4043_v1 = vmul.f32 0.5, %v4042_v18  ;;  %v4019_v56 = vadd.f32 1e-05, %v4015_v59 }
0x1053   :  { %v4094_v15 = vmul.f32 0.3275911, %v4090_v54  ;;  %v4066_v63 = vmul.f32 %v7424_v62, %v4061_v44  ;;  %v4198_v31 = vsub.f32 0.0, %v4090_v54 }
0x1054   :  { %v4044_v60 = vsub.f32 1.5, %v4043_v1  ;;  %4924 = vrsqrt.f32 %v4019_v56  ;;  %vm4056_vm7 = vweird.f32 %v4019_v56 }
0x1055   :  { %v4098_v14 = vadd.f32 1.0, %v4094_v15  ;;  %v7444_v10 = vadd.f32 %v7430_v34, %v4066_v63  ;;  %v4202_v49 = vmul.f32 %v4198_v31, %v4090_v54 }
0x1056   :  { %v4045_v52 = vmul.f32 %v4923_v58, %v4044_v60 }
0x1057   :  { %4926 = vrcp.f32 %v4098_v14  ;;  %v7447_v2 = vmul.f32 0.70710677, %v7444_v10  ;;  %v4113_v43 = vand.u32 2147483648, %v4098_v14  ;;  %v4111_v39 = vand.u32 2147483647, %v4098_v14 }
0x1058   :  { %v4049_v41 = vsel %vm4048_vm8, %v4923_v58, %v4045_v52  ;;  %vm4107_vm5 = vweird.f32 %v4098_v14 }
0x1059   :  { %v4062_v27 = vmul.f32 %v4049_v41, %v7388_v22  ;;  %v7451_v17 = vand.u32 2147483647, %v7447_v2  ;;  %v4114_v46 = vor.u32 1.1754944e-38, %v4113_v43  ;;  %vm4112_vm4 = vcmp.eq.f32.partialorder %v4111_v39, 8.507059e+37 }
0x105a   :  { %v4925_v30 = vpop.eup %4924 }
0x105b   :  { %v4067_v19 = vmul.f32 %v7424_v62, %v4062_v27  ;;  %v4051_v50 = vmul.f32 %v4925_v30, %v4019_v56  ;;  %v4095_v9 = vmul.f32 0.3275911, %v7451_v17  ;;  %vm4057_vm1 = vweird.f32 %v4925_v30 }
0x105c   :  { %vm4058_vm10 = vmor %vm4056_vm7, %vm4057_vm1  ;;  %v4199_v54 = vsub.f32 0.0, %v7451_v17  ;;  %vm4082_vm1 = vcmp.ge.f32.partialorder %v7437_v16, 0.0 }
0x105d   :  { %v4927_v28 = vpop.eup %4926  ;;  %v7456_v53 = vadd.f32 %v7430_v34, %v4067_v19  ;;  %v4052_v5 = vmul.f32 %v4925_v30, %v4051_v50  ;;  %v4099_v25 = vadd.f32 1.0, %v4095_v9 }
0x105e   :  { %v4103_v6 = vmul.f32 %v4927_v28, %v4098_v14  ;;  %vm4108_vm11 = vweird.f32 %v4927_v28 }
0x105f   :  { %v7459_v38 = vmul.f32 0.70710677, %v7456_v53  ;;  %v4053_v33 = vmul.f32 0.5, %v4052_v5  ;;  %4928 = vrcp.f32 %v4099_v25  ;;  %vm4109_vm13 = vmor %vm4107_vm5, %vm4108_vm11  ;;  %v4128_v59 = vand.u32 2147483648, %v4099_v25 }
0x1060   :  { %v4104_v22 = vsub.f32 1.0, %v4103_v6  ;;  %v4126_v56 = vand.u32 2147483647, %v4099_v25  ;;  %vm4122_vm12 = vweird.f32 %v4099_v25 }
0x1061   :  { %v7462_v13 = vand.u32 2147483647, %v7459_v38  ;;  %v4054_v11 = vsub.f32 1.5, %v4053_v33 }
0x1062   :  { %v4105_v32 = vmul.f32 %v4927_v28, %v4104_v22  ;;  %vm4127_vm2 = vcmp.eq.f32.partialorder %v4126_v56, 8.507059e+37  ;;  %v4086_v56 = vsel %vm4082_vm1, 1.0, %v7659_v47 }
0x1063   :  { %v4096_v21 = vmul.f32 0.3275911, %v7462_v13  ;;  %v4055_v0 = vmul.f32 %v4925_v30, %v4054_v11 }
0x1064   :  { %v4106_v20 = vadd.f32 %v4927_v28, %v4105_v32 }
0x1065   :  { %v4100_v61 = vadd.f32 1.0, %v4096_v21  ;;  %v4929_v37 = vpop.eup %4928  ;;  %v4059_v12 = vsel %vm4058_vm10, %v4925_v30, %v4055_v0  ;;  %v4203_v21 = vmul.f32 %v4199_v54, %v7451_v17 }
0x1066   :  { %v4110_v23 = vsel %vm4109_vm13, %v4927_v28, %v4106_v20  ;;  %v4063_v40 = vmul.f32 %v4059_v12, %v7399_v48  ;;  %v4118_v42 = vmul.f32 %v4929_v37, %v4099_v25  ;;  %vm4123_vm15 = vweird.f32 %v4929_v37 }
0x1067   :  { %v4115_v8 = vsel %vm4112_vm4, %v4114_v46, %v4110_v23  ;;  %4930 = vrcp.f32 %v4100_v61  ;;  %vm4124_vm6 = vmor %vm4122_vm12, %vm4123_vm15  ;;  %v4141_v9 = vand.u32 2147483647, %v4100_v61  ;;  %v4143_v28 = vand.u32 2147483648, %v4100_v61 }
0x1068   :  { %v4162_v58 = vmul.f32 1.0614054, %v4115_v8  ;;  %v4068_v26 = vmul.f32 %v7424_v62, %v4063_v40  ;;  %v4119_v18 = vsub.f32 1.0, %v4118_v42  ;;  %v4206_v62 = vmul.f32 1.442695, %v4202_v49 }
0x1069   :  { %vm4137_vm14 = vweird.f32 %v4100_v61  ;;  %v4144_v11 = vor.u32 1.1754944e-38, %v4143_v28  ;;  %vm4142_vm8 = vcmp.eq.f32.partialorder %v4141_v9, 8.507059e+37  ;;  %v4200_v23 = vsub.f32 0.0, %v7462_v13 }
0x106a   :  { %v4166_v51 = vadd.f32 -1.4531521, %v4162_v58  ;;  %v7468_v44 = vadd.f32 %v7430_v34, %v4068_v26  ;;  %v4120_v15 = vmul.f32 %v4929_v37, %v4119_v18  ;;  %v4129_v34 = vor.u32 1.1754944e-38, %v4128_v59 }
0x106b   :  { %4932 = vpow2.f32 %v4206_v62  ;;  %v4204_v17 = vmul.f32 %v4200_v23, %v7462_v13  ;;  %vm4083_vm13 = vcmp.ge.f32.partialorder %v7447_v2, 0.0  ;;  %vm4084_vm4 = vcmp.ge.f32.partialorder %v7459_v38, 0.0 }
0x106c   :  { %v4170_v1 = vmul.f32 %v4166_v51, %v4115_v8  ;;  %v7471_v60 = vmul.f32 0.70710677, %v7468_v44  ;;  %v4121_v52 = vadd.f32 %v4929_v37, %v4120_v15  ;;  %v4208_v51 = vmul.f32 1.442695, %v4203_v21 }
0x106d   :  { %v4931_v63 = vpop.eup %4930  ;;  %v4074_v15 = vmul.f32 0.5, %v7434_v57  ;;  %v4210_v62 = vmul.f32 1.442695, %v4204_v17  ;;  %v4076_v38 = vmul.f32 0.5, %v7456_v53 }
0x106e   :  { %v4174_v48 = vadd.f32 1.4214138, %v4170_v1  ;;  %v4133_v14 = vmul.f32 %v4931_v63, %v4100_v61  ;;  %v7474_v41 = vand.u32 2147483647, %v7471_v60  ;;  %v4125_v19 = vsel %vm4124_vm6, %v4929_v37, %v4121_v52 }
0x106f   :  { %v4130_v6 = vsel %vm4127_vm2, %v4129_v34, %v4125_v19  ;;  %vm4138_vm9 = vweird.f32 %v4931_v63  ;;  %vm4085_vm15 = vcmp.ge.f32.partialorder %v7471_v60, 0.0 }
0x1070   :  { %v4178_v27 = vmul.f32 %v4174_v48, %v4115_v8  ;;  %v4134_v30 = vsub.f32 1.0, %v4133_v14  ;;  %v4097_v50 = vmul.f32 0.3275911, %v7474_v41  ;;  %v4163_v25 = vmul.f32 1.0614054, %v4130_v6  ;;  %vm4139_vm3 = vmor %vm4137_vm14, %vm4138_vm9 }
0x1071   :  { %v4933_v58 = vpop.eup %4932 }
0x1072   :  { %v4182_v5 = vadd.f32 -0.28449672, %v4178_v27  ;;  %v4135_v22 = vmul.f32 %v4931_v63, %v4134_v30  ;;  %v4101_v33 = vadd.f32 1.0, %v4097_v50  ;;  %v4167_v39 = vadd.f32 -1.4531521, %v4163_v25 }
0x1074   :  { %v4186_v43 = vmul.f32 %v4182_v5, %v4115_v8  ;;  %v4136_v32 = vadd.f32 %v4931_v63, %v4135_v22  ;;  %4934 = vrcp.f32 %v4101_v33  ;;  %v4171_v46 = vmul.f32 %v4167_v39, %v4130_v6 }
0x1075   :  { %4936 = vpow2.f32 %v4208_v51  ;;  %v4156_v16 = vand.u32 2147483647, %v4101_v33  ;;  %v4158_v52 = vand.u32 2147483648, %v4101_v33  ;;  %vm4152_vm7 = vweird.f32 %v4101_v33 }
0x1076   :  { %v4190_v20 = vadd.f32 0.2548296, %v4186_v43  ;;  %v4140_v0 = vsel %vm4139_vm3, %v4931_v63, %v4136_v32  ;;  %v4175_v40 = vadd.f32 1.4214138, %v4171_v46  ;;  %4938 = vpow2.f32 %v4210_v62  ;;  %v4282_v32 = vpop.permute.xlu0 %4281  ;;  %v4286_v62 = vpop.permute.xlu2 %4285 }
0x1077   :  { %v4145_v37 = vsel %vm4142_vm8, %v4144_v11, %v4140_v0  ;;  %v4159_v9 = vor.u32 1.1754944e-38, %v4158_v52  ;;  %vm4157_vm10 = vcmp.eq.f32.partialorder %v4156_v16, 8.507059e+37  ;;  %v4201_v11 = vsub.f32 0.0, %v7474_v41 }
0x1078   :  { %v4194_v12 = vmul.f32 %v4190_v20, %v4115_v8  ;;  %v4164_v31 = vmul.f32 1.0614054, %v4145_v37  ;;  %v4179_v26 = vmul.f32 %v4175_v40, %v4130_v6 }
0x1079   :  { %v4205_v40 = vmul.f32 %v4201_v11, %v7474_v41 }
0x107a   :  { %v4214_v61 = vmul.f32 %v4933_v58, %v4194_v12  ;;  %v4168_v42 = vadd.f32 -1.4531521, %v4164_v31  ;;  %v4935_v18 = vpop.eup %4934  ;;  %v4183_v8 = vadd.f32 -0.28449672, %v4179_v26  ;;  %v4075_v26 = vmul.f32 0.5, %v7444_v10 }
0x107b   :  { %v4148_v59 = vmul.f32 %v4935_v18, %v4101_v33  ;;  %vm4153_vm11 = vweird.f32 %v4935_v18  ;;  %v4937_v5 = vpop.eup %4936  ;;  %v4212_v17 = vmul.f32 1.442695, %v4205_v40 }
0x107c   :  { %v4218_v49 = vsub.f32 1.0, %v4214_v61  ;;  %v4172_v1 = vmul.f32 %v4168_v42, %v4145_v37  ;;  %v4187_v34 = vmul.f32 %v4183_v8, %v4130_v6  ;;  %vm4154_vm5 = vmor %vm4152_vm7, %vm4153_vm11  ;;  %v4939_v31 = vpop.eup %4938  ;;  %v4284_v8 = vpop.permute.xlu1 %4283 }
0x107d   :  { %v4149_v48 = vsub.f32 1.0, %v4148_v59  ;;  %4940 = vpow2.f32 %v4212_v17 }
0x107e   :  { %v4222_v63 = vmul.f32 %v4218_v49, %v4086_v56  ;;  %v4176_v14 = vadd.f32 1.4214138, %v4172_v1  ;;  %v4191_v30 = vadd.f32 0.2548296, %v4187_v34  ;;  %v4088_v49 = vsel %vm4084_vm4, 1.0, %v7659_v47 }
0x107f   :  { %v4150_v27 = vmul.f32 %v4935_v18, %v4149_v48 }
0x1080   :  { %v4226_v54 = vadd.f32 1.0, %v4222_v63  ;;  %v4180_v13 = vmul.f32 %v4176_v14, %v4145_v37  ;;  %v4195_v28 = vmul.f32 %v4191_v30, %v4130_v6  ;;  %v4087_v6 = vsel %vm4083_vm13, 1.0, %v7659_v47 }
0x1081   :  { %v4151_v50 = vadd.f32 %v4935_v18, %v4150_v27 }
0x1082   :  { %v4230_v19 = vmul.f32 %v4226_v54, %v4074_v15  ;;  %v4184_v57 = vadd.f32 -0.28449672, %v4180_v13  ;;  %v4215_v21 = vmul.f32 %v4937_v5, %v4195_v28  ;;  %v4288_v5 = vpop.permute.xlu0 %4287 }
0x1083   :  { %v4155_v25 = vsel %vm4154_vm5, %v4935_v18, %v4151_v50 }
0x1084   :  { %v4234_v22 = vadd.f32 %v4230_v19, %v6745_v4  ;;  %v4188_v43 = vmul.f32 %v4184_v57, %v4145_v37  ;;  %v4160_v39 = vsel %vm4157_vm10, %v4159_v9, %v4155_v25  ;;  %v4219_v46 = vsub.f32 1.0, %v4215_v21 }
0x1085   :  { %v4165_v33 = vmul.f32 1.0614054, %v4160_v39 }
0x1086   :  { %v4293_v20 = vmul.f32 %v4282_v32, %v4234_v22  ;;  %v4192_v0 = vadd.f32 0.2548296, %v4188_v43  ;;  %v4223_v58 = vmul.f32 %v4219_v46, %v4087_v6 }
0x1087   :  { %v4169_v23 = vadd.f32 -1.4531521, %v4165_v33 }
0x1088   :  { %v4196_v12 = vmul.f32 %v4192_v0, %v4145_v37  ;;  %v4297_v4 = vadd.f32 %v4293_v20, %v7396_v35  ;;  %v4227_v51 = vadd.f32 1.0, %v4223_v58  ;;  %v4408_v58 = vld [vmem:[%s7594_s15 + $0x38] sm:$0xff] }
0x1089   :  { %v4173_v61 = vmul.f32 %v4169_v23, %v4160_v39  ;;  %4431 = vmatpush.msrb.mxu0 %v4408_v58 }
0x108a   :  { %v4216_v42 = vmul.f32 %v4939_v31, %v4196_v12  ;;  %v4303_v2 = vsel %vm582_vm0, %v4297_v4, 0.0  ;;  %v4231_v35 = vmul.f32 %v4227_v51, %v4075_v26  ;;  %v4404_v26 = vld [vmem:[%s7594_s15 + $0x18] sm:$0xff]  ;;  %v4403_v51 = vld [vmem:[%s7594_s15 + $0x10] sm:$0xff] }
0x108b   :  { %4304 = vadd.xlane.f32.xlu0 %v4303_v2  ;;  %v4177_v18 = vadd.f32 1.4214138, %v4173_v61  ;;  %v4407_v61 = vld [vmem:[%s7594_s15 + $0x30] sm:$0xff]  ;;  %v4405_v2 = vld [vmem:[%s7594_s15 + $0x20] sm:$0xff] }
0x108c   :  { %v4220_v37 = vsub.f32 1.0, %v4216_v42  ;;  %v4235_v41 = vadd.f32 %v4231_v35, %v6753_v36  ;;  %v4941_v36 = vpop.eup %4940  ;;  %4432 = vmatpush.msrb.mxu0 %v4407_v61  ;;  %v4406_v42 = vld [vmem:[%s7594_s15 + $0x28] sm:$0xff] }
0x108d   :  { %v4181_v59 = vmul.f32 %v4177_v18, %v4160_v39  ;;  %v4402_v18 = vld [vmem:[%s7594_s15 + $0x8] sm:$0xff] }
0x108e   :  { %v4224_v1 = vmul.f32 %v4220_v37, %v4088_v49  ;;  %v4294_v63 = vmul.f32 %v4284_v8, %v4235_v41  ;;  %4433 = vmatpush.msrb.mxu0 %v4406_v42  ;;  %v4401_v37 = vld [vmem:[%s7594_s15] sm:$0xff] }
0x108f   :  { %v4185_v15 = vadd.f32 -0.28449672, %v4181_v59 }
0x1090   :  { %v4228_v56 = vadd.f32 1.0, %v4224_v1  ;;  %v4298_v14 = vadd.f32 %v4294_v63, %v7409_v45  ;;  %v4089_v45 = vsel %vm4085_vm15, 1.0, %v7659_v47  ;;  %4434 = vmatpush.msrb.mxu0 %v4405_v2 }
0x1091   :  { %v4189_v10 = vmul.f32 %v4185_v15, %v4160_v39 }
0x1092   :  { %v4232_v48 = vmul.f32 %v4228_v56, %v4076_v38  ;;  %v4306_v34 = vsel %vm582_vm0, %v4298_v14, 0.0  ;;  %4435 = vmatpush.msrb.mxu0 %v4404_v26 }
0x1093   :  { %v4193_v16 = vadd.f32 0.2548296, %v4189_v10  ;;  %4307 = vadd.xlane.f32.xlu2 %v4306_v34 }
0x1094   :  { %v4236_v52 = vadd.f32 %v4232_v48, %v6764_v3  ;;  %v4077_v3 = vmul.f32 0.5, %v7468_v44  ;;  %4436 = vmatpush.msrb.mxu0 %v4403_v51 }
0x1095   :  { %v4197_v54 = vmul.f32 %v4193_v16, %v4160_v39 }
0x1096   :  { %v4295_v27 = vmul.f32 %v4286_v62, %v4236_v52  ;;  %4437 = vmatpush.msrb.mxu0 %v4402_v18  ;;  %v4647_v52 = vld [vmem:[%s7593_s14 + $0x1] ss:$0 sm:$0xff] }
0x1097   :  { %v4217_v53 = vmul.f32 %v4941_v36, %v4197_v54  ;;  %v4648_v36 = vld [vmem:[%s7593_s14 + $0x2] ss:$0 sm:$0xff] }
0x1098   :  { %v4299_v13 = vadd.f32 %v4295_v27, %v7414_v29  ;;  %4438 = vmatpush.msrb.mxu0 %v4401_v37 }
0x1099   :  { %v4221_v30 = vsub.f32 1.0, %v4217_v53 }
0x109a   :  { %v4309_v19 = vsel %vm582_vm0, %v4299_v13, 0.0 }
0x109b   :  { %4310 = vadd.xlane.f32.xlu1 %v4309_v19  ;;  %v4225_v50 = vmul.f32 %v4221_v30, %v4089_v45 }
0x109d   :  { %v4229_v57 = vadd.f32 1.0, %v4225_v50 }
0x109f   :  { %v4233_v9 = vmul.f32 %v4229_v57, %v4077_v3 }
0x10a1   :  { %v4237_v28 = vadd.f32 %v4233_v9, %v6771_v24 }
0x10a3   :  { %v4296_v22 = vmul.f32 %v4288_v5, %v4237_v28 }
0x10a5   :  { %v4300_v60 = vadd.f32 %v4296_v22, %v7406_v7 }
0x10a7   :  { %v4312_v25 = vsel %vm582_vm0, %v4300_v60, 0.0 }
0x10a8   :  { %4313 = vadd.xlane.f32.xlu0 %v4312_v25 }
0x10fe   :  { %v4305_v29 = vpop.xlane.xlu0 %4304 }
0x10ff   :  { %v4315_v43 = vmul.f32 %v4305_v29, %v5794_v55 }
0x1101   :  { %v7508_v32 = vsub.f32 %v4297_v4, %v4315_v43 }
0x1103   :  { %v4323_v47 = vmul.f32 %v7508_v32, %v7508_v32 }
0x1105   :  { %v4327_v44 = vsel %vm582_vm0, %v4323_v47, 0.0 }
0x1106   :  { %4328 = vadd.xlane.f32.xlu2 %v4327_v44  ;;  %v4308_v39 = vpop.xlane.xlu2 %4307 }
0x1107   :  { %v4316_v24 = vmul.f32 %v4308_v39, %v5794_v55 }
0x1109   :  { %v7514_v11 = vsub.f32 %v4298_v14, %v4316_v24 }
0x110b   :  { %v4324_v21 = vmul.f32 %v7514_v11, %v7514_v11 }
0x110d   :  { %v4330_v33 = vsel %vm582_vm0, %v4324_v21, 0.0 }
0x110e   :  { %v4311_v7 = vpop.xlane.xlu1 %4310  ;;  %4331 = vadd.xlane.f32.xlu1 %v4330_v33 }
0x110f   :  { %v4317_v20 = vmul.f32 %v4311_v7, %v5794_v55 }
0x1111   :  { %v7520_v0 = vsub.f32 %v4299_v13, %v4317_v20 }
0x1113   :  { %v4325_v46 = vmul.f32 %v7520_v0, %v7520_v0 }
0x1115   :  { %v4333_v23 = vsel %vm582_vm0, %v4325_v46, 0.0 }
0x1116   :  { %4334 = vadd.xlane.f32.xlu0 %v4333_v23 }
0x111b   :  { %v4314_v12 = vpop.xlane.xlu0 %4313 }
0x111c   :  { %v4318_v6 = vmul.f32 %v4314_v12, %v5794_v55 }
0x111e   :  { %v7526_v4 = vsub.f32 %v4300_v60, %v4318_v6 }
0x1120   :  { %v4326_v31 = vmul.f32 %v7526_v4, %v7526_v4 }
0x1122   :  { %v4336_v40 = vsel %vm582_vm0, %v4326_v31, 0.0 }
0x1123   :  { %4337 = vadd.xlane.f32.xlu2 %v4336_v40  ;;  %v4649_v40 = vld [vmem:[%s7593_s14 + $0x3] ss:$0 sm:$0xff]  ;;  %s4989_s14 = smov 128  }
0x1179   :  { %v4329_v17 = vpop.xlane.xlu2 %4328 }
0x117a   :  { %v4339_v49 = vmul.f32 %v4329_v17, %v5794_v55 }
0x117c   :  { %v4343_v35 = vadd.f32 1e-05, %v4339_v49 }
0x117e   :  { %4942 = vrsqrt.f32 %v4343_v35  ;;  %vm4353_vm6 = vweird.f32 %v4343_v35 }
0x1181   :  { %v4332_v1 = vpop.xlane.xlu1 %4331 }
0x1182   :  { %v4340_v15 = vmul.f32 %v4332_v1, %v5794_v55 }
0x1184   :  { %v4943_v59 = vpop.eup %4942  ;;  %v4344_v56 = vadd.f32 1e-05, %v4340_v15 }
0x1185   :  { %v4348_v41 = vmul.f32 %v4943_v59, %v4343_v35  ;;  %vm4354_vm12 = vweird.f32 %v4943_v59 }
0x1186   :  { %4944 = vrsqrt.f32 %v4344_v56  ;;  %vm4355_vm2 = vmor %vm4353_vm6, %vm4354_vm12  ;;  %vm4363_vm14 = vweird.f32 %v4344_v56 }
0x1187   :  { %v4349_v38 = vmul.f32 %v4943_v59, %v4348_v41 }
0x1189   :  { %v4350_v8 = vmul.f32 0.5, %v4349_v38  ;;  %v4335_v63 = vpop.xlane.xlu0 %4334 }
0x118a   :  { %v4341_v10 = vmul.f32 %v4335_v63, %v5794_v55 }
0x118b   :  { %v4351_v48 = vsub.f32 1.5, %v4350_v8 }
0x118c   :  { %v4345_v14 = vadd.f32 1e-05, %v4341_v10  ;;  %v4945_v62 = vpop.eup %4944 }
0x118d   :  { %v4352_v16 = vmul.f32 %v4943_v59, %v4351_v48  ;;  %v4358_v27 = vmul.f32 %v4945_v62, %v4344_v56  ;;  %vm4364_vm9 = vweird.f32 %v4945_v62 }
0x118e   :  { %4946 = vrsqrt.f32 %v4345_v14  ;;  %vm4365_vm3 = vmor %vm4363_vm14, %vm4364_vm9  ;;  %vm4373_vm1 = vweird.f32 %v4345_v14 }
0x118f   :  { %v4356_v34 = vsel %vm4355_vm2, %v4943_v59, %v4352_v16  ;;  %v4359_v13 = vmul.f32 %v4945_v62, %v4358_v27 }
0x1190   :  { %v4387_v54 = vmul.f32 %v4356_v34, %v7508_v32 }
0x1191   :  { %v4360_v19 = vmul.f32 0.5, %v4359_v13 }
0x1192   :  { %v4392_v53 = vmul.f32 %v4647_v52, %v4387_v54 }
0x1193   :  { %v4361_v3 = vsub.f32 1.5, %v4360_v19 }
0x1194   :  { %v4947_v30 = vpop.eup %4946  ;;  %v4397_v45 = vadd.f32 %v4648_v36, %v4392_v53 }
0x1195   :  { %v4368_v50 = vmul.f32 %v4947_v30, %v4345_v14  ;;  %v4362_v28 = vmul.f32 %v4945_v62, %v4361_v3  ;;  %vm4374_vm8 = vweird.f32 %v4947_v30 }
0x1196   :  { %4554 = vmatmul.msk.f32.vlgmr.msrb.gmra.mxu0 %vm582_vm0, %v4397_v45  ;;  %v4338_v9 = vpop.xlane.xlu2 %4337  ;;  %vm4375_vm11 = vmor %vm4373_vm1, %vm4374_vm8 }
0x1197   :  { %v4369_v57 = vmul.f32 %v4947_v30, %v4368_v50  ;;  %v4342_v5 = vmul.f32 %v4338_v9, %v5794_v55  ;;  %v4366_v60 = vsel %vm4365_vm3, %v4945_v62, %v4362_v28 }
0x1198   :  { %v4388_v43 = vmul.f32 %v4366_v60, %v7514_v11 }
0x1199   :  { %v4370_v22 = vmul.f32 0.5, %v4369_v57  ;;  %v4346_v25 = vadd.f32 1e-05, %v4342_v5 }
0x119a   :  { %v4393_v47 = vmul.f32 %v4647_v52, %v4388_v43 }
0x119b   :  { %v4371_v29 = vsub.f32 1.5, %v4370_v22  ;;  %4948 = vrsqrt.f32 %v4346_v25  ;;  %vm4383_vm5 = vweird.f32 %v4346_v25 }
0x119c   :  { %v4398_v39 = vadd.f32 %v4648_v36, %v4393_v47 }
0x119d   :  { %v4372_v32 = vmul.f32 %v4947_v30, %v4371_v29 }
0x119e   :  { %4555 = vmatmul.msk.f32.gmra.mxu0 %vm582_vm0, %v4398_v39 }
0x119f   :  { %v4376_v44 = vsel %vm4375_vm11, %v4947_v30, %v4372_v32 }
0x11a0   :  { %v4389_v24 = vmul.f32 %v4376_v44, %v7520_v0 }
0x11a1   :  { %v4949_v55 = vpop.eup %4948 }
0x11a2   :  { %v4394_v7 = vmul.f32 %v4647_v52, %v4389_v24  ;;  %v4378_v21 = vmul.f32 %v4949_v55, %v4346_v25  ;;  %vm4384_vm7 = vweird.f32 %v4949_v55 }
0x11a3   :  { %vm4385_vm10 = vmor %vm4383_vm5, %vm4384_vm7 }
0x11a4   :  { %v4379_v20 = vmul.f32 %v4949_v55, %v4378_v21  ;;  %v4399_v33 = vadd.f32 %v4648_v36, %v4394_v7 }
0x11a6   :  { %v4380_v46 = vmul.f32 0.5, %v4379_v20  ;;  %4556 = vmatmul.msk.f32.gmra.mxu0 %vm582_vm0, %v4399_v33 }
0x11a8   :  { %v4381_v23 = vsub.f32 1.5, %v4380_v46 }
0x11aa   :  { %v4382_v11 = vmul.f32 %v4949_v55, %v4381_v23 }
0x11ac   :  { %v4386_v12 = vsel %vm4385_vm10, %v4949_v55, %v4382_v11 }
0x11ad   :  { %v4390_v6 = vmul.f32 %v4386_v12, %v7526_v4 }
0x11af   :  { %v4395_v31 = vmul.f32 %v4647_v52, %v4390_v6 }
0x11b1   :  { %v4400_v0 = vadd.f32 %v4648_v36, %v4395_v31 }
0x11b3   :  { %4557 = vmatmul.msk.f32.gmra.mxu0 %vm582_vm0, %v4400_v0 }
0x1213   :  { %v4440_v58 = vpop.f32.mrf.mxu0 }
0x1214   :  { %v4441_v61 = vadd.f32 %v4649_v40, %v4440_v58 }
0x1216   :  { %4452 = vst [vmem:[#allocation2] sm:$0xff] %v4441_v61 }
0x121b   :  { %v4443_v42 = vpop.f32.mrf.mxu0 }
0x121c   :  { %v4444_v2 = vadd.f32 %v4649_v40, %v4443_v42 }
0x121e   :  { %4453 = vst [vmem:[#allocation2 + $0x8] sm:$0xff] %v4444_v2 }
0x1223   :  { %v4446_v26 = vpop.f32.mrf.mxu0 }
0x1224   :  { %v4447_v51 = vadd.f32 %v4649_v40, %v4446_v26 }
0x1226   :  { %4454 = vst [vmem:[#allocation2 + $0x10] sm:$0xff] %v4447_v51 }
0x1230   :  { %v4449_v4 = vpop.f32.mrf.mxu0 }
0x1231   :  { %v4450_v18 = vadd.f32 %v4649_v40, %v4449_v4 }
0x1233   :  { %4455 = vst [vmem:[#allocation2 + $0x18] sm:$0xff] %v4450_v18 }
0x1234   :  { %4468 = dma.vmem_to_hbm [thread:$0]  %s4461_s6, 512, %s4463_s10, [#allocation3], %s4989_s14, %s4989_s14, %s4990_s0  }
0x1235   :  { %4978 = dma.done.wait [#allocation3], 512  }
0x1236   :  { %4979 = vsyncadd [#allocation3], 4294966784 }
0x1237   :  { %4473 = vsyncpa [#allocation3], 1 }

</bundles_post_ra>
